<compile_context>
chip_gen: v5e
topology: v5e:2x2
jax: 0.10.0
libtpu: 0.0.40
codegen_flags: <defaults>
</compile_context>

<pallas_src>
import functools

import jax
import jax.numpy as jnp
from jax.experimental import pallas as pl
from jax.experimental.pallas import tpu as pltpu


HW_TILE = 8  # spatial positions of fc1's K dimension consumed per grid step


# ------------------------------ fused kernel --------------------------------

def _conv3x3_bn_relu(x_val, pad_ref, patch_ref, w_ref, s_ref, b_ref):
    """Fused 3x3 SAME conv + folded BatchNorm (eval) + ReLU, all in VMEM.

    x_val:     (B, H, W, Cin)      activation value
    pad_ref:   (B, H+2, W+2, Cin)  VMEM scratch, zero-padded activation
    patch_ref: (B*H*W, 9*Cin)      VMEM scratch, im2col patches
    w_ref:     (9*Cin, Cout)       conv taps, rows ordered (dy, dx, cin)
    s_ref:     (1, Cout)           folded BN scale
    b_ref:     (1, Cout)           folded BN bias (includes conv bias)
    returns:   (B, H, W, Cout)
    """
    B, H, W, Cin = x_val.shape
    BHW = B * H * W
    Cout = w_ref.shape[1]

    # SAME padding done in-kernel: zero the scratch, write the interior.
    pad_ref[...] = jnp.zeros_like(pad_ref)
    pad_ref[:, 1:H + 1, 1:W + 1, :] = x_val

    # im2col: 9 shifted copies -> (BHW, 9*Cin), then one MXU matmul.
    for dy in range(3):
        for dx in range(3):
            t = dy * 3 + dx
            patch_ref[:, t * Cin:(t + 1) * Cin] = (
                pad_ref[:, dy:dy + H, dx:dx + W, :].reshape(BHW, Cin))

    y = jnp.dot(patch_ref[...], w_ref[...], preferred_element_type=jnp.float32)
    y = y * s_ref[...] + b_ref[...]
    return jnp.maximum(y, 0.0).reshape(B, H, W, Cout)


def dqn_fused_kernel(x_ref,
                     w1_ref, s1_ref, b1_ref,
                     w2_ref, s2_ref, b2_ref,
                     w3_ref, s3_ref, b3_ref,
                     fc1w_ref, fc1b_ref, fc2w_ref, fc2b_ref,
                     q_ref,
                     pad1_ref, patch1_ref,
                     pad2_ref, patch2_ref,
                     pad3_ref, patch3_ref,
                     act3_ref, acc_ref,
                     *, num_actions):
    k = pl.program_id(0)
    nk = pl.num_programs(0)

    # ---- grid step 0: the three conv blocks; result stays in VMEM scratch ---
    @pl.when(k == 0)
    def _convs_and_init():
        a1 = _conv3x3_bn_relu(x_ref[...], pad1_ref, patch1_ref,
                              w1_ref, s1_ref, b1_ref)
        a2 = _conv3x3_bn_relu(a1, pad2_ref, patch2_ref,
                              w2_ref, s2_ref, b2_ref)
        a3 = _conv3x3_bn_relu(a2, pad3_ref, patch3_ref,
                              w3_ref, s3_ref, b3_ref)
        Bs, H, W, C3 = a3.shape
        act3_ref[...] = a3.reshape(Bs, H * W, C3)        # (B, HW, C3)
        acc_ref[...] = jnp.zeros_like(acc_ref)

    # ---- every step: one K-tile of fc1 (HW_TILE positions x C3 channels) ----
    hw_tile = fc1w_ref.shape[0]
    hw0 = pl.multiple_of(k * hw_tile, hw_tile)
    chunk = act3_ref[:, pl.ds(hw0, hw_tile), :]          # (B, hw_tile, C3)
    part = jnp.zeros(acc_ref.shape, acc_ref.dtype)
    for j in range(hw_tile):
        part = part + jnp.dot(chunk[:, j, :], fc1w_ref[j],
                              preferred_element_type=jnp.float32)
    acc_ref[...] += part

    # ---- last step: fc1 bias/ReLU + fc2 head, write Q values ----------------
    @pl.when(k == nk - 1)
    def _head():
        h = jnp.maximum(acc_ref[...] + fc1b_ref[...], 0.0)          # (B, 256)
        q = jnp.dot(h, fc2w_ref[...],
                    preferred_element_type=jnp.float32) + fc2b_ref[...]
        q_ref[...] = q[:, :num_actions]


# --------------------------------- wrapper ----------------------------------

def dqn_forward(kparams, x_nchw, *, num_actions):
    """Pallas forward pass.  x_nchw: (B, 4, H, W) f32 -> (B, num_actions)."""
    B, Cin, H, W = x_nchw.shape
    HW = H * W
    assert HW % HW_TILE == 0, "board_size**2 must be a multiple of HW_TILE"
    nk = HW // HW_TILE
    BHW = B * HW

    C1 = kparams["w1"].shape[1]
    C2 = kparams["w2"].shape[1]
    C3 = kparams["w3"].shape[1]
    N1 = kparams["fc1_w"].shape[-1]          # 256
    Np = kparams["fc2_w"].shape[-1]          # padded fc2 width (multiple of 128)

    x = jnp.transpose(x_nchw, (0, 2, 3, 1)).astype(jnp.float32)     # NHWC

    def const(rank):
        return lambda k: (0,) * rank

    grid_spec = pltpu.PrefetchScalarGridSpec(
        num_scalar_prefetch=0,
        grid=(nk,),
        in_specs=[
            pl.BlockSpec((B, H, W, Cin), const(4)),                 # x (NHWC)
            pl.BlockSpec((9 * Cin, C1), const(2)),                  # conv1 W
            pl.BlockSpec((1, C1), const(2)),                        # bn1 scale
            pl.BlockSpec((1, C1), const(2)),                        # bn1 bias
            pl.BlockSpec((9 * C1, C2), const(2)),                   # conv2 W
            pl.BlockSpec((1, C2), const(2)),                        # bn2 scale
            pl.BlockSpec((1, C2), const(2)),                        # bn2 bias
            pl.BlockSpec((9 * C2, C3), const(2)),                   # conv3 W
            pl.BlockSpec((1, C3), const(2)),                        # bn3 scale
            pl.BlockSpec((1, C3), const(2)),                        # bn3 bias
            pl.BlockSpec((HW_TILE, C3, N1), lambda k: (k, 0, 0)),   # fc1 W tile
            pl.BlockSpec((1, N1), const(2)),                        # fc1 bias
            pl.BlockSpec((N1, Np), const(2)),                       # fc2 W (pad)
            pl.BlockSpec((1, Np), const(2)),                        # fc2 b (pad)
        ],
        out_specs=pl.BlockSpec((B, num_actions), const(2)),
        scratch_shapes=[
            pltpu.VMEM((B, H + 2, W + 2, Cin), jnp.float32),        # padded x
            pltpu.VMEM((BHW, 9 * Cin), jnp.float32),                # im2col 1
            pltpu.VMEM((B, H + 2, W + 2, C1), jnp.float32),         # padded a1
            pltpu.VMEM((BHW, 9 * C1), jnp.float32),                 # im2col 2
            pltpu.VMEM((B, H + 2, W + 2, C2), jnp.float32),         # padded a2
            pltpu.VMEM((BHW, 9 * C2), jnp.float32),                 # im2col 3
            pltpu.VMEM((B, HW, C3), jnp.float32),                   # act3
            pltpu.VMEM((B, N1), jnp.float32),                       # fc1 acc
        ],
    )

    return pl.pallas_call(
        functools.partial(dqn_fused_kernel, num_actions=num_actions),
        out_shape=jax.ShapeDtypeStruct((B, num_actions), jnp.float32),
        grid_spec=grid_spec,
        compiler_params=pltpu.CompilerParams(
            dimension_semantics=("arbitrary",),
            vmem_limit_bytes=32 * 1024 * 1024),
    )(x,
      kparams["w1"], kparams["s1"], kparams["b1"],
      kparams["w2"], kparams["s2"], kparams["b2"],
      kparams["w3"], kparams["s3"], kparams["b3"],
      kparams["fc1_w"], kparams["fc1_b"],
      kparams["fc2_w"], kparams["fc2_b"])


def prepare_params(params, board_size, num_actions):
    """One-time repack of torch-layout params into kernel-ready layouts."""
    HW = board_size * board_size
    C3 = params["conv3_w"].shape[-1]          # 128
    N1 = params["fc1_w"].shape[-1]            # 256
    kp = {}
    for i in ("1", "2", "3"):
        w = params[f"conv{i}_w"]              # (3, 3, cin, cout) HWIO
        cin, cout = w.shape[2], w.shape[3]
        kp[f"w{i}"] = w.reshape(9 * cin, cout)           # rows = (dy, dx, cin)
        kp[f"s{i}"] = params[f"bn{i}_scale"].reshape(1, cout)
        kp[f"b{i}"] = params[f"bn{i}_bias"].reshape(1, cout)
    # torch flattens NCHW -> fc1_w rows are in (c, h, w) order; reorder rows to
    # (hw, c) and expose hw as a leading axis so the kernel K-tiles over it.
    kp["fc1_w"] = jnp.transpose(
        params["fc1_w"].reshape(C3, HW, N1), (1, 0, 2))            # (HW, C3, N1)
    kp["fc1_b"] = params["fc1_b"].reshape(1, N1)
    # pad fc2 to a lane-dense (multiple of 128) output width.
    n_pad = max(128, ((num_actions + 127) // 128) * 128)
    kp["fc2_w"] = jnp.zeros((N1, n_pad), jnp.float32).at[:, :num_actions].set(
        params["fc2_w"])
    kp["fc2_b"] = jnp.zeros((1, n_pad), jnp.float32).at[:, :num_actions].set(
        params["fc2_b"].reshape(1, num_actions))
    return kp


# --------------------------- deterministic params ----------------------------

def init_params(key, board_size, num_actions):
    D = 128 * board_size * board_size
    keys = jax.random.split(key, 22)
    p = {}

    def conv_block(i, ks, cin, cout):
        kw, kb, kg, kbe, km, kv = ks
        w = jax.random.normal(kw, (3, 3, cin, cout), jnp.float32) / jnp.sqrt(9.0 * cin)
        b = 0.01 * jax.random.normal(kb, (cout,), jnp.float32)
        gamma = 1.0 + 0.1 * jax.random.normal(kg, (cout,), jnp.float32)
        beta = 0.05 * jax.random.normal(kbe, (cout,), jnp.float32)
        mean = 0.05 * jax.random.normal(km, (cout,), jnp.float32)
        var = 1.0 + 0.1 * jnp.abs(jax.random.normal(kv, (cout,), jnp.float32))
        eps = 1e-5
        scale = gamma / jnp.sqrt(var + eps)
        bias = scale * (b - mean) + beta
        p[f"conv{i}_w"] = w
        p[f"bn{i}_scale"] = scale
        p[f"bn{i}_bias"] = bias

    conv_block("1", keys[0:6], 4, 64)
    conv_block("2", keys[6:12], 64, 128)
    conv_block("3", keys[12:18], 128, 128)

    p["fc1_w"] = jax.random.normal(keys[18], (D, 256), jnp.float32) / jnp.sqrt(D)
    p["fc1_b"] = 0.01 * jax.random.normal(keys[19], (256,), jnp.float32)
    p["fc2_w"] = jax.random.normal(keys[20], (256, num_actions), jnp.float32) / jnp.sqrt(256.0)
    p["fc2_b"] = 0.01 * jax.random.normal(keys[21], (num_actions,), jnp.float32)
    return p


# ---------------------------- pure-JAX reference -----------------------------

def reference_forward(params, x_nchw):
    x = jnp.transpose(x_nchw, (0, 2, 3, 1))
    for i in ("1", "2", "3"):
        y = jax.lax.conv_general_dilated(
            x, params[f"conv{i}_w"], window_strides=(1, 1), padding="SAME",
            dimension_numbers=("NHWC", "HWIO", "NHWC"))
        y = y * params[f"bn{i}_scale"] + params[f"bn{i}_bias"]
        x = jnp.maximum(y, 0.0)
    B = x.shape[0]
    x = jnp.transpose(x, (0, 3, 1, 2)).reshape(B, -1)   # torch C*H*W flatten
    x = jnp.maximum(x @ params["fc1_w"] + params["fc1_b"], 0.0)
    return x @ params["fc2_w"] + params["fc2_b"]


# ----------------------------------- main ------------------------------------

if __name__ == "__main__":
    board_size = 8
    num_actions = 4
    batch = 2

    root = jax.random.PRNGKey(0)
    pkey, xkey = jax.random.split(root)
    params = init_params(pkey, board_size, num_actions)
    x = jax.random.normal(xkey, (batch, 4, board_size, board_size), jnp.float32)

    kparams = prepare_params(params, board_size, num_actions)
    fwd = jax.jit(functools.partial(dqn_forward, num_actions=num_actions))
    q = jax.block_until_ready(fwd(kparams, x))

    q_ref = reference_forward(params, x)
    assert q.shape == (batch, num_actions)
    assert jnp.allclose(q, q_ref, rtol=2e-3, atol=2e-3), "mismatch vs reference"

    print("KERNEL_OK")
</pallas_src>

<mosaic_0001>
module attributes {stable_mosaic.version = 11 : i64} {
  func.func @dqn_fused_kernel(%arg0: i32, %arg1: memref<2x8x8x4xf32, #tpu.memory_space<vmem>>, %arg2: memref<36x64xf32, #tpu.memory_space<vmem>>, %arg3: memref<1x64xf32, #tpu.memory_space<vmem>>, %arg4: memref<1x64xf32, #tpu.memory_space<vmem>>, %arg5: memref<576x128xf32, #tpu.memory_space<vmem>>, %arg6: memref<1x128xf32, #tpu.memory_space<vmem>>, %arg7: memref<1x128xf32, #tpu.memory_space<vmem>>, %arg8: memref<1152x128xf32, #tpu.memory_space<vmem>>, %arg9: memref<1x128xf32, #tpu.memory_space<vmem>>, %arg10: memref<1x128xf32, #tpu.memory_space<vmem>>, %arg11: memref<8x128x256xf32, #tpu.memory_space<vmem>>, %arg12: memref<1x256xf32, #tpu.memory_space<vmem>>, %arg13: memref<256x128xf32, #tpu.memory_space<vmem>>, %arg14: memref<1x128xf32, #tpu.memory_space<vmem>>, %arg15: memref<2x4xf32, #tpu.memory_space<vmem>>, %arg16: memref<2x10x10x4xf32, #tpu.memory_space<vmem>>, %arg17: memref<128x36xf32, #tpu.memory_space<vmem>>, %arg18: memref<2x10x10x64xf32, #tpu.memory_space<vmem>>, %arg19: memref<128x576xf32, #tpu.memory_space<vmem>>, %arg20: memref<2x10x10x128xf32, #tpu.memory_space<vmem>>, %arg21: memref<128x1152xf32, #tpu.memory_space<vmem>>, %arg22: memref<2x64x128xf32, #tpu.memory_space<vmem>>, %arg23: memref<2x256xf32, #tpu.memory_space<vmem>>) attributes {dimension_semantics = [#tpu.dimension_semantics<arbitrary>], iteration_bounds = array<i64: 8>, scalar_prefetch = 0 : i64, scratch_operands = 8 : i64, tpu.core_type = #tpu.core_type<tc>, window_params = [{pipeline_mode = #tpu.pipeline_mode<synchronous>, transform_indices = @transform_0, window_bounds = array<i64: 2, 8, 8, 4>}, {pipeline_mode = #tpu.pipeline_mode<synchronous>, transform_indices = @transform_1, window_bounds = array<i64: 36, 64>}, {pipeline_mode = #tpu.pipeline_mode<synchronous>, transform_indices = @transform_2, window_bounds = array<i64: 1, 64>}, {pipeline_mode = #tpu.pipeline_mode<synchronous>, transform_indices = @transform_3, window_bounds = array<i64: 1, 64>}, {pipeline_mode = #tpu.pipeline_mode<synchronous>, transform_indices = @transform_4, window_bounds = array<i64: 576, 128>}, {pipeline_mode = #tpu.pipeline_mode<synchronous>, transform_indices = @transform_5, window_bounds = array<i64: 1, 128>}, {pipeline_mode = #tpu.pipeline_mode<synchronous>, transform_indices = @transform_6, window_bounds = array<i64: 1, 128>}, {pipeline_mode = #tpu.pipeline_mode<synchronous>, transform_indices = @transform_7, window_bounds = array<i64: 1152, 128>}, {pipeline_mode = #tpu.pipeline_mode<synchronous>, transform_indices = @transform_8, window_bounds = array<i64: 1, 128>}, {pipeline_mode = #tpu.pipeline_mode<synchronous>, transform_indices = @transform_9, window_bounds = array<i64: 1, 128>}, {transform_indices = @transform_10, window_bounds = array<i64: 8, 128, 256>}, {pipeline_mode = #tpu.pipeline_mode<synchronous>, transform_indices = @transform_11, window_bounds = array<i64: 1, 256>}, {pipeline_mode = #tpu.pipeline_mode<synchronous>, transform_indices = @transform_12, window_bounds = array<i64: 256, 128>}, {pipeline_mode = #tpu.pipeline_mode<synchronous>, transform_indices = @transform_13, window_bounds = array<i64: 1, 128>}, {pipeline_mode = #tpu.pipeline_mode<synchronous>, transform_indices = @transform_14, window_bounds = array<i64: 2, 4>}]} {
    %c0_i32 = arith.constant 0 : i32
    %0 = arith.cmpi eq, %arg0, %c0_i32 : i32
    %1 = arith.extui %0 : i1 to i32
    %c0_i32_0 = arith.constant 0 : i32
    %2 = arith.cmpi ne, %1, %c0_i32_0 : i32
    scf.if %2 {
      %c0_32 = arith.constant 0 : index
      %c0_33 = arith.constant 0 : index
      %c0_34 = arith.constant 0 : index
      %c0_35 = arith.constant 0 : index
      %62 = vector.load %arg1[%c0_32, %c0_33, %c0_34, %c0_35] : memref<2x8x8x4xf32, #tpu.memory_space<vmem>>, vector<2x8x8x4xf32>
      %cst_36 = arith.constant 0.000000e+00 : f32
      %63 = vector.broadcast %cst_36 : f32 to vector<2x10x10x4xf32>
      %c0_37 = arith.constant 0 : index
      %c0_38 = arith.constant 0 : index
      %c0_39 = arith.constant 0 : index
      %c0_40 = arith.constant 0 : index
      %64 = vector.load %arg16[%c0_37, %c0_38, %c0_39, %c0_40] : memref<2x10x10x4xf32, #tpu.memory_space<vmem>>, vector<2x10x10x4xf32>
      tpu.vector_store %arg16[%c0_37, %c0_38, %c0_39, %c0_40], %63 {strides = array<i32>} : memref<2x10x10x4xf32, #tpu.memory_space<vmem>>, vector<2x10x10x4xf32>,
      %c0_41 = arith.constant 0 : index
      %c1_42 = arith.constant 1 : index
      %c1_43 = arith.constant 1 : index
      %c0_44 = arith.constant 0 : index
      %65 = vector.load %arg16[%c0_41, %c1_42, %c1_43, %c0_44] : memref<2x10x10x4xf32, #tpu.memory_space<vmem>>, vector<2x8x8x4xf32>
      tpu.vector_store %arg16[%c0_41, %c1_42, %c1_43, %c0_44], %62 {strides = array<i32>} : memref<2x10x10x4xf32, #tpu.memory_space<vmem>>, vector<2x8x8x4xf32>,
      %c0_45 = arith.constant 0 : index
      %c0_46 = arith.constant 0 : index
      %c0_47 = arith.constant 0 : index
      %c0_48 = arith.constant 0 : index
      %66 = vector.load %arg16[%c0_45, %c0_46, %c0_47, %c0_48] : memref<2x10x10x4xf32, #tpu.memory_space<vmem>>, vector<2x8x8x4xf32>
      %67 = vector.shape_cast %66 : vector<2x8x8x4xf32> to vector<128x4xf32>
      %c0_49 = arith.constant 0 : index
      %c0_50 = arith.constant 0 : index
      %68 = vector.load %arg17[%c0_49, %c0_50] : memref<128x36xf32, #tpu.memory_space<vmem>>, vector<128x4xf32>
      tpu.vector_store %arg17[%c0_49, %c0_50], %67 {strides = array<i32>} : memref<128x36xf32, #tpu.memory_space<vmem>>, vector<128x4xf32>,
      %c0_51 = arith.constant 0 : index
      %c0_52 = arith.constant 0 : index
      %c1_53 = arith.constant 1 : index
      %c0_54 = arith.constant 0 : index
      %69 = vector.load %arg16[%c0_51, %c0_52, %c1_53, %c0_54] : memref<2x10x10x4xf32, #tpu.memory_space<vmem>>, vector<2x8x8x4xf32>
      %70 = vector.shape_cast %69 : vector<2x8x8x4xf32> to vector<128x4xf32>
      %c0_55 = arith.constant 0 : index
      %c4_56 = arith.constant 4 : index
      %71 = vector.load %arg17[%c0_55, %c4_56] : memref<128x36xf32, #tpu.memory_space<vmem>>, vector<128x4xf32>
      tpu.vector_store %arg17[%c0_55, %c4_56], %70 {strides = array<i32>} : memref<128x36xf32, #tpu.memory_space<vmem>>, vector<128x4xf32>,
      %c0_57 = arith.constant 0 : index
      %c0_58 = arith.constant 0 : index
      %c2_59 = arith.constant 2 : index
      %c0_60 = arith.constant 0 : index
      %72 = vector.load %arg16[%c0_57, %c0_58, %c2_59, %c0_60] : memref<2x10x10x4xf32, #tpu.memory_space<vmem>>, vector<2x8x8x4xf32>
      %73 = vector.shape_cast %72 : vector<2x8x8x4xf32> to vector<128x4xf32>
      %c0_61 = arith.constant 0 : index
      %c8 = arith.constant 8 : index
      %74 = vector.load %arg17[%c0_61, %c8] : memref<128x36xf32, #tpu.memory_space<vmem>>, vector<128x4xf32>
      tpu.vector_store %arg17[%c0_61, %c8], %73 {strides = array<i32>} : memref<128x36xf32, #tpu.memory_space<vmem>>, vector<128x4xf32>,
      %c0_62 = arith.constant 0 : index
      %c1_63 = arith.constant 1 : index
      %c0_64 = arith.constant 0 : index
      %c0_65 = arith.constant 0 : index
      %75 = vector.load %arg16[%c0_62, %c1_63, %c0_64, %c0_65] : memref<2x10x10x4xf32, #tpu.memory_space<vmem>>, vector<2x8x8x4xf32>
      %76 = vector.shape_cast %75 : vector<2x8x8x4xf32> to vector<128x4xf32>
      %c0_66 = arith.constant 0 : index
      %c12 = arith.constant 12 : index
      %77 = vector.load %arg17[%c0_66, %c12] : memref<128x36xf32, #tpu.memory_space<vmem>>, vector<128x4xf32>
      tpu.vector_store %arg17[%c0_66, %c12], %76 {strides = array<i32>} : memref<128x36xf32, #tpu.memory_space<vmem>>, vector<128x4xf32>,
      %c0_67 = arith.constant 0 : index
      %c1_68 = arith.constant 1 : index
      %c1_69 = arith.constant 1 : index
      %c0_70 = arith.constant 0 : index
      %78 = vector.load %arg16[%c0_67, %c1_68, %c1_69, %c0_70] : memref<2x10x10x4xf32, #tpu.memory_space<vmem>>, vector<2x8x8x4xf32>
      %79 = vector.shape_cast %78 : vector<2x8x8x4xf32> to vector<128x4xf32>
      %c0_71 = arith.constant 0 : index
      %c16 = arith.constant 16 : index
      %80 = vector.load %arg17[%c0_71, %c16] : memref<128x36xf32, #tpu.memory_space<vmem>>, vector<128x4xf32>
      tpu.vector_store %arg17[%c0_71, %c16], %79 {strides = array<i32>} : memref<128x36xf32, #tpu.memory_space<vmem>>, vector<128x4xf32>,
      %c0_72 = arith.constant 0 : index
      %c1_73 = arith.constant 1 : index
      %c2_74 = arith.constant 2 : index
      %c0_75 = arith.constant 0 : index
      %81 = vector.load %arg16[%c0_72, %c1_73, %c2_74, %c0_75] : memref<2x10x10x4xf32, #tpu.memory_space<vmem>>, vector<2x8x8x4xf32>
      %82 = vector.shape_cast %81 : vector<2x8x8x4xf32> to vector<128x4xf32>
      %c0_76 = arith.constant 0 : index
      %c20 = arith.constant 20 : index
      %83 = vector.load %arg17[%c0_76, %c20] : memref<128x36xf32, #tpu.memory_space<vmem>>, vector<128x4xf32>
      tpu.vector_store %arg17[%c0_76, %c20], %82 {strides = array<i32>} : memref<128x36xf32, #tpu.memory_space<vmem>>, vector<128x4xf32>,
      %c0_77 = arith.constant 0 : index
      %c2_78 = arith.constant 2 : index
      %c0_79 = arith.constant 0 : index
      %c0_80 = arith.constant 0 : index
      %84 = vector.load %arg16[%c0_77, %c2_78, %c0_79, %c0_80] : memref<2x10x10x4xf32, #tpu.memory_space<vmem>>, vector<2x8x8x4xf32>
      %85 = vector.shape_cast %84 : vector<2x8x8x4xf32> to vector<128x4xf32>
      %c0_81 = arith.constant 0 : index
      %c24 = arith.constant 24 : index
      %86 = vector.load %arg17[%c0_81, %c24] : memref<128x36xf32, #tpu.memory_space<vmem>>, vector<128x4xf32>
      tpu.vector_store %arg17[%c0_81, %c24], %85 {strides = array<i32>} : memref<128x36xf32, #tpu.memory_space<vmem>>, vector<128x4xf32>,
      %c0_82 = arith.constant 0 : index
      %c2_83 = arith.constant 2 : index
      %c1_84 = arith.constant 1 : index
      %c0_85 = arith.constant 0 : index
      %87 = vector.load %arg16[%c0_82, %c2_83, %c1_84, %c0_85] : memref<2x10x10x4xf32, #tpu.memory_space<vmem>>, vector<2x8x8x4xf32>
      %88 = vector.shape_cast %87 : vector<2x8x8x4xf32> to vector<128x4xf32>
      %c0_86 = arith.constant 0 : index
      %c28 = arith.constant 28 : index
      %89 = vector.load %arg17[%c0_86, %c28] : memref<128x36xf32, #tpu.memory_space<vmem>>, vector<128x4xf32>
      tpu.vector_store %arg17[%c0_86, %c28], %88 {strides = array<i32>} : memref<128x36xf32, #tpu.memory_space<vmem>>, vector<128x4xf32>,
      %c0_87 = arith.constant 0 : index
      %c2_88 = arith.constant 2 : index
      %c2_89 = arith.constant 2 : index
      %c0_90 = arith.constant 0 : index
      %90 = vector.load %arg16[%c0_87, %c2_88, %c2_89, %c0_90] : memref<2x10x10x4xf32, #tpu.memory_space<vmem>>, vector<2x8x8x4xf32>
      %91 = vector.shape_cast %90 : vector<2x8x8x4xf32> to vector<128x4xf32>
      %c0_91 = arith.constant 0 : index
      %c32 = arith.constant 32 : index
      %92 = vector.load %arg17[%c0_91, %c32] : memref<128x36xf32, #tpu.memory_space<vmem>>, vector<128x4xf32>
      tpu.vector_store %arg17[%c0_91, %c32], %91 {strides = array<i32>} : memref<128x36xf32, #tpu.memory_space<vmem>>, vector<128x4xf32>,
      %c0_92 = arith.constant 0 : index
      %c0_93 = arith.constant 0 : index
      %93 = vector.load %arg17[%c0_92, %c0_93] : memref<128x36xf32, #tpu.memory_space<vmem>>, vector<128x36xf32>
      %c0_94 = arith.constant 0 : index
      %c0_95 = arith.constant 0 : index
      %94 = vector.load %arg2[%c0_94, %c0_95] : memref<36x64xf32, #tpu.memory_space<vmem>>, vector<36x64xf32>
      %cst_96 = arith.constant dense<0.000000e+00> : vector<128x64xf32>
      %95 = tpu.matmul %93, %94, %cst_96 {dimension_numbers = #tpu.dot_dimension_numbers<[1], [0], [0], [1], [0, 0, 1, 1], [], []>} : vector<128x36xf32>, vector<36x64xf32>, vector<128x64xf32> -> vector<128x64xf32>
      %c0_97 = arith.constant 0 : index
      %c0_98 = arith.constant 0 : index
      %96 = vector.load %arg3[%c0_97, %c0_98] : memref<1x64xf32, #tpu.memory_space<vmem>>, vector<1x64xf32>
      %97 = vector.broadcast %96 : vector<1x64xf32> to vector<128x64xf32>
      %98 = arith.mulf %95, %97 : vector<128x64xf32>
      %c0_99 = arith.constant 0 : index
      %c0_100 = arith.constant 0 : index
      %99 = vector.load %arg4[%c0_99, %c0_100] : memref<1x64xf32, #tpu.memory_space<vmem>>, vector<1x64xf32>
      %100 = vector.broadcast %99 : vector<1x64xf32> to vector<128x64xf32>
      %101 = arith.addf %98, %100 : vector<128x64xf32>
      %cst_101 = arith.constant 0.000000e+00 : f32
      %102 = vector.broadcast %cst_101 : f32 to vector<128x64xf32>
      %103 = arith.maximumf %101, %102 : vector<128x64xf32>
      %104 = vector.shape_cast %103 : vector<128x64xf32> to vector<2x8x8x64xf32>
      %cst_102 = arith.constant 0.000000e+00 : f32
      %105 = vector.broadcast %cst_102 : f32 to vector<2x10x10x64xf32>
      %c0_103 = arith.constant 0 : index
      %c0_104 = arith.constant 0 : index
      %c0_105 = arith.constant 0 : index
      %c0_106 = arith.constant 0 : index
      %106 = vector.load %arg18[%c0_103, %c0_104, %c0_105, %c0_106] : memref<2x10x10x64xf32, #tpu.memory_space<vmem>>, vector<2x10x10x64xf32>
      tpu.vector_store %arg18[%c0_103, %c0_104, %c0_105, %c0_106], %105 {strides = array<i32>} : memref<2x10x10x64xf32, #tpu.memory_space<vmem>>, vector<2x10x10x64xf32>,
      %c0_107 = arith.constant 0 : index
      %c1_108 = arith.constant 1 : index
      %c1_109 = arith.constant 1 : index
      %c0_110 = arith.constant 0 : index
      %107 = vector.load %arg18[%c0_107, %c1_108, %c1_109, %c0_110] : memref<2x10x10x64xf32, #tpu.memory_space<vmem>>, vector<2x8x8x64xf32>
      tpu.vector_store %arg18[%c0_107, %c1_108, %c1_109, %c0_110], %104 {strides = array<i32>} : memref<2x10x10x64xf32, #tpu.memory_space<vmem>>, vector<2x8x8x64xf32>,
      %c0_111 = arith.constant 0 : index
      %c0_112 = arith.constant 0 : index
      %c0_113 = arith.constant 0 : index
      %c0_114 = arith.constant 0 : index
      %108 = vector.load %arg18[%c0_111, %c0_112, %c0_113, %c0_114] : memref<2x10x10x64xf32, #tpu.memory_space<vmem>>, vector<2x8x8x64xf32>
      %109 = vector.shape_cast %108 : vector<2x8x8x64xf32> to vector<128x64xf32>
      %c0_115 = arith.constant 0 : index
      %c0_116 = arith.constant 0 : index
      %110 = vector.load %arg19[%c0_115, %c0_116] : memref<128x576xf32, #tpu.memory_space<vmem>>, vector<128x64xf32>
      tpu.vector_store %arg19[%c0_115, %c0_116], %109 {strides = array<i32>} : memref<128x576xf32, #tpu.memory_space<vmem>>, vector<128x64xf32>,
      %c0_117 = arith.constant 0 : index
      %c0_118 = arith.constant 0 : index
      %c1_119 = arith.constant 1 : index
      %c0_120 = arith.constant 0 : index
      %111 = vector.load %arg18[%c0_117, %c0_118, %c1_119, %c0_120] : memref<2x10x10x64xf32, #tpu.memory_space<vmem>>, vector<2x8x8x64xf32>
      %112 = vector.shape_cast %111 : vector<2x8x8x64xf32> to vector<128x64xf32>
      %c0_121 = arith.constant 0 : index
      %c64 = arith.constant 64 : index
      %113 = vector.load %arg19[%c0_121, %c64] : memref<128x576xf32, #tpu.memory_space<vmem>>, vector<128x64xf32>
      tpu.vector_store %arg19[%c0_121, %c64], %112 {strides = array<i32>} : memref<128x576xf32, #tpu.memory_space<vmem>>, vector<128x64xf32>,
      %c0_122 = arith.constant 0 : index
      %c0_123 = arith.constant 0 : index
      %c2_124 = arith.constant 2 : index
      %c0_125 = arith.constant 0 : index
      %114 = vector.load %arg18[%c0_122, %c0_123, %c2_124, %c0_125] : memref<2x10x10x64xf32, #tpu.memory_space<vmem>>, vector<2x8x8x64xf32>
      %115 = vector.shape_cast %114 : vector<2x8x8x64xf32> to vector<128x64xf32>
      %c0_126 = arith.constant 0 : index
      %c128 = arith.constant 128 : index
      %116 = vector.load %arg19[%c0_126, %c128] : memref<128x576xf32, #tpu.memory_space<vmem>>, vector<128x64xf32>
      tpu.vector_store %arg19[%c0_126, %c128], %115 {strides = array<i32>} : memref<128x576xf32, #tpu.memory_space<vmem>>, vector<128x64xf32>,
      %c0_127 = arith.constant 0 : index
      %c1_128 = arith.constant 1 : index
      %c0_129 = arith.constant 0 : index
      %c0_130 = arith.constant 0 : index
      %117 = vector.load %arg18[%c0_127, %c1_128, %c0_129, %c0_130] : memref<2x10x10x64xf32, #tpu.memory_space<vmem>>, vector<2x8x8x64xf32>
      %118 = vector.shape_cast %117 : vector<2x8x8x64xf32> to vector<128x64xf32>
      %c0_131 = arith.constant 0 : index
      %c192 = arith.constant 192 : index
      %119 = vector.load %arg19[%c0_131, %c192] : memref<128x576xf32, #tpu.memory_space<vmem>>, vector<128x64xf32>
      tpu.vector_store %arg19[%c0_131, %c192], %118 {strides = array<i32>} : memref<128x576xf32, #tpu.memory_space<vmem>>, vector<128x64xf32>,
      %c0_132 = arith.constant 0 : index
      %c1_133 = arith.constant 1 : index
      %c1_134 = arith.constant 1 : index
      %c0_135 = arith.constant 0 : index
      %120 = vector.load %arg18[%c0_132, %c1_133, %c1_134, %c0_135] : memref<2x10x10x64xf32, #tpu.memory_space<vmem>>, vector<2x8x8x64xf32>
      %121 = vector.shape_cast %120 : vector<2x8x8x64xf32> to vector<128x64xf32>
      %c0_136 = arith.constant 0 : index
      %c256 = arith.constant 256 : index
      %122 = vector.load %arg19[%c0_136, %c256] : memref<128x576xf32, #tpu.memory_space<vmem>>, vector<128x64xf32>
      tpu.vector_store %arg19[%c0_136, %c256], %121 {strides = array<i32>} : memref<128x576xf32, #tpu.memory_space<vmem>>, vector<128x64xf32>,
      %c0_137 = arith.constant 0 : index
      %c1_138 = arith.constant 1 : index
      %c2_139 = arith.constant 2 : index
      %c0_140 = arith.constant 0 : index
      %123 = vector.load %arg18[%c0_137, %c1_138, %c2_139, %c0_140] : memref<2x10x10x64xf32, #tpu.memory_space<vmem>>, vector<2x8x8x64xf32>
      %124 = vector.shape_cast %123 : vector<2x8x8x64xf32> to vector<128x64xf32>
      %c0_141 = arith.constant 0 : index
      %c320 = arith.constant 320 : index
      %125 = vector.load %arg19[%c0_141, %c320] : memref<128x576xf32, #tpu.memory_space<vmem>>, vector<128x64xf32>
      tpu.vector_store %arg19[%c0_141, %c320], %124 {strides = array<i32>} : memref<128x576xf32, #tpu.memory_space<vmem>>, vector<128x64xf32>,
      %c0_142 = arith.constant 0 : index
      %c2_143 = arith.constant 2 : index
      %c0_144 = arith.constant 0 : index
      %c0_145 = arith.constant 0 : index
      %126 = vector.load %arg18[%c0_142, %c2_143, %c0_144, %c0_145] : memref<2x10x10x64xf32, #tpu.memory_space<vmem>>, vector<2x8x8x64xf32>
      %127 = vector.shape_cast %126 : vector<2x8x8x64xf32> to vector<128x64xf32>
      %c0_146 = arith.constant 0 : index
      %c384 = arith.constant 384 : index
      %128 = vector.load %arg19[%c0_146, %c384] : memref<128x576xf32, #tpu.memory_space<vmem>>, vector<128x64xf32>
      tpu.vector_store %arg19[%c0_146, %c384], %127 {strides = array<i32>} : memref<128x576xf32, #tpu.memory_space<vmem>>, vector<128x64xf32>,
      %c0_147 = arith.constant 0 : index
      %c2_148 = arith.constant 2 : index
      %c1_149 = arith.constant 1 : index
      %c0_150 = arith.constant 0 : index
      %129 = vector.load %arg18[%c0_147, %c2_148, %c1_149, %c0_150] : memref<2x10x10x64xf32, #tpu.memory_space<vmem>>, vector<2x8x8x64xf32>
      %130 = vector.shape_cast %129 : vector<2x8x8x64xf32> to vector<128x64xf32>
      %c0_151 = arith.constant 0 : index
      %c448 = arith.constant 448 : index
      %131 = vector.load %arg19[%c0_151, %c448] : memref<128x576xf32, #tpu.memory_space<vmem>>, vector<128x64xf32>
      tpu.vector_store %arg19[%c0_151, %c448], %130 {strides = array<i32>} : memref<128x576xf32, #tpu.memory_space<vmem>>, vector<128x64xf32>,
      %c0_152 = arith.constant 0 : index
      %c2_153 = arith.constant 2 : index
      %c2_154 = arith.constant 2 : index
      %c0_155 = arith.constant 0 : index
      %132 = vector.load %arg18[%c0_152, %c2_153, %c2_154, %c0_155] : memref<2x10x10x64xf32, #tpu.memory_space<vmem>>, vector<2x8x8x64xf32>
      %133 = vector.shape_cast %132 : vector<2x8x8x64xf32> to vector<128x64xf32>
      %c0_156 = arith.constant 0 : index
      %c512 = arith.constant 512 : index
      %134 = vector.load %arg19[%c0_156, %c512] : memref<128x576xf32, #tpu.memory_space<vmem>>, vector<128x64xf32>
      tpu.vector_store %arg19[%c0_156, %c512], %133 {strides = array<i32>} : memref<128x576xf32, #tpu.memory_space<vmem>>, vector<128x64xf32>,
      %c0_157 = arith.constant 0 : index
      %c0_158 = arith.constant 0 : index
      %135 = vector.load %arg19[%c0_157, %c0_158] : memref<128x576xf32, #tpu.memory_space<vmem>>, vector<128x576xf32>
      %c0_159 = arith.constant 0 : index
      %c0_160 = arith.constant 0 : index
      %136 = vector.load %arg5[%c0_159, %c0_160] : memref<576x128xf32, #tpu.memory_space<vmem>>, vector<576x128xf32>
      %cst_161 = arith.constant dense<0.000000e+00> : vector<128x128xf32>
      %137 = tpu.matmul %135, %136, %cst_161 {dimension_numbers = #tpu.dot_dimension_numbers<[1], [0], [0], [1], [0, 0, 1, 1], [], []>} : vector<128x576xf32>, vector<576x128xf32>, vector<128x128xf32> -> vector<128x128xf32>
      %c0_162 = arith.constant 0 : index
      %c0_163 = arith.constant 0 : index
      %138 = vector.load %arg6[%c0_162, %c0_163] : memref<1x128xf32, #tpu.memory_space<vmem>>, vector<1x128xf32>
      %139 = vector.broadcast %138 : vector<1x128xf32> to vector<128x128xf32>
      %140 = arith.mulf %137, %139 : vector<128x128xf32>
      %c0_164 = arith.constant 0 : index
      %c0_165 = arith.constant 0 : index
      %141 = vector.load %arg7[%c0_164, %c0_165] : memref<1x128xf32, #tpu.memory_space<vmem>>, vector<1x128xf32>
      %142 = vector.broadcast %141 : vector<1x128xf32> to vector<128x128xf32>
      %143 = arith.addf %140, %142 : vector<128x128xf32>
      %cst_166 = arith.constant 0.000000e+00 : f32
      %144 = vector.broadcast %cst_166 : f32 to vector<128x128xf32>
      %145 = arith.maximumf %143, %144 : vector<128x128xf32>
      %146 = vector.shape_cast %145 : vector<128x128xf32> to vector<2x8x8x128xf32>
      %cst_167 = arith.constant 0.000000e+00 : f32
      %147 = vector.broadcast %cst_167 : f32 to vector<2x10x10x128xf32>
      %c0_168 = arith.constant 0 : index
      %c0_169 = arith.constant 0 : index
      %c0_170 = arith.constant 0 : index
      %c0_171 = arith.constant 0 : index
      %148 = vector.load %arg20[%c0_168, %c0_169, %c0_170, %c0_171] : memref<2x10x10x128xf32, #tpu.memory_space<vmem>>, vector<2x10x10x128xf32>
      tpu.vector_store %arg20[%c0_168, %c0_169, %c0_170, %c0_171], %147 {strides = array<i32>} : memref<2x10x10x128xf32, #tpu.memory_space<vmem>>, vector<2x10x10x128xf32>,
      %c0_172 = arith.constant 0 : index
      %c1_173 = arith.constant 1 : index
      %c1_174 = arith.constant 1 : index
      %c0_175 = arith.constant 0 : index
      %149 = vector.load %arg20[%c0_172, %c1_173, %c1_174, %c0_175] : memref<2x10x10x128xf32, #tpu.memory_space<vmem>>, vector<2x8x8x128xf32>
      tpu.vector_store %arg20[%c0_172, %c1_173, %c1_174, %c0_175], %146 {strides = array<i32>} : memref<2x10x10x128xf32, #tpu.memory_space<vmem>>, vector<2x8x8x128xf32>,
      %c0_176 = arith.constant 0 : index
      %c0_177 = arith.constant 0 : index
      %c0_178 = arith.constant 0 : index
      %c0_179 = arith.constant 0 : index
      %150 = vector.load %arg20[%c0_176, %c0_177, %c0_178, %c0_179] : memref<2x10x10x128xf32, #tpu.memory_space<vmem>>, vector<2x8x8x128xf32>
      %151 = vector.shape_cast %150 : vector<2x8x8x128xf32> to vector<128x128xf32>
      %c0_180 = arith.constant 0 : index
      %c0_181 = arith.constant 0 : index
      %152 = vector.load %arg21[%c0_180, %c0_181] : memref<128x1152xf32, #tpu.memory_space<vmem>>, vector<128x128xf32>
      tpu.vector_store %arg21[%c0_180, %c0_181], %151 {strides = array<i32>} : memref<128x1152xf32, #tpu.memory_space<vmem>>, vector<128x128xf32>,
      %c0_182 = arith.constant 0 : index
      %c0_183 = arith.constant 0 : index
      %c1_184 = arith.constant 1 : index
      %c0_185 = arith.constant 0 : index
      %153 = vector.load %arg20[%c0_182, %c0_183, %c1_184, %c0_185] : memref<2x10x10x128xf32, #tpu.memory_space<vmem>>, vector<2x8x8x128xf32>
      %154 = vector.shape_cast %153 : vector<2x8x8x128xf32> to vector<128x128xf32>
      %c0_186 = arith.constant 0 : index
      %c128_187 = arith.constant 128 : index
      %155 = vector.load %arg21[%c0_186, %c128_187] : memref<128x1152xf32, #tpu.memory_space<vmem>>, vector<128x128xf32>
      tpu.vector_store %arg21[%c0_186, %c128_187], %154 {strides = array<i32>} : memref<128x1152xf32, #tpu.memory_space<vmem>>, vector<128x128xf32>,
      %c0_188 = arith.constant 0 : index
      %c0_189 = arith.constant 0 : index
      %c2_190 = arith.constant 2 : index
      %c0_191 = arith.constant 0 : index
      %156 = vector.load %arg20[%c0_188, %c0_189, %c2_190, %c0_191] : memref<2x10x10x128xf32, #tpu.memory_space<vmem>>, vector<2x8x8x128xf32>
      %157 = vector.shape_cast %156 : vector<2x8x8x128xf32> to vector<128x128xf32>
      %c0_192 = arith.constant 0 : index
      %c256_193 = arith.constant 256 : index
      %158 = vector.load %arg21[%c0_192, %c256_193] : memref<128x1152xf32, #tpu.memory_space<vmem>>, vector<128x128xf32>
      tpu.vector_store %arg21[%c0_192, %c256_193], %157 {strides = array<i32>} : memref<128x1152xf32, #tpu.memory_space<vmem>>, vector<128x128xf32>,
      %c0_194 = arith.constant 0 : index
      %c1_195 = arith.constant 1 : index
      %c0_196 = arith.constant 0 : index
      %c0_197 = arith.constant 0 : index
      %159 = vector.load %arg20[%c0_194, %c1_195, %c0_196, %c0_197] : memref<2x10x10x128xf32, #tpu.memory_space<vmem>>, vector<2x8x8x128xf32>
      %160 = vector.shape_cast %159 : vector<2x8x8x128xf32> to vector<128x128xf32>
      %c0_198 = arith.constant 0 : index
      %c384_199 = arith.constant 384 : index
      %161 = vector.load %arg21[%c0_198, %c384_199] : memref<128x1152xf32, #tpu.memory_space<vmem>>, vector<128x128xf32>
      tpu.vector_store %arg21[%c0_198, %c384_199], %160 {strides = array<i32>} : memref<128x1152xf32, #tpu.memory_space<vmem>>, vector<128x128xf32>,
      %c0_200 = arith.constant 0 : index
      %c1_201 = arith.constant 1 : index
      %c1_202 = arith.constant 1 : index
      %c0_203 = arith.constant 0 : index
      %162 = vector.load %arg20[%c0_200, %c1_201, %c1_202, %c0_203] : memref<2x10x10x128xf32, #tpu.memory_space<vmem>>, vector<2x8x8x128xf32>
      %163 = vector.shape_cast %162 : vector<2x8x8x128xf32> to vector<128x128xf32>
      %c0_204 = arith.constant 0 : index
      %c512_205 = arith.constant 512 : index
      %164 = vector.load %arg21[%c0_204, %c512_205] : memref<128x1152xf32, #tpu.memory_space<vmem>>, vector<128x128xf32>
      tpu.vector_store %arg21[%c0_204, %c512_205], %163 {strides = array<i32>} : memref<128x1152xf32, #tpu.memory_space<vmem>>, vector<128x128xf32>,
      %c0_206 = arith.constant 0 : index
      %c1_207 = arith.constant 1 : index
      %c2_208 = arith.constant 2 : index
      %c0_209 = arith.constant 0 : index
      %165 = vector.load %arg20[%c0_206, %c1_207, %c2_208, %c0_209] : memref<2x10x10x128xf32, #tpu.memory_space<vmem>>, vector<2x8x8x128xf32>
      %166 = vector.shape_cast %165 : vector<2x8x8x128xf32> to vector<128x128xf32>
      %c0_210 = arith.constant 0 : index
      %c640 = arith.constant 640 : index
      %167 = vector.load %arg21[%c0_210, %c640] : memref<128x1152xf32, #tpu.memory_space<vmem>>, vector<128x128xf32>
      tpu.vector_store %arg21[%c0_210, %c640], %166 {strides = array<i32>} : memref<128x1152xf32, #tpu.memory_space<vmem>>, vector<128x128xf32>,
      %c0_211 = arith.constant 0 : index
      %c2_212 = arith.constant 2 : index
      %c0_213 = arith.constant 0 : index
      %c0_214 = arith.constant 0 : index
      %168 = vector.load %arg20[%c0_211, %c2_212, %c0_213, %c0_214] : memref<2x10x10x128xf32, #tpu.memory_space<vmem>>, vector<2x8x8x128xf32>
      %169 = vector.shape_cast %168 : vector<2x8x8x128xf32> to vector<128x128xf32>
      %c0_215 = arith.constant 0 : index
      %c768 = arith.constant 768 : index
      %170 = vector.load %arg21[%c0_215, %c768] : memref<128x1152xf32, #tpu.memory_space<vmem>>, vector<128x128xf32>
      tpu.vector_store %arg21[%c0_215, %c768], %169 {strides = array<i32>} : memref<128x1152xf32, #tpu.memory_space<vmem>>, vector<128x128xf32>,
      %c0_216 = arith.constant 0 : index
      %c2_217 = arith.constant 2 : index
      %c1_218 = arith.constant 1 : index
      %c0_219 = arith.constant 0 : index
      %171 = vector.load %arg20[%c0_216, %c2_217, %c1_218, %c0_219] : memref<2x10x10x128xf32, #tpu.memory_space<vmem>>, vector<2x8x8x128xf32>
      %172 = vector.shape_cast %171 : vector<2x8x8x128xf32> to vector<128x128xf32>
      %c0_220 = arith.constant 0 : index
      %c896 = arith.constant 896 : index
      %173 = vector.load %arg21[%c0_220, %c896] : memref<128x1152xf32, #tpu.memory_space<vmem>>, vector<128x128xf32>
      tpu.vector_store %arg21[%c0_220, %c896], %172 {strides = array<i32>} : memref<128x1152xf32, #tpu.memory_space<vmem>>, vector<128x128xf32>,
      %c0_221 = arith.constant 0 : index
      %c2_222 = arith.constant 2 : index
      %c2_223 = arith.constant 2 : index
      %c0_224 = arith.constant 0 : index
      %174 = vector.load %arg20[%c0_221, %c2_222, %c2_223, %c0_224] : memref<2x10x10x128xf32, #tpu.memory_space<vmem>>, vector<2x8x8x128xf32>
      %175 = vector.shape_cast %174 : vector<2x8x8x128xf32> to vector<128x128xf32>
      %c0_225 = arith.constant 0 : index
      %c1024 = arith.constant 1024 : index
      %176 = vector.load %arg21[%c0_225, %c1024] : memref<128x1152xf32, #tpu.memory_space<vmem>>, vector<128x128xf32>
      tpu.vector_store %arg21[%c0_225, %c1024], %175 {strides = array<i32>} : memref<128x1152xf32, #tpu.memory_space<vmem>>, vector<128x128xf32>,
      %c0_226 = arith.constant 0 : index
      %c0_227 = arith.constant 0 : index
      %177 = vector.load %arg21[%c0_226, %c0_227] : memref<128x1152xf32, #tpu.memory_space<vmem>>, vector<128x1152xf32>
      %c0_228 = arith.constant 0 : index
      %c0_229 = arith.constant 0 : index
      %178 = vector.load %arg8[%c0_228, %c0_229] : memref<1152x128xf32, #tpu.memory_space<vmem>>, vector<1152x128xf32>
      %cst_230 = arith.constant dense<0.000000e+00> : vector<128x128xf32>
      %179 = tpu.matmul %177, %178, %cst_230 {dimension_numbers = #tpu.dot_dimension_numbers<[1], [0], [0], [1], [0, 0, 1, 1], [], []>} : vector<128x1152xf32>, vector<1152x128xf32>, vector<128x128xf32> -> vector<128x128xf32>
      %c0_231 = arith.constant 0 : index
      %c0_232 = arith.constant 0 : index
      %180 = vector.load %arg9[%c0_231, %c0_232] : memref<1x128xf32, #tpu.memory_space<vmem>>, vector<1x128xf32>
      %181 = vector.broadcast %180 : vector<1x128xf32> to vector<128x128xf32>
      %182 = arith.mulf %179, %181 : vector<128x128xf32>
      %c0_233 = arith.constant 0 : index
      %c0_234 = arith.constant 0 : index
      %183 = vector.load %arg10[%c0_233, %c0_234] : memref<1x128xf32, #tpu.memory_space<vmem>>, vector<1x128xf32>
      %184 = vector.broadcast %183 : vector<1x128xf32> to vector<128x128xf32>
      %185 = arith.addf %182, %184 : vector<128x128xf32>
      %cst_235 = arith.constant 0.000000e+00 : f32
      %186 = vector.broadcast %cst_235 : f32 to vector<128x128xf32>
      %187 = arith.maximumf %185, %186 : vector<128x128xf32>
      %188 = vector.shape_cast %187 : vector<128x128xf32> to vector<2x8x8x128xf32>
      %189 = vector.shape_cast %188 : vector<2x8x8x128xf32> to vector<2x64x128xf32>
      %c0_236 = arith.constant 0 : index
      %c0_237 = arith.constant 0 : index
      %c0_238 = arith.constant 0 : index
      %190 = vector.load %arg22[%c0_236, %c0_237, %c0_238] : memref<2x64x128xf32, #tpu.memory_space<vmem>>, vector<2x64x128xf32>
      tpu.vector_store %arg22[%c0_236, %c0_237, %c0_238], %189 {strides = array<i32>} : memref<2x64x128xf32, #tpu.memory_space<vmem>>, vector<2x64x128xf32>,
      %cst_239 = arith.constant 0.000000e+00 : f32
      %191 = vector.broadcast %cst_239 : f32 to vector<2x256xf32>
      %c0_240 = arith.constant 0 : index
      %c0_241 = arith.constant 0 : index
      %192 = vector.load %arg23[%c0_240, %c0_241] : memref<2x256xf32, #tpu.memory_space<vmem>>, vector<2x256xf32>
      tpu.vector_store %arg23[%c0_240, %c0_241], %191 {strides = array<i32>} : memref<2x256xf32, #tpu.memory_space<vmem>>, vector<2x256xf32>,
    } else {
    }
    %c8_i32 = arith.constant 8 : i32
    %3 = arith.muli %arg0, %c8_i32 : i32
    %4 = tpu.assume_multiple %3, 8 : i32
    %c0 = arith.constant 0 : index
    %5 = arith.index_cast %4 : i32 to index
    %c0_1 = arith.constant 0 : index
    %6 = vector.load %arg22[%c0, %5, %c0_1] : memref<2x64x128xf32, #tpu.memory_space<vmem>>, vector<2x8x128xf32>
    %cst = arith.constant 0.000000e+00 : f32
    %7 = vector.broadcast %cst : f32 to vector<2x256xf32>
    %8 = vector.extract_strided_slice %6 {offsets = [0, 0, 0], sizes = [2, 1, 128], strides = [1, 1, 1]} : vector<2x8x128xf32> to vector<2x1x128xf32>
    %9 = vector.shape_cast %8 : vector<2x1x128xf32> to vector<2x128xf32>
    %c0_2 = arith.constant 0 : index
    %c0_3 = arith.constant 0 : index
    %c0_4 = arith.constant 0 : index
    %10 = vector.load %arg11[%c0_2, %c0_3, %c0_4] : memref<8x128x256xf32, #tpu.memory_space<vmem>>, vector<1x128x256xf32>
    %11 = vector.shape_cast %10 : vector<1x128x256xf32> to vector<128x256xf32>
    %cst_5 = arith.constant dense<0.000000e+00> : vector<2x256xf32>
    %12 = tpu.matmul %9, %11, %cst_5 {dimension_numbers = #tpu.dot_dimension_numbers<[1], [0], [0], [1], [0, 0, 1, 1], [], []>} : vector<2x128xf32>, vector<128x256xf32>, vector<2x256xf32> -> vector<2x256xf32>
    %13 = arith.addf %7, %12 : vector<2x256xf32>
    %14 = vector.extract_strided_slice %6 {offsets = [0, 1, 0], sizes = [2, 1, 128], strides = [1, 1, 1]} : vector<2x8x128xf32> to vector<2x1x128xf32>
    %15 = vector.shape_cast %14 : vector<2x1x128xf32> to vector<2x128xf32>
    %c1 = arith.constant 1 : index
    %c0_6 = arith.constant 0 : index
    %c0_7 = arith.constant 0 : index
    %16 = vector.load %arg11[%c1, %c0_6, %c0_7] : memref<8x128x256xf32, #tpu.memory_space<vmem>>, vector<1x128x256xf32>
    %17 = vector.shape_cast %16 : vector<1x128x256xf32> to vector<128x256xf32>
    %cst_8 = arith.constant dense<0.000000e+00> : vector<2x256xf32>
    %18 = tpu.matmul %15, %17, %cst_8 {dimension_numbers = #tpu.dot_dimension_numbers<[1], [0], [0], [1], [0, 0, 1, 1], [], []>} : vector<2x128xf32>, vector<128x256xf32>, vector<2x256xf32> -> vector<2x256xf32>
    %19 = arith.addf %13, %18 : vector<2x256xf32>
    %20 = vector.extract_strided_slice %6 {offsets = [0, 2, 0], sizes = [2, 1, 128], strides = [1, 1, 1]} : vector<2x8x128xf32> to vector<2x1x128xf32>
    %21 = vector.shape_cast %20 : vector<2x1x128xf32> to vector<2x128xf32>
    %c2 = arith.constant 2 : index
    %c0_9 = arith.constant 0 : index
    %c0_10 = arith.constant 0 : index
    %22 = vector.load %arg11[%c2, %c0_9, %c0_10] : memref<8x128x256xf32, #tpu.memory_space<vmem>>, vector<1x128x256xf32>
    %23 = vector.shape_cast %22 : vector<1x128x256xf32> to vector<128x256xf32>
    %cst_11 = arith.constant dense<0.000000e+00> : vector<2x256xf32>
    %24 = tpu.matmul %21, %23, %cst_11 {dimension_numbers = #tpu.dot_dimension_numbers<[1], [0], [0], [1], [0, 0, 1, 1], [], []>} : vector<2x128xf32>, vector<128x256xf32>, vector<2x256xf32> -> vector<2x256xf32>
    %25 = arith.addf %19, %24 : vector<2x256xf32>
    %26 = vector.extract_strided_slice %6 {offsets = [0, 3, 0], sizes = [2, 1, 128], strides = [1, 1, 1]} : vector<2x8x128xf32> to vector<2x1x128xf32>
    %27 = vector.shape_cast %26 : vector<2x1x128xf32> to vector<2x128xf32>
    %c3 = arith.constant 3 : index
    %c0_12 = arith.constant 0 : index
    %c0_13 = arith.constant 0 : index
    %28 = vector.load %arg11[%c3, %c0_12, %c0_13] : memref<8x128x256xf32, #tpu.memory_space<vmem>>, vector<1x128x256xf32>
    %29 = vector.shape_cast %28 : vector<1x128x256xf32> to vector<128x256xf32>
    %cst_14 = arith.constant dense<0.000000e+00> : vector<2x256xf32>
    %30 = tpu.matmul %27, %29, %cst_14 {dimension_numbers = #tpu.dot_dimension_numbers<[1], [0], [0], [1], [0, 0, 1, 1], [], []>} : vector<2x128xf32>, vector<128x256xf32>, vector<2x256xf32> -> vector<2x256xf32>
    %31 = arith.addf %25, %30 : vector<2x256xf32>
    %32 = vector.extract_strided_slice %6 {offsets = [0, 4, 0], sizes = [2, 1, 128], strides = [1, 1, 1]} : vector<2x8x128xf32> to vector<2x1x128xf32>
    %33 = vector.shape_cast %32 : vector<2x1x128xf32> to vector<2x128xf32>
    %c4 = arith.constant 4 : index
    %c0_15 = arith.constant 0 : index
    %c0_16 = arith.constant 0 : index
    %34 = vector.load %arg11[%c4, %c0_15, %c0_16] : memref<8x128x256xf32, #tpu.memory_space<vmem>>, vector<1x128x256xf32>
    %35 = vector.shape_cast %34 : vector<1x128x256xf32> to vector<128x256xf32>
    %cst_17 = arith.constant dense<0.000000e+00> : vector<2x256xf32>
    %36 = tpu.matmul %33, %35, %cst_17 {dimension_numbers = #tpu.dot_dimension_numbers<[1], [0], [0], [1], [0, 0, 1, 1], [], []>} : vector<2x128xf32>, vector<128x256xf32>, vector<2x256xf32> -> vector<2x256xf32>
    %37 = arith.addf %31, %36 : vector<2x256xf32>
    %38 = vector.extract_strided_slice %6 {offsets = [0, 5, 0], sizes = [2, 1, 128], strides = [1, 1, 1]} : vector<2x8x128xf32> to vector<2x1x128xf32>
    %39 = vector.shape_cast %38 : vector<2x1x128xf32> to vector<2x128xf32>
    %c5 = arith.constant 5 : index
    %c0_18 = arith.constant 0 : index
    %c0_19 = arith.constant 0 : index
    %40 = vector.load %arg11[%c5, %c0_18, %c0_19] : memref<8x128x256xf32, #tpu.memory_space<vmem>>, vector<1x128x256xf32>
    %41 = vector.shape_cast %40 : vector<1x128x256xf32> to vector<128x256xf32>
    %cst_20 = arith.constant dense<0.000000e+00> : vector<2x256xf32>
    %42 = tpu.matmul %39, %41, %cst_20 {dimension_numbers = #tpu.dot_dimension_numbers<[1], [0], [0], [1], [0, 0, 1, 1], [], []>} : vector<2x128xf32>, vector<128x256xf32>, vector<2x256xf32> -> vector<2x256xf32>
    %43 = arith.addf %37, %42 : vector<2x256xf32>
    %44 = vector.extract_strided_slice %6 {offsets = [0, 6, 0], sizes = [2, 1, 128], strides = [1, 1, 1]} : vector<2x8x128xf32> to vector<2x1x128xf32>
    %45 = vector.shape_cast %44 : vector<2x1x128xf32> to vector<2x128xf32>
    %c6 = arith.constant 6 : index
    %c0_21 = arith.constant 0 : index
    %c0_22 = arith.constant 0 : index
    %46 = vector.load %arg11[%c6, %c0_21, %c0_22] : memref<8x128x256xf32, #tpu.memory_space<vmem>>, vector<1x128x256xf32>
    %47 = vector.shape_cast %46 : vector<1x128x256xf32> to vector<128x256xf32>
    %cst_23 = arith.constant dense<0.000000e+00> : vector<2x256xf32>
    %48 = tpu.matmul %45, %47, %cst_23 {dimension_numbers = #tpu.dot_dimension_numbers<[1], [0], [0], [1], [0, 0, 1, 1], [], []>} : vector<2x128xf32>, vector<128x256xf32>, vector<2x256xf32> -> vector<2x256xf32>
    %49 = arith.addf %43, %48 : vector<2x256xf32>
    %50 = vector.extract_strided_slice %6 {offsets = [0, 7, 0], sizes = [2, 1, 128], strides = [1, 1, 1]} : vector<2x8x128xf32> to vector<2x1x128xf32>
    %51 = vector.shape_cast %50 : vector<2x1x128xf32> to vector<2x128xf32>
    %c7 = arith.constant 7 : index
    %c0_24 = arith.constant 0 : index
    %c0_25 = arith.constant 0 : index
    %52 = vector.load %arg11[%c7, %c0_24, %c0_25] : memref<8x128x256xf32, #tpu.memory_space<vmem>>, vector<1x128x256xf32>
    %53 = vector.shape_cast %52 : vector<1x128x256xf32> to vector<128x256xf32>
    %cst_26 = arith.constant dense<0.000000e+00> : vector<2x256xf32>
    %54 = tpu.matmul %51, %53, %cst_26 {dimension_numbers = #tpu.dot_dimension_numbers<[1], [0], [0], [1], [0, 0, 1, 1], [], []>} : vector<2x128xf32>, vector<128x256xf32>, vector<2x256xf32> -> vector<2x256xf32>
    %55 = arith.addf %49, %54 : vector<2x256xf32>
    %c0_27 = arith.constant 0 : index
    %c0_28 = arith.constant 0 : index
    %56 = vector.load %arg23[%c0_27, %c0_28] : memref<2x256xf32, #tpu.memory_space<vmem>>, vector<2x256xf32>
    %57 = arith.addf %56, %55 : vector<2x256xf32>
    %c0_29 = arith.constant 0 : index
    %c0_30 = arith.constant 0 : index
    %58 = vector.load %arg23[%c0_29, %c0_30] : memref<2x256xf32, #tpu.memory_space<vmem>>, vector<2x256xf32>
    tpu.vector_store %arg23[%c0_29, %c0_30], %57 {strides = array<i32>} : memref<2x256xf32, #tpu.memory_space<vmem>>, vector<2x256xf32>,
    %c7_i32 = arith.constant 7 : i32
    %59 = arith.cmpi eq, %arg0, %c7_i32 : i32
    %60 = arith.extui %59 : i1 to i32
    %c0_i32_31 = arith.constant 0 : i32
    %61 = arith.cmpi ne, %60, %c0_i32_31 : i32
    scf.if %61 {
      %c0_32 = arith.constant 0 : index
      %c0_33 = arith.constant 0 : index
      %62 = vector.load %arg23[%c0_32, %c0_33] : memref<2x256xf32, #tpu.memory_space<vmem>>, vector<2x256xf32>
      %c0_34 = arith.constant 0 : index
      %c0_35 = arith.constant 0 : index
      %63 = vector.load %arg12[%c0_34, %c0_35] : memref<1x256xf32, #tpu.memory_space<vmem>>, vector<1x256xf32>
      %64 = vector.broadcast %63 : vector<1x256xf32> to vector<2x256xf32>
      %65 = arith.addf %62, %64 : vector<2x256xf32>
      %cst_36 = arith.constant 0.000000e+00 : f32
      %66 = vector.broadcast %cst_36 : f32 to vector<2x256xf32>
      %67 = arith.maximumf %65, %66 : vector<2x256xf32>
      %c0_37 = arith.constant 0 : index
      %c0_38 = arith.constant 0 : index
      %68 = vector.load %arg13[%c0_37, %c0_38] : memref<256x128xf32, #tpu.memory_space<vmem>>, vector<256x128xf32>
      %cst_39 = arith.constant dense<0.000000e+00> : vector<2x128xf32>
      %69 = tpu.matmul %67, %68, %cst_39 {dimension_numbers = #tpu.dot_dimension_numbers<[1], [0], [0], [1], [0, 0, 1, 1], [], []>} : vector<2x256xf32>, vector<256x128xf32>, vector<2x128xf32> -> vector<2x128xf32>
      %c0_40 = arith.constant 0 : index
      %c0_41 = arith.constant 0 : index
      %70 = vector.load %arg14[%c0_40, %c0_41] : memref<1x128xf32, #tpu.memory_space<vmem>>, vector<1x128xf32>
      %71 = vector.broadcast %70 : vector<1x128xf32> to vector<2x128xf32>
      %72 = arith.addf %69, %71 : vector<2x128xf32>
      %73 = vector.extract_strided_slice %72 {offsets = [0, 0], sizes = [2, 4], strides = [1, 1]} : vector<2x128xf32> to vector<2x4xf32>
      %c0_42 = arith.constant 0 : index
      %c0_43 = arith.constant 0 : index
      %74 = vector.load %arg15[%c0_42, %c0_43] : memref<2x4xf32, #tpu.memory_space<vmem>>, vector<2x4xf32>
      tpu.vector_store %arg15[%c0_42, %c0_43], %73 {strides = array<i32>} : memref<2x4xf32, #tpu.memory_space<vmem>>, vector<2x4xf32>,
    } else {
    }
    return
  }
  func.func @transform_0(%arg0: i32) -> (i32, i32, i32, i32) {
    %c0_i32 = arith.constant 0 : i32
    %c0_i32_0 = arith.constant 0 : i32
    %c0_i32_1 = arith.constant 0 : i32
    %c0_i32_2 = arith.constant 0 : i32
    %c0_i32_3 = arith.constant 0 : i32
    return %c0_i32, %c0_i32_0, %c0_i32_1, %c0_i32_2 : i32, i32, i32, i32
  }
  func.func @transform_1(%arg0: i32) -> (i32, i32) {
    %c0_i32 = arith.constant 0 : i32
    %c0_i32_0 = arith.constant 0 : i32
    %c0_i32_1 = arith.constant 0 : i32
    return %c0_i32, %c0_i32_0 : i32, i32
  }
  func.func @transform_2(%arg0: i32) -> (i32, i32) {
    %c0_i32 = arith.constant 0 : i32
    %c0_i32_0 = arith.constant 0 : i32
    %c0_i32_1 = arith.constant 0 : i32
    return %c0_i32, %c0_i32_0 : i32, i32
  }
  func.func @transform_3(%arg0: i32) -> (i32, i32) {
    %c0_i32 = arith.constant 0 : i32
    %c0_i32_0 = arith.constant 0 : i32
    %c0_i32_1 = arith.constant 0 : i32
    return %c0_i32, %c0_i32_0 : i32, i32
  }
  func.func @transform_4(%arg0: i32) -> (i32, i32) {
    %c0_i32 = arith.constant 0 : i32
    %c0_i32_0 = arith.constant 0 : i32
    %c0_i32_1 = arith.constant 0 : i32
    return %c0_i32, %c0_i32_0 : i32, i32
  }
  func.func @transform_5(%arg0: i32) -> (i32, i32) {
    %c0_i32 = arith.constant 0 : i32
    %c0_i32_0 = arith.constant 0 : i32
    %c0_i32_1 = arith.constant 0 : i32
    return %c0_i32, %c0_i32_0 : i32, i32
  }
  func.func @transform_6(%arg0: i32) -> (i32, i32) {
    %c0_i32 = arith.constant 0 : i32
    %c0_i32_0 = arith.constant 0 : i32
    %c0_i32_1 = arith.constant 0 : i32
    return %c0_i32, %c0_i32_0 : i32, i32
  }
  func.func @transform_7(%arg0: i32) -> (i32, i32) {
    %c0_i32 = arith.constant 0 : i32
    %c0_i32_0 = arith.constant 0 : i32
    %c0_i32_1 = arith.constant 0 : i32
    return %c0_i32, %c0_i32_0 : i32, i32
  }
  func.func @transform_8(%arg0: i32) -> (i32, i32) {
    %c0_i32 = arith.constant 0 : i32
    %c0_i32_0 = arith.constant 0 : i32
    %c0_i32_1 = arith.constant 0 : i32
    return %c0_i32, %c0_i32_0 : i32, i32
  }
  func.func @transform_9(%arg0: i32) -> (i32, i32) {
    %c0_i32 = arith.constant 0 : i32
    %c0_i32_0 = arith.constant 0 : i32
    %c0_i32_1 = arith.constant 0 : i32
    return %c0_i32, %c0_i32_0 : i32, i32
  }
  func.func @transform_10(%arg0: i32) -> (i32, i32, i32) {
    %c0_i32 = arith.constant 0 : i32
    %c0_i32_0 = arith.constant 0 : i32
    %c0_i32_1 = arith.constant 0 : i32
    return %arg0, %c0_i32, %c0_i32_0 : i32, i32, i32
  }
  func.func @transform_11(%arg0: i32) -> (i32, i32) {
    %c0_i32 = arith.constant 0 : i32
    %c0_i32_0 = arith.constant 0 : i32
    %c0_i32_1 = arith.constant 0 : i32
    return %c0_i32, %c0_i32_0 : i32, i32
  }
  func.func @transform_12(%arg0: i32) -> (i32, i32) {
    %c0_i32 = arith.constant 0 : i32
    %c0_i32_0 = arith.constant 0 : i32
    %c0_i32_1 = arith.constant 0 : i32
    return %c0_i32, %c0_i32_0 : i32, i32
  }
  func.func @transform_13(%arg0: i32) -> (i32, i32) {
    %c0_i32 = arith.constant 0 : i32
    %c0_i32_0 = arith.constant 0 : i32
    %c0_i32_1 = arith.constant 0 : i32
    return %c0_i32, %c0_i32_0 : i32, i32
  }
  func.func @transform_14(%arg0: i32) -> (i32, i32) {
    %c0_i32 = arith.constant 0 : i32
    %c0_i32_0 = arith.constant 0 : i32
    %c0_i32_1 = arith.constant 0 : i32
    return %c0_i32, %c0_i32_0 : i32, i32
  }
}

</mosaic_0001>

<bundles_post_ra>
// kernel: dqn_forward.1
= control target key start
LH: loop header
LB: loop body
LE: loop exit
PB: predicated region body
PF: predicated region fallthrough
CT: control target
= control target key end

     0   :  { %s8379_s0 = inlined_call_operand.vmem [shape: f32[2,8,8,4], index: 0, kind: input, shape index: {}]   ;;  %s8380_s1 = inlined_call_operand.hbm [shape: f32[36,64], index: 1, kind: input, shape index: {}]   ;;  %s8381_s2 = inlined_call_operand.hbm [shape: f32[1,64], index: 2, kind: input, shape index: {}]   ;;  %s8382_s3 = inlined_call_operand.hbm [shape: f32[1,64], index: 3, kind: input, shape index: {}]   ;;  %s8383_s4 = inlined_call_operand.hbm [shape: f32[576,128], index: 4, kind: input, shape index: {}]   ;;  %s8384_s5 = inlined_call_operand.hbm [shape: f32[1,128], index: 5, kind: input, shape index: {}]   ;;  %s8385_s6 = inlined_call_operand.hbm [shape: f32[1,128], index: 6, kind: input, shape index: {}]   ;;  %s8386_s7 = inlined_call_operand.hbm [shape: f32[1152,128], index: 7, kind: input, shape index: {}]   ;;  %s8387_s8 = inlined_call_operand.hbm [shape: f32[1,128], index: 8, kind: input, shape index: {}]   ;;  %s8388_s9 = inlined_call_operand.hbm [shape: f32[1,128], index: 9, kind: input, shape index: {}]   ;;  %s8389_s10 = inlined_call_operand.hbm [shape: f32[64,128,256], index: 10, kind: input, shape index: {}]   ;;  %s8390_s11 = inlined_call_operand.hbm [shape: f32[1,256], index: 11, kind: input, shape index: {}]   ;;  %s8391_s12 = inlined_call_operand.hbm [shape: f32[256,128], index: 12, kind: input, shape index: {}]   ;;  %s8392_s13 = inlined_call_operand.hbm [shape: f32[1,128], index: 13, kind: input, shape index: {}]   ;;  %s8393_s14 = inlined_call_operand.hbm [shape: f32[2,4], index: 14, kind: output, shape index: {}]  }
   0x1   :  { %8405 = sst [smem:[#allocation48_spill]] %s8379_s0 }
   0x2   :  { %8406 = sst [smem:[#allocation49_spill]] %s8381_s2 }
   0x3   :  { %8407 = sst [smem:[#allocation50_spill]] %s8383_s4 }
   0x4   :  { %8408 = sst [smem:[#allocation51_spill]] %s8385_s6 }
   0x5   :  { %8409 = sst [smem:[#allocation52_spill]] %s8393_s14 }
   0x6   :  { %19 = vsyncpa [#allocation11], 0 }
   0x7   :  { %20 = vsyncpa [#allocation14], 0 }
   0x8   :  { %21 = vsyncpa [#allocation17], 0 }
   0x9   :  { %22 = vsyncpa [#allocation20], 0 }
   0xa   :  { %23 = vsyncpa [#allocation23], 0 }
   0xb   :  { %24 = vsyncpa [#allocation26], 0 }
   0xc   :  { %26 = vsyncpa [#allocation26 + $0x1], 0 }
   0xd   :  { %27 = vsyncpa [#allocation29], 0 }
   0xe   :  { %28 = vsyncpa [#allocation12], 0  ;;  %s6264_s29 = smov 0   ;;  %s6266_s30 = smov 0  }
   0xf   :  { %s6268_s15 = smov 0   ;;  %s6270_s16 = smov 0  }
  0x10 LB: > { %s8410_s2 = sld [smem:[#allocation49_spill]]  ;;  %s6288_s20 = sadd.s32 4294967295, %s6160_s16   ;;  %s6160_s16 = sphi %s6270_s16, %s8436_s16   ;;  %s6156_s15 = sphi %s6268_s15, %s8435_s15   ;;  %s6152_s30 = sphi %s6266_s30, %s8434_s30   ;;  %s6148_s29 = sphi %s6264_s29, %s8433_s29  }
  0x11   : > { %p5138_p0 = scmp.ge.s32.totalorder %s6160_s16, 1  ;;  %p265_p1 = scmp.eq.s32.totalorder %s6288_s20, 0 }
  0x12   : > { %p359_p2 = scmp.lt.s32.totalorder %s6160_s16, 9  ;;  %p5139_p3 = scmp.ne.s32.totalorder %s6288_s20, 0 }
  0x13   : > { %s6162_s22 = smov [#allocation13]   ;;  %s8413_s4 = sld [smem:[#allocation50_spill]] }
  0x14   : > { %p6294_p4 = pnand %p5138_p0, %p359_p2  ;;  %s390_s23 = sshll.u32 %s6162_s22, 4  ;;  %s391_s23 = int_to_ptr.vmem [resolvable:$true] %s390_s23 }
  0x15   : > { %s8415_s6 = sld [smem:[#allocation51_spill]]  ;;  %s6163_s22 = smov [#allocation16]  }
  0x16   : > { %s388_s19 = sshll.u32 %s8410_s2, 4  ;;  %p5538_p5 = pneg %p6294_p4  ;;  %s389_s19 = int_to_ptr.hbm [resolvable:$true] %s388_s19 }
  0x17   : > { %s8411_s21 = scalar_select %p6294_p4, 1, 0 }
  0x18   : > { %p6305_p6 = pnand %p5538_p5, %p265_p1  ;;  %s413_s2 = sshll.u32 %s6163_s22, 4  ;;  %s414_s2 = int_to_ptr.vmem [resolvable:$true] %s413_s2 }
  0x19   : > { %8412 = sst [smem:[#allocation41_spill]] %s8411_s21  ;;  %s411_s26 = sshll.u32 %s8413_s4, 4  ;;  %s412_s26 = int_to_ptr.hbm [resolvable:$true] %s411_s26 }
  0x1a   : > { %5544 = dma.hbm_to_vmem [thread:$0]  (!%p6305_p6), %s389_s19, 16, %s391_s23, [#allocation14]  }
  0x1b   : > { %s438_s18 = sshll.u32 %s8415_s6, 4  ;;  %s6164_s24 = smov 128   ;;  %s439_s18 = int_to_ptr.hbm [resolvable:$true] %s438_s18 }
  0x1c   : > { %s6165_s25 = smov 8   ;;  %s464_s0 = sshll.u32 %s8387_s8, 4  ;;  %s465_s0 = int_to_ptr.hbm [resolvable:$true] %s464_s0 }
  0x1d   : > { %5550 = dma.hbm_to_vmem [thread:$0]  (!%p6305_p6), %s412_s26, 9216, %s414_s2, [#allocation17], %s6164_s24, %s6164_s24, %s6165_s25  }
  0x1e   : > { %s6166_s28 = smov [#allocation19]   ;;  %s6167_s19 = smov [#allocation22]  }
  0x1f   : > { %s440_s17 = sshll.u32 %s6166_s28, 4  ;;  %s466_s23 = sshll.u32 %s6167_s19, 4  ;;  %s441_s17 = int_to_ptr.vmem [resolvable:$true] %s440_s17  ;;  %s467_s23 = int_to_ptr.vmem [resolvable:$true] %s466_s23 }
  0x20   : > { %5556 = dma.hbm_to_vmem [thread:$0]  (!%p6305_p6), %s439_s18, 16, %s441_s17, [#allocation20]  }
  0x21   : > { %s488_s21 = sshll.u32 %s8390_s11, 4  ;;  %s499_s14 = sshll.u32 %s8391_s12, 4  ;;  %s489_s21 = int_to_ptr.hbm [resolvable:$true] %s488_s21  ;;  %s500_s14 = int_to_ptr.hbm [resolvable:$true] %s499_s14 }
  0x22   : > { %5562 = dma.hbm_to_vmem [thread:$0]  (!%p6305_p6), %s465_s0, 16, %s467_s23, [#allocation23]  }
  0x23   : > { %s6168_s26 = smov [#allocation27]   ;;  %s6169_s18 = smov [#allocation28]  }
  0x24   : > { %s490_s28 = sshll.u32 %s6168_s26, 4  ;;  %s501_s17 = sshll.u32 %s6169_s18, 4  ;;  %s491_s28 = int_to_ptr.vmem [resolvable:$true] %s490_s28  ;;  %s502_s17 = int_to_ptr.vmem [resolvable:$true] %s501_s17 }
  0x25   : > { %5568 = dma.hbm_to_vmem [thread:$0]  (!%p6305_p6), %s489_s21, 32, %s491_s28, [#allocation26]  }
  0x26   : > { %s373_s22 = sshll.u32 %s8380_s1, 4  ;;  %s400_s2 = sshll.u32 %s8382_s3, 4  ;;  %s374_s22 = int_to_ptr.hbm [resolvable:$true] %s373_s22  ;;  %s401_s2 = int_to_ptr.hbm [resolvable:$true] %s400_s2 }
  0x27   : > { %5571 = dma.hbm_to_vmem [thread:$0]  (!%p6305_p6), %s500_s14, 4096, %s502_s17, [#allocation29], %s6164_s24, %s6164_s24, %s6165_s25  }
  0x28   : > { %s6170_s4 = smov [#allocation10]   ;;  %s6171_s26 = smov [#allocation15]  }
  0x29   : > { %s375_s21 = sshll.u32 %s6170_s4, 4  ;;  %s402_s28 = sshll.u32 %s6171_s26, 4  ;;  %s376_s21 = int_to_ptr.vmem [resolvable:$true] %s375_s21  ;;  %s403_s28 = int_to_ptr.vmem [resolvable:$true] %s402_s28 }
  0x2a   : > { %5541 = dma.hbm_to_vmem [thread:$0]  (!%p6305_p6), %s374_s22, 640, %s376_s21, [#allocation11], %s6164_s24, %s6164_s24, %s6165_s25  }
  0x2b   : > { %s426_s14 = sshll.u32 %s8384_s5, 4  ;;  %s449_s0 = sshll.u32 %s8386_s7, 4  ;;  %s427_s14 = int_to_ptr.hbm [resolvable:$true] %s426_s14  ;;  %s450_s0 = int_to_ptr.hbm [resolvable:$true] %s449_s0 }
  0x2c   : > { %5547 = dma.hbm_to_vmem [thread:$0]  (!%p6305_p6), %s401_s2, 16, %s403_s28, [#allocation14]  }
  0x2d   : > { %s6172_s23 = smov [#allocation18]   ;;  %s6173_s22 = smov [#allocation21]  }
  0x2e   : > { %s428_s4 = sshll.u32 %s6172_s23, 4  ;;  %s451_s21 = sshll.u32 %s6173_s22, 4  ;;  %s429_s4 = int_to_ptr.vmem [resolvable:$true] %s428_s4  ;;  %s452_s21 = int_to_ptr.vmem [resolvable:$true] %s451_s21 }
  0x2f   : > { %5553 = dma.hbm_to_vmem [thread:$0]  (!%p6305_p6), %s427_s14, 16, %s429_s4, [#allocation17]  }
  0x30   : > { %s476_s2 = sshll.u32 %s8388_s9, 4  ;;  %s514_s14 = sshll.u32 %s8392_s13, 4  ;;  %s477_s2 = int_to_ptr.hbm [resolvable:$true] %s476_s2  ;;  %s515_s14 = int_to_ptr.hbm [resolvable:$true] %s514_s14 }
  0x31   : > { %5559 = dma.hbm_to_vmem [thread:$0]  (!%p6305_p6), %s450_s0, 18432, %s452_s21, [#allocation20], %s6164_s24, %s6164_s24, %s6165_s25  }
  0x32   : > { %s6174_s17 = smov [#allocation24]   ;;  %s6175_s23 = smov [#allocation30]  }
  0x33   : > { %s478_s19 = sshll.u32 %s6174_s17, 4  ;;  %s516_s24 = sshll.u32 %s6175_s23, 4  ;;  %s479_s19 = int_to_ptr.vmem [resolvable:$true] %s478_s19  ;;  %s517_s24 = int_to_ptr.vmem [resolvable:$true] %s516_s24 }
  0x34   : > { %5565 = dma.hbm_to_vmem [thread:$0]  (!%p6305_p6), %s477_s2, 16, %s479_s19, [#allocation23]  }
  0x35   : > { %5574 = dma.hbm_to_vmem [thread:$0]  (!%p6305_p6), %s515_s14, 16, %s517_s24, [#allocation29]  }
  0x36   : > { %s6376_s25 = sadd.s32 1, %s6160_s16   ;;  %s251_s0 = sadd.s32 1, %s6156_s15 }
  0x37   : > { %s248_s4 = ssub.s32 %s6160_s16, %s6376_s25  ;;  %p258_p7 = scmp.ne.s32.totalorder %s6156_s15, %s6152_s30 }
  0x38   : > { %p249_p8 = scmp.eq.s32.totalorder %s248_s4, 0  ;;  %p259_p9 = scmp.eq.s32.totalorder %s6160_s16, 0 }
  0x39   : > { %p264_p10 = scmp.ne.s32.totalorder %s6152_s30, %s6148_s29  ;;  %p5591_p11 = scmp.lt.s32.totalorder %s6160_s16, 8 }
  0x3a   : > { %s6388_s22 = scalar_select %p249_p8, %s6156_s15, %s251_s0  }
  0x3b   : > { %p260_p12 = por %p259_p9, %p258_p7  ;;  %p6392_p13 = por %p265_p1, %p264_p10 }
  0x3c   : > { %s527_s27 = sand.u32 1, %s6160_s16   ;;  %s529_s26 = sand.u32 1, %s6156_s15  }
  0x3d   : > { %s5152_s18 = sshll.u32 %s529_s26, 11  ;;  %s5435_s2 = sshll.u32 %s6160_s16, 11 }
  0x3e   : > { %s537_s14 = scalar_lea.hbm %s8389_s10, %s5435_s2  ;;  %s531_s17 = scalar_lea.vmem [#allocation25], %s5152_s18 }
  0x3f   : > { %s540_s19 = sshll.u32 %s531_s17, 4  ;;  %s538_s29 = sshll.u32 %s537_s14, 4  ;;  %s541_s19 = int_to_ptr.vmem [resolvable:$true] %s540_s19  ;;  %s539_s29 = int_to_ptr.hbm [resolvable:$true] %s538_s29 }
  0x40   : > { %p6404_p0 = pnand %p5591_p11, %p260_p12  ;;  %s528_s24 = scalar_lea.sflag [#allocation26], %s527_s27 }
  0x41   : > { %s6036_s0 = sshra.s32 %s539_s29, 4  ;;  %s6043_s2 = scalar_lea.hbm %s8389_s10, 16384  ;;  %s6037_s0 = int_to_ptr.hbm [resolvable:$true] %s6036_s0 }
  0x42   : > { %s6038_s4 = scalar_lea.hbm %s6037_s0, 2048  ;;  %p6040_p5 = pneg %p6404_p0 }
  0x43   : > { %p6039_p2 = scmp.ne.s32.totalorder %s6037_s0, %s6038_s4  ;;  %p6044_p8 = scmp.lt.s32.totalorder %s6037_s0, %s8389_s10 }
  0x44   : > { %p6045_p9 = scmp.lt.s32.totalorder %s6043_s2, %s6038_s4 }
  0x45   : > { %p6041_p6 = pnand %p6040_p5, %p6039_p2 }
  0x46   : > { %p6046_p10 = por %p6045_p9, %p6044_p8 }
  0x47   : > { %p6042_p7 = pneg %p6041_p6 }
  0x49   : > { %p6047_p11 = pnand %p6046_p10, %p6042_p7 }
  0x4b   : > { %6050 = shalt.err (!%p6047_p11)
}
  0x4c   : > { %s6176_s27 = smov 256   ;;  %s6177_s6 = smov 16  }
  0x4d   : > { %5578 = dma.hbm_to_vmem [thread:$0]  (!%p6404_p0), %s539_s29, 32768, %s541_s19, %s528_s24, %s6176_s27, %s6176_s27, %s6177_s6  }
  0x4e   : > { %552 = sbr.rel (%p6294_p4) target bundleno = 2039 (0x7f7), region = 76 }
  0x53   : > { %6111 = dma.done.wait (%p265_p1), [#allocation11], 640  }
  0x54   : > { %6113 = vsyncadd (%p265_p1), [#allocation11], 4294966656 }
  0x55   : > { %6115 = dma.done.wait (%p265_p1), [#allocation14], 32  }
  0x56   : > { %6117 = vsyncadd (%p265_p1), [#allocation14], 4294967264 }
  0x57   : > { %6119 = dma.done.wait (%p265_p1), [#allocation17], 9232  }
  0x58   : > { %6121 = vsyncadd (%p265_p1), [#allocation17], 4294958064 }
  0x59   : > { %6123 = dma.done.wait (%p265_p1), [#allocation20], 18448  }
  0x5a   : > { %6125 = vsyncadd (%p265_p1), [#allocation20], 4294948848 }
  0x5b   : > { %6127 = dma.done.wait (%p265_p1), [#allocation23], 32  }
  0x5c   : > { %6129 = vsyncadd (%p265_p1), [#allocation23], 4294967264  ;;  %s599_s17 = sand.u32 1, %s6288_s20   ;;  %s601_s19 = sand.u32 1, %s6152_s30  }
  0x5d   : > { %s5166_s29 = sshll.u32 %s601_s19, 11  ;;  %s600_s23 = scalar_lea.sflag [#allocation26], %s599_s17 }
  0x5e   : > { %s6442_s24 = scalar_lea.vmem [#allocation25], %s5166_s29 }
  0x5f   : > { %6131 = dma.done.wait (%p6392_p13), %s600_s23, 32768  }
  0x60   : > { %6133 = vsyncadd (%p6392_p13), %s600_s23, 4294934528 }
  0x61   : > { %6135 = dma.done.wait (%p265_p1), [#allocation26], 32  }
  0x62   : > { %6137 = vsyncadd (%p265_p1), [#allocation26], 4294967264 }
  0x63   : > { %6139 = dma.done.wait (%p265_p1), [#allocation29], 4112  }
  0x64   : > { %6141 = vsyncadd (%p265_p1), [#allocation29], 4294963184  ;;  %663 = sbr.rel (%p5139_p3) target bundleno = 1589 (0x635), region = 132 }
  0x69   : > { %vm680_vm0 = vcmask 31744   ;;  %vm682_vm1 = vcmask 25600   ;;  %v6178_v0 = vmov 0.0   ;;  %s6179_s21 = smov 4   ;;  %s6180_s0 = smov 8   ;;  %vm851_vm2 = vcmask 64544  }
  0x6a   : > { %681 = vst.msk [vmem:[#allocation2] sm:$0xff] %vm680_vm0, %v6178_v0  ;;  %s8419_s18 = sld [smem:[#allocation48_spill]]  ;;  %s6181_s6 = smov 12   ;;  %vm948_vm3 = vcmask 97344   ;;  %v1568_v33 = vld [vmem:[#allocation10 + $0x20] sm:$0xf] }
  0x6b   : > { %683 = vst.msk [vmem:[#allocation2 + $0x8] sm:$0x3] %vm682_vm1, %v6178_v0  ;;  %s6182_s14 = smov 20   ;;  %s6183_s17 = smov 28   ;;  %vm1618_vm4 = vcmask 1043456   ;;  %v1567_v35 = vld [vmem:[#allocation10 + $0x18] sm:$0xff] }
  0x6c   : > { %684 = vst.msk [vmem:[#allocation2 + $0x10] sm:$0xff] %vm680_vm0, %v6178_v0  ;;  %s6184_s19 = smov 16   ;;  %s6185_s29 = smov 24   ;;  %5171 = vmatpush.msk.msra.mxu0 %vm1618_vm4, %v1568_v33  ;;  %v1566_v36 = vld [vmem:[#allocation10 + $0x10] sm:$0xff]  ;;  %v1565_v37 = vld [vmem:[#allocation10 + $0x8] sm:$0xff]  ;;  %v1564_v39 = vld [vmem:[#allocation10] sm:$0xff] }
  0x6d   : > { %685 = vst.msk [vmem:[#allocation2 + $0x18] sm:$0x3] %vm682_vm1, %v6178_v0  ;;  %s6186_s26 = smov 32   ;;  %vm1045_vm5 = vcmask 130144   ;;  %vm1142_vm6 = vcmask 162944   ;;  %vm1239_vm7 = vcmask 195744  }
  0x6e   : > { %686 = vst.msk [vmem:[#allocation2 + $0x20] sm:$0xff] %vm680_vm0, %v6178_v0  ;;  %1634 = vmatpush.msra.mxu0 %v1567_v35  ;;  %vm1337_vm8 = vcmask 228544   ;;  %vm1434_vm9 = vcmask 261344   ;;  %vm1531_vm10 = vcmask 294144   ;;  %vm1569_vm11 = vcmask 293888  }
  0x6f   : > { %687 = vst.msk [vmem:[#allocation2 + $0x28] sm:$0x3] %vm682_vm1, %v6178_v0  ;;  %vm1743_vm12 = vcmask 523264   ;;  %vm1745_vm13 = vcmask 517120   ;;  %vm1914_vm14 = vcmask 1048064  }
  0x70   : > { %688 = vst.msk [vmem:[#allocation2 + $0x30] sm:$0xff] %vm680_vm0, %v6178_v0  ;;  %v664_v3 = vld [vmem:[%s8419_s18] sm:$0xff]  ;;  %v665_v4 = vld [vmem:[%s8419_s18 + $0x8] sm:$0xff]  ;;  %v666_v5 = vld [vmem:[%s8419_s18 + $0x10] sm:$0xff]  ;;  %1635 = vmatpush.msra.mxu0 %v1566_v36 }
  0x71   : > { %689 = vst.msk [vmem:[#allocation2 + $0x38] sm:$0x3] %vm682_vm1, %v6178_v0  ;;  %v667_v13 = vld [vmem:[%s8419_s18 + $0x18] sm:$0xff]  ;;  %v668_v17 = vld [vmem:[%s8419_s18 + $0x20] sm:$0xff]  ;;  %v669_v21 = vld [vmem:[%s8419_s18 + $0x28] sm:$0xff] }
  0x72   : > { %v771_v1 = vld [vmem:[#allocation2 + $0x1] sm:$0xff]  ;;  %690 = vst.msk [vmem:[#allocation2 + $0x40] sm:$0xff] %vm680_vm0, %v6178_v0  ;;  %v671_v38 = vld [vmem:[%s8419_s18 + $0x38] sm:$0xff]  ;;  %1636 = vmatpush.msra.mxu0 %v1565_v37  ;;  %v672_v53 = vld [vmem:[%s8419_s18 + $0x40] sm:$0xff] }
  0x73   : > { %803 = vrot.lane.b32.xlu0 %v771_v1, %s6179_s21  ;;  %691 = vst.msk [vmem:[#allocation2 + $0x48] sm:$0x3] %vm682_vm1, %v6178_v0  ;;  %v868_v2 = vld [vmem:[#allocation2 + $0x2] sm:$0xff] }
  0x74   : > { %692 = vst.msk [vmem:[#allocation2 + $0x50] sm:$0xff] %vm680_vm0, %v6178_v0  ;;  %v670_v25 = vld [vmem:[%s8419_s18 + $0x30] sm:$0xff]  ;;  %v739_v27 = vld [vmem:[#allocation2] sm:$0xff]  ;;  %1637 = vmatpush.msra.mxu0 %v1564_v39 }
  0x75   : > { %693 = vst.msk [vmem:[#allocation2 + $0x58] sm:$0x3] %vm682_vm1, %v6178_v0  ;;  %v673_v60 = vld [vmem:[%s8419_s18 + $0x48] sm:$0xff] }
  0x76   : > { %694 = vst.msk [vmem:[#allocation2 + $0x60] sm:$0xff] %vm680_vm0, %v6178_v0 }
  0x77   : > { %695 = vst.msk [vmem:[#allocation2 + $0x68] sm:$0x3] %vm682_vm1, %v6178_v0 }
  0x78   : > { %696 = vst.msk [vmem:[#allocation2 + $0x70] sm:$0xff] %vm680_vm0, %v6178_v0 }
  0x79   : > { %697 = vst.msk [vmem:[#allocation2 + $0x78] sm:$0x3] %vm682_vm1, %v6178_v0 }
  0x7a   : > { %698 = vst.msk [vmem:[#allocation2 + $0x80] sm:$0xff] %vm680_vm0, %v6178_v0 }
  0x7b   : > { %699 = vst.msk [vmem:[#allocation2 + $0x88] sm:$0x3] %vm682_vm1, %v6178_v0  ;;  %900 = vrot.lane.b32.xlu0 %v868_v2, %s6180_s0 }
  0x7c   : > { %700 = vst.msk [vmem:[#allocation2 + $0x90] sm:$0xff] %vm680_vm0, %v6178_v0 }
  0x7d   : > { %701 = vst.msk [vmem:[#allocation2 + $0x98] sm:$0x3] %vm682_vm1, %v6178_v0 }
  0x7e   : > { %702 = vst.msk [vmem:[#allocation2 + $0xa0] sm:$0xff] %vm680_vm0, %v6178_v0 }
  0x7f   : > { %703 = vst.msk [vmem:[#allocation2 + $0xa8] sm:$0x3] %vm682_vm1, %v6178_v0 }
  0x80   : > { %704 = vst.msk [vmem:[#allocation2 + $0xb0] sm:$0xff] %vm680_vm0, %v6178_v0 }
  0x81   : > { %705 = vst.msk [vmem:[#allocation2 + $0xb8] sm:$0x3] %vm682_vm1, %v6178_v0 }
  0x82   : > { %706 = vst.msk [vmem:[#allocation2 + $0xc0] sm:$0xff] %vm680_vm0, %v6178_v0 }
  0x83   : > { %707 = vst.msk [vmem:[#allocation2 + $0xc8] sm:$0x3] %vm682_vm1, %v6178_v0 }
  0x84   : > { %708 = vst.msk [vmem:[#allocation2 + $0xd0] sm:$0xff] %vm680_vm0, %v6178_v0  ;;  %v1458_v2 = vld [vmem:[#allocation2 + $0x92] sm:$0xff] }
  0x85   : > { %709 = vst.msk [vmem:[#allocation2 + $0xd8] sm:$0x3] %vm682_vm1, %v6178_v0 }
  0x86   : > { %710 = vst.msk [vmem:[#allocation2 + $0xe0] sm:$0xff] %vm680_vm0, %v6178_v0 }
  0x87   : > { %711 = vst.msk [vmem:[#allocation2 + $0xe8] sm:$0x3] %vm682_vm1, %v6178_v0 }
  0x88   : > { %712 = vst.msk [vmem:[#allocation2 + $0xf0] sm:$0xff] %vm680_vm0, %v6178_v0 }
  0x89   : > { %713 = vst.msk [vmem:[#allocation2 + $0xf8] sm:$0x3] %vm682_vm1, %v6178_v0 }
  0x8a   : > { %714 = vst.msk [vmem:[#allocation2 + $0x100] sm:$0xff] %vm680_vm0, %v6178_v0 }
  0x8b   : > { %715 = vst.msk [vmem:[#allocation2 + $0x108] sm:$0x3] %vm682_vm1, %v6178_v0 }
  0x8c   : > { %716 = vst.msk [vmem:[#allocation2 + $0x110] sm:$0xff] %vm680_vm0, %v6178_v0 }
  0x8d   : > { %717 = vst.msk [vmem:[#allocation2 + $0x118] sm:$0x3] %vm682_vm1, %v6178_v0 }
  0x8e   : > { %718 = vst.msk [vmem:[#allocation2 + $0x120] sm:$0xff] %vm680_vm0, %v6178_v0 }
  0x8f   : > { %719 = vst.msk [vmem:[#allocation2 + $0x128] sm:$0x3] %vm682_vm1, %v6178_v0 }
  0x90   : > { %720 = vst.msk [vmem:[#allocation2 + $0x130] sm:$0xff] %vm680_vm0, %v6178_v0 }
  0x91   : > { %721 = vst.msk [vmem:[#allocation2 + $0x138] sm:$0x3] %vm682_vm1, %v6178_v0 }
  0x92   : > { %2929 = vst [vmem:[#allocation6] sm:$0xff] %v6178_v0 }
  0x93   : > { %2930 = vst [vmem:[#allocation6 + $0x8] sm:$0x3] %v6178_v0 }
  0x94   : > { %2931 = vst [vmem:[#allocation6 + $0x10] sm:$0xff] %v6178_v0 }
  0x95   : > { %2932 = vst [vmem:[#allocation6 + $0x18] sm:$0x3] %v6178_v0 }
  0x96   : > { %2933 = vst [vmem:[#allocation6 + $0x20] sm:$0xff] %v6178_v0 }
  0x97   : > { %2934 = vst [vmem:[#allocation6 + $0x28] sm:$0x3] %v6178_v0 }
  0x98   : > { %2935 = vst [vmem:[#allocation6 + $0x30] sm:$0xff] %v6178_v0 }
  0x99   : > { %2936 = vst [vmem:[#allocation6 + $0x38] sm:$0x3] %v6178_v0 }
  0x9a   : > { %2937 = vst [vmem:[#allocation6 + $0x40] sm:$0xff] %v6178_v0 }
  0x9b   : > { %2938 = vst [vmem:[#allocation6 + $0x48] sm:$0x3] %v6178_v0 }
  0x9c   : > { %2939 = vst [vmem:[#allocation6 + $0x50] sm:$0xff] %v6178_v0 }
  0x9d   : > { %2940 = vst [vmem:[#allocation6 + $0x58] sm:$0x3] %v6178_v0 }
  0x9e   : > { %2941 = vst [vmem:[#allocation6 + $0x60] sm:$0xff] %v6178_v0 }
  0x9f   : > { %2942 = vst [vmem:[#allocation6 + $0x68] sm:$0x3] %v6178_v0 }
  0xa0   : > { %2943 = vst [vmem:[#allocation6 + $0x70] sm:$0xff] %v6178_v0 }
  0xa1   : > { %2944 = vst [vmem:[#allocation6 + $0x78] sm:$0x3] %v6178_v0 }
  0xa2   : > { %2945 = vst [vmem:[#allocation6 + $0x80] sm:$0xff] %v6178_v0 }
  0xa3   : > { %2946 = vst [vmem:[#allocation6 + $0x88] sm:$0x3] %v6178_v0 }
  0xa4   : > { %2947 = vst [vmem:[#allocation6 + $0x90] sm:$0xff] %v6178_v0 }
  0xa5   : > { %2948 = vst [vmem:[#allocation6 + $0x98] sm:$0x3] %v6178_v0 }
  0xa6   : > { %2949 = vst [vmem:[#allocation6 + $0xa0] sm:$0xff] %v6178_v0 }
  0xa7   : > { %2950 = vst [vmem:[#allocation6 + $0xa8] sm:$0x3] %v6178_v0 }
  0xa8   : > { %2951 = vst [vmem:[#allocation6 + $0xb0] sm:$0xff] %v6178_v0 }
  0xa9   : > { %2952 = vst [vmem:[#allocation6 + $0xb8] sm:$0x3] %v6178_v0 }
  0xaa   : > { %2953 = vst [vmem:[#allocation6 + $0xc0] sm:$0xff] %v6178_v0 }
  0xab   : > { %2954 = vst [vmem:[#allocation6 + $0xc8] sm:$0x3] %v6178_v0 }
  0xac   : > { %2955 = vst [vmem:[#allocation6 + $0xd0] sm:$0xff] %v6178_v0 }
  0xad   : > { %2956 = vst [vmem:[#allocation6 + $0xd8] sm:$0x3] %v6178_v0 }
  0xae   : > { %2957 = vst [vmem:[#allocation6 + $0xe0] sm:$0xff] %v6178_v0 }
  0xaf   : > { %2958 = vst [vmem:[#allocation6 + $0xe8] sm:$0x3] %v6178_v0 }
  0xb0   : > { %2959 = vst [vmem:[#allocation6 + $0xf0] sm:$0xff] %v6178_v0 }
  0xb1   : > { %2960 = vst [vmem:[#allocation6 + $0xf8] sm:$0x3] %v6178_v0 }
  0xb2   : > { %2961 = vst [vmem:[#allocation6 + $0x100] sm:$0xff] %v6178_v0 }
  0xb3   : > { %2962 = vst [vmem:[#allocation6 + $0x108] sm:$0x3] %v6178_v0 }
  0xb4   : > { %2963 = vst [vmem:[#allocation6 + $0x110] sm:$0xff] %v6178_v0 }
  0xb5   : > { %2964 = vst [vmem:[#allocation6 + $0x118] sm:$0x3] %v6178_v0 }
  0xb6   : > { %2965 = vst [vmem:[#allocation6 + $0x120] sm:$0xff] %v6178_v0 }
  0xb7   : > { %2966 = vst [vmem:[#allocation6 + $0x128] sm:$0x3] %v6178_v0 }
  0xb8   : > { %2967 = vst [vmem:[#allocation6 + $0x130] sm:$0xff] %v6178_v0 }
  0xb9   : > { %2968 = vst [vmem:[#allocation6 + $0x138] sm:$0x3] %v6178_v0 }
  0xba   : > { %4220 = vst [vmem:[#allocation9] sm:$0xf] %v6178_v0 }
  0xbb   : > { %723 = vst.msk [vmem:[#allocation2 + $0x11] sm:$0xff] %vm680_vm0, %v664_v3 }
  0xbc   : > { %724 = vst.msk [vmem:[#allocation2 + $0x21] sm:$0xff] %vm680_vm0, %v665_v4 }
  0xbd   : > { %725 = vst.msk [vmem:[#allocation2 + $0x31] sm:$0xff] %vm680_vm0, %v666_v5 }
  0xbe   : > { %726 = vst.msk [vmem:[#allocation2 + $0x41] sm:$0xff] %vm680_vm0, %v667_v13  ;;  %v779_v13 = vld [vmem:[#allocation2 + $0xa1] sm:$0xff] }
  0xbf   : > { %727 = vst.msk [vmem:[#allocation2 + $0x51] sm:$0xff] %vm680_vm0, %v668_v17 }
  0xc0   : > { %728 = vst.msk [vmem:[#allocation2 + $0x61] sm:$0xff] %vm680_vm0, %v669_v21 }
  0xc1   : > { %729 = vst.msk [vmem:[#allocation2 + $0x71] sm:$0xff] %vm680_vm0, %v670_v25 }
  0xc2   : > { %v965_v6 = vld [vmem:[#allocation2 + $0x10] sm:$0xff]  ;;  %755 = vst.msk [vmem:[#allocation3] sm:$0xff] %vm680_vm0, %v739_v27 }
  0xc3   : > { %v1159_v7 = vld [vmem:[#allocation2 + $0x12] sm:$0xff]  ;;  %997 = vrot.lane.b32.xlu1 %v965_v6, %s6181_s6  ;;  %v1354_v8 = vld [vmem:[#allocation2 + $0x21] sm:$0xff]  ;;  %756 = vst.msk [vmem:[#allocation3 + $0x8] sm:$0xff] %vm680_vm0, %v965_v6 }
  0xc4   : > { %1191 = vrot.lane.b32.xlu2 %v1159_v7, %s6182_s14  ;;  %v966_v9 = vld [vmem:[#allocation2 + $0x20] sm:$0xff]  ;;  %1386 = vrot.lane.b32.xlu0 %v1354_v8, %s6183_s17  ;;  %v1258_v10 = vld [vmem:[#allocation2 + $0x30] sm:$0xff]  ;;  %730 = vst.msk [vmem:[#allocation2 + $0x81] sm:$0xff] %vm680_vm0, %v671_v38 }
  0xc5   : > { %757 = vst.msk [vmem:[#allocation3 + $0x10] sm:$0xff] %vm680_vm0, %v966_v9  ;;  %v1062_v11 = vld [vmem:[#allocation2 + $0x11] sm:$0xff]  ;;  %v1451_v12 = vld [vmem:[#allocation2 + $0x22] sm:$0xff] }
  0xc6   : > { %758 = vst.msk [vmem:[#allocation3 + $0x18] sm:$0xff] %vm680_vm0, %v1258_v10  ;;  %v1452_v14 = vld [vmem:[#allocation2 + $0x32] sm:$0xff]  ;;  %v1259_v15 = vld [vmem:[#allocation2 + $0x40] sm:$0xff] }
  0xc7   : > { %759 = vst.msk [vmem:[#allocation3 + $0x20] sm:$0xff] %vm680_vm0, %v1259_v15  ;;  %v1064_v16 = vld [vmem:[#allocation2 + $0x31] sm:$0xff]  ;;  %v1356_v19 = vld [vmem:[#allocation2 + $0x41] sm:$0xff] }
  0xc8   : > { %v969_v18 = vld [vmem:[#allocation2 + $0x50] sm:$0xff]  ;;  %v1162_v20 = vld [vmem:[#allocation2 + $0x42] sm:$0xff]  ;;  %731 = vst.msk [vmem:[#allocation2 + $0xb1] sm:$0xff] %vm680_vm0, %v672_v53 }
  0xc9   : > { %760 = vst.msk [vmem:[#allocation3 + $0x28] sm:$0xff] %vm680_vm0, %v969_v18  ;;  %v1357_v22 = vld [vmem:[#allocation2 + $0x51] sm:$0xff]  ;;  %v1261_v23 = vld [vmem:[#allocation2 + $0x60] sm:$0xff] }
  0xca   : > { %761 = vst.msk [vmem:[#allocation3 + $0x30] sm:$0xff] %vm680_vm0, %v1261_v23  ;;  %v1454_v24 = vld [vmem:[#allocation2 + $0x52] sm:$0xff]  ;;  %v1455_v28 = vld [vmem:[#allocation2 + $0x62] sm:$0xff] }
  0xcb   : > { %1094 = vrot.lane.b32.xlu1 %v1062_v11, %s6184_s19  ;;  %v1262_v29 = vld [vmem:[#allocation2 + $0x70] sm:$0xff]  ;;  %v1067_v32 = vld [vmem:[#allocation2 + $0x61] sm:$0xff]  ;;  %732 = vst.msk [vmem:[#allocation2 + $0xc1] sm:$0xff] %vm680_vm0, %v673_v60 }
  0xcc   : > { %1289 = vrot.lane.b32.xlu2 %v966_v9, %s6185_s29  ;;  %902 = vrot.lane.b32.xlu0 %v1159_v7, %s6180_s0  ;;  %762 = vst.msk [vmem:[#allocation3 + $0x38] sm:$0xff] %vm680_vm0, %v1262_v29  ;;  %v1359_v44 = vld [vmem:[#allocation2 + $0x71] sm:$0xff]  ;;  %v1360_v49 = vld [vmem:[#allocation2 + $0x81] sm:$0xff] }
  0xcd   : > { %v1165_v45 = vld [vmem:[#allocation2 + $0x72] sm:$0xff]  ;;  %v972_v54 = vld [vmem:[#allocation2 + $0x80] sm:$0xff]  ;;  %1747 = vst.msk [vmem:[#allocation4 + $0x10] sm:$0xff] %vm1743_vm12, %v6178_v0 }
  0xce   : > { %v1457_v59 = vld [vmem:[#allocation2 + $0x82] sm:$0xff]  ;;  %1748 = vst.msk [vmem:[#allocation4 + $0x18] sm:$0x3] %vm1745_vm13, %v6178_v0 }
  0xcf   : > { %v973_v61 = vld [vmem:[#allocation2 + $0xb0] sm:$0xff]  ;;  %1744 = vst.msk [vmem:[#allocation4] sm:$0xff] %vm1743_vm12, %v6178_v0 }
  0xd0   : > { %764 = vst.msk [vmem:[#allocation3 + $0x48] sm:$0xff] %vm680_vm0, %v973_v61 }
  0xd1   : > { %1746 = vst.msk [vmem:[#allocation4 + $0x8] sm:$0x3] %vm1745_vm13, %v6178_v0 }
  0xd2   : > { %v6704_v3 = vld [vmem:[#allocation2 + $0xc0] sm:$0xff]  ;;  %1749 = vst.msk [vmem:[#allocation4 + $0x20] sm:$0xff] %vm1743_vm12, %v6178_v0 }
  0xd3   : > { %1483 = vrot.lane.b32.xlu1 %v1451_v12, %s6186_s26  ;;  %765 = vst.msk [vmem:[#allocation3 + $0x50] sm:$0xff] %vm680_vm0, %v6704_v3  ;;  %v1362_v25 = vld [vmem:[#allocation2 + $0xc1] sm:$0xff] }
  0xd4   : > { %805 = vrot.lane.b32.xlu2 %v1062_v11, %s6179_s21  ;;  %1193 = vrot.lane.b32.xlu0 %v1451_v12, %s6182_s14  ;;  %v1168_v27 = vld [vmem:[#allocation2 + $0xc2] sm:$0xff]  ;;  %1750 = vst.msk [vmem:[#allocation4 + $0x28] sm:$0x3] %vm1745_vm13, %v6178_v0 }
  0xd5   : > { %1751 = vst.msk [vmem:[#allocation4 + $0x30] sm:$0xff] %vm1743_vm12, %v6178_v0 }
  0xd6   : > { %1752 = vst.msk [vmem:[#allocation4 + $0x38] sm:$0x3] %vm1745_vm13, %v6178_v0 }
  0xd7   : > { %1753 = vst.msk [vmem:[#allocation4 + $0x40] sm:$0xff] %vm1743_vm12, %v6178_v0 }
  0xd8   : > { %1754 = vst.msk [vmem:[#allocation4 + $0x48] sm:$0x3] %vm1745_vm13, %v6178_v0 }
  0xd9   : > { %1755 = vst.msk [vmem:[#allocation4 + $0x50] sm:$0xff] %vm1743_vm12, %v6178_v0 }
  0xda   : > { %1756 = vst.msk [vmem:[#allocation4 + $0x58] sm:$0x3] %vm1745_vm13, %v6178_v0 }
  0xdb   : > { %999 = vrot.lane.b32.xlu1 %v966_v9, %s6181_s6  ;;  %v1361_v9 = vld [vmem:[#allocation2 + $0x91] sm:$0xff]  ;;  %1757 = vst.msk [vmem:[#allocation4 + $0x60] sm:$0xff] %vm1743_vm12, %v6178_v0 }
  0xdc   : > { %1096 = vrot.lane.b32.xlu2 %v1354_v8, %s6184_s19  ;;  %1485 = vrot.lane.b32.xlu0 %v1452_v14, %s6186_s26  ;;  %1758 = vst.msk [vmem:[#allocation4 + $0x68] sm:$0x3] %vm1745_vm13, %v6178_v0 }
  0xdd   : > { %1759 = vst.msk [vmem:[#allocation4 + $0x70] sm:$0xff] %vm1743_vm12, %v6178_v0 }
  0xde   : > { %1760 = vst.msk [vmem:[#allocation4 + $0x78] sm:$0x3] %vm1745_vm13, %v6178_v0 }
  0xdf   : > { %1761 = vst.msk [vmem:[#allocation4 + $0x80] sm:$0xff] %vm1743_vm12, %v6178_v0 }
  0xe0   : > { %1762 = vst.msk [vmem:[#allocation4 + $0x88] sm:$0x3] %vm1745_vm13, %v6178_v0 }
  0xe1   : > { %1763 = vst.msk [vmem:[#allocation4 + $0x90] sm:$0xff] %vm1743_vm12, %v6178_v0 }
  0xe2   : > { %1764 = vst.msk [vmem:[#allocation4 + $0x98] sm:$0x3] %vm1745_vm13, %v6178_v0 }
  0xe3   : > { %1291 = vrot.lane.b32.xlu1 %v1258_v10, %s6185_s29  ;;  %1765 = vst.msk [vmem:[#allocation4 + $0xa0] sm:$0xff] %vm1743_vm12, %v6178_v0 }
  0xe4   : > { %1388 = vrot.lane.b32.xlu2 %v1064_v16, %s6183_s17  ;;  %1001 = vrot.lane.b32.xlu0 %v1258_v10, %s6181_s6  ;;  %1766 = vst.msk [vmem:[#allocation4 + $0xa8] sm:$0x3] %vm1745_vm13, %v6178_v0 }
  0xe5   : > { %v804_v26 = vpop.permute.xlu0 %803  ;;  %1767 = vst.msk [vmem:[#allocation4 + $0xb0] sm:$0xff] %vm1743_vm12, %v6178_v0 }
  0xe6   : > { %852 = vst.msk [vmem:[#allocation3] sm:$0xff] %vm851_vm2, %v804_v26 }
  0xe7   : > { %1768 = vst.msk [vmem:[#allocation4 + $0xb8] sm:$0x3] %vm1745_vm13, %v6178_v0 }
  0xe8   : > { %1769 = vst.msk [vmem:[#allocation4 + $0xc0] sm:$0xff] %vm1743_vm12, %v6178_v0 }
  0xe9   : > { %1770 = vst.msk [vmem:[#allocation4 + $0xc8] sm:$0x3] %vm1745_vm13, %v6178_v0 }
  0xea   : > { %1771 = vst.msk [vmem:[#allocation4 + $0xd0] sm:$0xff] %vm1743_vm12, %v6178_v0 }
  0xeb   : > { %807 = vrot.lane.b32.xlu1 %v1354_v8, %s6179_s21  ;;  %v1264_v8 = vld [vmem:[#allocation2 + $0x90] sm:$0xff]  ;;  %1772 = vst.msk [vmem:[#allocation4 + $0xd8] sm:$0x3] %vm1745_vm13, %v6178_v0 }
  0xec   : > { %904 = vrot.lane.b32.xlu2 %v1451_v12, %s6180_s0  ;;  %1293 = vrot.lane.b32.xlu0 %v1259_v15, %s6185_s29  ;;  %1773 = vst.msk [vmem:[#allocation4 + $0xe0] sm:$0xff] %vm1743_vm12, %v6178_v0 }
  0xed   : > { %v901_v30 = vpop.permute.xlu0 %900  ;;  %1774 = vst.msk [vmem:[#allocation4 + $0xe8] sm:$0x3] %vm1745_vm13, %v6178_v0 }
  0xee   : > { %949 = vst.msk [vmem:[#allocation3] sm:$0xff] %vm948_vm3, %v901_v30 }
  0xef   : > { %1775 = vst.msk [vmem:[#allocation4 + $0xf0] sm:$0xff] %vm1743_vm12, %v6178_v0 }
  0xf0   : > { %1776 = vst.msk [vmem:[#allocation4 + $0xf8] sm:$0x3] %vm1745_vm13, %v6178_v0 }
  0xf1   : > { %1777 = vst.msk [vmem:[#allocation4 + $0x100] sm:$0xff] %vm1743_vm12, %v6178_v0 }
  0xf2   : > { %1778 = vst.msk [vmem:[#allocation4 + $0x108] sm:$0x3] %vm1745_vm13, %v6178_v0 }
  0xf3   : > { %1098 = vrot.lane.b32.xlu1 %v1064_v16, %s6184_s19  ;;  %1779 = vst.msk [vmem:[#allocation4 + $0x110] sm:$0xff] %vm1743_vm12, %v6178_v0 }
  0xf4   : > { %1195 = vrot.lane.b32.xlu2 %v1452_v14, %s6182_s14  ;;  %809 = vrot.lane.b32.xlu0 %v1064_v16, %s6179_s21  ;;  %1780 = vst.msk [vmem:[#allocation4 + $0x118] sm:$0x3] %vm1745_vm13, %v6178_v0 }
  0xf5   : > { %1781 = vst.msk [vmem:[#allocation4 + $0x120] sm:$0xff] %vm1743_vm12, %v6178_v0 }
  0xf6   : > { %1782 = vst.msk [vmem:[#allocation4 + $0x128] sm:$0x3] %vm1745_vm13, %v6178_v0 }
  0xf7   : > { %1783 = vst.msk [vmem:[#allocation4 + $0x130] sm:$0xff] %vm1743_vm12, %v6178_v0 }
  0xf8   : > { %1784 = vst.msk [vmem:[#allocation4 + $0x138] sm:$0x3] %vm1745_vm13, %v6178_v0 }
  0xfb   : > { %1390 = vrot.lane.b32.xlu1 %v1356_v19, %s6183_s17 }
  0xfc   : > { %1487 = vrot.lane.b32.xlu2 %v1162_v20, %s6186_s26  ;;  %1100 = vrot.lane.b32.xlu0 %v1356_v19, %s6184_s19 }
 0x103   : > { %906 = vrot.lane.b32.xlu1 %v1452_v14, %s6180_s0  ;;  %v876_v14 = vld [vmem:[#allocation2 + $0xa2] sm:$0xff] }
 0x104   : > { %1003 = vrot.lane.b32.xlu2 %v1259_v15, %s6181_s6  ;;  %1392 = vrot.lane.b32.xlu0 %v1357_v22, %s6183_s17  ;;  %v674_v15 = vld [vmem:[%s8419_s18 + $0x50] sm:$0xff] }
 0x105   : > { %733 = vst.msk [vmem:[#allocation2 + $0xd1] sm:$0xff] %vm680_vm0, %v674_v15 }
 0x10b   : > { %1197 = vrot.lane.b32.xlu1 %v1162_v20, %s6182_s14 }
 0x10c   : > { %1295 = vrot.lane.b32.xlu2 %v969_v18, %s6185_s29  ;;  %908 = vrot.lane.b32.xlu0 %v1162_v20, %s6180_s0  ;;  %v877_v20 = vld [vmem:[#allocation2 + $0xb2] sm:$0xff] }
 0x10d   : > { %v975_v26 = vld [vmem:[#allocation2 + $0xd0] sm:$0xff] }
 0x10e   : > { %766 = vst.msk [vmem:[#allocation3 + $0x58] sm:$0xff] %vm680_vm0, %v975_v26 }
 0x113   : > { %1489 = vrot.lane.b32.xlu1 %v1454_v24, %s6186_s26 }
 0x114   : > { %811 = vrot.lane.b32.xlu2 %v1356_v19, %s6179_s21  ;;  %1199 = vrot.lane.b32.xlu0 %v1454_v24, %s6182_s14  ;;  %v1070_v19 = vld [vmem:[#allocation2 + $0xb1] sm:$0xff] }
 0x11b   : > { %1005 = vrot.lane.b32.xlu1 %v969_v18, %s6181_s6 }
 0x11c   : > { %1102 = vrot.lane.b32.xlu2 %v1357_v22, %s6184_s19  ;;  %1491 = vrot.lane.b32.xlu0 %v1455_v28, %s6186_s26 }
 0x11e   : > { %v1192_v31 = vpop.permute.xlu2 %1191 }
 0x123   : > { %1297 = vrot.lane.b32.xlu1 %v1261_v23, %s6185_s29 }
 0x124   : > { %1394 = vrot.lane.b32.xlu2 %v1067_v32, %s6183_s17  ;;  %1007 = vrot.lane.b32.xlu0 %v1261_v23, %s6181_s6 }
 0x126   : > { %v1290_v34 = vpop.permute.xlu2 %1289 }
 0x12b   : > { %813 = vrot.lane.b32.xlu1 %v1357_v22, %s6179_s21 }
 0x12c   : > { %910 = vrot.lane.b32.xlu2 %v1454_v24, %s6180_s0  ;;  %1299 = vrot.lane.b32.xlu0 %v1262_v29, %s6185_s29 }
 0x12e   : > { %v806_v40 = vpop.permute.xlu2 %805 }
 0x12f   : > { %853 = vst.msk [vmem:[#allocation3 + $0x8] sm:$0xff] %vm851_vm2, %v806_v40 }
 0x133   : > { %1104 = vrot.lane.b32.xlu1 %v1067_v32, %s6184_s19 }
 0x134   : > { %1201 = vrot.lane.b32.xlu2 %v1455_v28, %s6182_s14  ;;  %815 = vrot.lane.b32.xlu0 %v1067_v32, %s6179_s21  ;;  %v1363_v32 = vld [vmem:[#allocation2 + $0xd1] sm:$0xff] }
 0x135   : > { %v998_v41 = vpop.permute.xlu1 %997 }
 0x136   : > { %v1097_v42 = vpop.permute.xlu2 %1096  ;;  %1046 = vst.msk [vmem:[#allocation3] sm:$0xff] %vm1045_vm5, %v998_v41  ;;  %v1387_v43 = vpop.permute.xlu0 %1386  ;;  %v1460_v41 = vld [vmem:[#allocation2 + $0xd2] sm:$0xff] }
 0x13b   : > { %1396 = vrot.lane.b32.xlu1 %v1359_v44, %s6183_s17 }
 0x13c   : > { %1493 = vrot.lane.b32.xlu2 %v1165_v45, %s6186_s26  ;;  %1106 = vrot.lane.b32.xlu0 %v1359_v44, %s6184_s19 }
 0x13d   : > { %v1095_v46 = vpop.permute.xlu1 %1094 }
 0x13e   : > { %v1389_v47 = vpop.permute.xlu2 %1388  ;;  %1143 = vst.msk [vmem:[#allocation3] sm:$0xff] %vm1142_vm6, %v1095_v46  ;;  %v903_v48 = vpop.permute.xlu0 %902 }
 0x13f   : > { %1240 = vst.msk [vmem:[#allocation3] sm:$0xff] %vm1239_vm7, %v1192_v31 }
 0x140   : > { %1338 = vst.msk [vmem:[#allocation3] sm:$0xff] %vm1337_vm8, %v1290_v34 }
 0x141   : > { %1435 = vst.msk [vmem:[#allocation3] sm:$0xff] %vm1434_vm9, %v1387_v43 }
 0x142   : > { %950 = vst.msk [vmem:[#allocation3 + $0x8] sm:$0xff] %vm948_vm3, %v903_v48 }
 0x143   : > { %912 = vrot.lane.b32.xlu1 %v1455_v28, %s6180_s0  ;;  %v675_v28 = vld [vmem:[%s8419_s18 + $0x58] sm:$0xff] }
 0x144   : > { %1009 = vrot.lane.b32.xlu2 %v1262_v29, %s6181_s6  ;;  %1398 = vrot.lane.b32.xlu0 %v1360_v49, %s6183_s17  ;;  %734 = vst.msk [vmem:[#allocation2 + $0xe1] sm:$0xff] %vm680_vm0, %v675_v28 }
 0x145   : > { %v1484_v50 = vpop.permute.xlu1 %1483 }
 0x146   : > { %v905_v51 = vpop.permute.xlu2 %904  ;;  %1532 = vst.msk [vmem:[#allocation3] sm:$0xff] %vm1531_vm10, %v1484_v50  ;;  %v1194_v52 = vpop.permute.xlu0 %1193 }
 0x14b   : > { %1203 = vrot.lane.b32.xlu1 %v1165_v45, %s6182_s14  ;;  %v1267_v33 = vld [vmem:[#allocation2 + $0xe0] sm:$0xff] }
 0x14c   : > { %1301 = vrot.lane.b32.xlu2 %v972_v54, %s6185_s29  ;;  %914 = vrot.lane.b32.xlu0 %v1165_v45, %s6180_s0  ;;  %767 = vst.msk [vmem:[#allocation3 + $0x60] sm:$0xff] %vm680_vm0, %v1267_v33  ;;  %v6775_v46 = vld [vmem:[#allocation2 + $0xe2] sm:$0xff] }
 0x14d   : > { %v1000_v55 = vpop.permute.xlu1 %999  ;;  %v1548_v56 = vld [vmem:[#allocation3] sm:$0xff] }
 0x14e   : > { %v1196_v57 = vpop.permute.xlu2 %1195  ;;  %1047 = vst.msk [vmem:[#allocation3 + $0x8] sm:$0xff] %vm1045_vm5, %v1000_v55  ;;  %5172 = vmatmul.msk.f32.vlgmr.msra.gmra.mxu0 %vm1569_vm11, %v1548_v56  ;;  %v1486_v58 = vpop.permute.xlu0 %1485 }
 0x14f   : > { %1144 = vst.msk [vmem:[#allocation3 + $0x8] sm:$0xff] %vm1142_vm6, %v1097_v42  ;;  %v676_v42 = vld [vmem:[%s8419_s18 + $0x60] sm:$0xff] }
 0x150   : > { %1241 = vst.msk [vmem:[#allocation3 + $0x8] sm:$0xff] %vm1239_vm7, %v1194_v52  ;;  %v1073_v52 = vld [vmem:[#allocation2 + $0xe1] sm:$0xff] }
 0x151   : > { %735 = vst.msk [vmem:[#allocation2 + $0xf1] sm:$0xff] %vm680_vm0, %v676_v42 }
 0x153   : > { %1495 = vrot.lane.b32.xlu1 %v1457_v59, %s6186_s26 }
 0x154   : > { %817 = vrot.lane.b32.xlu2 %v1359_v44, %s6179_s21  ;;  %1205 = vrot.lane.b32.xlu0 %v1457_v59, %s6182_s14 }
 0x155   : > { %v1292_v62 = vpop.permute.xlu1 %1291 }
 0x156   : > { %v1488_v63 = vpop.permute.xlu2 %1487  ;;  %1339 = vst.msk [vmem:[#allocation3 + $0x8] sm:$0xff] %vm1337_vm8, %v1292_v62  ;;  %v1002_v1 = vpop.permute.xlu0 %1001 }
 0x157   : > { %1436 = vst.msk [vmem:[#allocation3 + $0x8] sm:$0xff] %vm1434_vm9, %v1389_v47 }
 0x158   : > { %1533 = vst.msk [vmem:[#allocation3 + $0x8] sm:$0xff] %vm1531_vm10, %v1486_v58  ;;  %v6777_v47 = vld [vmem:[#allocation2 + $0xf0] sm:$0xff] }
 0x159   : > { %768 = vst.msk [vmem:[#allocation3 + $0x68] sm:$0xff] %vm680_vm0, %v6777_v47 }
 0x15b   : > { %1011 = vrot.lane.b32.xlu1 %v972_v54, %s6181_s6 }
 0x15c   : > { %1108 = vrot.lane.b32.xlu2 %v1360_v49, %s6184_s19  ;;  %1497 = vrot.lane.b32.xlu0 %v1458_v2, %s6186_s26 }
 0x15d   : > { %v808_v4 = vpop.permute.xlu1 %807 }
 0x15e   : > { %v1004_v5 = vpop.permute.xlu2 %1003  ;;  %854 = vst.msk [vmem:[#allocation3 + $0x10] sm:$0xff] %vm851_vm2, %v808_v4  ;;  %v1294_v6 = vpop.permute.xlu0 %1293 }
 0x15f   : > { %951 = vst.msk [vmem:[#allocation3 + $0x10] sm:$0xff] %vm948_vm3, %v905_v51  ;;  %v1549_v7 = vld [vmem:[#allocation3 + $0x8] sm:$0xff] }
 0x160   : > { %1048 = vst.msk [vmem:[#allocation3 + $0x10] sm:$0xff] %vm1045_vm5, %v1002_v1  ;;  %5173 = vmatmul.msk.f32.gmra.mxu0 %vm1569_vm11, %v1549_v7 }
 0x163   : > { %1303 = vrot.lane.b32.xlu1 %v1264_v8, %s6185_s29 }
 0x164   : > { %1400 = vrot.lane.b32.xlu2 %v1361_v9, %s6183_s17  ;;  %1013 = vrot.lane.b32.xlu0 %v973_v61, %s6181_s6  ;;  %v6820_v61 = vld [vmem:[#allocation2 + $0xf1] sm:$0xff] }
 0x165   : > { %v1099_v10 = vpop.permute.xlu1 %1098 }
 0x166   : > { %v1296_v11 = vpop.permute.xlu2 %1295  ;;  %1145 = vst.msk [vmem:[#allocation3 + $0x10] sm:$0xff] %vm1142_vm6, %v1099_v10  ;;  %v810_v12 = vpop.permute.xlu0 %809 }
 0x167   : > { %1242 = vst.msk [vmem:[#allocation3 + $0x10] sm:$0xff] %vm1239_vm7, %v1196_v57 }
 0x168   : > { %1340 = vst.msk [vmem:[#allocation3 + $0x10] sm:$0xff] %vm1337_vm8, %v1294_v6  ;;  %v6867_v6 = vld [vmem:[#allocation15] ss:$0 sm:$0xff] }
 0x169   : > { %855 = vst.msk [vmem:[#allocation3 + $0x18] sm:$0xff] %vm851_vm2, %v810_v12 }
 0x16b   : > { %819 = vrot.lane.b32.xlu1 %v779_v13, %s6179_s21 }
 0x16c   : > { %916 = vrot.lane.b32.xlu2 %v876_v14, %s6180_s0  ;;  %1305 = vrot.lane.b32.xlu0 %v6704_v3, %s6185_s29 }
 0x16d   : > { %v1391_v16 = vpop.permute.xlu1 %1390 }
 0x16e   : > { %v812_v17 = vpop.permute.xlu2 %811  ;;  %1437 = vst.msk [vmem:[#allocation3 + $0x10] sm:$0xff] %vm1434_vm9, %v1391_v16  ;;  %v1101_v18 = vpop.permute.xlu0 %1100 }
 0x16f   : > { %1534 = vst.msk [vmem:[#allocation3 + $0x10] sm:$0xff] %vm1531_vm10, %v1488_v63  ;;  %v6825_v63 = vld [vmem:[#allocation2 + $0xf2] sm:$0xff] }
 0x170   : > { %856 = vst.msk [vmem:[#allocation3 + $0x20] sm:$0xff] %vm851_vm2, %v812_v17 }
 0x173   : > { %1110 = vrot.lane.b32.xlu1 %v1070_v19, %s6184_s19 }
 0x174   : > { %1207 = vrot.lane.b32.xlu2 %v877_v20, %s6182_s14  ;;  %821 = vrot.lane.b32.xlu0 %v1070_v19, %s6179_s21 }
 0x175   : > { %v907_v21 = vpop.permute.xlu1 %906 }
 0x176   : > { %v1103_v22 = vpop.permute.xlu2 %1102  ;;  %952 = vst.msk [vmem:[#allocation3 + $0x18] sm:$0xff] %vm948_vm3, %v907_v21  ;;  %v1550_v23 = vld [vmem:[#allocation3 + $0x10] sm:$0xff]  ;;  %v1393_v24 = vpop.permute.xlu0 %1392 }
 0x177   : > { %1049 = vst.msk [vmem:[#allocation3 + $0x18] sm:$0xff] %vm1045_vm5, %v1004_v5  ;;  %5174 = vmatmul.msk.f32.gmra.mxu0 %vm1569_vm11, %v1550_v23  ;;  %v6861_v5 = vld [vmem:[#allocation13] ss:$0 sm:$0xff]  ;;  %v677_v23 = vld [vmem:[%s8419_s18 + $0x68] sm:$0xff] }
 0x178   : > { %1146 = vst.msk [vmem:[#allocation3 + $0x18] sm:$0xff] %vm1142_vm6, %v1101_v18 }
 0x179   : > { %736 = vst.msk [vmem:[#allocation2 + $0x101] sm:$0xff] %vm680_vm0, %v677_v23 }
 0x17b   : > { %1402 = vrot.lane.b32.xlu1 %v1362_v25, %s6183_s17 }
 0x17c   : > { %1499 = vrot.lane.b32.xlu2 %v1168_v27, %s6186_s26  ;;  %1112 = vrot.lane.b32.xlu0 %v1362_v25, %s6184_s19 }
 0x17d   : > { %v1198_v29 = vpop.permute.xlu1 %1197 }
 0x17e   : > { %v1395_v30 = vpop.permute.xlu2 %1394  ;;  %1243 = vst.msk [vmem:[#allocation3 + $0x18] sm:$0xff] %vm1239_vm7, %v1198_v29  ;;  %v909_v31 = vpop.permute.xlu0 %908  ;;  %v678_v29 = vld [vmem:[%s8419_s18 + $0x70] sm:$0xff] }
 0x17f   : > { %1341 = vst.msk [vmem:[#allocation3 + $0x18] sm:$0xff] %vm1337_vm8, %v1296_v11 }
 0x180   : > { %1438 = vst.msk [vmem:[#allocation3 + $0x18] sm:$0xff] %vm1434_vm9, %v1393_v24 }
 0x181   : > { %953 = vst.msk [vmem:[#allocation3 + $0x20] sm:$0xff] %vm948_vm3, %v909_v31  ;;  %v6937_v31 = vld [vmem:[#allocation2 + $0x102] sm:$0xff] }
 0x182   : > { %737 = vst.msk [vmem:[#allocation2 + $0x111] sm:$0xff] %vm680_vm0, %v678_v29  ;;  %v1369_v29 = vld [vmem:[#allocation2 + $0x131] sm:$0xff] }
 0x183   : > { %918 = vrot.lane.b32.xlu1 %v877_v20, %s6180_s0 }
 0x184   : > { %1015 = vrot.lane.b32.xlu2 %v6704_v3, %s6181_s6  ;;  %1404 = vrot.lane.b32.xlu0 %v1363_v32, %s6183_s17 }
 0x185   : > { %v1490_v34 = vpop.permute.xlu1 %1489 }
 0x186   : > { %v911_v35 = vpop.permute.xlu2 %910  ;;  %1535 = vst.msk [vmem:[#allocation3 + $0x18] sm:$0xff] %vm1531_vm10, %v1490_v34  ;;  %v1200_v36 = vpop.permute.xlu0 %1199 }
 0x18b   : > { %1209 = vrot.lane.b32.xlu1 %v1168_v27, %s6182_s14 }
 0x18c   : > { %1307 = vrot.lane.b32.xlu2 %v975_v26, %s6185_s29  ;;  %920 = vrot.lane.b32.xlu0 %v1168_v27, %s6180_s0  ;;  %v747_v27 = vld [vmem:[#allocation2 + $0xa0] sm:$0xff] }
 0x18d   : > { %v1006_v37 = vpop.permute.xlu1 %1005  ;;  %v1551_v38 = vld [vmem:[#allocation3 + $0x18] sm:$0xff]  ;;  %763 = vst.msk [vmem:[#allocation3 + $0x40] sm:$0xff] %vm680_vm0, %v747_v27 }
 0x18e   : > { %v1202_v39 = vpop.permute.xlu2 %1201  ;;  %1050 = vst.msk [vmem:[#allocation3 + $0x20] sm:$0xff] %vm1045_vm5, %v1006_v37  ;;  %5175 = vmatmul.msk.f32.gmra.mxu0 %vm1569_vm11, %v1551_v38  ;;  %v1492_v40 = vpop.permute.xlu0 %1491  ;;  %v679_v37 = vld [vmem:[%s8419_s18 + $0x78] sm:$0xff] }
 0x18f   : > { %1147 = vst.msk [vmem:[#allocation3 + $0x20] sm:$0xff] %vm1142_vm6, %v1103_v22 }
 0x190   : > { %1244 = vst.msk [vmem:[#allocation3 + $0x20] sm:$0xff] %vm1239_vm7, %v1200_v36 }
 0x191   : > { %738 = vst.msk [vmem:[#allocation2 + $0x121] sm:$0xff] %vm680_vm0, %v679_v37 }
 0x193   : > { %1501 = vrot.lane.b32.xlu1 %v1460_v41, %s6186_s26 }
 0x194   : > { %823 = vrot.lane.b32.xlu2 %v1362_v25, %s6179_s21  ;;  %1211 = vrot.lane.b32.xlu0 %v1460_v41, %s6182_s14 }
 0x195   : > { %v1298_v43 = vpop.permute.xlu1 %1297 }
 0x196   : > { %v1494_v44 = vpop.permute.xlu2 %1493  ;;  %1342 = vst.msk [vmem:[#allocation3 + $0x20] sm:$0xff] %vm1337_vm8, %v1298_v43  ;;  %v1008_v45 = vpop.permute.xlu0 %1007 }
 0x197   : > { %1439 = vst.msk [vmem:[#allocation3 + $0x20] sm:$0xff] %vm1434_vm9, %v1395_v30  ;;  %v1366_v30 = vld [vmem:[#allocation2 + $0x101] sm:$0xff] }
 0x198   : > { %1536 = vst.msk [vmem:[#allocation3 + $0x20] sm:$0xff] %vm1531_vm10, %v1492_v40 }
 0x19b   : > { %1017 = vrot.lane.b32.xlu1 %v975_v26, %s6181_s6 }
 0x19c   : > { %1114 = vrot.lane.b32.xlu2 %v1363_v32, %s6184_s19  ;;  %1503 = vrot.lane.b32.xlu0 %v6775_v46, %s6186_s26 }
 0x19d   : > { %v814_v48 = vpop.permute.xlu1 %813 }
 0x19e   : > { %v1010_v49 = vpop.permute.xlu2 %1009  ;;  %857 = vst.msk [vmem:[#allocation3 + $0x28] sm:$0xff] %vm851_vm2, %v814_v48  ;;  %v1300_v50 = vpop.permute.xlu0 %1299 }
 0x19f   : > { %954 = vst.msk [vmem:[#allocation3 + $0x28] sm:$0xff] %vm948_vm3, %v911_v35  ;;  %v1552_v51 = vld [vmem:[#allocation3 + $0x20] sm:$0xff] }
 0x1a0   : > { %1051 = vst.msk [vmem:[#allocation3 + $0x28] sm:$0xff] %vm1045_vm5, %v1008_v45  ;;  %5176 = vmatmul.msk.f32.gmra.mxu0 %vm1569_vm11, %v1552_v51 }
 0x1a3   : > { %1309 = vrot.lane.b32.xlu1 %v1267_v33, %s6185_s29 }
 0x1a4   : > { %1406 = vrot.lane.b32.xlu2 %v1073_v52, %s6183_s17  ;;  %1019 = vrot.lane.b32.xlu0 %v1267_v33, %s6181_s6 }
 0x1a5   : > { %v1105_v53 = vpop.permute.xlu1 %1104 }
 0x1a6   : > { %v1302_v54 = vpop.permute.xlu2 %1301  ;;  %1148 = vst.msk [vmem:[#allocation3 + $0x28] sm:$0xff] %vm1142_vm6, %v1105_v53  ;;  %v816_v55 = vpop.permute.xlu0 %815  ;;  %v1464_v53 = vld [vmem:[#allocation2 + $0x112] sm:$0xff] }
 0x1a7   : > { %1245 = vst.msk [vmem:[#allocation3 + $0x28] sm:$0xff] %vm1239_vm7, %v1202_v39 }
 0x1a8   : > { %1343 = vst.msk [vmem:[#allocation3 + $0x28] sm:$0xff] %vm1337_vm8, %v1300_v50 }
 0x1a9   : > { %858 = vst.msk [vmem:[#allocation3 + $0x30] sm:$0xff] %vm851_vm2, %v816_v55  ;;  %v1076_v55 = vld [vmem:[#allocation2 + $0x111] sm:$0xff] }
 0x1ab   : > { %825 = vrot.lane.b32.xlu1 %v1363_v32, %s6179_s21  ;;  %v978_v32 = vld [vmem:[#allocation2 + $0x100] sm:$0xff] }
 0x1ac   : > { %922 = vrot.lane.b32.xlu2 %v1460_v41, %s6180_s0  ;;  %1311 = vrot.lane.b32.xlu0 %v6777_v47, %s6185_s29  ;;  %769 = vst.msk [vmem:[#allocation3 + $0x70] sm:$0xff] %vm680_vm0, %v978_v32 }
 0x1ad   : > { %v1397_v56 = vpop.permute.xlu1 %1396 }
 0x1ae   : > { %1440 = vst.msk [vmem:[#allocation3 + $0x28] sm:$0xff] %vm1434_vm9, %v1397_v56  ;;  %v1107_v57 = vpop.permute.xlu0 %1106  ;;  %v818_v58 = vpop.permute.xlu2 %817 }
 0x1af   : > { %1537 = vst.msk [vmem:[#allocation3 + $0x28] sm:$0xff] %vm1531_vm10, %v1494_v44  ;;  %v1270_v44 = vld [vmem:[#allocation2 + $0x110] sm:$0xff] }
 0x1b0   : > { %859 = vst.msk [vmem:[#allocation3 + $0x38] sm:$0xff] %vm851_vm2, %v818_v58 }
 0x1b1   : > { %770 = vst.msk [vmem:[#allocation3 + $0x78] sm:$0xff] %vm680_vm0, %v1270_v44 }
 0x1b3   : > { %1116 = vrot.lane.b32.xlu1 %v1073_v52, %s6184_s19 }
 0x1b4   : > { %1213 = vrot.lane.b32.xlu2 %v6775_v46, %s6182_s14  ;;  %827 = vrot.lane.b32.xlu0 %v1073_v52, %s6179_s21 }
 0x1b5   : > { %v913_v59 = vpop.permute.xlu1 %912 }
 0x1b6   : > { %955 = vst.msk [vmem:[#allocation3 + $0x30] sm:$0xff] %vm948_vm3, %v913_v59  ;;  %v1553_v60 = vld [vmem:[#allocation3 + $0x28] sm:$0xff]  ;;  %v1399_v62 = vpop.permute.xlu0 %1398  ;;  %v1109_v3 = vpop.permute.xlu2 %1108 }
 0x1b7   : > { %1052 = vst.msk [vmem:[#allocation3 + $0x30] sm:$0xff] %vm1045_vm5, %v1010_v49  ;;  %5177 = vmatmul.msk.f32.gmra.mxu0 %vm1569_vm11, %v1553_v60 }
 0x1b8   : > { %1149 = vst.msk [vmem:[#allocation3 + $0x30] sm:$0xff] %vm1142_vm6, %v1107_v57 }
 0x1bb   : > { %1408 = vrot.lane.b32.xlu1 %v6820_v61, %s6183_s17 }
 0x1bc   : > { %1505 = vrot.lane.b32.xlu2 %v6825_v63, %s6186_s26  ;;  %1118 = vrot.lane.b32.xlu0 %v6820_v61, %s6184_s19 }
 0x1bd   : > { %v1204_v1 = vpop.permute.xlu1 %1203 }
 0x1be   : > { %1246 = vst.msk [vmem:[#allocation3 + $0x30] sm:$0xff] %vm1239_vm7, %v1204_v1  ;;  %v915_v2 = vpop.permute.xlu0 %914  ;;  %v1401_v10 = vpop.permute.xlu2 %1400 }
 0x1bf   : > { %1344 = vst.msk [vmem:[#allocation3 + $0x30] sm:$0xff] %vm1337_vm8, %v1302_v54 }
 0x1c0   : > { %1441 = vst.msk [vmem:[#allocation3 + $0x30] sm:$0xff] %vm1434_vm9, %v1399_v62 }
 0x1c1   : > { %956 = vst.msk [vmem:[#allocation3 + $0x38] sm:$0xff] %vm948_vm3, %v915_v2 }
 0x1c3   : > { %924 = vrot.lane.b32.xlu1 %v6775_v46, %s6180_s0 }
 0x1c4   : > { %1021 = vrot.lane.b32.xlu2 %v6777_v47, %s6181_s6  ;;  %1410 = vrot.lane.b32.xlu0 %v1366_v30, %s6183_s17 }
 0x1c5   : > { %v1496_v4 = vpop.permute.xlu1 %1495 }
 0x1c6   : > { %1538 = vst.msk [vmem:[#allocation3 + $0x30] sm:$0xff] %vm1531_vm10, %v1496_v4  ;;  %v1206_v9 = vpop.permute.xlu0 %1205  ;;  %v917_v16 = vpop.permute.xlu2 %916 }
 0x1cb   : > { %1215 = vrot.lane.b32.xlu1 %v6825_v63, %s6182_s14  ;;  %v1639_v7 = vpop.f32.mrf.mxu0 }
 0x1cc   : > { %v1691_v8 = vmul.f32 %v6861_v5, %v1639_v7  ;;  %1313 = vrot.lane.b32.xlu2 %v978_v32, %s6185_s29  ;;  %926 = vrot.lane.b32.xlu0 %v6825_v63, %s6180_s0 }
 0x1cd   : > { %v1012_v11 = vpop.permute.xlu1 %1011  ;;  %v1554_v12 = vld [vmem:[#allocation3 + $0x30] sm:$0xff] }
 0x1ce   : > { %v1711_v13 = vadd.f32 %v6867_v6, %v1691_v8  ;;  %5178 = vmatmul.msk.f32.gmra.mxu0 %vm1569_vm11, %v1554_v12  ;;  %v1498_v15 = vpop.permute.xlu0 %1497  ;;  %v1208_v19 = vpop.permute.xlu2 %1207  ;;  %1053 = vst.msk [vmem:[#allocation3 + $0x38] sm:$0xff] %vm1045_vm5, %v1012_v11  ;;  %v1368_v11 = vld [vmem:[#allocation2 + $0x121] sm:$0xff] }
 0x1cf   : > { %1150 = vst.msk [vmem:[#allocation3 + $0x38] sm:$0xff] %vm1142_vm6, %v1109_v3 }
 0x1d0   : > { %v1727_v14 = vmax.f32 %v1711_v13, 0.0  ;;  %1247 = vst.msk [vmem:[#allocation3 + $0x38] sm:$0xff] %vm1239_vm7, %v1206_v9 }
 0x1d2   : > { %1786 = vst.msk [vmem:[#allocation4 + $0x11] sm:$0xff] %vm1743_vm12, %v1727_v14 }
 0x1d3   : > { %1507 = vrot.lane.b32.xlu1 %v6937_v31, %s6186_s26 }
 0x1d4   : > { %829 = vrot.lane.b32.xlu2 %v6820_v61, %s6179_s21  ;;  %1217 = vrot.lane.b32.xlu0 %v6937_v31, %s6182_s14 }
 0x1d5   : > { %v1304_v17 = vpop.permute.xlu1 %1303 }
 0x1d6   : > { %v1014_v18 = vpop.permute.xlu0 %1013  ;;  %v1500_v26 = vpop.permute.xlu2 %1499  ;;  %1345 = vst.msk [vmem:[#allocation3 + $0x38] sm:$0xff] %vm1337_vm8, %v1304_v17  ;;  %v1174_v17 = vld [vmem:[#allocation2 + $0x122] sm:$0xff] }
 0x1d7   : > { %1442 = vst.msk [vmem:[#allocation3 + $0x38] sm:$0xff] %vm1434_vm9, %v1401_v10  ;;  %v1271_v10 = vld [vmem:[#allocation2 + $0x120] sm:$0xff] }
 0x1d8   : > { %1539 = vst.msk [vmem:[#allocation3 + $0x38] sm:$0xff] %vm1531_vm10, %v1498_v15 }
 0x1d9   : > { %v6969_v46 = vld [vmem:[#allocation4 + $0x10] sm:$0xff] }
 0x1da   : > { %1819 = vst.msk [vmem:[#allocation5 + $0x28] sm:$0xff] %vm1743_vm12, %v6969_v46  ;;  %v6987_v52 = vld [vmem:[#allocation4 + $0x12] sm:$0xff] }
 0x1db   : > { %1023 = vrot.lane.b32.xlu1 %v978_v32, %s6181_s6  ;;  %1948 = vst.msk [vmem:[#allocation5 + $0x30] sm:$0xff] %vm1743_vm12, %v6987_v52  ;;  %v2059_v57 = vld [vmem:[#allocation4 + $0x11] sm:$0xff] }
 0x1dc   : > { %1120 = vrot.lane.b32.xlu2 %v1366_v30, %s6184_s19  ;;  %1509 = vrot.lane.b32.xlu0 %v1464_v53, %s6186_s26  ;;  %2075 = vst.msk [vmem:[#allocation5 + $0x10] sm:$0xff] %vm1743_vm12, %v2059_v57 }
 0x1dd   : > { %v820_v20 = vpop.permute.xlu1 %819  ;;  %v1642_v21 = vpop.f32.mrf.mxu0 }
 0x1de   : > { %v1692_v22 = vmul.f32 %v6861_v5, %v1642_v21  ;;  %v1306_v25 = vpop.permute.xlu0 %1305  ;;  %860 = vst.msk [vmem:[#allocation3 + $0x40] sm:$0xff] %vm851_vm2, %v820_v20  ;;  %v1016_v34 = vpop.permute.xlu2 %1015 }
 0x1df   : > { %957 = vst.msk [vmem:[#allocation3 + $0x40] sm:$0xff] %vm948_vm3, %v917_v16  ;;  %v1555_v36 = vld [vmem:[#allocation3 + $0x38] sm:$0xff] }
 0x1e0   : > { %v1712_v24 = vadd.f32 %v6867_v6, %v1692_v22  ;;  %1054 = vst.msk [vmem:[#allocation3 + $0x40] sm:$0xff] %vm1045_vm5, %v1014_v18  ;;  %5179 = vmatmul.msk.f32.gmra.mxu0 %vm1569_vm11, %v1555_v36 }
 0x1e2   : > { %v1728_v28 = vmax.f32 %v1712_v24, 0.0 }
 0x1e3   : > { %1315 = vrot.lane.b32.xlu1 %v1270_v44, %s6185_s29 }
 0x1e4   : > { %1787 = vst.msk [vmem:[#allocation4 + $0x21] sm:$0xff] %vm1743_vm12, %v1728_v28  ;;  %1412 = vrot.lane.b32.xlu2 %v1076_v55, %s6183_s17  ;;  %1025 = vrot.lane.b32.xlu0 %v1270_v44, %s6181_s6 }
 0x1e5   : > { %v1111_v0 = vpop.permute.xlu1 %1110 }
 0x1e6   : > { %v822_v33 = vpop.permute.xlu0 %821  ;;  %1151 = vst.msk [vmem:[#allocation3 + $0x40] sm:$0xff] %vm1142_vm6, %v1111_v0  ;;  %v1308_v42 = vpop.permute.xlu2 %1307 }
 0x1e7   : > { %1248 = vst.msk [vmem:[#allocation3 + $0x40] sm:$0xff] %vm1239_vm7, %v1208_v19 }
 0x1e8   : > { %1346 = vst.msk [vmem:[#allocation3 + $0x40] sm:$0xff] %vm1337_vm8, %v1306_v25 }
 0x1e9   : > { %861 = vst.msk [vmem:[#allocation3 + $0x48] sm:$0xff] %vm851_vm2, %v822_v33 }
 0x1eb   : > { %v6972_v48 = vld [vmem:[#allocation4 + $0x20] sm:$0xff]  ;;  %831 = vrot.lane.b32.xlu1 %v1366_v30, %s6179_s21  ;;  %v1466_v30 = vld [vmem:[#allocation2 + $0x132] sm:$0xff] }
 0x1ec   : > { %1820 = vst.msk [vmem:[#allocation5 + $0x50] sm:$0xff] %vm1743_vm12, %v6972_v48  ;;  %v6990_v54 = vld [vmem:[#allocation4 + $0x22] sm:$0xff]  ;;  %928 = vrot.lane.b32.xlu2 %v6937_v31, %s6180_s0  ;;  %1317 = vrot.lane.b32.xlu0 %v1271_v10, %s6185_s29  ;;  %v1272_v31 = vld [vmem:[#allocation2 + $0x130] sm:$0xff] }
 0x1ed   : > { %v1403_v35 = vpop.permute.xlu1 %1402  ;;  %2204 = vst.msk [vmem:[#allocation5 + $0x18] sm:$0xff] %vm1743_vm12, %v6972_v48  ;;  %v2060_v60 = vld [vmem:[#allocation4 + $0x21] sm:$0xff] }
 0x1ee   : > { %1443 = vst.msk [vmem:[#allocation3 + $0x40] sm:$0xff] %vm1434_vm9, %v1403_v35  ;;  %v1113_v39 = vpop.permute.xlu0 %1112  ;;  %v824_v51 = vpop.permute.xlu2 %823  ;;  %v1834_v35 = vld [vmem:[#allocation4 + $0x1] sm:$0xff] }
 0x1ef   : > { %1540 = vst.msk [vmem:[#allocation3 + $0x40] sm:$0xff] %vm1531_vm10, %v1500_v26 }
 0x1f0   : > { %862 = vst.msk [vmem:[#allocation3 + $0x50] sm:$0xff] %vm851_vm2, %v824_v51 }
 0x1f1   : > { %1949 = vst.msk [vmem:[#allocation5 + $0x58] sm:$0xff] %vm1743_vm12, %v6990_v54 }
 0x1f2   : > { %2076 = vst.msk [vmem:[#allocation5 + $0x38] sm:$0xff] %vm1743_vm12, %v2060_v60 }
 0x1f3   : > { %2332 = vst.msk [vmem:[#allocation5 + $0x20] sm:$0xff] %vm1743_vm12, %v6990_v54  ;;  %1122 = vrot.lane.b32.xlu1 %v1076_v55, %s6184_s19 }
 0x1f4   : > { %v1645_v38 = vpop.f32.mrf.mxu0  ;;  %1219 = vrot.lane.b32.xlu2 %v1464_v53, %s6182_s14  ;;  %833 = vrot.lane.b32.xlu0 %v1076_v55, %s6179_s21  ;;  %s6187_s21 = smov 64  }
 0x1f5   : > { %v919_v40 = vpop.permute.xlu1 %918  ;;  %v1693_v41 = vmul.f32 %v6861_v5, %v1645_v38  ;;  %v1835_v38 = vld [vmem:[#allocation4 + $0x11] sm:$0xff] }
 0x1f6   : > { %958 = vst.msk [vmem:[#allocation3 + $0x48] sm:$0xff] %vm948_vm3, %v919_v40  ;;  %v1556_v47 = vld [vmem:[#allocation3 + $0x40] sm:$0xff]  ;;  %v1405_v49 = vpop.permute.xlu0 %1404  ;;  %v1115_v59 = vpop.permute.xlu2 %1114 }
 0x1f7   : > { %1055 = vst.msk [vmem:[#allocation3 + $0x48] sm:$0xff] %vm1045_vm5, %v1016_v34  ;;  %v1713_v43 = vadd.f32 %v6867_v6, %v1693_v41  ;;  %5180 = vmatmul.msk.f32.gmra.mxu0 %vm1569_vm11, %v1556_v47 }
 0x1f8   : > { %1152 = vst.msk [vmem:[#allocation3 + $0x48] sm:$0xff] %vm1142_vm6, %v1113_v39  ;;  %v7079_v39 = vld [vmem:[#allocation4 + $0x21] sm:$0xff] }
 0x1f9   : > { %v1729_v45 = vmax.f32 %v1713_v43, 0.0 }
 0x1fb   : > { %1788 = vst.msk [vmem:[#allocation4 + $0x31] sm:$0xff] %vm1743_vm12, %v1729_v45  ;;  %1414 = vrot.lane.b32.xlu1 %v1368_v11, %s6183_s17 }
 0x1fc   : > { %1511 = vrot.lane.b32.xlu2 %v1174_v17, %s6186_s26  ;;  %1124 = vrot.lane.b32.xlu0 %v1368_v11, %s6184_s19 }
 0x1fd   : > { %v1210_v50 = vpop.permute.xlu1 %1209 }
 0x1fe   : > { %1249 = vst.msk [vmem:[#allocation3 + $0x48] sm:$0xff] %vm1239_vm7, %v1210_v50  ;;  %v921_v56 = vpop.permute.xlu0 %920  ;;  %v1407_v8 = vpop.permute.xlu2 %1406 }
 0x1ff   : > { %1347 = vst.msk [vmem:[#allocation3 + $0x48] sm:$0xff] %vm1337_vm8, %v1308_v42 }
 0x200   : > { %1444 = vst.msk [vmem:[#allocation3 + $0x48] sm:$0xff] %vm1434_vm9, %v1405_v49 }
 0x201   : > { %959 = vst.msk [vmem:[#allocation3 + $0x50] sm:$0xff] %vm948_vm3, %v921_v56 }
 0x202   : > { %v7005_v61 = vld [vmem:[#allocation4 + $0x30] sm:$0xff] }
 0x203   : > { %v7007_v62 = vld [vmem:[#allocation4 + $0x32] sm:$0xff]  ;;  %1821 = vst.msk [vmem:[#allocation5 + $0x78] sm:$0xff] %vm1743_vm12, %v7005_v61  ;;  %930 = vrot.lane.b32.xlu1 %v1464_v53, %s6180_s0 }
 0x204   : > { %2205 = vst.msk [vmem:[#allocation5 + $0x40] sm:$0xff] %vm1743_vm12, %v7005_v61  ;;  %v2061_v13 = vld [vmem:[#allocation4 + $0x31] sm:$0xff]  ;;  %1027 = vrot.lane.b32.xlu2 %v1271_v10, %s6181_s6  ;;  %1416 = vrot.lane.b32.xlu0 %v1369_v29, %s6183_s17  ;;  %v2438_v29 = vld [vmem:[#allocation16 + $0x50] sm:$0xff] }
 0x205   : > { %v1502_v58 = vpop.permute.xlu1 %1501  ;;  %1950 = vst.msk [vmem:[#allocation5 + $0x80] sm:$0xff] %vm1743_vm12, %v7007_v62  ;;  %v7103_v51 = vld [vmem:[#allocation4 + $0x31] sm:$0xff] }
 0x206   : > { %1541 = vst.msk [vmem:[#allocation3 + $0x48] sm:$0xff] %vm1531_vm10, %v1502_v58  ;;  %v1212_v2 = vpop.permute.xlu0 %1211  ;;  %v923_v15 = vpop.permute.xlu2 %922 }
 0x207   : > { %2333 = vst.msk [vmem:[#allocation5 + $0x48] sm:$0xff] %vm1743_vm12, %v7007_v62 }
 0x208   : > { %2077 = vst.msk [vmem:[#allocation5 + $0x60] sm:$0xff] %vm1743_vm12, %v2061_v13 }
 0x20b   : > { %v1648_v63 = vpop.f32.mrf.mxu0  ;;  %1221 = vrot.lane.b32.xlu1 %v1174_v17, %s6182_s14  ;;  %v2443_v17 = vld [vmem:[#allocation16 + $0x78] sm:$0xff] }
 0x20c   : > { %v1694_v1 = vmul.f32 %v6861_v5, %v1648_v63  ;;  %1319 = vrot.lane.b32.xlu2 %v1272_v31, %s6185_s29  ;;  %1868 = vrot.lane.b32.xlu0 %v1835_v38, %s6187_s21  ;;  %v2435_v38 = vld [vmem:[#allocation16 + $0x38] sm:$0xff] }
 0x20d   : > { %v1018_v3 = vpop.permute.xlu1 %1017  ;;  %v1557_v4 = vld [vmem:[#allocation3 + $0x48] sm:$0xff]  ;;  %2548 = vmatpush.msra.mxu1 %v2443_v17  ;;  %5436 = vmatpush.msra.mxu3 %v2443_v17 }
 0x20e   : > { %v1714_v7 = vadd.f32 %v6867_v6, %v1694_v1  ;;  %1056 = vst.msk [vmem:[#allocation3 + $0x50] sm:$0xff] %vm1045_vm5, %v1018_v3  ;;  %5181 = vmatmul.msk.f32.gmra.mxu0 %vm1569_vm11, %v1557_v4  ;;  %v1504_v12 = vpop.permute.xlu0 %1503  ;;  %v1214_v0 = vpop.permute.xlu2 %1213 }
 0x20f   : > { %1153 = vst.msk [vmem:[#allocation3 + $0x50] sm:$0xff] %vm1142_vm6, %v1115_v59 }
 0x210   : > { %v1730_v9 = vmax.f32 %v1714_v7, 0.0  ;;  %1250 = vst.msk [vmem:[#allocation3 + $0x50] sm:$0xff] %vm1239_vm7, %v1212_v2 }
 0x212   : > { %1789 = vst.msk [vmem:[#allocation4 + $0x41] sm:$0xff] %vm1743_vm12, %v1730_v9 }
 0x213   : > { %1513 = vrot.lane.b32.xlu1 %v1466_v30, %s6186_s26  ;;  %v2437_v30 = vld [vmem:[#allocation16 + $0x48] sm:$0xff] }
 0x214   : > { %1866 = vrot.lane.b32.xlu2 %v1834_v35, %s6187_s21  ;;  %1872 = vrot.lane.b32.xlu0 %v7103_v51, %s6187_s21 }
 0x215   : > { %v1310_v14 = vpop.permute.xlu1 %1309 }
 0x216   : > { %1348 = vst.msk [vmem:[#allocation3 + $0x50] sm:$0xff] %vm1337_vm8, %v1310_v14  ;;  %v1020_v18 = vpop.permute.xlu0 %1019  ;;  %v1506_v32 = vpop.permute.xlu2 %1505 }
 0x217   : > { %1445 = vst.msk [vmem:[#allocation3 + $0x50] sm:$0xff] %vm1434_vm9, %v1407_v8 }
 0x218   : > { %1542 = vst.msk [vmem:[#allocation3 + $0x50] sm:$0xff] %vm1531_vm10, %v1504_v12 }
 0x219   : > { %v7037_v16 = vld [vmem:[#allocation4 + $0x40] sm:$0xff] }
 0x21a   : > { %1822 = vst.msk [vmem:[#allocation5 + $0xa0] sm:$0xff] %vm1743_vm12, %v7037_v16  ;;  %v7048_v22 = vld [vmem:[#allocation4 + $0x42] sm:$0xff] }
 0x21b   : > { %2206 = vst.msk [vmem:[#allocation5 + $0x68] sm:$0xff] %vm1743_vm12, %v7037_v16  ;;  %v7051_v24 = vld [vmem:[#allocation4 + $0x41] sm:$0xff]  ;;  %1870 = vrot.lane.b32.xlu1 %v7079_v39, %s6187_s21 }
 0x21c   : > { %1951 = vst.msk [vmem:[#allocation5 + $0xa8] sm:$0xff] %vm1743_vm12, %v7048_v22 }
 0x21d   : > { %v826_v19 = vpop.permute.xlu1 %825  ;;  %v1651_v20 = vpop.f32.mrf.mxu0  ;;  %2078 = vst.msk [vmem:[#allocation5 + $0x88] sm:$0xff] %vm1743_vm12, %v7051_v24 }
 0x21e   : > { %863 = vst.msk [vmem:[#allocation3 + $0x58] sm:$0xff] %vm851_vm2, %v826_v19  ;;  %v1695_v21 = vmul.f32 %v6861_v5, %v1651_v20  ;;  %v1312_v27 = vpop.permute.xlu0 %1311  ;;  %v1022_v44 = vpop.permute.xlu2 %1021  ;;  %v2441_v19 = vld [vmem:[#allocation16 + $0x68] sm:$0xff]  ;;  %v2440_v20 = vld [vmem:[#allocation16 + $0x60] sm:$0xff] }
 0x21f   : > { %960 = vst.msk [vmem:[#allocation3 + $0x58] sm:$0xff] %vm948_vm3, %v923_v15  ;;  %v1558_v23 = vld [vmem:[#allocation3 + $0x50] sm:$0xff] }
 0x220   : > { %v1715_v25 = vadd.f32 %v6867_v6, %v1695_v21  ;;  %1057 = vst.msk [vmem:[#allocation3 + $0x58] sm:$0xff] %vm1045_vm5, %v1020_v18  ;;  %5182 = vmatmul.msk.f32.gmra.mxu0 %vm1569_vm11, %v1558_v23  ;;  %v2442_v18 = vld [vmem:[#allocation16 + $0x70] sm:$0xff] }
 0x221   : > { %2334 = vst.msk [vmem:[#allocation5 + $0x70] sm:$0xff] %vm1743_vm12, %v7048_v22  ;;  %2549 = vmatpush.msra.mxu1 %v2442_v18  ;;  %5437 = vmatpush.msra.mxu3 %v2442_v18 }
 0x222   : > { %v1731_v26 = vmax.f32 %v1715_v25, 0.0 }
 0x223   : > { %2550 = vmatpush.msra.mxu1 %v2441_v19  ;;  %5438 = vmatpush.msra.mxu3 %v2441_v19 }
 0x224   : > { %1790 = vst.msk [vmem:[#allocation4 + $0x51] sm:$0xff] %vm1743_vm12, %v1731_v26 }
 0x225   : > { %v1117_v28 = vpop.permute.xlu1 %1116  ;;  %2551 = vmatpush.msra.mxu1 %v2440_v20  ;;  %5439 = vmatpush.msra.mxu3 %v2440_v20 }
 0x226   : > { %1154 = vst.msk [vmem:[#allocation3 + $0x58] sm:$0xff] %vm1142_vm6, %v1117_v28  ;;  %v828_v33 = vpop.permute.xlu0 %827  ;;  %v1314_v55 = vpop.permute.xlu2 %1313 }
 0x227   : > { %1251 = vst.msk [vmem:[#allocation3 + $0x58] sm:$0xff] %vm1239_vm7, %v1214_v0 }
 0x228   : > { %1349 = vst.msk [vmem:[#allocation3 + $0x58] sm:$0xff] %vm1337_vm8, %v1312_v27  ;;  %v2439_v27 = vld [vmem:[#allocation16 + $0x58] sm:$0xff] }
 0x229   : > { %864 = vst.msk [vmem:[#allocation3 + $0x60] sm:$0xff] %vm851_vm2, %v828_v33  ;;  %2552 = vmatpush.msra.mxu1 %v2439_v27  ;;  %5440 = vmatpush.msra.mxu3 %v2439_v27 }
 0x22b   : > { %v7075_v36 = vld [vmem:[#allocation4 + $0x50] sm:$0xff]  ;;  %2553 = vmatpush.msra.mxu1 %v2438_v29  ;;  %5441 = vmatpush.msra.mxu3 %v2438_v29 }
 0x22c   : > { %v7077_v37 = vld [vmem:[#allocation4 + $0x52] sm:$0xff]  ;;  %1823 = vst.msk [vmem:[#allocation5 + $0xc8] sm:$0xff] %vm1743_vm12, %v7075_v36 }
 0x22d   : > { %v1409_v34 = vpop.permute.xlu1 %1408  ;;  %2207 = vst.msk [vmem:[#allocation5 + $0x90] sm:$0xff] %vm1743_vm12, %v7075_v36  ;;  %v7093_v47 = vld [vmem:[#allocation4 + $0x51] sm:$0xff]  ;;  %2554 = vmatpush.msra.mxu1 %v2437_v30  ;;  %5442 = vmatpush.msra.mxu3 %v2437_v30 }
 0x22e   : > { %1446 = vst.msk [vmem:[#allocation3 + $0x58] sm:$0xff] %vm1434_vm9, %v1409_v34  ;;  %v1119_v43 = vpop.permute.xlu0 %1118  ;;  %v830_v1 = vpop.permute.xlu2 %829 }
 0x22f   : > { %1543 = vst.msk [vmem:[#allocation3 + $0x58] sm:$0xff] %vm1531_vm10, %v1506_v32  ;;  %v2436_v32 = vld [vmem:[#allocation16 + $0x40] sm:$0xff] }
 0x230   : > { %1952 = vst.msk [vmem:[#allocation5 + $0xd0] sm:$0xff] %vm1743_vm12, %v7077_v37  ;;  %2555 = vmatpush.msra.mxu1 %v2436_v32  ;;  %5443 = vmatpush.msra.mxu3 %v2436_v32 }
 0x231   : > { %2079 = vst.msk [vmem:[#allocation5 + $0xb0] sm:$0xff] %vm1743_vm12, %v7093_v47 }
 0x232   : > { %2335 = vst.msk [vmem:[#allocation5 + $0x98] sm:$0xff] %vm1743_vm12, %v7077_v37  ;;  %2556 = vmatpush.msra.mxu1 %v2435_v38  ;;  %5444 = vmatpush.msra.mxu3 %v2435_v38 }
 0x233   : > { %865 = vst.msk [vmem:[#allocation3 + $0x68] sm:$0xff] %vm851_vm2, %v830_v1 }
 0x234   : > { %v1654_v40 = vpop.f32.mrf.mxu0 }
 0x235   : > { %v925_v41 = vpop.permute.xlu1 %924  ;;  %v1696_v42 = vmul.f32 %v6861_v5, %v1654_v40 }
 0x236   : > { %961 = vst.msk [vmem:[#allocation3 + $0x60] sm:$0xff] %vm948_vm3, %v925_v41  ;;  %v1559_v45 = vld [vmem:[#allocation3 + $0x58] sm:$0xff]  ;;  %v1121_v3 = vpop.permute.xlu2 %1120  ;;  %v1411_v8 = vpop.permute.xlu0 %1410 }
 0x237   : > { %1058 = vst.msk [vmem:[#allocation3 + $0x60] sm:$0xff] %vm1045_vm5, %v1022_v44  ;;  %5183 = vmatmul.msk.f32.gmra.mxu0 %vm1569_vm11, %v1559_v45  ;;  %v1716_v49 = vadd.f32 %v6867_v6, %v1696_v42  ;;  %v2434_v42 = vld [vmem:[#allocation16 + $0x30] sm:$0xff]  ;;  %v2432_v45 = vld [vmem:[#allocation16 + $0x20] sm:$0xff] }
 0x238   : > { %1155 = vst.msk [vmem:[#allocation3 + $0x60] sm:$0xff] %vm1142_vm6, %v1119_v43  ;;  %v2433_v43 = vld [vmem:[#allocation16 + $0x28] sm:$0xff]  ;;  %2557 = vmatpush.msra.mxu1 %v2434_v42  ;;  %5445 = vmatpush.msra.mxu3 %v2434_v42 }
 0x239   : > { %v1732_v50 = vmax.f32 %v1716_v49, 0.0 }
 0x23a   : > { %2558 = vmatpush.msra.mxu1 %v2433_v43  ;;  %5446 = vmatpush.msra.mxu3 %v2433_v43 }
 0x23b   : > { %1791 = vst.msk [vmem:[#allocation4 + $0x61] sm:$0xff] %vm1743_vm12, %v1732_v50 }
 0x23c   : > { %2559 = vmatpush.msra.mxu1 %v2432_v45  ;;  %5447 = vmatpush.msra.mxu3 %v2432_v45 }
 0x23d   : > { %v1216_v53 = vpop.permute.xlu1 %1215 }
 0x23e   : > { %1252 = vst.msk [vmem:[#allocation3 + $0x60] sm:$0xff] %vm1239_vm7, %v1216_v53  ;;  %v1413_v11 = vpop.permute.xlu2 %1412  ;;  %v927_v12 = vpop.permute.xlu0 %926  ;;  %v1802_v53 = vld [vmem:[#allocation4] sm:$0xff] }
 0x23f   : > { %1350 = vst.msk [vmem:[#allocation3 + $0x60] sm:$0xff] %vm1337_vm8, %v1314_v55 }
 0x240   : > { %1447 = vst.msk [vmem:[#allocation3 + $0x60] sm:$0xff] %vm1434_vm9, %v1411_v8 }
 0x241   : > { %962 = vst.msk [vmem:[#allocation3 + $0x68] sm:$0xff] %vm948_vm3, %v927_v12 }
 0x242   : > { %v7110_v56 = vld [vmem:[#allocation4 + $0x60] sm:$0xff]  ;;  %1818 = vst.msk [vmem:[#allocation5] sm:$0xff] %vm1743_vm12, %v1802_v53 }
 0x243   : > { %v7112_v57 = vld [vmem:[#allocation4 + $0x62] sm:$0xff]  ;;  %1824 = vst.msk [vmem:[#allocation5 + $0xf0] sm:$0xff] %vm1743_vm12, %v7110_v56 }
 0x244   : > { %v7114_v58 = vld [vmem:[#allocation4 + $0x61] sm:$0xff]  ;;  %2208 = vst.msk [vmem:[#allocation5 + $0xb8] sm:$0xff] %vm1743_vm12, %v7110_v56 }
 0x245   : > { %1953 = vst.msk [vmem:[#allocation5 + $0xf8] sm:$0xff] %vm1743_vm12, %v7112_v57  ;;  %v1508_v9 = vpop.permute.xlu1 %1507 }
 0x246   : > { %2080 = vst.msk [vmem:[#allocation5 + $0xd8] sm:$0xff] %vm1743_vm12, %v7114_v58  ;;  %v929_v15 = vpop.permute.xlu2 %928  ;;  %v1218_v23 = vpop.permute.xlu0 %1217 }
 0x247   : > { %2336 = vst.msk [vmem:[#allocation5 + $0xc0] sm:$0xff] %vm1743_vm12, %v7112_v57 }
 0x248   : > { %1544 = vst.msk [vmem:[#allocation3 + $0x60] sm:$0xff] %vm1531_vm10, %v1508_v9  ;;  %v2429_v9 = vld [vmem:[#allocation16 + $0x8] sm:$0xff] }
 0x24b   : > { %v1657_v59 = vpop.f32.mrf.mxu0 }
 0x24c   : > { %v1697_v60 = vmul.f32 %v6861_v5, %v1657_v59 }
 0x24d   : > { %v1024_v13 = vpop.permute.xlu1 %1023 }
 0x24e   : > { %v1717_v63 = vadd.f32 %v6867_v6, %v1697_v60  ;;  %1059 = vst.msk [vmem:[#allocation3 + $0x68] sm:$0xff] %vm1045_vm5, %v1024_v13  ;;  %v1220_v0 = vpop.permute.xlu2 %1219  ;;  %v1510_v33 = vpop.permute.xlu0 %1509 }
 0x24f   : > { %v1560_v14 = vld [vmem:[#allocation3 + $0x60] sm:$0xff]  ;;  %1156 = vst.msk [vmem:[#allocation3 + $0x68] sm:$0xff] %vm1142_vm6, %v1121_v3 }
 0x250   : > { %v1733_v2 = vmax.f32 %v1717_v63, 0.0  ;;  %5184 = vmatmul.msk.f32.gmra.mxu0 %vm1569_vm11, %v1560_v14  ;;  %1253 = vst.msk [vmem:[#allocation3 + $0x68] sm:$0xff] %vm1239_vm7, %v1218_v23  ;;  %v2430_v3 = vld [vmem:[#allocation16 + $0x10] sm:$0xff] }
 0x252   : > { %1792 = vst.msk [vmem:[#allocation4 + $0x71] sm:$0xff] %vm1743_vm12, %v1733_v2  ;;  %v2431_v2 = vld [vmem:[#allocation16 + $0x18] sm:$0xff] }
 0x253   : > { %2560 = vmatpush.msra.mxu1 %v2431_v2  ;;  %5448 = vmatpush.msra.mxu3 %v2431_v2 }
 0x255   : > { %v1316_v25 = vpop.permute.xlu1 %1315  ;;  %2561 = vmatpush.msra.mxu1 %v2430_v3  ;;  %5449 = vmatpush.msra.mxu3 %v2430_v3 }
 0x256   : > { %1351 = vst.msk [vmem:[#allocation3 + $0x68] sm:$0xff] %vm1337_vm8, %v1316_v25  ;;  %v1512_v35 = vpop.permute.xlu2 %1511  ;;  %v1026_v55 = vpop.permute.xlu0 %1025 }
 0x257   : > { %1448 = vst.msk [vmem:[#allocation3 + $0x68] sm:$0xff] %vm1434_vm9, %v1413_v11  ;;  %v2428_v11 = vld [vmem:[#allocation16] sm:$0xff]  ;;  %2562 = vmatpush.msra.mxu1 %v2429_v9  ;;  %5450 = vmatpush.msra.mxu3 %v2429_v9 }
 0x258   : > { %1545 = vst.msk [vmem:[#allocation3 + $0x68] sm:$0xff] %vm1531_vm10, %v1510_v33 }
 0x259   : > { %v7130_v4 = vld [vmem:[#allocation4 + $0x70] sm:$0xff]  ;;  %2563 = vmatpush.msra.mxu1 %v2428_v11  ;;  %5451 = vmatpush.msra.mxu3 %v2428_v11 }
 0x25a   : > { %v7132_v7 = vld [vmem:[#allocation4 + $0x72] sm:$0xff]  ;;  %1825 = vst.msk [vmem:[#allocation5 + $0x118] sm:$0xff] %vm1743_vm12, %v7130_v4 }
 0x25b   : > { %2209 = vst.msk [vmem:[#allocation5 + $0xe0] sm:$0xff] %vm1743_vm12, %v7130_v4  ;;  %v7138_v10 = vld [vmem:[#allocation4 + $0x71] sm:$0xff] }
 0x25c   : > { %1954 = vst.msk [vmem:[#allocation5 + $0x120] sm:$0xff] %vm1743_vm12, %v7132_v7 }
 0x25d   : > { %2081 = vst.msk [vmem:[#allocation5 + $0x100] sm:$0xff] %vm1743_vm12, %v7138_v10  ;;  %v1660_v21 = vpop.f32.mrf.mxu0  ;;  %v832_v34 = vpop.permute.xlu1 %831 }
 0x25e   : > { %2337 = vst.msk [vmem:[#allocation5 + $0xe8] sm:$0xff] %vm1743_vm12, %v7132_v7  ;;  %v1698_v26 = vmul.f32 %v6861_v5, %v1660_v21  ;;  %v1028_v1 = vpop.permute.xlu2 %1027  ;;  %v1318_v12 = vpop.permute.xlu0 %1317 }
 0x25f   : > { %866 = vst.msk [vmem:[#allocation3 + $0x70] sm:$0xff] %vm851_vm2, %v832_v34  ;;  %v1561_v60 = vld [vmem:[#allocation3 + $0x68] sm:$0xff] }
 0x260   : > { %v1718_v28 = vadd.f32 %v6867_v6, %v1698_v26  ;;  %963 = vst.msk [vmem:[#allocation3 + $0x70] sm:$0xff] %vm948_vm3, %v929_v15  ;;  %5185 = vmatmul.msk.f32.gmra.mxu0 %vm1569_vm11, %v1561_v60 }
 0x261   : > { %1060 = vst.msk [vmem:[#allocation3 + $0x70] sm:$0xff] %vm1045_vm5, %v1026_v55 }
 0x262   : > { %v1734_v31 = vmax.f32 %v1718_v28, 0.0 }
 0x264   : > { %1793 = vst.msk [vmem:[#allocation4 + $0x81] sm:$0xff] %vm1743_vm12, %v1734_v31 }
 0x265   : > { %v1123_v59 = vpop.permute.xlu1 %1122 }
 0x266   : > { %1157 = vst.msk [vmem:[#allocation3 + $0x70] sm:$0xff] %vm1142_vm6, %v1123_v59  ;;  %v1320_v14 = vpop.permute.xlu2 %1319  ;;  %v834_v20 = vpop.permute.xlu0 %833 }
 0x267   : > { %1254 = vst.msk [vmem:[#allocation3 + $0x70] sm:$0xff] %vm1239_vm7, %v1220_v0 }
 0x268   : > { %1352 = vst.msk [vmem:[#allocation3 + $0x70] sm:$0xff] %vm1337_vm8, %v1318_v12 }
 0x269   : > { %867 = vst.msk [vmem:[#allocation3 + $0x78] sm:$0xff] %vm851_vm2, %v834_v20 }
 0x26b   : > { %v7163_v49 = vld [vmem:[#allocation4 + $0x80] sm:$0xff] }
 0x26c   : > { %v7165_v50 = vld [vmem:[#allocation4 + $0x81] sm:$0xff]  ;;  %2210 = vst.msk [vmem:[#allocation5 + $0x108] sm:$0xff] %vm1743_vm12, %v7163_v49 }
 0x26d   : > { %2082 = vst.msk [vmem:[#allocation5 + $0x128] sm:$0xff] %vm1743_vm12, %v7165_v50  ;;  %v7175_v8 = vld [vmem:[#allocation4 + $0x82] sm:$0xff]  ;;  %v1415_v13 = vpop.permute.xlu1 %1414 }
 0x26e   : > { %2338 = vst.msk [vmem:[#allocation5 + $0x110] sm:$0xff] %vm1743_vm12, %v7175_v8  ;;  %v1867_v25 = vpop.permute.xlu2 %1866  ;;  %v1125_v28 = vpop.permute.xlu0 %1124 }
 0x26f   : > { %1449 = vst.msk [vmem:[#allocation3 + $0x70] sm:$0xff] %vm1434_vm9, %v1415_v13 }
 0x270   : > { %1546 = vst.msk [vmem:[#allocation3 + $0x70] sm:$0xff] %vm1531_vm10, %v1512_v35 }
 0x271   : > { %1915 = vst.msk [vmem:[#allocation5] sm:$0xff] %vm1914_vm14, %v1867_v25 }
 0x274   : > { %v1663_v40 = vpop.f32.mrf.mxu0 }
 0x275   : > { %v1699_v41 = vmul.f32 %v6861_v5, %v1663_v40  ;;  %v931_v21 = vpop.permute.xlu1 %930 }
 0x276   : > { %964 = vst.msk [vmem:[#allocation3 + $0x78] sm:$0xff] %vm948_vm3, %v931_v21  ;;  %v1417_v34 = vpop.permute.xlu0 %1416 }
 0x277   : > { %v1719_v44 = vadd.f32 %v6867_v6, %v1699_v41  ;;  %v1562_v26 = vld [vmem:[#allocation3 + $0x70] sm:$0xff]  ;;  %1061 = vst.msk [vmem:[#allocation3 + $0x78] sm:$0xff] %vm1045_vm5, %v1028_v1 }
 0x278   : > { %5186 = vmatmul.msk.f32.gmra.mxu0 %vm1569_vm11, %v1562_v26  ;;  %1158 = vst.msk [vmem:[#allocation3 + $0x78] sm:$0xff] %vm1142_vm6, %v1125_v28  ;;  %v2348_v30 = vld [vmem:[#allocation5] sm:$0xff] }
 0x279   : > { %v1735_v63 = vmax.f32 %v1719_v44, 0.0  ;;  %2564 = vmatmul.f32.vlgmr.msra.gmra.mxu1 %v2348_v30 }
 0x27b   : > { %1794 = vst.msk [vmem:[#allocation4 + $0xb1] sm:$0xff] %vm1743_vm12, %v1735_v63 }
 0x27d   : > { %v1222_v29 = vpop.permute.xlu1 %1221 }
 0x27e   : > { %1255 = vst.msk [vmem:[#allocation3 + $0x78] sm:$0xff] %vm1239_vm7, %v1222_v29  ;;  %v1869_v42 = vpop.permute.xlu0 %1868 }
 0x27f   : > { %1353 = vst.msk [vmem:[#allocation3 + $0x78] sm:$0xff] %vm1337_vm8, %v1320_v14 }
 0x280   : > { %1450 = vst.msk [vmem:[#allocation3 + $0x78] sm:$0xff] %vm1434_vm9, %v1417_v34 }
 0x281   : > { %1916 = vst.msk [vmem:[#allocation5 + $0x28] sm:$0xff] %vm1914_vm14, %v1869_v42 }
 0x282   : > { %v7184_v15 = vld [vmem:[#allocation4 + $0xb0] sm:$0xff] }
 0x283   : > { %v7186_v17 = vld [vmem:[#allocation4 + $0xb2] sm:$0xff]  ;;  %1827 = vst.msk [vmem:[#allocation5 + $0x168] sm:$0xff] %vm1743_vm12, %v7184_v15 }
 0x284   : > { %1956 = vst.msk [vmem:[#allocation5 + $0x170] sm:$0xff] %vm1743_vm12, %v7186_v17  ;;  %v2067_v27 = vld [vmem:[#allocation4 + $0xb1] sm:$0xff] }
 0x285   : > { %2083 = vst.msk [vmem:[#allocation5 + $0x150] sm:$0xff] %vm1743_vm12, %v2067_v27  ;;  %v1514_v35 = vpop.permute.xlu1 %1513 }
 0x286   : > { %1547 = vst.msk [vmem:[#allocation3 + $0x78] sm:$0xff] %vm1531_vm10, %v1514_v35  ;;  %v1873_v53 = vpop.permute.xlu0 %1872 }
 0x287   : > { %1918 = vst.msk [vmem:[#allocation5 + $0x78] sm:$0xff] %vm1914_vm14, %v1873_v53 }
 0x288   : > { %v2353_v55 = vld [vmem:[#allocation5 + $0x28] sm:$0xff] }
 0x289   : > { %2567 = vmatmul.f32.gmra.mxu1 %v2353_v55 }
 0x28b   : > { %v1666_v18 = vpop.f32.mrf.mxu0 }
 0x28c   : > { %v1700_v19 = vmul.f32 %v6861_v5, %v1666_v18 }
 0x28d   : > { %v1871_v43 = vpop.permute.xlu1 %1870  ;;  %v1563_v45 = vld [vmem:[#allocation3 + $0x78] sm:$0xff] }
 0x28e   : > { %v1720_v23 = vadd.f32 %v6867_v6, %v1700_v19  ;;  %1917 = vst.msk [vmem:[#allocation5 + $0x50] sm:$0xff] %vm1914_vm14, %v1871_v43  ;;  %5187 = vmatmul.msk.f32.gmra.mxu0 %vm1569_vm11, %v1563_v45  ;;  %v2363_v12 = vld [vmem:[#allocation5 + $0x78] sm:$0xff] }
 0x290   : > { %v1736_v0 = vmax.f32 %v1720_v23, 0.0 }
 0x292   : > { %1795 = vst.msk [vmem:[#allocation4 + $0xc1] sm:$0xff] %vm1743_vm12, %v1736_v0 }
 0x295   : > { %v2358_v2 = vld [vmem:[#allocation5 + $0x50] sm:$0xff] }
 0x296   : > { %2570 = vmatmul.f32.gmra.mxu1 %v2358_v2 }
 0x299   : > { %v7204_v31 = vld [vmem:[#allocation4 + $0xc0] sm:$0xff] }
 0x29a   : > { %v7206_v32 = vld [vmem:[#allocation4 + $0xc2] sm:$0xff]  ;;  %1828 = vst.msk [vmem:[#allocation5 + $0x190] sm:$0xff] %vm1743_vm12, %v7204_v31 }
 0x29b   : > { %2212 = vst.msk [vmem:[#allocation5 + $0x158] sm:$0xff] %vm1743_vm12, %v7204_v31  ;;  %v2068_v44 = vld [vmem:[#allocation4 + $0xc1] sm:$0xff] }
 0x29c   : > { %1957 = vst.msk [vmem:[#allocation5 + $0x198] sm:$0xff] %vm1743_vm12, %v7206_v32 }
 0x29d   : > { %v1669_v33 = vpop.f32.mrf.mxu0  ;;  %2340 = vst.msk [vmem:[#allocation5 + $0x160] sm:$0xff] %vm1743_vm12, %v7206_v32 }
 0x29e   : > { %v1701_v38 = vmul.f32 %v6861_v5, %v1669_v33  ;;  %2084 = vst.msk [vmem:[#allocation5 + $0x178] sm:$0xff] %vm1743_vm12, %v2068_v44  ;;  %2573 = vmatmul.f32.gmra.mxu1 %v2363_v12 }
 0x2a0   : > { %v1721_v40 = vadd.f32 %v6867_v6, %v1701_v38 }
 0x2a2   : > { %v1737_v41 = vmax.f32 %v1721_v40, 0.0  ;;  %v1842_v40 = vld [vmem:[#allocation4 + $0xa1] sm:$0xff] }
 0x2a4   : > { %1796 = vst.msk [vmem:[#allocation4 + $0xd1] sm:$0xff] %vm1743_vm12, %v1737_v41 }
 0x2ab   : > { %v7226_v59 = vld [vmem:[#allocation4 + $0xd0] sm:$0xff] }
 0x2ac   : > { %v7228_v60 = vld [vmem:[#allocation4 + $0xd2] sm:$0xff]  ;;  %1829 = vst.msk [vmem:[#allocation5 + $0x1b8] sm:$0xff] %vm1743_vm12, %v7226_v59 }
 0x2ad   : > { %2213 = vst.msk [vmem:[#allocation5 + $0x180] sm:$0xff] %vm1743_vm12, %v7226_v59  ;;  %v2069_v11 = vld [vmem:[#allocation4 + $0xd1] sm:$0xff] }
 0x2ae   : > { %1958 = vst.msk [vmem:[#allocation5 + $0x1c0] sm:$0xff] %vm1743_vm12, %v7228_v60 }
 0x2af   : > { %2341 = vst.msk [vmem:[#allocation5 + $0x188] sm:$0xff] %vm1743_vm12, %v7228_v60 }
 0x2b0   : > { %2085 = vst.msk [vmem:[#allocation5 + $0x1a0] sm:$0xff] %vm1743_vm12, %v2069_v11  ;;  %v2491_v11 = vld [vmem:[#allocation16 + $0x1f8] sm:$0xff] }
 0x2b1   : > { %2743 = vmatpush.msrb.mxu0 %v2491_v11  ;;  %v2449_v11 = vld [vmem:[#allocation16 + $0xa8] sm:$0xff] }
 0x2b4   : > { %v1672_v63 = vpop.f32.mrf.mxu0 }
 0x2b5   : > { %v1702_v1 = vmul.f32 %v6861_v5, %v1672_v63 }
 0x2b7   : > { %v1722_v3 = vadd.f32 %v6867_v6, %v1702_v1 }
 0x2b9   : > { %v1738_v9 = vmax.f32 %v1722_v3, 0.0 }
 0x2bb   : > { %1797 = vst.msk [vmem:[#allocation4 + $0xe1] sm:$0xff] %vm1743_vm12, %v1738_v9 }
 0x2c2   : > { %v7242_v13 = vld [vmem:[#allocation4 + $0xe1] sm:$0xff] }
 0x2c3   : > { %1890 = vrot.lane.b32.xlu2 %v7242_v13, %s6187_s21  ;;  %v7246_v14 = vld [vmem:[#allocation4 + $0xe0] sm:$0xff] }
 0x2c4   : > { %v7248_v18 = vld [vmem:[#allocation4 + $0xe2] sm:$0xff]  ;;  %1830 = vst.msk [vmem:[#allocation5 + $0x1e0] sm:$0xff] %vm1743_vm12, %v7246_v14 }
 0x2c5   : > { %1959 = vst.msk [vmem:[#allocation5 + $0x1e8] sm:$0xff] %vm1743_vm12, %v7248_v18  ;;  %v2198_v19 = vld [vmem:[#allocation4 + $0xe0] sm:$0xff] }
 0x2c6   : > { %2342 = vst.msk [vmem:[#allocation5 + $0x1b0] sm:$0xff] %vm1743_vm12, %v7248_v18  ;;  %v2070_v20 = vld [vmem:[#allocation4 + $0xe1] sm:$0xff] }
 0x2c7   : > { %2214 = vst.msk [vmem:[#allocation5 + $0x1a8] sm:$0xff] %vm1743_vm12, %v2198_v19  ;;  %v1843_v19 = vld [vmem:[#allocation4 + $0xb1] sm:$0xff] }
 0x2c8   : > { %2086 = vst.msk [vmem:[#allocation5 + $0x1c8] sm:$0xff] %vm1743_vm12, %v2070_v20 }
 0x2cb   : > { %1874 = vrot.lane.b32.xlu2 %v7051_v24, %s6187_s21 }
 0x2cd   : > { %v1675_v21 = vpop.f32.mrf.mxu0 }
 0x2ce   : > { %v1703_v23 = vmul.f32 %v6861_v5, %v1675_v21 }
 0x2d0   : > { %v1723_v25 = vadd.f32 %v6867_v6, %v1703_v23 }
 0x2d2   : > { %v1739_v26 = vmax.f32 %v1723_v25, 0.0  ;;  %v2490_v25 = vld [vmem:[#allocation16 + $0x1f0] sm:$0xff] }
 0x2d3   : > { %2744 = vmatpush.msrb.mxu0 %v2490_v25 }
 0x2d4   : > { %1798 = vst.msk [vmem:[#allocation4 + $0xf1] sm:$0xff] %vm1743_vm12, %v1739_v26  ;;  %v5671_v26 = vld [vmem:[#allocation13] ss:$0 sm:$0xff] }
 0x2db   : > { %v7263_v0 = vld [vmem:[#allocation4 + $0xf1] sm:$0xff] }
 0x2dc   : > { %v1975_v27 = vld [vmem:[#allocation4 + $0xf0] sm:$0xff]  ;;  %1892 = vrot.lane.b32.xlu1 %v7263_v0, %s6187_s21 }
 0x2dd   : > { %v7265_v28 = vld [vmem:[#allocation4 + $0xf2] sm:$0xff]  ;;  %1831 = vst.msk [vmem:[#allocation5 + $0x208] sm:$0xff] %vm1743_vm12, %v1975_v27  ;;  %v1678_v33 = vpop.f32.mrf.mxu0 }
 0x2de   : > { %v2071_v29 = vld [vmem:[#allocation4 + $0xf1] sm:$0xff]  ;;  %1960 = vst.msk [vmem:[#allocation5 + $0x210] sm:$0xff] %vm1743_vm12, %v7265_v28  ;;  %v1704_v34 = vmul.f32 %v6861_v5, %v1678_v33 }
 0x2df   : > { %v2199_v30 = vld [vmem:[#allocation4 + $0xf0] sm:$0xff]  ;;  %2087 = vst.msk [vmem:[#allocation5 + $0x1f0] sm:$0xff] %vm1743_vm12, %v2071_v29  ;;  %v5672_v29 = vld [vmem:[#allocation15] ss:$0 sm:$0xff] }
 0x2e0   : > { %2215 = vst.msk [vmem:[#allocation5 + $0x1d0] sm:$0xff] %vm1743_vm12, %v2199_v30  ;;  %v1724_v35 = vadd.f32 %v6867_v6, %v1704_v34 }
 0x2e1   : > { %2343 = vst.msk [vmem:[#allocation5 + $0x1d8] sm:$0xff] %vm1743_vm12, %v7265_v28 }
 0x2e2   : > { %v1740_v38 = vmax.f32 %v1724_v35, 0.0  ;;  %v2489_v35 = vld [vmem:[#allocation16 + $0x1e8] sm:$0xff] }
 0x2e3   : > { %2745 = vmatpush.msrb.mxu0 %v2489_v35 }
 0x2e4   : > { %1876 = vrot.lane.b32.xlu1 %v7093_v47, %s6187_s21  ;;  %1799 = vst.msk [vmem:[#allocation4 + $0x101] sm:$0xff] %vm1743_vm12, %v1740_v38 }
 0x2eb   : > { %v7282_v41 = vld [vmem:[#allocation4 + $0x101] sm:$0xff] }
 0x2ec   : > { %2019 = vrot.lane.b32.xlu1 %v1975_v27, %s6187_s21  ;;  %v1976_v42 = vld [vmem:[#allocation4 + $0x100] sm:$0xff]  ;;  %1894 = vrot.lane.b32.xlu0 %v7282_v41, %s6187_s21 }
 0x2ed   : > { %v7284_v43 = vld [vmem:[#allocation4 + $0x102] sm:$0xff]  ;;  %1832 = vst.msk [vmem:[#allocation5 + $0x230] sm:$0xff] %vm1743_vm12, %v1976_v42 }
 0x2ee   : > { %v2072_v44 = vld [vmem:[#allocation4 + $0x101] sm:$0xff]  ;;  %1961 = vst.msk [vmem:[#allocation5 + $0x238] sm:$0xff] %vm1743_vm12, %v7284_v43 }
 0x2ef   : > { %v2200_v45 = vld [vmem:[#allocation4 + $0x100] sm:$0xff]  ;;  %2088 = vst.msk [vmem:[#allocation5 + $0x218] sm:$0xff] %vm1743_vm12, %v2072_v44 }
 0x2f0   : > { %2216 = vst.msk [vmem:[#allocation5 + $0x1f8] sm:$0xff] %vm1743_vm12, %v2200_v45  ;;  %v7331_v44 = vld [vmem:[#allocation4 + $0xc1] sm:$0xff]  ;;  %v2488_v45 = vld [vmem:[#allocation16 + $0x1e0] sm:$0xff] }
 0x2f1   : > { %2344 = vst.msk [vmem:[#allocation5 + $0x200] sm:$0xff] %vm1743_vm12, %v7284_v43  ;;  %2746 = vmatpush.msrb.mxu0 %v2488_v45 }
 0x2f4   : > { %1882 = vrot.lane.b32.xlu1 %v1842_v40, %s6187_s21  ;;  %1878 = vrot.lane.b32.xlu0 %v7114_v58, %s6187_s21 }
 0x2f5   : > { %v1681_v53 = vpop.f32.mrf.mxu0 }
 0x2f6   : > { %v1705_v55 = vmul.f32 %v6861_v5, %v1681_v53  ;;  %v2487_v53 = vld [vmem:[#allocation16 + $0x1d8] sm:$0xff] }
 0x2f7   : > { %2747 = vmatpush.msrb.mxu0 %v2487_v53  ;;  %v2469_v53 = vld [vmem:[#allocation16 + $0x148] sm:$0xff] }
 0x2f8   : > { %v1725_v63 = vadd.f32 %v6867_v6, %v1705_v55  ;;  %v2499_v55 = vld [vmem:[#allocation16 + $0x238] sm:$0xff] }
 0x2f9   : > { %2816 = vmatpush.msrb.mxu1 %v2499_v55  ;;  %v2478_v55 = vld [vmem:[#allocation16 + $0x190] sm:$0xff] }
 0x2fa   : > { %v1741_v1 = vmax.f32 %v1725_v63, 0.0  ;;  %v2454_v63 = vld [vmem:[#allocation16 + $0xd0] sm:$0xff] }
 0x2fc   : > { %1800 = vst.msk [vmem:[#allocation4 + $0x111] sm:$0xff] %vm1743_vm12, %v1741_v1  ;;  %2021 = vrot.lane.b32.xlu0 %v1976_v42, %s6187_s21  ;;  %v2453_v1 = vld [vmem:[#allocation16 + $0xc8] sm:$0xff] }
 0x303   : > { %v7302_v2 = vld [vmem:[#allocation4 + $0x111] sm:$0xff] }
 0x304   : > { %v1977_v3 = vld [vmem:[#allocation4 + $0x110] sm:$0xff]  ;;  %1896 = vrot.lane.b32.xlu2 %v7302_v2, %s6187_s21  ;;  %1884 = vrot.lane.b32.xlu0 %v1843_v19, %s6187_s21  ;;  %v2481_v19 = vld [vmem:[#allocation16 + $0x1a8] sm:$0xff] }
 0x305   : > { %v7304_v9 = vld [vmem:[#allocation4 + $0x112] sm:$0xff]  ;;  %1833 = vst.msk [vmem:[#allocation5 + $0x258] sm:$0xff] %vm1743_vm12, %v1977_v3 }
 0x306   : > { %v2201_v6 = vld [vmem:[#allocation4 + $0x110] sm:$0xff]  ;;  %1962 = vst.msk [vmem:[#allocation5 + $0x260] sm:$0xff] %vm1743_vm12, %v7304_v9 }
 0x307   : > { %v2073_v12 = vld [vmem:[#allocation4 + $0x111] sm:$0xff]  ;;  %2217 = vst.msk [vmem:[#allocation5 + $0x220] sm:$0xff] %vm1743_vm12, %v2201_v6 }
 0x308   : > { %2089 = vst.msk [vmem:[#allocation5 + $0x240] sm:$0xff] %vm1743_vm12, %v2073_v12  ;;  %v2447_v12 = vld [vmem:[#allocation16 + $0x98] sm:$0xff] }
 0x309   : > { %2345 = vst.msk [vmem:[#allocation5 + $0x228] sm:$0xff] %vm1743_vm12, %v7304_v9 }
 0x30b   : > { %v1684_v20 = vpop.f32.mrf.mxu0 }
 0x30c   : > { %1880 = vrot.lane.b32.xlu2 %v7138_v10, %s6187_s21  ;;  %v1706_v27 = vmul.f32 %v5671_v26, %v1684_v20  ;;  %1995 = vrot.lane.b32.xlu0 %v6969_v46, %s6187_s21  ;;  %v2495_v20 = vld [vmem:[#allocation16 + $0x218] sm:$0xff] }
 0x30d   : > { %v2475_v26 = vld [vmem:[#allocation16 + $0x178] sm:$0xff] }
 0x30e   : > { %v1726_v30 = vadd.f32 %v5672_v29, %v1706_v27  ;;  %v2480_v27 = vld [vmem:[#allocation16 + $0x1a0] sm:$0xff]  ;;  %v2473_v29 = vld [vmem:[#allocation16 + $0x168] sm:$0xff] }
 0x310   : > { %v1742_v33 = vmax.f32 %v1726_v30, 0.0  ;;  %v2472_v30 = vld [vmem:[#allocation16 + $0x160] sm:$0xff] }
 0x312   : > { %1801 = vst.msk [vmem:[#allocation4 + $0x121] sm:$0xff] %vm1743_vm12, %v1742_v33  ;;  %v2494_v33 = vld [vmem:[#allocation16 + $0x210] sm:$0xff] }
 0x314   : > { %2023 = vrot.lane.b32.xlu2 %v1977_v3, %s6187_s21  ;;  %1997 = vrot.lane.b32.xlu0 %v6972_v48, %s6187_s21  ;;  %v7344_v48 = vld [vmem:[#allocation4 + $0xd1] sm:$0xff]  ;;  %v2451_v3 = vld [vmem:[#allocation16 + $0xb8] sm:$0xff] }
 0x319   : > { %v1978_v38 = vld [vmem:[#allocation4 + $0x120] sm:$0xff] }
 0x31a   : > { %v7326_v40 = vld [vmem:[#allocation4 + $0x121] sm:$0xff]  ;;  %2025 = vrot.lane.b32.xlu1 %v1978_v38, %s6187_s21 }
 0x31b   : > { %v7328_v42 = vld [vmem:[#allocation4 + $0x122] sm:$0xff]  ;;  %2090 = vst.msk [vmem:[#allocation5 + $0x268] sm:$0xff] %vm1743_vm12, %v7326_v40 }
 0x31c   : > { %v2202_v46 = vld [vmem:[#allocation4 + $0x120] sm:$0xff]  ;;  %1886 = vrot.lane.b32.xlu2 %v7331_v44, %s6187_s21  ;;  %2346 = vst.msk [vmem:[#allocation5 + $0x250] sm:$0xff] %vm1743_vm12, %v7328_v42  ;;  %1999 = vrot.lane.b32.xlu0 %v7005_v61, %s6187_s21 }
 0x31d   : > { %v1891_v5 = vpop.permute.xlu2 %1890  ;;  %2218 = vst.msk [vmem:[#allocation5 + $0x248] sm:$0xff] %vm1743_vm12, %v2202_v46  ;;  %v2486_v61 = vld [vmem:[#allocation16 + $0x1d0] sm:$0xff]  ;;  %v2471_v46 = vld [vmem:[#allocation16 + $0x158] sm:$0xff] }
 0x31e   : > { %1927 = vst.msk [vmem:[#allocation5 + $0x1e0] sm:$0xff] %vm1914_vm14, %v1891_v5  ;;  %2748 = vmatpush.msrb.mxu0 %v2486_v61  ;;  %v2482_v5 = vld [vmem:[#allocation16 + $0x1b0] sm:$0xff]  ;;  %v2468_v61 = vld [vmem:[#allocation16 + $0x140] sm:$0xff] }
 0x322   : > { %2123 = vrot.lane.b32.xlu1 %v6987_v52, %s6187_s21  ;;  %v2498_v52 = vld [vmem:[#allocation16 + $0x230] sm:$0xff] }
 0x323   : > { %2817 = vmatpush.msrb.mxu1 %v2498_v52  ;;  %v2477_v52 = vld [vmem:[#allocation16 + $0x188] sm:$0xff] }
 0x324   : > { %1888 = vrot.lane.b32.xlu2 %v7344_v48, %s6187_s21  ;;  %2001 = vrot.lane.b32.xlu0 %v7037_v16, %s6187_s21  ;;  %v2485_v16 = vld [vmem:[#allocation16 + $0x1c8] sm:$0xff] }
 0x325   : > { %v1875_v21 = vpop.permute.xlu2 %1874  ;;  %v2408_v23 = vld [vmem:[#allocation5 + $0x1e0] sm:$0xff]  ;;  %2749 = vmatpush.msrb.mxu0 %v2485_v16 }
 0x326   : > { %1919 = vst.msk [vmem:[#allocation5 + $0xa0] sm:$0xff] %vm1914_vm14, %v1875_v21  ;;  %2600 = vmatmul.f32.vlgmr.msra.gmra.mxu3 %v2408_v23  ;;  %v1810_v21 = vld [vmem:[#allocation4 + $0xa0] sm:$0xff] }
 0x327   : > { %1826 = vst.msk [vmem:[#allocation5 + $0x140] sm:$0xff] %vm1743_vm12, %v1810_v21 }
 0x32a   : > { %2125 = vrot.lane.b32.xlu1 %v6990_v54, %s6187_s21  ;;  %v2459_v54 = vld [vmem:[#allocation16 + $0xf8] sm:$0xff] }
 0x32b   : > { %5452 = vmatpush.msrb.mxu3 %v2459_v54  ;;  %2613 = vmatpush.msra.mxu2 %v2459_v54 }
 0x32c   : > { %2252 = vrot.lane.b32.xlu2 %v7079_v39, %s6187_s21  ;;  %2003 = vrot.lane.b32.xlu0 %v7075_v36, %s6187_s21  ;;  %v2484_v36 = vld [vmem:[#allocation16 + $0x1c0] sm:$0xff]  ;;  %v2497_v39 = vld [vmem:[#allocation16 + $0x228] sm:$0xff] }
 0x32d   : > { %v2368_v34 = vld [vmem:[#allocation5 + $0xa0] sm:$0xff]  ;;  %2750 = vmatpush.msrb.mxu0 %v2484_v36  ;;  %2818 = vmatpush.msrb.mxu1 %v2497_v39  ;;  %v2476_v39 = vld [vmem:[#allocation16 + $0x180] sm:$0xff] }
 0x32e   : > { %2576 = vmatmul.f32.gmra.mxu1 %v2368_v34  ;;  %v1931_v34 = vld [vmem:[#allocation4 + $0x2] sm:$0xff] }
 0x32f   : > { %1947 = vst.msk [vmem:[#allocation5 + $0x8] sm:$0xff] %vm1743_vm12, %v1931_v34 }
 0x332   : > { %2127 = vrot.lane.b32.xlu1 %v7007_v62, %s6187_s21  ;;  %v2458_v62 = vld [vmem:[#allocation16 + $0xf0] sm:$0xff] }
 0x333   : > { %5453 = vmatpush.msrb.mxu3 %v2458_v62  ;;  %2614 = vmatpush.msra.mxu2 %v2458_v62  ;;  %v2467_v62 = vld [vmem:[#allocation16 + $0x138] sm:$0xff] }
 0x334   : > { %2254 = vrot.lane.b32.xlu2 %v7103_v51, %s6187_s21  ;;  %2005 = vrot.lane.b32.xlu0 %v7110_v56, %s6187_s21  ;;  %v2457_v51 = vld [vmem:[#allocation16 + $0xe8] sm:$0xff]  ;;  %v2483_v56 = vld [vmem:[#allocation16 + $0x1b8] sm:$0xff] }
 0x335   : > { %5454 = vmatpush.msrb.mxu3 %v2457_v51  ;;  %2615 = vmatpush.msra.mxu2 %v2457_v51  ;;  %v2465_v51 = vld [vmem:[#allocation16 + $0x128] sm:$0xff] }
 0x336   : > { %2751 = vmatpush.msrb.mxu0 %v2483_v56 }
 0x338   : > { %2752 = vmatpush.msrb.mxu0 %v2482_v5 }
 0x33a   : > { %2129 = vrot.lane.b32.xlu1 %v7048_v22, %s6187_s21  ;;  %v2456_v22 = vld [vmem:[#allocation16 + $0xe0] sm:$0xff]  ;;  %2753 = vmatpush.msrb.mxu0 %v2481_v19 }
 0x33b   : > { %5455 = vmatpush.msrb.mxu3 %v2456_v22  ;;  %2616 = vmatpush.msra.mxu2 %v2456_v22 }
 0x33c   : > { %2256 = vrot.lane.b32.xlu2 %v7051_v24, %s6187_s21  ;;  %2007 = vrot.lane.b32.xlu0 %v7130_v4, %s6187_s21  ;;  %v2455_v24 = vld [vmem:[#allocation16 + $0xd8] sm:$0xff] }
 0x33d   : > { %5456 = vmatpush.msrb.mxu3 %v2455_v24  ;;  %2617 = vmatpush.msra.mxu2 %v2455_v24 }
 0x33e   : > { %2754 = vmatpush.msrb.mxu0 %v2480_v27 }
 0x33f   : > { %5457 = vmatpush.msrb.mxu3 %v2454_v63  ;;  %2618 = vmatpush.msra.mxu2 %v2454_v63 }
 0x341   : > { %5458 = vmatpush.msrb.mxu3 %v2453_v1  ;;  %2619 = vmatpush.msra.mxu2 %v2453_v1  ;;  %v2463_v1 = vld [vmem:[#allocation16 + $0x118] sm:$0xff] }
 0x342   : > { %2131 = vrot.lane.b32.xlu1 %v7077_v37, %s6187_s21  ;;  %v2452_v37 = vld [vmem:[#allocation16 + $0xc0] sm:$0xff] }
 0x343   : > { %5459 = vmatpush.msrb.mxu3 %v2452_v37  ;;  %2620 = vmatpush.msra.mxu2 %v2452_v37  ;;  %v2461_v37 = vld [vmem:[#allocation16 + $0x108] sm:$0xff] }
 0x344   : > { %2258 = vrot.lane.b32.xlu2 %v7093_v47, %s6187_s21  ;;  %2009 = vrot.lane.b32.xlu0 %v7163_v49, %s6187_s21  ;;  %v2496_v47 = vld [vmem:[#allocation16 + $0x220] sm:$0xff]  ;;  %v2450_v49 = vld [vmem:[#allocation16 + $0xb0] sm:$0xff] }
 0x345   : > { %2819 = vmatpush.msrb.mxu1 %v2496_v47  ;;  %5460 = vmatpush.msrb.mxu3 %v2451_v3 }
 0x346   : > { %2621 = vmatpush.msra.mxu2 %v2451_v3 }
 0x347   : > { %5461 = vmatpush.msrb.mxu3 %v2450_v49  ;;  %2820 = vmatpush.msrb.mxu1 %v2495_v20 }
 0x348   : > { %2622 = vmatpush.msra.mxu2 %v2450_v49 }
 0x349   : > { %5462 = vmatpush.msrb.mxu3 %v2449_v11  ;;  %2821 = vmatpush.msrb.mxu1 %v2494_v33  ;;  %v2352_v33 = vld [vmem:[#allocation5 + $0x20] sm:$0xff] }
 0x34a   : > { %2133 = vrot.lane.b32.xlu1 %v7112_v57, %s6187_s21  ;;  %v2448_v57 = vld [vmem:[#allocation16 + $0xa0] sm:$0xff]  ;;  %2623 = vmatpush.msra.mxu2 %v2449_v11 }
 0x34b   : > { %5463 = vmatpush.msrb.mxu3 %v2448_v57 }
 0x34c   : > { %2260 = vrot.lane.b32.xlu2 %v7114_v58, %s6187_s21  ;;  %2011 = vrot.lane.b32.xlu0 %v7184_v15, %s6187_s21  ;;  %v2446_v15 = vld [vmem:[#allocation16 + $0x90] sm:$0xff] }
 0x34d   : > { %5464 = vmatpush.msrb.mxu3 %v2447_v12  ;;  %2624 = vmatpush.msra.mxu2 %v2448_v57 }
 0x34e   : > { %v1893_v4 = vpop.permute.xlu1 %1892 }
 0x34f   : > { %1928 = vst.msk [vmem:[#allocation5 + $0x208] sm:$0xff] %vm1914_vm14, %v1893_v4  ;;  %5465 = vmatpush.msrb.mxu3 %v2446_v15  ;;  %2625 = vmatpush.msra.mxu2 %v2447_v12 }
 0x351   : > { %2626 = vmatpush.msra.mxu2 %v2446_v15 }
 0x352   : > { %2135 = vrot.lane.b32.xlu1 %v7132_v7, %s6187_s21  ;;  %v2445_v7 = vld [vmem:[#allocation16 + $0x88] sm:$0xff] }
 0x353   : > { %5466 = vmatpush.msrb.mxu3 %v2445_v7  ;;  %2627 = vmatpush.msra.mxu2 %v2445_v7 }
 0x354   : > { %2262 = vrot.lane.b32.xlu2 %v7138_v10, %s6187_s21  ;;  %2013 = vrot.lane.b32.xlu0 %v7204_v31, %s6187_s21  ;;  %v2444_v10 = vld [vmem:[#allocation16 + $0x80] sm:$0xff] }
 0x355   : > { %5467 = vmatpush.msrb.mxu3 %v2444_v10  ;;  %2628 = vmatpush.msra.mxu2 %v2444_v10  ;;  %v2235_v10 = vld [vmem:[#allocation4 + $0x131] sm:$0xff] }
 0x356   : > { %v1877_v58 = vpop.permute.xlu1 %1876  ;;  %v2413_v6 = vld [vmem:[#allocation5 + $0x208] sm:$0xff] }
 0x357   : > { %1920 = vst.msk [vmem:[#allocation5 + $0xc8] sm:$0xff] %vm1914_vm14, %v1877_v58  ;;  %2603 = vmatmul.f32.gmra.mxu3 %v2413_v6 }
 0x358   : > { %2678 = vmatpush.msra.mxu3 %v2475_v26 }
 0x35a   : > { %2137 = vrot.lane.b32.xlu1 %v7175_v8, %s6187_s21  ;;  %v2474_v8 = vld [vmem:[#allocation16 + $0x170] sm:$0xff] }
 0x35b   : > { %2679 = vmatpush.msra.mxu3 %v2474_v8  ;;  %v2195_v8 = vld [vmem:[#allocation4 + $0x90] sm:$0xff] }
 0x35c   : > { %2264 = vrot.lane.b32.xlu2 %v7165_v50, %s6187_s21  ;;  %v2227_v50 = vld [vmem:[#allocation4 + $0x91] sm:$0xff]  ;;  %2015 = vrot.lane.b32.xlu0 %v7226_v59, %s6187_s21  ;;  %v2479_v59 = vld [vmem:[#allocation16 + $0x198] sm:$0xff]  ;;  %2211 = vst.msk [vmem:[#allocation5 + $0x130] sm:$0xff] %vm1743_vm12, %v2195_v8 }
 0x35d   : > { %2680 = vmatpush.msra.mxu3 %v2473_v29  ;;  %2755 = vmatpush.msrb.mxu0 %v2479_v59  ;;  %v1939_v29 = vld [vmem:[#allocation4 + $0xa2] sm:$0xff] }
 0x35e   : > { %v2020_v23 = vpop.permute.xlu1 %2019  ;;  %v2373_v25 = vld [vmem:[#allocation5 + $0xc8] sm:$0xff]  ;;  %v1897_v31 = vpop.permute.xlu2 %1896  ;;  %1955 = vst.msk [vmem:[#allocation5 + $0x148] sm:$0xff] %vm1743_vm12, %v1939_v29 }
 0x35f   : > { %2055 = vst.msk [vmem:[#allocation5 + $0x1e8] sm:$0xff] %vm1914_vm14, %v2020_v23  ;;  %2579 = vmatmul.f32.gmra.mxu1 %v2373_v25  ;;  %v1895_v35 = vpop.permute.xlu0 %1894  ;;  %2681 = vmatpush.msra.mxu3 %v2472_v30 }
 0x360   : > { %1930 = vst.msk [vmem:[#allocation5 + $0x258] sm:$0xff] %vm1914_vm14, %v1897_v31  ;;  %2756 = vmatpush.msrb.mxu0 %v2478_v55 }
 0x361   : > { %1929 = vst.msk [vmem:[#allocation5 + $0x230] sm:$0xff] %vm1914_vm14, %v1895_v35  ;;  %2682 = vmatpush.msra.mxu3 %v2471_v46 }
 0x362   : > { %2139 = vrot.lane.b32.xlu1 %v7186_v17, %s6187_s21  ;;  %v2470_v17 = vld [vmem:[#allocation16 + $0x150] sm:$0xff]  ;;  %2757 = vmatpush.msrb.mxu0 %v2477_v52 }
 0x363   : > { %2683 = vmatpush.msra.mxu3 %v2470_v17  ;;  %v2357_v17 = vld [vmem:[#allocation5 + $0x48] sm:$0xff] }
 0x364   : > { %2266 = vrot.lane.b32.xlu2 %v2227_v50, %s6187_s21  ;;  %2017 = vrot.lane.b32.xlu0 %v7246_v14, %s6187_s21  ;;  %v2493_v14 = vld [vmem:[#allocation16 + $0x208] sm:$0xff] }
 0x365   : > { %2684 = vmatpush.msra.mxu3 %v2469_v53  ;;  %2758 = vmatpush.msrb.mxu0 %v2476_v39  ;;  %v2362_v39 = vld [vmem:[#allocation5 + $0x70] sm:$0xff] }
 0x366   : > { %v1883_v38 = vpop.permute.xlu1 %1882  ;;  %v1881_v45 = vpop.permute.xlu2 %1880  ;;  %2822 = vmatpush.msrb.mxu1 %v2493_v14  ;;  %v2409_v3 = vld [vmem:[#allocation5 + $0x1e8] sm:$0xff] }
 0x367   : > { %1923 = vst.msk [vmem:[#allocation5 + $0x140] sm:$0xff] %vm1914_vm14, %v1883_v38  ;;  %v1879_v16 = vpop.permute.xlu0 %1878  ;;  %2685 = vmatpush.msra.mxu3 %v2468_v61  ;;  %v2423_v56 = vld [vmem:[#allocation5 + $0x258] sm:$0xff] }
 0x368   : > { %1922 = vst.msk [vmem:[#allocation5 + $0x118] sm:$0xff] %vm1914_vm14, %v1881_v45  ;;  %v2418_v54 = vld [vmem:[#allocation5 + $0x230] sm:$0xff] }
 0x369   : > { %1921 = vst.msk [vmem:[#allocation5 + $0xf0] sm:$0xff] %vm1914_vm14, %v1879_v16  ;;  %2606 = vmatmul.f32.gmra.mxu3 %v2418_v54  ;;  %v3434_v16 = vld [vmem:[#allocation21 + $0x78] sm:$0xff]  ;;  %v3433_v54 = vld [vmem:[#allocation21 + $0x70] sm:$0xff] }
 0x36a   : > { %2141 = vrot.lane.b32.xlu1 %v7206_v32, %s6187_s21  ;;  %2686 = vmatpush.msra.mxu3 %v2467_v62  ;;  %v2466_v32 = vld [vmem:[#allocation16 + $0x130] sm:$0xff] }
 0x36b   : > { %3563 = vmatpush.msrb.mxu2 %v3434_v16 }
 0x36c   : > { %2268 = vrot.lane.b32.xlu2 %v7331_v44, %s6187_s21  ;;  %2687 = vmatpush.msra.mxu3 %v2466_v32  ;;  %v2464_v44 = vld [vmem:[#allocation16 + $0x120] sm:$0xff] }
 0x36d   : > { %2147 = vrot.lane.b32.xlu0 %v7265_v28, %s6187_s21  ;;  %v2462_v28 = vld [vmem:[#allocation16 + $0x110] sm:$0xff]  ;;  %3564 = vmatpush.msrb.mxu2 %v3433_v54 }
 0x36e   : > { %v2024_v36 = vpop.permute.xlu2 %2023  ;;  %2688 = vmatpush.msra.mxu3 %v2465_v51 }
 0x36f   : > { %2057 = vst.msk [vmem:[#allocation5 + $0x238] sm:$0xff] %vm1914_vm14, %v2024_v36  ;;  %v2022_v22 = vpop.permute.xlu0 %2021  ;;  %v2383_v4 = vld [vmem:[#allocation5 + $0x118] sm:$0xff] }
 0x370   : > { %v2378_v24 = vld [vmem:[#allocation5 + $0xf0] sm:$0xff]  ;;  %2056 = vst.msk [vmem:[#allocation5 + $0x210] sm:$0xff] %vm1914_vm14, %v2022_v22  ;;  %2689 = vmatpush.msra.mxu3 %v2464_v44  ;;  %v3432_v22 = vld [vmem:[#allocation21 + $0x68] sm:$0xff] }
 0x371   : > { %2582 = vmatmul.f32.gmra.mxu1 %v2378_v24  ;;  %2609 = vmatmul.f32.gmra.mxu3 %v2423_v56  ;;  %v7466_v24 = vpop.f32.mrf.mxu1 }
 0x372   : > { %2143 = vrot.lane.b32.xlu1 %v7228_v60, %s6187_s21  ;;  %2690 = vmatpush.msra.mxu3 %v2463_v1  ;;  %v2492_v60 = vld [vmem:[#allocation16 + $0x200] sm:$0xff]  ;;  %v2367_v1 = vld [vmem:[#allocation5 + $0x98] sm:$0xff] }
 0x373   : > { %2823 = vmatpush.msrb.mxu1 %v2492_v60  ;;  %3565 = vmatpush.msrb.mxu2 %v3432_v22  ;;  %v3449_v22 = vld [vmem:[#allocation21 + $0xf0] sm:$0xff] }
 0x374   : > { %2270 = vrot.lane.b32.xlu2 %v7344_v48, %s6187_s21  ;;  %2691 = vmatpush.msra.mxu3 %v2462_v28  ;;  %v2460_v48 = vld [vmem:[#allocation16 + $0x100] sm:$0xff] }
 0x375   : > { %2276 = vrot.lane.b32.xlu0 %v7282_v41, %s6187_s21 }
 0x376   : > { %v1887_v63 = vpop.permute.xlu2 %1886  ;;  %2692 = vmatpush.msra.mxu3 %v2461_v37  ;;  %v2323_v37 = vld [vmem:[#allocation4 + $0x92] sm:$0xff] }
 0x377   : > { %1925 = vst.msk [vmem:[#allocation5 + $0x190] sm:$0xff] %vm1914_vm14, %v1887_v63  ;;  %v1885_v47 = vpop.permute.xlu0 %1884 }
 0x378   : > { %1924 = vst.msk [vmem:[#allocation5 + $0x168] sm:$0xff] %vm1914_vm14, %v1885_v47  ;;  %2693 = vmatpush.msra.mxu3 %v2460_v48 }
 0x379   : > { %2585 = vmatmul.f32.gmra.mxu1 %v2383_v4  ;;  %2665 = vmatmul.f32.vlgmr.msrb.gmra.mxu3 %v2409_v3  ;;  %v3431_v4 = vld [vmem:[#allocation21 + $0x60] sm:$0xff]  ;;  %2339 = vst.msk [vmem:[#allocation5 + $0x138] sm:$0xff] %vm1743_vm12, %v2323_v37  ;;  %v3465_v37 = vld [vmem:[#allocation21 + $0x170] sm:$0xff] }
 0x37a   : > { %2145 = vrot.lane.b32.xlu1 %v7248_v18, %s6187_s21  ;;  %v2388_v18 = vld [vmem:[#allocation5 + $0x140] sm:$0xff]  ;;  %3566 = vmatpush.msrb.mxu2 %v3431_v4 }
 0x37c   : > { %2272 = vrot.lane.b32.xlu2 %v7242_v13, %s6187_s21  ;;  %v2414_v13 = vld [vmem:[#allocation5 + $0x210] sm:$0xff] }
 0x37d   : > { %2280 = vrot.lane.b32.xlu0 %v7326_v40, %s6187_s21 }
 0x37e   : > { %v1889_v5 = vpop.permute.xlu2 %1888 }
 0x37f   : > { %1926 = vst.msk [vmem:[#allocation5 + $0x1b8] sm:$0xff] %vm1914_vm14, %v1889_v5  ;;  %v1996_v41 = vpop.permute.xlu0 %1995 }
 0x380   : > { %2043 = vst.msk [vmem:[#allocation5 + $0x8] sm:$0xff] %vm1914_vm14, %v1996_v41  ;;  %v2387_v8 = vld [vmem:[#allocation5 + $0x138] sm:$0xff] }
 0x381   : > { %2588 = vmatmul.f32.gmra.mxu1 %v2388_v18  ;;  %2668 = vmatmul.f32.gmra.mxu3 %v2414_v13  ;;  %v2372_v18 = vld [vmem:[#allocation5 + $0xc0] sm:$0xff] }
 0x382   : > { %2274 = vrot.lane.b32.xlu1 %v7263_v0, %s6187_s21  ;;  %v2393_v0 = vld [vmem:[#allocation5 + $0x168] sm:$0xff] }
 0x384   : > { %2149 = vrot.lane.b32.xlu2 %v7284_v43, %s6187_s21  ;;  %v2419_v43 = vld [vmem:[#allocation5 + $0x238] sm:$0xff] }
 0x386   : > { %v2253_v49 = vpop.permute.xlu2 %2252  ;;  %v2403_v21 = vld [vmem:[#allocation5 + $0x1b8] sm:$0xff] }
 0x387   : > { %2300 = vst.msk [vmem:[#allocation5 + $0x18] sm:$0xff] %vm1914_vm14, %v2253_v49  ;;  %v1998_v40 = vpop.permute.xlu0 %1997  ;;  %v2349_v11 = vld [vmem:[#allocation5 + $0x8] sm:$0xff]  ;;  %v7475_v49 = vpop.f32.mrf.mxu1 }
 0x388   : > { %2044 = vst.msk [vmem:[#allocation5 + $0x30] sm:$0xff] %vm1914_vm14, %v1998_v40  ;;  %2629 = vmatmul.f32.vlgmr.msra.gmra.mxu2 %v2349_v11  ;;  %v3430_v11 = vld [vmem:[#allocation21 + $0x58] sm:$0xff] }
 0x389   : > { %2591 = vmatmul.f32.gmra.mxu1 %v2393_v0  ;;  %2671 = vmatmul.f32.gmra.mxu3 %v2419_v43  ;;  %v3429_v43 = vld [vmem:[#allocation21 + $0x50] sm:$0xff] }
 0x38a   : > { %2151 = vrot.lane.b32.xlu1 %v7304_v9, %s6187_s21  ;;  %v2398_v9 = vld [vmem:[#allocation5 + $0x190] sm:$0xff]  ;;  %3567 = vmatpush.msrb.mxu2 %v3430_v11 }
 0x38b   : > { %v3422_v11 = vld [vmem:[#allocation21 + $0x18] sm:$0xff] }
 0x38c   : > { %2278 = vrot.lane.b32.xlu2 %v7302_v2, %s6187_s21  ;;  %v2026_v57 = vpop.permute.xlu1 %2025  ;;  %3568 = vmatpush.msrb.mxu2 %v3429_v43  ;;  %v3445_v43 = vld [vmem:[#allocation21 + $0xd0] sm:$0xff] }
 0x38d   : > { %2058 = vst.msk [vmem:[#allocation5 + $0x260] sm:$0xff] %vm1914_vm14, %v2026_v57 }
 0x38e   : > { %v2255_v58 = vpop.permute.xlu2 %2254  ;;  %v2351_v6 = vld [vmem:[#allocation5 + $0x18] sm:$0xff] }
 0x38f   : > { %2301 = vst.msk [vmem:[#allocation5 + $0x40] sm:$0xff] %vm1914_vm14, %v2255_v58  ;;  %2759 = vmatmul.f32.vlgmr.msrb.gmra.mxu0 %v2351_v6  ;;  %v2000_v2 = vpop.permute.xlu0 %1999  ;;  %v2354_v12 = vld [vmem:[#allocation5 + $0x30] sm:$0xff]  ;;  %v2377_v6 = vld [vmem:[#allocation5 + $0xe8] sm:$0xff] }
 0x390   : > { %2045 = vst.msk [vmem:[#allocation5 + $0x58] sm:$0xff] %vm1914_vm14, %v2000_v2  ;;  %2632 = vmatmul.f32.gmra.mxu2 %v2354_v12 }
 0x391   : > { %2594 = vmatmul.f32.gmra.mxu1 %v2398_v9 }
 0x392   : > { %2153 = vrot.lane.b32.xlu1 %v7328_v42, %s6187_s21 }
 0x394   : > { %v2124_v19 = vpop.permute.xlu1 %2123  ;;  %v2424_v15 = vld [vmem:[#allocation5 + $0x260] sm:$0xff]  ;;  %2282 = vrot.lane.b32.xlu2 %v2235_v10, %s6187_s21 }
 0x395   : > { %2171 = vst.msk [vmem:[#allocation5 + $0x10] sm:$0xff] %vm1914_vm14, %v2124_v19  ;;  %2674 = vmatmul.f32.gmra.mxu3 %v2424_v15  ;;  %v7483_v15 = vpop.f32.mrf.mxu1 }
 0x396   : > { %v2257_v20 = vpop.permute.xlu2 %2256  ;;  %v2356_v7 = vld [vmem:[#allocation5 + $0x40] sm:$0xff] }
 0x397   : > { %2302 = vst.msk [vmem:[#allocation5 + $0x68] sm:$0xff] %vm1914_vm14, %v2257_v20  ;;  %2762 = vmatmul.f32.gmra.mxu0 %v2356_v7  ;;  %v2002_v42 = vpop.permute.xlu0 %2001  ;;  %v2359_v23 = vld [vmem:[#allocation5 + $0x58] sm:$0xff] }
 0x398   : > { %2046 = vst.msk [vmem:[#allocation5 + $0x80] sm:$0xff] %vm1914_vm14, %v2002_v42  ;;  %2635 = vmatmul.f32.gmra.mxu2 %v2359_v23  ;;  %v3428_v20 = vld [vmem:[#allocation21 + $0x48] sm:$0xff]  ;;  %v2382_v42 = vld [vmem:[#allocation5 + $0x110] sm:$0xff] }
 0x399   : > { %2597 = vmatmul.f32.gmra.mxu1 %v2403_v21  ;;  %3569 = vmatpush.msrb.mxu2 %v3428_v20  ;;  %v2407_v20 = vld [vmem:[#allocation5 + $0x1d8] sm:$0xff] }
 0x39c   : > { %v2126_v25 = vpop.permute.xlu1 %2125  ;;  %v2350_v26 = vld [vmem:[#allocation5 + $0x10] sm:$0xff] }
 0x39d   : > { %2172 = vst.msk [vmem:[#allocation5 + $0x38] sm:$0xff] %vm1914_vm14, %v2126_v25  ;;  %2694 = vmatmul.f32.vlgmr.msra.gmra.mxu3 %v2350_v26 }
 0x39e   : > { %v2259_v27 = vpop.permute.xlu2 %2258  ;;  %v2361_v31 = vld [vmem:[#allocation5 + $0x68] sm:$0xff] }
 0x39f   : > { %2303 = vst.msk [vmem:[#allocation5 + $0x90] sm:$0xff] %vm1914_vm14, %v2259_v27  ;;  %2765 = vmatmul.f32.gmra.mxu0 %v2361_v31  ;;  %v2004_v50 = vpop.permute.xlu0 %2003  ;;  %v2364_v30 = vld [vmem:[#allocation5 + $0x80] sm:$0xff]  ;;  %v3427_v27 = vld [vmem:[#allocation21 + $0x40] sm:$0xff]  ;;  %v7489_v31 = vpop.f32.mrf.mxu1 }
 0x3a0   : > { %2047 = vst.msk [vmem:[#allocation5 + $0xa8] sm:$0xff] %vm1914_vm14, %v2004_v50  ;;  %2638 = vmatmul.f32.gmra.mxu2 %v2364_v30 }
 0x3a1   : > { %5188 = vmatmul.msk.f32.vlgmr.msrb.gmra.mxu1 %vm1743_vm12, %v2352_v33  ;;  %3570 = vmatpush.msrb.mxu2 %v3427_v27  ;;  %v3442_v27 = vld [vmem:[#allocation21 + $0xb8] sm:$0xff] }
 0x3a4   : > { %v2128_v34 = vpop.permute.xlu1 %2127  ;;  %v2355_v35 = vld [vmem:[#allocation5 + $0x38] sm:$0xff] }
 0x3a5   : > { %2173 = vst.msk [vmem:[#allocation5 + $0x60] sm:$0xff] %vm1914_vm14, %v2128_v34  ;;  %2697 = vmatmul.f32.gmra.mxu3 %v2355_v35 }
 0x3a6   : > { %v2261_v38 = vpop.permute.xlu2 %2260  ;;  %v2366_v46 = vld [vmem:[#allocation5 + $0x90] sm:$0xff] }
 0x3a7   : > { %2304 = vst.msk [vmem:[#allocation5 + $0xb8] sm:$0xff] %vm1914_vm14, %v2261_v38  ;;  %2768 = vmatmul.f32.gmra.mxu0 %v2366_v46  ;;  %v2006_v59 = vpop.permute.xlu0 %2005  ;;  %v2369_v45 = vld [vmem:[#allocation5 + $0xa8] sm:$0xff] }
 0x3a8   : > { %2048 = vst.msk [vmem:[#allocation5 + $0xd0] sm:$0xff] %vm1914_vm14, %v2006_v59  ;;  %2641 = vmatmul.f32.gmra.mxu2 %v2369_v45  ;;  %v3426_v38 = vld [vmem:[#allocation21 + $0x38] sm:$0xff]  ;;  %v3425_v45 = vld [vmem:[#allocation21 + $0x30] sm:$0xff] }
 0x3a9   : > { %5189 = vmatmul.msk.f32.gmra.mxu1 %vm1743_vm12, %v2357_v17  ;;  %3571 = vmatpush.msrb.mxu2 %v3426_v38  ;;  %v7495_v46 = vpop.f32.mrf.mxu3 }
 0x3ab   : > { %v7497_v59 = vpop.f32.mrf.mxu1  ;;  %3572 = vmatpush.msrb.mxu2 %v3425_v45  ;;  %v3440_v45 = vld [vmem:[#allocation21 + $0xa8] sm:$0xff] }
 0x3ac   : > { %v2130_v53 = vpop.permute.xlu1 %2129  ;;  %v2360_v55 = vld [vmem:[#allocation5 + $0x60] sm:$0xff] }
 0x3ad   : > { %2174 = vst.msk [vmem:[#allocation5 + $0x88] sm:$0xff] %vm1914_vm14, %v2130_v53  ;;  %2700 = vmatmul.f32.gmra.mxu3 %v2360_v55  ;;  %v2392_v55 = vld [vmem:[#allocation5 + $0x160] sm:$0xff] }
 0x3ae   : > { %v2263_v61 = vpop.permute.xlu2 %2262  ;;  %v2371_v52 = vld [vmem:[#allocation5 + $0xb8] sm:$0xff] }
 0x3af   : > { %2305 = vst.msk [vmem:[#allocation5 + $0xe0] sm:$0xff] %vm1914_vm14, %v2263_v61  ;;  %2771 = vmatmul.f32.gmra.mxu0 %v2371_v52  ;;  %v2008_v36 = vpop.permute.xlu0 %2007  ;;  %v2374_v62 = vld [vmem:[#allocation5 + $0xd0] sm:$0xff] }
 0x3b0   : > { %2049 = vst.msk [vmem:[#allocation5 + $0xf8] sm:$0xff] %vm1914_vm14, %v2008_v36  ;;  %2644 = vmatmul.f32.gmra.mxu2 %v2374_v62  ;;  %v3424_v62 = vld [vmem:[#allocation21 + $0x28] sm:$0xff] }
 0x3b1   : > { %5190 = vmatmul.msk.f32.gmra.mxu1 %vm1743_vm12, %v2362_v39  ;;  %3573 = vmatpush.msrb.mxu2 %v3424_v62 }
 0x3b4   : > { %v2132_v32 = vpop.permute.xlu1 %2131  ;;  %v2365_v14 = vld [vmem:[#allocation5 + $0x88] sm:$0xff] }
 0x3b5   : > { %2175 = vst.msk [vmem:[#allocation5 + $0xb0] sm:$0xff] %vm1914_vm14, %v2132_v32  ;;  %2703 = vmatmul.f32.gmra.mxu3 %v2365_v14  ;;  %v2397_v32 = vld [vmem:[#allocation5 + $0x188] sm:$0xff] }
 0x3b6   : > { %v2265_v51 = vpop.permute.xlu2 %2264  ;;  %v2376_v44 = vld [vmem:[#allocation5 + $0xe0] sm:$0xff] }
 0x3b7   : > { %2306 = vst.msk [vmem:[#allocation5 + $0x108] sm:$0xff] %vm1914_vm14, %v2265_v51  ;;  %2774 = vmatmul.f32.gmra.mxu0 %v2376_v44  ;;  %v2010_v56 = vpop.permute.xlu0 %2009  ;;  %v2379_v63 = vld [vmem:[#allocation5 + $0xf8] sm:$0xff]  ;;  %v3450_v44 = vld [vmem:[#allocation21 + $0xf8] sm:$0xff] }
 0x3b8   : > { %2050 = vst.msk [vmem:[#allocation5 + $0x120] sm:$0xff] %vm1914_vm14, %v2010_v56  ;;  %2647 = vmatmul.f32.gmra.mxu2 %v2379_v63  ;;  %v3466_v56 = vld [vmem:[#allocation21 + $0x178] sm:$0xff]  ;;  %3628 = vmatpush.msrb.mxu3 %v3450_v44  ;;  %v3420_v44 = vld [vmem:[#allocation21 + $0x8] sm:$0xff] }
 0x3b9   : > { %5191 = vmatmul.msk.f32.gmra.mxu1 %vm1743_vm12, %v2367_v1  ;;  %3693 = vmatpush.msra.mxu0 %v3466_v56  ;;  %v3456_v56 = vld [vmem:[#allocation21 + $0x128] sm:$0xff] }
 0x3ba   : > { %3629 = vmatpush.msrb.mxu3 %v3449_v22  ;;  %v3439_v22 = vld [vmem:[#allocation21 + $0xa0] sm:$0xff] }
 0x3bb   : > { %3694 = vmatpush.msra.mxu0 %v3465_v37  ;;  %v3438_v37 = vld [vmem:[#allocation21 + $0x98] sm:$0xff] }
 0x3bc   : > { %v2134_v28 = vpop.permute.xlu1 %2133  ;;  %v2370_v60 = vld [vmem:[#allocation5 + $0xb0] sm:$0xff] }
 0x3bd   : > { %2176 = vst.msk [vmem:[#allocation5 + $0xd8] sm:$0xff] %vm1914_vm14, %v2134_v28  ;;  %2706 = vmatmul.f32.gmra.mxu3 %v2370_v60  ;;  %v3423_v28 = vld [vmem:[#allocation21 + $0x20] sm:$0xff]  ;;  %v3448_v60 = vld [vmem:[#allocation21 + $0xe8] sm:$0xff] }
 0x3be   : > { %v2267_v48 = vpop.permute.xlu2 %2266  ;;  %v2381_v47 = vld [vmem:[#allocation5 + $0x108] sm:$0xff]  ;;  %3574 = vmatpush.msrb.mxu2 %v3423_v28  ;;  %3630 = vmatpush.msrb.mxu3 %v3448_v60  ;;  %v3476_v60 = vld [vmem:[#allocation21 + $0x1c8] sm:$0xff] }
 0x3bf   : > { %2307 = vst.msk [vmem:[#allocation5 + $0x130] sm:$0xff] %vm1914_vm14, %v2267_v48  ;;  %2777 = vmatmul.f32.gmra.mxu0 %v2381_v47  ;;  %v2012_v3 = vpop.permute.xlu0 %2011  ;;  %v2384_v5 = vld [vmem:[#allocation5 + $0x120] sm:$0xff]  ;;  %v3447_v48 = vld [vmem:[#allocation21 + $0xe0] sm:$0xff] }
 0x3c0   : > { %2051 = vst.msk [vmem:[#allocation5 + $0x148] sm:$0xff] %vm1914_vm14, %v2012_v3  ;;  %2650 = vmatmul.f32.gmra.mxu2 %v2384_v5  ;;  %v3464_v47 = vld [vmem:[#allocation21 + $0x168] sm:$0xff]  ;;  %v2402_v3 = vld [vmem:[#allocation5 + $0x1b0] sm:$0xff]  ;;  %3631 = vmatpush.msrb.mxu3 %v3447_v48 }
 0x3c1   : > { %5192 = vmatmul.msk.f32.gmra.mxu1 %vm1743_vm12, %v2372_v18  ;;  %v2203_v5 = vld [vmem:[#allocation4 + $0x130] sm:$0xff]  ;;  %3695 = vmatpush.msra.mxu0 %v3464_v47 }
 0x3c2   : > { %2219 = vst.msk [vmem:[#allocation5 + $0x270] sm:$0xff] %vm1743_vm12, %v2203_v5  ;;  %3575 = vmatpush.msrb.mxu2 %v3422_v11  ;;  %v3455_v48 = vld [vmem:[#allocation21 + $0x120] sm:$0xff] }
 0x3c3   : > { %v2422_v11 = vld [vmem:[#allocation5 + $0x250] sm:$0xff] }
 0x3c4   : > { %v2136_v41 = vpop.permute.xlu1 %2135  ;;  %v2375_v13 = vld [vmem:[#allocation5 + $0xd8] sm:$0xff] }
 0x3c5   : > { %2177 = vst.msk [vmem:[#allocation5 + $0x100] sm:$0xff] %vm1914_vm14, %v2136_v41  ;;  %2709 = vmatmul.f32.gmra.mxu3 %v2375_v13  ;;  %v3463_v13 = vld [vmem:[#allocation21 + $0x160] sm:$0xff] }
 0x3c6   : > { %v2269_v40 = vpop.permute.xlu2 %2268  ;;  %v2386_v0 = vld [vmem:[#allocation5 + $0x130] sm:$0xff]  ;;  %3696 = vmatpush.msra.mxu0 %v3463_v13 }
 0x3c7   : > { %2308 = vst.msk [vmem:[#allocation5 + $0x158] sm:$0xff] %vm1914_vm14, %v2269_v40  ;;  %2780 = vmatmul.f32.gmra.mxu0 %v2386_v0  ;;  %v2014_v57 = vpop.permute.xlu0 %2013  ;;  %v2389_v58 = vld [vmem:[#allocation5 + $0x148] sm:$0xff]  ;;  %v3419_v13 = vld [vmem:[#allocation21] sm:$0xff] }
 0x3c8   : > { %2052 = vst.msk [vmem:[#allocation5 + $0x170] sm:$0xff] %vm1914_vm14, %v2014_v57  ;;  %2653 = vmatmul.f32.gmra.mxu2 %v2389_v58  ;;  %v3446_v0 = vld [vmem:[#allocation21 + $0xd8] sm:$0xff] }
 0x3c9   : > { %5193 = vmatmul.msk.f32.gmra.mxu1 %vm1743_vm12, %v2377_v6  ;;  %3632 = vmatpush.msrb.mxu3 %v3446_v0  ;;  %v3462_v57 = vld [vmem:[#allocation21 + $0x158] sm:$0xff]  ;;  %v3436_v0 = vld [vmem:[#allocation21 + $0x88] sm:$0xff] }
 0x3ca   : > { %v3482_v58 = vld [vmem:[#allocation21 + $0x1f8] sm:$0xff]  ;;  %3697 = vmatpush.msra.mxu0 %v3462_v57  ;;  %v3473_v57 = vld [vmem:[#allocation21 + $0x1b0] sm:$0xff] }
 0x3cb   : > { %3758 = vmatpush.msra.mxu1 %v3482_v58  ;;  %3633 = vmatpush.msrb.mxu3 %v3445_v43  ;;  %v3453_v43 = vld [vmem:[#allocation21 + $0x110] sm:$0xff] }
 0x3cc   : > { %v2138_v2 = vpop.permute.xlu1 %2137  ;;  %v2380_v9 = vld [vmem:[#allocation5 + $0x100] sm:$0xff] }
 0x3cd   : > { %2178 = vst.msk [vmem:[#allocation5 + $0x128] sm:$0xff] %vm1914_vm14, %v2138_v2  ;;  %2712 = vmatmul.f32.gmra.mxu3 %v2380_v9  ;;  %v3444_v9 = vld [vmem:[#allocation21 + $0xc8] sm:$0xff] }
 0x3ce   : > { %v2271_v12 = vpop.permute.xlu2 %2270  ;;  %v2391_v19 = vld [vmem:[#allocation5 + $0x158] sm:$0xff]  ;;  %3634 = vmatpush.msrb.mxu3 %v3444_v9 }
 0x3cf   : > { %2309 = vst.msk [vmem:[#allocation5 + $0x180] sm:$0xff] %vm1914_vm14, %v2271_v12  ;;  %2783 = vmatmul.f32.gmra.mxu0 %v2391_v19  ;;  %v2016_v7 = vpop.permute.xlu0 %2015  ;;  %v2394_v10 = vld [vmem:[#allocation5 + $0x170] sm:$0xff]  ;;  %v3461_v12 = vld [vmem:[#allocation21 + $0x150] sm:$0xff] }
 0x3d0   : > { %2053 = vst.msk [vmem:[#allocation5 + $0x198] sm:$0xff] %vm1914_vm14, %v2016_v7  ;;  %2656 = vmatmul.f32.gmra.mxu2 %v2394_v10  ;;  %v3481_v19 = vld [vmem:[#allocation21 + $0x1f0] sm:$0xff]  ;;  %v3443_v7 = vld [vmem:[#allocation21 + $0xc0] sm:$0xff]  ;;  %3698 = vmatpush.msra.mxu0 %v3461_v12 }
 0x3d1   : > { %5194 = vmatmul.msk.f32.gmra.mxu1 %vm1743_vm12, %v2382_v42  ;;  %v3460_v42 = vld [vmem:[#allocation21 + $0x148] sm:$0xff]  ;;  %3635 = vmatpush.msrb.mxu3 %v3443_v7  ;;  %v3435_v12 = vld [vmem:[#allocation21 + $0x80] sm:$0xff] }
 0x3d2   : > { %3759 = vmatpush.msra.mxu1 %v3481_v19  ;;  %3699 = vmatpush.msra.mxu0 %v3460_v42  ;;  %v3452_v19 = vld [vmem:[#allocation21 + $0x108] sm:$0xff]  ;;  %v3451_v42 = vld [vmem:[#allocation21 + $0x100] sm:$0xff] }
 0x3d3   : > { %3636 = vmatpush.msrb.mxu3 %v3442_v27 }
 0x3d4   : > { %v2140_v21 = vpop.permute.xlu1 %2139  ;;  %v2385_v23 = vld [vmem:[#allocation5 + $0x128] sm:$0xff] }
 0x3d5   : > { %2179 = vst.msk [vmem:[#allocation5 + $0x150] sm:$0xff] %vm1914_vm14, %v2140_v21  ;;  %2715 = vmatmul.f32.gmra.mxu3 %v2385_v23  ;;  %v3480_v21 = vld [vmem:[#allocation21 + $0x1e8] sm:$0xff] }
 0x3d6   : > { %v2273_v25 = vpop.permute.xlu2 %2272  ;;  %v2396_v26 = vld [vmem:[#allocation5 + $0x180] sm:$0xff]  ;;  %3760 = vmatpush.msra.mxu1 %v3480_v21  ;;  %v3471_v21 = vld [vmem:[#allocation21 + $0x1a0] sm:$0xff] }
 0x3d7   : > { %2310 = vst.msk [vmem:[#allocation5 + $0x1a8] sm:$0xff] %vm1914_vm14, %v2273_v25  ;;  %2786 = vmatmul.f32.gmra.mxu0 %v2396_v26  ;;  %v2018_v29 = vpop.permute.xlu0 %2017  ;;  %v2399_v50 = vld [vmem:[#allocation5 + $0x198] sm:$0xff]  ;;  %v3421_v26 = vld [vmem:[#allocation21 + $0x10] sm:$0xff] }
 0x3d8   : > { %2054 = vst.msk [vmem:[#allocation5 + $0x1c0] sm:$0xff] %vm1914_vm14, %v2018_v29  ;;  %2659 = vmatmul.f32.gmra.mxu2 %v2399_v50  ;;  %v3479_v29 = vld [vmem:[#allocation21 + $0x1e0] sm:$0xff]  ;;  %v3441_v50 = vld [vmem:[#allocation21 + $0xb0] sm:$0xff] }
 0x3d9   : > { %5195 = vmatmul.msk.f32.gmra.mxu1 %vm1743_vm12, %v2387_v8  ;;  %v3459_v8 = vld [vmem:[#allocation21 + $0x140] sm:$0xff]  ;;  %3576 = vmatpush.msrb.mxu2 %v3421_v26 }
 0x3da   : > { %v7503_v54 = vpop.f32.mrf.mxu3  ;;  %3700 = vmatpush.msra.mxu0 %v3459_v8  ;;  %3761 = vmatpush.msra.mxu1 %v3479_v29 }
 0x3db   : > { %3637 = vmatpush.msrb.mxu3 %v3441_v50  ;;  %3577 = vmatpush.msrb.mxu2 %v3420_v44  ;;  %v3018_v50 = vld [vmem:[#allocation6 + $0x1] sm:$0xff]  ;;  %v7554_v44 = vld [vmem:[#allocation18] ss:$0 sm:$0xff] }
 0x3dc   : > { %v2142_v30 = vpop.permute.xlu1 %2141  ;;  %v2390_v33 = vld [vmem:[#allocation5 + $0x150] sm:$0xff]  ;;  %v7505_v36 = vpop.f32.mrf.mxu1 }
 0x3dd   : > { %2180 = vst.msk [vmem:[#allocation5 + $0x178] sm:$0xff] %vm1914_vm14, %v2142_v30  ;;  %2718 = vmatmul.f32.gmra.mxu3 %v2390_v33  ;;  %v3458_v33 = vld [vmem:[#allocation21 + $0x138] sm:$0xff]  ;;  %3578 = vmatpush.msrb.mxu2 %v3419_v13 }
 0x3de   : > { %v2150_v34 = vpop.permute.xlu2 %2149  ;;  %v2401_v35 = vld [vmem:[#allocation5 + $0x1a8] sm:$0xff]  ;;  %3701 = vmatpush.msra.mxu0 %v3458_v33  ;;  %3638 = vmatpush.msrb.mxu3 %v3440_v45 }
 0x3df   : > { %2184 = vst.msk [vmem:[#allocation5 + $0x218] sm:$0xff] %vm1914_vm14, %v2150_v34  ;;  %2789 = vmatmul.f32.gmra.mxu0 %v2401_v35  ;;  %v2148_v17 = vpop.permute.xlu0 %2147  ;;  %v2404_v53 = vld [vmem:[#allocation5 + $0x1c0] sm:$0xff]  ;;  %v3478_v34 = vld [vmem:[#allocation21 + $0x1d8] sm:$0xff] }
 0x3e0   : > { %2183 = vst.msk [vmem:[#allocation5 + $0x1f0] sm:$0xff] %vm1914_vm14, %v2148_v17  ;;  %2662 = vmatmul.f32.gmra.mxu2 %v2404_v53  ;;  %v2331_v35 = vld [vmem:[#allocation4 + $0x132] sm:$0xff]  ;;  %v3457_v17 = vld [vmem:[#allocation21 + $0x130] sm:$0xff]  ;;  %3762 = vmatpush.msra.mxu1 %v3478_v34 }
 0x3e1   : > { %5196 = vmatmul.msk.f32.gmra.mxu1 %vm1743_vm12, %v2392_v55  ;;  %2347 = vst.msk [vmem:[#allocation5 + $0x278] sm:$0xff] %vm1743_vm12, %v2331_v35  ;;  %v2412_v53 = vld [vmem:[#allocation5 + $0x200] sm:$0xff]  ;;  %3702 = vmatpush.msra.mxu0 %v3457_v17  ;;  %v3470_v33 = vld [vmem:[#allocation21 + $0x198] sm:$0xff] }
 0x3e2   : > { %v3477_v55 = vld [vmem:[#allocation21 + $0x1d0] sm:$0xff]  ;;  %3639 = vmatpush.msrb.mxu3 %v3439_v22 }
 0x3e3   : > { %3763 = vmatpush.msra.mxu1 %v3477_v55  ;;  %3703 = vmatpush.msra.mxu0 %v3456_v56  ;;  %v3469_v34 = vld [vmem:[#allocation21 + $0x190] sm:$0xff]  ;;  %v7556_v56 = vld [vmem:[#allocation19] ss:$0 sm:$0xff] }
 0x3e4   : > { %v2144_v61 = vpop.permute.xlu1 %2143  ;;  %v2395_v52 = vld [vmem:[#allocation5 + $0x178] sm:$0xff]  ;;  %3640 = vmatpush.msrb.mxu3 %v3438_v37  ;;  %v3497_v35 = vld [vmem:[#allocation21 + $0x270] sm:$0xff] }
 0x3e5   : > { %2181 = vst.msk [vmem:[#allocation5 + $0x1a0] sm:$0xff] %vm1914_vm14, %v2144_v61  ;;  %2721 = vmatmul.f32.gmra.mxu3 %v2395_v52  ;;  %3764 = vmatpush.msra.mxu1 %v3476_v60 }
 0x3e6   : > { %v2279_v16 = vpop.permute.xlu2 %2278  ;;  %v2415_v52 = vld [vmem:[#allocation5 + $0x218] sm:$0xff]  ;;  %3704 = vmatpush.msra.mxu0 %v3455_v48 }
 0x3e7   : > { %2313 = vst.msk [vmem:[#allocation5 + $0x220] sm:$0xff] %vm1914_vm14, %v2279_v16  ;;  %v2277_v39 = vpop.permute.xlu0 %2276  ;;  %v2410_v10 = vld [vmem:[#allocation5 + $0x1f0] sm:$0xff] }
 0x3e8   : > { %2312 = vst.msk [vmem:[#allocation5 + $0x1f8] sm:$0xff] %vm1914_vm14, %v2277_v39  ;;  %v2427_v8 = vld [vmem:[#allocation5 + $0x278] sm:$0xff] }
 0x3e9   : > { %5197 = vmatmul.msk.f32.gmra.mxu1 %vm1743_vm12, %v2397_v32  ;;  %v2417_v32 = vld [vmem:[#allocation5 + $0x228] sm:$0xff] }
 0x3ec   : > { %v2146_v14 = vpop.permute.xlu1 %2145  ;;  %v2400_v51 = vld [vmem:[#allocation5 + $0x1a0] sm:$0xff]  ;;  %v7510_v63 = vpop.f32.mrf.mxu3 }
 0x3ed   : > { %2182 = vst.msk [vmem:[#allocation5 + $0x1c8] sm:$0xff] %vm1914_vm14, %v2146_v14  ;;  %2724 = vmatmul.f32.gmra.mxu3 %v2400_v51 }
 0x3ee   : > { %v7512_v1 = vpop.f32.mrf.mxu1  ;;  %v2283_v40 = vpop.permute.xlu2 %2282  ;;  %v2416_v51 = vld [vmem:[#allocation5 + $0x220] sm:$0xff] }
 0x3ef   : > { %v2281_v4 = vpop.permute.xlu0 %2280  ;;  %2315 = vst.msk [vmem:[#allocation5 + $0x270] sm:$0xff] %vm1914_vm14, %v2283_v40  ;;  %v2411_v16 = vld [vmem:[#allocation5 + $0x1f8] sm:$0xff] }
 0x3f0   : > { %2314 = vst.msk [vmem:[#allocation5 + $0x248] sm:$0xff] %vm1914_vm14, %v2281_v4  ;;  %v3475_v4 = vld [vmem:[#allocation21 + $0x1c0] sm:$0xff] }
 0x3f1   : > { %5198 = vmatmul.msk.f32.gmra.mxu1 %vm1743_vm12, %v2402_v3  ;;  %v3437_v3 = vld [vmem:[#allocation21 + $0x90] sm:$0xff] }
 0x3f2   : > { %3765 = vmatpush.msra.mxu1 %v3475_v4  ;;  %3641 = vmatpush.msrb.mxu3 %v3437_v3 }
 0x3f4   : > { %v2275_v18 = vpop.permute.xlu1 %2274  ;;  %v2405_v41 = vld [vmem:[#allocation5 + $0x1c8] sm:$0xff]  ;;  %v7518_v6 = vpop.f32.mrf.mxu3  ;;  %3642 = vmatpush.msrb.mxu3 %v3436_v0 }
 0x3f5   : > { %2311 = vst.msk [vmem:[#allocation5 + $0x1d0] sm:$0xff] %vm1914_vm14, %v2275_v18  ;;  %2727 = vmatmul.f32.gmra.mxu3 %v2405_v41  ;;  %v3454_v18 = vld [vmem:[#allocation21 + $0x118] sm:$0xff] }
 0x3f6   : > { %v7521_v2 = vpop.f32.mrf.mxu1  ;;  %v3474_v41 = vld [vmem:[#allocation21 + $0x1b8] sm:$0xff]  ;;  %3705 = vmatpush.msra.mxu0 %v3454_v18  ;;  %3643 = vmatpush.msrb.mxu3 %v3435_v12 }
 0x3f7   : > { %3766 = vmatpush.msra.mxu1 %v3474_v41  ;;  %v2421_v9 = vld [vmem:[#allocation5 + $0x248] sm:$0xff]  ;;  %v2426_v29 = vld [vmem:[#allocation5 + $0x270] sm:$0xff] }
 0x3f8   : > { %3706 = vmatpush.msra.mxu0 %v3453_v43 }
 0x3f9   : > { %5199 = vmatmul.msk.f32.gmra.mxu1 %vm1743_vm12, %v2407_v20  ;;  %v3472_v20 = vld [vmem:[#allocation21 + $0x1a8] sm:$0xff] }
 0x3fa   : > { %3767 = vmatpush.msra.mxu1 %v3473_v57  ;;  %3707 = vmatpush.msra.mxu0 %v3452_v19 }
 0x3fc   : > { %v2152_v23 = vpop.permute.xlu1 %2151  ;;  %v2406_v25 = vld [vmem:[#allocation5 + $0x1d0] sm:$0xff]  ;;  %v7525_v30 = vpop.f32.mrf.mxu3  ;;  %3768 = vmatpush.msra.mxu1 %v3472_v20  ;;  %3708 = vmatpush.msra.mxu0 %v3451_v42 }
 0x3fd   : > { %2185 = vst.msk [vmem:[#allocation5 + $0x240] sm:$0xff] %vm1914_vm14, %v2152_v23  ;;  %2730 = vmatmul.f32.gmra.mxu3 %v2410_v10  ;;  %2792 = vmatmul.f32.gmra.mxu0 %v2406_v25  ;;  %v7544_v10 = vld [vmem:[#allocation6] sm:$0xff]  ;;  %v3498_v23 = vld [vmem:[#allocation21 + $0x278] sm:$0xff] }
 0x3fe   : > { %v7527_v38 = vpop.f32.mrf.mxu1  ;;  %3579 = vmatmul.f32.vlgmr.msrb.gmra.mxu2 %v7544_v10  ;;  %3769 = vmatpush.msra.mxu1 %v3471_v21 }
 0x3ff   : > { %3823 = vmatpush.msra.mxu2 %v3498_v23 }
 0x400   : > { %3770 = vmatpush.msra.mxu1 %v3470_v33 }
 0x401   : > { %5200 = vmatmul.msk.f32.gmra.mxu1 %vm1743_vm12, %v2412_v53  ;;  %3824 = vmatpush.msra.mxu2 %v3497_v35  ;;  %v3468_v53 = vld [vmem:[#allocation21 + $0x188] sm:$0xff] }
 0x402   : > { %3771 = vmatpush.msra.mxu1 %v3469_v34 }
 0x404   : > { %v2154_v61 = vpop.permute.xlu1 %2153  ;;  %v7532_v62 = vpop.f32.mrf.mxu3  ;;  %v2420_v14 = vld [vmem:[#allocation5 + $0x240] sm:$0xff]  ;;  %3772 = vmatpush.msra.mxu1 %v3468_v53 }
 0x405   : > { %2186 = vst.msk [vmem:[#allocation5 + $0x268] sm:$0xff] %vm1914_vm14, %v2154_v61  ;;  %2733 = vmatmul.f32.gmra.mxu3 %v2415_v52  ;;  %2795 = vmatmul.f32.gmra.mxu0 %v2411_v16  ;;  %v3467_v16 = vld [vmem:[#allocation21 + $0x180] sm:$0xff] }
 0x406   : > { %v7534_v39 = vpop.f32.mrf.mxu1  ;;  %3773 = vmatpush.msra.mxu1 %v3467_v16 }
 0x409   : > { %5201 = vmatmul.msk.f32.gmra.mxu1 %vm1743_vm12, %v2417_v32 }
 0x40b   : > { %v2630_v47 = vpop.f32.mrf.mxu2 }
 0x40c   : > { %v7537_v28 = vpop.f32.mrf.mxu0  ;;  %v7539_v5 = vpop.f32.mrf.mxu3  ;;  %v2425_v58 = vld [vmem:[#allocation5 + $0x268] sm:$0xff]  ;;  %v2631_v45 = vadd.f32 %v2630_v47, %v7466_v24  ;;  %v3496_v24 = vld [vmem:[#allocation21 + $0x268] sm:$0xff] }
 0x40d   : > { %2736 = vmatmul.f32.gmra.mxu3 %v2420_v14  ;;  %2798 = vmatmul.f32.gmra.mxu0 %v2416_v51  ;;  %v3050_v14 = vld [vmem:[#allocation6 + $0x2] sm:$0xff] }
 0x40e   : > { %v7541_v40 = vpop.f32.mrf.mxu1  ;;  %3825 = vmatpush.msra.mxu2 %v3496_v24 }
 0x411   : > { %5202 = vmatmul.msk.f32.gmra.mxu1 %vm1743_vm12, %v2422_v11  ;;  %v3495_v11 = vld [vmem:[#allocation21 + $0x260] sm:$0xff] }
 0x412   : > { %3826 = vmatpush.msra.mxu2 %v3495_v11 }
 0x413   : > { %v2633_v7 = vpop.f32.mrf.mxu2 }
 0x414   : > { %v2763_v25 = vpop.f32.mrf.mxu0  ;;  %v2634_v60 = vadd.f32 %v2633_v7, %v7475_v49 }
 0x415   : > { %2739 = vmatmul.f32.gmra.mxu3 %v2425_v58  ;;  %2801 = vmatmul.f32.gmra.mxu0 %v2421_v9 }
 0x416   : > { %v7549_v27 = vpop.f32.mrf.mxu1 }
 0x418   : > { %v7547_v26 = vpop.f32.mrf.mxu3 }
 0x419   : > { %5203 = vmatmul.msk.f32.gmra.mxu1 %vm1743_vm12, %v2427_v8 }
 0x41b   : > { %v2636_v17 = vpop.f32.mrf.mxu2 }
 0x41c   : > { %v2766_v32 = vpop.f32.mrf.mxu0  ;;  %v2637_v49 = vadd.f32 %v2636_v17, %v7483_v15  ;;  %v3494_v15 = vld [vmem:[#allocation21 + $0x258] sm:$0xff] }
 0x41d   : > { %2804 = vmatmul.f32.gmra.mxu0 %v2426_v29  ;;  %3644 = vmatmul.f32.vlgmr.msrb.gmra.mxu3 %v3018_v50 }
 0x41e   : > { %v2825_v52 = vpop.f32.mrf.mxu1  ;;  %3827 = vmatpush.msra.mxu2 %v3494_v15 }
 0x420   : > { %v2695_v55 = vpop.f32.mrf.mxu3 }
 0x421   : > { %v2696_v61 = vadd.f32 %v2695_v55, %v2631_v45 }
 0x423   : > { %v2761_v51 = vadd.f32 %v7537_v28, %v2696_v61  ;;  %v2639_v48 = vpop.f32.mrf.mxu2 }
 0x424   : > { %v2769_v13 = vpop.f32.mrf.mxu0  ;;  %v2640_v8 = vadd.f32 %v2639_v48, %v7489_v31  ;;  %v3493_v31 = vld [vmem:[#allocation21 + $0x250] sm:$0xff] }
 0x425   : > { %v2826_v22 = vadd.f32 %v2825_v52, %v2761_v51  ;;  %3709 = vmatmul.f32.vlgmr.msra.gmra.mxu0 %v3050_v14  ;;  %3828 = vmatpush.msra.mxu2 %v3493_v31 }
 0x426   : > { %v2828_v18 = vpop.f32.mrf.mxu1 }
 0x427   : > { %v2877_v37 = vmul.f32 %v7554_v44, %v2826_v22 }
 0x428   : > { %v2698_v47 = vpop.f32.mrf.mxu3 }
 0x429   : > { %v2897_v4 = vadd.f32 %v7556_v56, %v2877_v37  ;;  %v2699_v3 = vadd.f32 %v2698_v47, %v2634_v60 }
 0x42b   : > { %v7561_v28 = vmax.f32 %v2897_v4, 0.0  ;;  %v2764_v41 = vadd.f32 %v2763_v25, %v2699_v3  ;;  %v2642_v57 = vpop.f32.mrf.mxu2 }
 0x42c   : > { %v2772_v25 = vpop.f32.mrf.mxu0  ;;  %v2643_v16 = vadd.f32 %v2642_v57, %v7497_v59 }
 0x42d   : > { %2970 = vst [vmem:[#allocation6 + $0x11] sm:$0xff] %v7561_v28  ;;  %v2829_v0 = vadd.f32 %v2828_v18, %v2764_v41  ;;  %3647 = vmatmul.f32.gmra.mxu3 %v7561_v28  ;;  %v3492_v18 = vld [vmem:[#allocation21 + $0x248] sm:$0xff] }
 0x42e   : > { %v2831_v19 = vpop.f32.mrf.mxu1  ;;  %3829 = vmatpush.msra.mxu2 %v3492_v18 }
 0x42f   : > { %v2878_v43 = vmul.f32 %v7554_v44, %v2829_v0 }
 0x430   : > { %v2701_v58 = vpop.f32.mrf.mxu3 }
 0x431   : > { %v2898_v9 = vadd.f32 %v7556_v56, %v2878_v43  ;;  %v2702_v12 = vadd.f32 %v2701_v58, %v2637_v49 }
 0x433   : > { %v7568_v20 = vmax.f32 %v2898_v9, 0.0  ;;  %v2767_v7 = vadd.f32 %v2766_v32, %v2702_v12  ;;  %v2645_v50 = vpop.f32.mrf.mxu2 }
 0x434   : > { %v2987_v42 = vld [vmem:[#allocation6 + $0x10] sm:$0xff]  ;;  %v2775_v14 = vpop.f32.mrf.mxu0  ;;  %v2646_v41 = vadd.f32 %v2645_v50, %v7505_v36 }
 0x435   : > { %v7570_v21 = vld [vmem:[#allocation6 + $0x12] sm:$0xff]  ;;  %2971 = vst [vmem:[#allocation6 + $0x21] sm:$0xff] %v7568_v20  ;;  %v2832_v23 = vadd.f32 %v2831_v19, %v2767_v7  ;;  %3582 = vmatmul.f32.gmra.mxu2 %v2987_v42  ;;  %3774 = vmatmul.f32.vlgmr.msra.gmra.mxu1 %v2987_v42 }
 0x436   : > { %3712 = vmatmul.f32.gmra.mxu0 %v7570_v21  ;;  %3650 = vmatmul.f32.gmra.mxu3 %v7568_v20  ;;  %v2834_v45 = vpop.f32.mrf.mxu1  ;;  %v3491_v42 = vld [vmem:[#allocation21 + $0x240] sm:$0xff] }
 0x437   : > { %v2879_v29 = vmul.f32 %v7554_v44, %v2832_v23  ;;  %3830 = vmatpush.msra.mxu2 %v3491_v42  ;;  %v3026_v42 = vld [vmem:[#allocation6 + $0xa1] sm:$0xff] }
 0x438   : > { %v2704_v33 = vpop.f32.mrf.mxu3 }
 0x439   : > { %v2899_v34 = vadd.f32 %v7556_v56, %v2879_v29  ;;  %v2705_v35 = vadd.f32 %v2704_v33, %v2640_v8 }
 0x43b   : > { %v7578_v17 = vmax.f32 %v2899_v34, 0.0  ;;  %v2770_v53 = vadd.f32 %v2769_v13, %v2705_v35  ;;  %v2648_v37 = vpop.f32.mrf.mxu2 }
 0x43c   : > { %v7580_v55 = vld [vmem:[#allocation6 + $0x20] sm:$0xff]  ;;  %v2778_v57 = vpop.f32.mrf.mxu0  ;;  %v2649_v23 = vadd.f32 %v2648_v37, %v7512_v1  ;;  %v3490_v1 = vld [vmem:[#allocation21 + $0x238] sm:$0xff] }
 0x43d   : > { %v7582_v61 = vld [vmem:[#allocation6 + $0x22] sm:$0xff]  ;;  %2972 = vst [vmem:[#allocation6 + $0x31] sm:$0xff] %v7578_v17  ;;  %v2835_v52 = vadd.f32 %v2834_v45, %v2770_v53  ;;  %3585 = vmatmul.f32.gmra.mxu2 %v7580_v55  ;;  %3777 = vmatmul.f32.gmra.mxu1 %v7580_v55 }
 0x43e   : > { %3715 = vmatmul.f32.gmra.mxu0 %v7582_v61  ;;  %3653 = vmatmul.f32.gmra.mxu3 %v7578_v17  ;;  %v2837_v60 = vpop.f32.mrf.mxu1 }
 0x43f   : > { %v2880_v32 = vmul.f32 %v7554_v44, %v2835_v52  ;;  %3831 = vmatpush.msra.mxu2 %v3490_v1 }
 0x440   : > { %v2707_v51 = vpop.f32.mrf.mxu3 }
 0x441   : > { %v2900_v22 = vadd.f32 %v7556_v56, %v2880_v32  ;;  %v2708_v24 = vadd.f32 %v2707_v51, %v2643_v16 }
 0x443   : > { %v7592_v48 = vmax.f32 %v2900_v22, 0.0  ;;  %v2773_v47 = vadd.f32 %v2772_v25, %v2708_v24  ;;  %v2651_v12 = vpop.f32.mrf.mxu2 }
 0x444   : > { %v7594_v4 = vld [vmem:[#allocation6 + $0x30] sm:$0xff]  ;;  %v2781_v35 = vpop.f32.mrf.mxu0  ;;  %v2652_v16 = vadd.f32 %v2651_v12, %v7521_v2  ;;  %v3489_v2 = vld [vmem:[#allocation21 + $0x230] sm:$0xff] }
 0x445   : > { %v7596_v3 = vld [vmem:[#allocation6 + $0x32] sm:$0xff]  ;;  %2973 = vst [vmem:[#allocation6 + $0x41] sm:$0xff] %v7592_v48  ;;  %v2838_v59 = vadd.f32 %v2837_v60, %v2773_v47  ;;  %3588 = vmatmul.f32.gmra.mxu2 %v7594_v4  ;;  %3780 = vmatmul.f32.gmra.mxu1 %v7594_v4 }
 0x446   : > { %3718 = vmatmul.f32.gmra.mxu0 %v7596_v3  ;;  %3656 = vmatmul.f32.gmra.mxu3 %v7592_v48  ;;  %v2840_v43 = vpop.f32.mrf.mxu1 }
 0x447   : > { %v2881_v13 = vmul.f32 %v7554_v44, %v2838_v59  ;;  %3832 = vmatpush.msra.mxu2 %v3489_v2 }
 0x448   : > { %v2710_v0 = vpop.f32.mrf.mxu3 }
 0x449   : > { %v2901_v11 = vadd.f32 %v7556_v56, %v2881_v13  ;;  %v2711_v49 = vadd.f32 %v2710_v0, %v2646_v41 }
 0x44b   : > { %v7606_v58 = vmax.f32 %v2901_v11, 0.0  ;;  %v2776_v9 = vadd.f32 %v2775_v14, %v2711_v49  ;;  %v2654_v31 = vpop.f32.mrf.mxu2 }
 0x44c   : > { %v7608_v19 = vld [vmem:[#allocation6 + $0x40] sm:$0xff]  ;;  %v2784_v41 = vpop.f32.mrf.mxu0  ;;  %v2655_v13 = vadd.f32 %v2654_v31, %v7527_v38 }
 0x44d   : > { %v7610_v7 = vld [vmem:[#allocation6 + $0x42] sm:$0xff]  ;;  %2974 = vst [vmem:[#allocation6 + $0x51] sm:$0xff] %v7606_v58  ;;  %v2841_v36 = vadd.f32 %v2840_v43, %v2776_v9  ;;  %3591 = vmatmul.f32.gmra.mxu2 %v7608_v19  ;;  %3783 = vmatmul.f32.gmra.mxu1 %v7608_v19 }
 0x44e   : > { %3721 = vmatmul.f32.gmra.mxu0 %v7610_v7  ;;  %3659 = vmatmul.f32.gmra.mxu3 %v7606_v58  ;;  %v2843_v50 = vpop.f32.mrf.mxu1 }
 0x44f   : > { %v2882_v15 = vmul.f32 %v7554_v44, %v2841_v36 }
 0x450   : > { %v2713_v25 = vpop.f32.mrf.mxu3 }
 0x451   : > { %v2902_v8 = vadd.f32 %v7556_v56, %v2882_v15  ;;  %v2714_v29 = vadd.f32 %v2713_v25, %v2649_v23  ;;  %v3488_v25 = vld [vmem:[#allocation21 + $0x228] sm:$0xff] }
 0x452   : > { %3833 = vmatpush.msra.mxu2 %v3488_v25 }
 0x453   : > { %v7620_v33 = vmax.f32 %v2902_v8, 0.0  ;;  %v2779_v34 = vadd.f32 %v2778_v57, %v2714_v29  ;;  %v2657_v11 = vpop.f32.mrf.mxu2 }
 0x454   : > { %v7622_v45 = vld [vmem:[#allocation6 + $0x50] sm:$0xff]  ;;  %v2658_v8 = vadd.f32 %v2657_v11, %v7534_v39 }
 0x455   : > { %v7624_v53 = vld [vmem:[#allocation6 + $0x52] sm:$0xff]  ;;  %2975 = vst [vmem:[#allocation6 + $0x61] sm:$0xff] %v7620_v33  ;;  %v2844_v52 = vadd.f32 %v2843_v50, %v2779_v34  ;;  %3594 = vmatmul.f32.gmra.mxu2 %v7622_v45  ;;  %3786 = vmatmul.f32.gmra.mxu1 %v7622_v45  ;;  %v2787_v50 = vpop.f32.mrf.mxu0 }
 0x456   : > { %3724 = vmatmul.f32.gmra.mxu0 %v7624_v53  ;;  %3662 = vmatmul.f32.gmra.mxu3 %v7620_v33  ;;  %v2846_v24 = vpop.f32.mrf.mxu1  ;;  %v3487_v39 = vld [vmem:[#allocation21 + $0x220] sm:$0xff] }
 0x457   : > { %v2883_v32 = vmul.f32 %v7554_v44, %v2844_v52  ;;  %3834 = vmatpush.msra.mxu2 %v3487_v39 }
 0x458   : > { %v2716_v14 = vpop.f32.mrf.mxu3 }
 0x459   : > { %v2903_v51 = vadd.f32 %v7556_v56, %v2883_v32  ;;  %v2717_v22 = vadd.f32 %v2716_v14, %v2652_v16  ;;  %v3058_v16 = vld [vmem:[#allocation6 + $0xa2] sm:$0xff] }
 0x45b   : > { %v7634_v60 = vmax.f32 %v2903_v51, 0.0  ;;  %v2782_v37 = vadd.f32 %v2781_v35, %v2717_v22  ;;  %v2660_v31 = vpop.f32.mrf.mxu2 }
 0x45c   : > { %v7636_v47 = vld [vmem:[#allocation6 + $0x60] sm:$0xff] }
 0x45d   : > { %v7638_v59 = vld [vmem:[#allocation6 + $0x62] sm:$0xff]  ;;  %2976 = vst [vmem:[#allocation6 + $0x71] sm:$0xff] %v7634_v60  ;;  %v2847_v18 = vadd.f32 %v2846_v24, %v2782_v37  ;;  %3597 = vmatmul.f32.gmra.mxu2 %v7636_v47  ;;  %3789 = vmatmul.f32.gmra.mxu1 %v7636_v47  ;;  %v2661_v24 = vadd.f32 %v2660_v31, %v7541_v40  ;;  %v3486_v40 = vld [vmem:[#allocation21 + $0x218] sm:$0xff] }
 0x45e   : > { %3727 = vmatmul.f32.gmra.mxu0 %v7638_v59  ;;  %3665 = vmatmul.f32.gmra.mxu3 %v7634_v60  ;;  %v2849_v9 = vpop.f32.mrf.mxu1 }
 0x45f   : > { %v2884_v0 = vmul.f32 %v7554_v44, %v2847_v18  ;;  %3835 = vmatpush.msra.mxu2 %v3486_v40 }
 0x460   : > { %v2719_v49 = vpop.f32.mrf.mxu3 }
 0x461   : > { %v2904_v43 = vadd.f32 %v7556_v56, %v2884_v0  ;;  %v2720_v57 = vadd.f32 %v2719_v49, %v2655_v13  ;;  %v2790_v0 = vpop.f32.mrf.mxu0 }
 0x463   : > { %v7648_v12 = vmax.f32 %v2904_v43, 0.0  ;;  %v2785_v36 = vadd.f32 %v2784_v41, %v2720_v57  ;;  %v2663_v49 = vpop.f32.mrf.mxu2 }
 0x464   : > { %v7650_v23 = vld [vmem:[#allocation6 + $0x70] sm:$0xff]  ;;  %v2664_v25 = vadd.f32 %v2663_v49, %v7549_v27 }
 0x465   : > { %v7652_v15 = vld [vmem:[#allocation6 + $0x72] sm:$0xff]  ;;  %2977 = vst [vmem:[#allocation6 + $0x81] sm:$0xff] %v7648_v12  ;;  %v2850_v38 = vadd.f32 %v2849_v9, %v2785_v36  ;;  %3600 = vmatmul.f32.gmra.mxu2 %v7650_v23  ;;  %3792 = vmatmul.f32.gmra.mxu1 %v7650_v23 }
 0x466   : > { %3730 = vmatmul.f32.gmra.mxu0 %v7652_v15  ;;  %3668 = vmatmul.f32.gmra.mxu3 %v3026_v42  ;;  %v2852_v1 = vpop.f32.mrf.mxu1  ;;  %v3514_v36 = vld [vmem:[#allocation21 + $0x2f8] sm:$0xff] }
 0x467   : > { %v2885_v29 = vmul.f32 %v7554_v44, %v2850_v38  ;;  %v7678_v42 = vld [vmem:[#allocation21 + $0x378] sm:$0xff]  ;;  %v3513_v38 = vld [vmem:[#allocation21 + $0x2f0] sm:$0xff]  ;;  %3888 = vmatpush.msra.mxu3 %v3514_v36 }
 0x468   : > { %v2722_v34 = vpop.f32.mrf.mxu3  ;;  %3953 = vmatpush.msrb.mxu0 %v7678_v42  ;;  %v3510_v49 = vld [vmem:[#allocation21 + $0x2d8] sm:$0xff] }
 0x469   : > { %v2905_v35 = vadd.f32 %v7556_v56, %v2885_v29  ;;  %v2723_v52 = vadd.f32 %v2722_v34, %v2658_v8  ;;  %v7683_v29 = vld [vmem:[#allocation21 + $0x370] sm:$0xff]  ;;  %3889 = vmatpush.msra.mxu3 %v3513_v38 }
 0x46a   : > { %3954 = vmatpush.msrb.mxu0 %v7683_v29 }
 0x46b   : > { %v7661_v32 = vmax.f32 %v2905_v35, 0.0  ;;  %v2788_v14 = vadd.f32 %v2787_v50, %v2723_v52 }
 0x46c   : > { %v7663_v51 = vld [vmem:[#allocation6 + $0x80] sm:$0xff] }
 0x46d   : > { %2978 = vst [vmem:[#allocation6 + $0xb1] sm:$0xff] %v7661_v32  ;;  %v2853_v22 = vadd.f32 %v2852_v1, %v2788_v14  ;;  %3603 = vmatmul.f32.gmra.mxu2 %v7544_v10  ;;  %3795 = vmatmul.f32.gmra.mxu1 %v7663_v51 }
 0x46e   : > { %3733 = vmatmul.f32.gmra.mxu0 %v3058_v16  ;;  %3671 = vmatmul.f32.gmra.mxu3 %v7661_v32  ;;  %v2855_v13 = vpop.f32.mrf.mxu1 }
 0x46f   : > { %v2886_v37 = vmul.f32 %v7554_v44, %v2853_v22  ;;  %v3512_v22 = vld [vmem:[#allocation21 + $0x2e8] sm:$0xff] }
 0x470   : > { %v2725_v18 = vpop.f32.mrf.mxu3  ;;  %3890 = vmatpush.msra.mxu3 %v3512_v22  ;;  %v3508_v22 = vld [vmem:[#allocation21 + $0x2c8] sm:$0xff] }
 0x471   : > { %v2906_v2 = vadd.f32 %v7556_v56, %v2886_v37  ;;  %v2726_v41 = vadd.f32 %v2725_v18, %v2661_v24  ;;  %v7697_v24 = vld [vmem:[#allocation21 + $0x368] sm:$0xff]  ;;  %v3511_v37 = vld [vmem:[#allocation21 + $0x2e0] sm:$0xff] }
 0x472   : > { %v7701_v18 = vld [vmem:[#allocation21 + $0x360] sm:$0xff]  ;;  %3955 = vmatpush.msrb.mxu0 %v7697_v24  ;;  %3891 = vmatpush.msra.mxu3 %v3511_v37  ;;  %v3484_v37 = vld [vmem:[#allocation21 + $0x208] sm:$0xff] }
 0x473   : > { %v7672_v11 = vmax.f32 %v2906_v2, 0.0  ;;  %v2791_v10 = vadd.f32 %v2790_v0, %v2726_v41  ;;  %v3485_v2 = vld [vmem:[#allocation21 + $0x210] sm:$0xff]  ;;  %v2667_v41 = vadd.f32 %v7525_v30, %v7495_v46  ;;  %v3546_v0 = vld [vmem:[#allocation21 + $0x3f8] sm:$0xff]  ;;  %v3544_v46 = vld [vmem:[#allocation21 + $0x3e8] sm:$0xff] }
 0x474   : > { %v2995_v43 = vld [vmem:[#allocation6 + $0xb0] sm:$0xff]  ;;  %3836 = vmatpush.msra.mxu2 %v3485_v2  ;;  %4018 = vmatpush.msrb.mxu1 %v3546_v0  ;;  %v2670_v2 = vadd.f32 %v7532_v62, %v7503_v54  ;;  %v3541_v54 = vld [vmem:[#allocation21 + $0x3d0] sm:$0xff] }
 0x475   : > { %v7674_v57 = vld [vmem:[#allocation6 + $0xb2] sm:$0xff]  ;;  %2979 = vst [vmem:[#allocation6 + $0xc1] sm:$0xff] %v7672_v11  ;;  %v2856_v9 = vadd.f32 %v2855_v13, %v2791_v10  ;;  %3606 = vmatmul.f32.gmra.mxu2 %v2995_v43  ;;  %3798 = vmatmul.f32.gmra.mxu1 %v2995_v43 }
 0x476   : > { %3736 = vmatmul.f32.gmra.mxu0 %v7674_v57  ;;  %3674 = vmatmul.f32.gmra.mxu3 %v7672_v11  ;;  %v2858_v52 = vpop.f32.mrf.mxu1  ;;  %v7707_v43 = vld [vmem:[#allocation21 + $0x358] sm:$0xff] }
 0x477   : > { %v2887_v8 = vmul.f32 %v7554_v44, %v2856_v9  ;;  %v3545_v9 = vld [vmem:[#allocation21 + $0x3f0] sm:$0xff]  ;;  %3956 = vmatpush.msrb.mxu0 %v7701_v18  ;;  %3892 = vmatpush.msra.mxu3 %v3510_v49  ;;  %v7731_v49 = vld [vmem:[#allocation21 + $0x340] sm:$0xff] }
 0x478   : > { %v2728_v50 = vpop.f32.mrf.mxu3  ;;  %4019 = vmatpush.msrb.mxu1 %v3545_v9  ;;  %3837 = vmatpush.msra.mxu2 %v3484_v37  ;;  %v3540_v37 = vld [vmem:[#allocation21 + $0x3c8] sm:$0xff] }
 0x479   : > { %v2907_v34 = vadd.f32 %v7556_v56, %v2887_v8  ;;  %v2729_v35 = vadd.f32 %v2728_v50, %v2664_v25  ;;  %3957 = vmatpush.msrb.mxu0 %v7707_v43  ;;  %v3509_v50 = vld [vmem:[#allocation21 + $0x2d0] sm:$0xff] }
 0x47a   : > { %v2793_v1 = vpop.f32.mrf.mxu0  ;;  %4020 = vmatpush.msrb.mxu1 %v3544_v46  ;;  %3893 = vmatpush.msra.mxu3 %v3509_v50 }
 0x47b   : > { %v7688_v31 = vmax.f32 %v2907_v34, 0.0  ;;  %v2794_v27 = vadd.f32 %v2793_v1, %v2729_v35 }
 0x47c   : > { %v7690_v16 = vld [vmem:[#allocation6 + $0xc0] sm:$0xff]  ;;  %3894 = vmatpush.msra.mxu3 %v3508_v22 }
 0x47d   : > { %v7692_v14 = vld [vmem:[#allocation6 + $0xc2] sm:$0xff]  ;;  %2980 = vst [vmem:[#allocation6 + $0xd1] sm:$0xff] %v7688_v31  ;;  %v2859_v39 = vadd.f32 %v2858_v52, %v2794_v27  ;;  %3609 = vmatmul.f32.gmra.mxu2 %v7690_v16  ;;  %3801 = vmatmul.f32.gmra.mxu1 %v7690_v16  ;;  %v3543_v27 = vld [vmem:[#allocation21 + $0x3e0] sm:$0xff] }
 0x47e   : > { %3739 = vmatmul.f32.gmra.mxu0 %v7692_v14  ;;  %3677 = vmatmul.f32.gmra.mxu3 %v7688_v31  ;;  %v2861_v38 = vpop.f32.mrf.mxu1  ;;  %v7718_v52 = vld [vmem:[#allocation21 + $0x350] sm:$0xff] }
 0x47f   : > { %v2888_v13 = vmul.f32 %v7554_v44, %v2859_v39  ;;  %v7725_v39 = vld [vmem:[#allocation21 + $0x348] sm:$0xff]  ;;  %3958 = vmatpush.msrb.mxu0 %v7718_v52  ;;  %4021 = vmatpush.msrb.mxu1 %v3543_v27  ;;  %v7742_v27 = vld [vmem:[#allocation21 + $0x338] sm:$0xff] }
 0x480   : > { %v2731_v10 = vpop.f32.mrf.mxu3 }
 0x481   : > { %v2908_v40 = vadd.f32 %v7556_v56, %v2888_v13  ;;  %v2732_v36 = vadd.f32 %v2731_v10, %v2667_v41  ;;  %v3542_v13 = vld [vmem:[#allocation21 + $0x3d8] sm:$0xff]  ;;  %v3507_v10 = vld [vmem:[#allocation21 + $0x2c0] sm:$0xff]  ;;  %3959 = vmatpush.msrb.mxu0 %v7725_v39 }
 0x482   : > { %v2796_v30 = vpop.f32.mrf.mxu0  ;;  %4022 = vmatpush.msrb.mxu1 %v3542_v13  ;;  %3895 = vmatpush.msra.mxu3 %v3507_v10  ;;  %v2673_v13 = vadd.f32 %v7539_v5, %v7510_v63  ;;  %v3539_v10 = vld [vmem:[#allocation21 + $0x3c0] sm:$0xff]  ;;  %v3538_v63 = vld [vmem:[#allocation21 + $0x3b8] sm:$0xff] }
 0x483   : > { %v7711_v25 = vmax.f32 %v2908_v40, 0.0  ;;  %v2797_v8 = vadd.f32 %v2796_v30, %v2732_v36  ;;  %3960 = vmatpush.msrb.mxu0 %v7731_v49 }
 0x484   : > { %v7714_v34 = vld [vmem:[#allocation6 + $0xd0] sm:$0xff]  ;;  %4023 = vmatpush.msrb.mxu1 %v3541_v54  ;;  %v7755_v54 = vld [vmem:[#allocation21 + $0x328] sm:$0xff] }
 0x485   : > { %8420 = vst [vmem:[#allocation42_spill] sm:$0xff] %v7711_v25  ;;  %v7716_v35 = vld [vmem:[#allocation6 + $0xd2] sm:$0xff]  ;;  %v2862_v1 = vadd.f32 %v2861_v38, %v2797_v8  ;;  %3612 = vmatmul.f32.gmra.mxu2 %v7714_v34  ;;  %3804 = vmatmul.f32.gmra.mxu1 %v7714_v34 }
 0x486   : > { %2981 = vst [vmem:[#allocation6 + $0xe1] sm:$0xff] %v7711_v25  ;;  %3742 = vmatmul.f32.gmra.mxu0 %v7716_v35  ;;  %3680 = vmatmul.f32.gmra.mxu3 %v7711_v25  ;;  %v2864_v36 = vpop.f32.mrf.mxu1  ;;  %v3483_v38 = vld [vmem:[#allocation21 + $0x200] sm:$0xff]  ;;  %v3506_v8 = vld [vmem:[#allocation21 + $0x2b8] sm:$0xff] }
 0x487   : > { %v2889_v41 = vmul.f32 %v7554_v44, %v2862_v1  ;;  %3838 = vmatpush.msra.mxu2 %v3483_v38  ;;  %3896 = vmatpush.msra.mxu3 %v3506_v8 }
 0x488   : > { %v2734_v0 = vpop.f32.mrf.mxu3  ;;  %3961 = vmatpush.msrb.mxu0 %v7742_v27  ;;  %4024 = vmatpush.msrb.mxu1 %v3540_v37 }
 0x489   : > { %v2909_v9 = vadd.f32 %v7556_v56, %v2889_v41  ;;  %v2735_v40 = vadd.f32 %v2734_v0, %v2670_v2  ;;  %v3505_v2 = vld [vmem:[#allocation21 + $0x2b0] sm:$0xff] }
 0x48a   : > { %v2799_v62 = vpop.f32.mrf.mxu0  ;;  %v7749_v41 = vld [vmem:[#allocation21 + $0x330] sm:$0xff]  ;;  %3897 = vmatpush.msra.mxu3 %v3505_v2  ;;  %4025 = vmatpush.msrb.mxu1 %v3539_v10  ;;  %v3502_v10 = vld [vmem:[#allocation21 + $0x298] sm:$0xff] }
 0x48b   : > { %v7735_v46 = vmax.f32 %v2909_v9, 0.0  ;;  %v2800_v30 = vadd.f32 %v2799_v62, %v2735_v40  ;;  %v3562_v9 = vld [vmem:[#allocation21 + $0x478] sm:$0xff]  ;;  %3962 = vmatpush.msrb.mxu0 %v7749_v41 }
 0x48c   : > { %4083 = vmatpush.msrb.mxu2 %v3562_v9  ;;  %4026 = vmatpush.msrb.mxu1 %v3538_v63  ;;  %v7773_v9 = vld [vmem:[#allocation21 + $0x318] sm:$0xff] }
 0x48d   : > { %8421 = vst [vmem:[#allocation43_spill] sm:$0xff] %v7735_v46  ;;  %v7738_v50 = vld [vmem:[#allocation6 + $0xe0] sm:$0xff]  ;;  %v2865_v22 = vadd.f32 %v2864_v36, %v2800_v30  ;;  %3963 = vmatpush.msrb.mxu0 %v7755_v54 }
 0x48e   : > { %v7740_v1 = vld [vmem:[#allocation6 + $0xe2] sm:$0xff]  ;;  %2982 = vst [vmem:[#allocation6 + $0xf1] sm:$0xff] %v7735_v46  ;;  %3615 = vmatmul.f32.gmra.mxu2 %v7738_v50  ;;  %3807 = vmatmul.f32.gmra.mxu1 %v7738_v50  ;;  %v2867_v5 = vpop.f32.mrf.mxu1 }
 0x48f   : > { %8422 = vst [vmem:[#allocation44_spill] sm:$0xff] %v7740_v1  ;;  %3745 = vmatmul.f32.gmra.mxu0 %v7740_v1  ;;  %3683 = vmatmul.f32.gmra.mxu3 %v7735_v46  ;;  %v2890_v0 = vmul.f32 %v7554_v44, %v2865_v22  ;;  %v3504_v36 = vld [vmem:[#allocation21 + $0x2a8] sm:$0xff]  ;;  %v3503_v46 = vld [vmem:[#allocation21 + $0x2a0] sm:$0xff] }
 0x490   : > { %v2737_v40 = vpop.f32.mrf.mxu3  ;;  %3898 = vmatpush.msra.mxu3 %v3504_v36  ;;  %v2676_v36 = vadd.f32 %v7547_v26, %v7518_v6 }
 0x491   : > { %v2910_v62 = vadd.f32 %v7556_v56, %v2890_v0  ;;  %v2738_v38 = vadd.f32 %v2737_v40, %v2673_v13  ;;  %v7766_v0 = vld [vmem:[#allocation21 + $0x320] sm:$0xff]  ;;  %v3537_v13 = vld [vmem:[#allocation21 + $0x3b0] sm:$0xff] }
 0x492   : > { %v2802_v30 = vpop.f32.mrf.mxu0  ;;  %v3561_v40 = vld [vmem:[#allocation21 + $0x470] sm:$0xff]  ;;  %3899 = vmatpush.msra.mxu3 %v3503_v46  ;;  %3964 = vmatpush.msrb.mxu0 %v7766_v0 }
 0x493   : > { %v7759_v8 = vmax.f32 %v2910_v62, 0.0  ;;  %v2803_v22 = vadd.f32 %v2802_v30, %v2738_v38  ;;  %v3536_v38 = vld [vmem:[#allocation21 + $0x3a8] sm:$0xff]  ;;  %v7779_v30 = vld [vmem:[#allocation21 + $0x310] sm:$0xff]  ;;  %4027 = vmatpush.msrb.mxu1 %v3537_v13  ;;  %4084 = vmatpush.msrb.mxu2 %v3561_v40 }
 0x494   : > { %3900 = vmatpush.msra.mxu3 %v3502_v10  ;;  %3965 = vmatpush.msrb.mxu0 %v7773_v9  ;;  %v7790_v40 = vld [vmem:[#allocation21 + $0x308] sm:$0xff] }
 0x495   : > { %8423 = vst [vmem:[#allocation45_spill] sm:$0xff] %v7759_v8  ;;  %v7762_v25 = vld [vmem:[#allocation6 + $0xf0] sm:$0xff]  ;;  %v2868_v2 = vadd.f32 %v2867_v5, %v2803_v22  ;;  %v3501_v5 = vld [vmem:[#allocation21 + $0x290] sm:$0xff]  ;;  %4028 = vmatpush.msrb.mxu1 %v3536_v38  ;;  %v3560_v38 = vld [vmem:[#allocation21 + $0x468] sm:$0xff] }
 0x496   : > { %8424 = vst [vmem:[#allocation46_spill] sm:$0xff] %v7762_v25  ;;  %v7764_v37 = vld [vmem:[#allocation6 + $0xf2] sm:$0xff]  ;;  %3618 = vmatmul.f32.gmra.mxu2 %v7762_v25  ;;  %3810 = vmatmul.f32.gmra.mxu1 %v7762_v25  ;;  %v2870_v26 = vpop.f32.mrf.mxu1  ;;  %v3500_v25 = vld [vmem:[#allocation21 + $0x288] sm:$0xff] }
 0x497   : > { %8425 = vst [vmem:[#allocation47_spill] sm:$0xff] %v7764_v37  ;;  %3748 = vmatmul.f32.gmra.mxu0 %v7764_v37  ;;  %3686 = vmatmul.f32.gmra.mxu3 %v7759_v8  ;;  %v2891_v62 = vmul.f32 %v7554_v44, %v2868_v2  ;;  %v3535_v37 = vld [vmem:[#allocation21 + $0x3a0] sm:$0xff] }
 0x498   : > { %2983 = vst [vmem:[#allocation6 + $0x101] sm:$0xff] %v7759_v8  ;;  %v2740_v63 = vpop.f32.mrf.mxu3  ;;  %3901 = vmatpush.msra.mxu3 %v3501_v5  ;;  %3966 = vmatpush.msrb.mxu0 %v7779_v30 }
 0x499   : > { %v2911_v22 = vadd.f32 %v7556_v56, %v2891_v62  ;;  %v2741_v8 = vadd.f32 %v2740_v63, %v2676_v36  ;;  %4029 = vmatpush.msrb.mxu1 %v3535_v37  ;;  %v3534_v36 = vld [vmem:[#allocation21 + $0x398] sm:$0xff]  ;;  %v7797_v62 = vld [vmem:[#allocation21 + $0x300] sm:$0xff]  ;;  %v3533_v37 = vld [vmem:[#allocation21 + $0x390] sm:$0xff]  ;;  %4085 = vmatpush.msrb.mxu2 %v3560_v38 }
 0x49a   : > { %v2805_v6 = vpop.f32.mrf.mxu0  ;;  %3902 = vmatpush.msra.mxu3 %v3500_v25  ;;  %3967 = vmatpush.msrb.mxu0 %v7790_v40  ;;  %v3531_v25 = vld [vmem:[#allocation21 + $0x380] sm:$0xff] }
 0x49b   : > { %v7783_v46 = vmax.f32 %v2911_v22, 0.0  ;;  %v2806_v2 = vadd.f32 %v2805_v6, %v2741_v8  ;;  %v3499_v8 = vld [vmem:[#allocation21 + $0x280] sm:$0xff]  ;;  %4030 = vmatpush.msrb.mxu1 %v3534_v36  ;;  %v3532_v22 = vld [vmem:[#allocation21 + $0x388] sm:$0xff] }
 0x49c   : > { %3903 = vmatpush.msra.mxu3 %v3499_v8  ;;  %3968 = vmatpush.msrb.mxu0 %v7797_v62 }
 0x49d   : > { %2984 = vst [vmem:[#allocation6 + $0x111] sm:$0xff] %v7783_v46  ;;  %v2871_v10 = vadd.f32 %v2870_v26, %v2806_v2  ;;  %4031 = vmatpush.msrb.mxu1 %v3533_v37 }
 0x49e   : > { %5468 = vmatpush.msrb.mxu3 %v7678_v42  ;;  %v3559_v42 = vld [vmem:[#allocation21 + $0x460] sm:$0xff] }
 0x49f   : > { %v7786_v1 = vld [vmem:[#allocation6 + $0x100] sm:$0xff]  ;;  %3689 = vmatmul.f32.gmra.mxu3 %v7783_v46  ;;  %v2892_v63 = vmul.f32 %v7554_v44, %v2871_v10  ;;  %4032 = vmatpush.msrb.mxu1 %v3532_v22  ;;  %v7830_v10 = vpop.f32.mrf.mxu2 }
 0x4a0   : > { %v7788_v13 = vld [vmem:[#allocation6 + $0x102] sm:$0xff]  ;;  %3621 = vmatmul.f32.gmra.mxu2 %v7786_v1  ;;  %3813 = vmatmul.f32.gmra.mxu1 %v7786_v1 }
 0x4a1   : > { %3751 = vmatmul.f32.gmra.mxu0 %v7788_v13  ;;  %v2912_v5 = vadd.f32 %v7556_v56, %v2892_v63  ;;  %5469 = vmatpush.msrb.mxu3 %v7683_v29  ;;  %v7816_v56 = vpop.f32.mrf.mxu3 }
 0x4a2   : > { %4033 = vmatpush.msrb.mxu1 %v3531_v25  ;;  %4086 = vmatpush.msrb.mxu2 %v3559_v42  ;;  %v7818_v2 = vpop.f32.mrf.mxu0 }
 0x4a3   : > { %v7804_v6 = vmax.f32 %v2912_v5, 0.0  ;;  %5470 = vmatpush.msrb.mxu3 %v7697_v24 }
 0x4a4   : > { %v7806_v26 = vld [vmem:[#allocation6 + $0x110] sm:$0xff] }
 0x4a5   : > { %v7808_v44 = vld [vmem:[#allocation6 + $0x112] sm:$0xff]  ;;  %2985 = vst [vmem:[#allocation6 + $0x121] sm:$0xff] %v7804_v6  ;;  %5471 = vmatpush.msrb.mxu3 %v7701_v18 }
 0x4a7   : > { %3904 = vmatmul.f32.vlgmr.msra.gmra.mxu3 %v7570_v21  ;;  %v3558_v21 = vld [vmem:[#allocation21 + $0x458] sm:$0xff] }
 0x4a8   : > { %3624 = vmatmul.f32.gmra.mxu2 %v7806_v26  ;;  %3816 = vmatmul.f32.gmra.mxu1 %v7806_v26 }
 0x4a9   : > { %3754 = vmatmul.f32.gmra.mxu0 %v7808_v44  ;;  %5472 = vmatpush.msrb.mxu3 %v7707_v43 }
 0x4aa   : > { %4087 = vmatpush.msrb.mxu2 %v3558_v21  ;;  %v7886_v21 = vld [vmem:[#allocation6 + $0x82] sm:$0xff] }
 0x4ab   : > { %5473 = vmatpush.msrb.mxu3 %v7718_v52 }
 0x4ac   : > { %v7822_v29 = vld [vmem:[#allocation6 + $0x120] sm:$0xff] }
 0x4ad   : > { %5474 = vmatpush.msrb.mxu3 %v7725_v39 }
 0x4af   : > { %3907 = vmatmul.f32.gmra.mxu3 %v7582_v61 }
 0x4b0   : > { %3839 = vmatmul.f32.vlgmr.msra.gmra.mxu2 %v7561_v28  ;;  %3819 = vmatmul.f32.gmra.mxu1 %v7822_v29  ;;  %v3648_v24 = vpop.f32.mrf.mxu3  ;;  %v3557_v28 = vld [vmem:[#allocation21 + $0x450] sm:$0xff] }
 0x4b1   : > { %3969 = vmatmul.f32.vlgmr.msrb.gmra.mxu0 %v7580_v55  ;;  %5475 = vmatpush.msrb.mxu3 %v7731_v49 }
 0x4b2   : > { %v7833_v36 = vpop.f32.mrf.mxu1  ;;  %4088 = vmatpush.msrb.mxu2 %v3557_v28 }
 0x4b3   : > { %v3713_v18 = vpop.f32.mrf.mxu0  ;;  %5476 = vmatpush.msrb.mxu3 %v7742_v27 }
 0x4b5   : > { %5477 = vmatpush.msrb.mxu3 %v7749_v41 }
 0x4b7   : > { %3910 = vmatmul.f32.gmra.mxu3 %v7596_v3 }
 0x4b8   : > { %3842 = vmatmul.f32.gmra.mxu2 %v7568_v20  ;;  %4034 = vmatmul.f32.vlgmr.msrb.gmra.mxu1 %v7568_v20  ;;  %v3583_v55 = vpop.f32.mrf.mxu2  ;;  %v3556_v20 = vld [vmem:[#allocation21 + $0x448] sm:$0xff] }
 0x4b9   : > { %3972 = vmatmul.f32.gmra.mxu0 %v7594_v4  ;;  %v3649_v61 = vadd.f32 %v3648_v24, %v3583_v55  ;;  %v3651_v43 = vpop.f32.mrf.mxu3  ;;  %5478 = vmatpush.msrb.mxu3 %v7755_v54 }
 0x4ba   : > { %v7844_v49 = vpop.f32.mrf.mxu1  ;;  %4089 = vmatpush.msrb.mxu2 %v3556_v20 }
 0x4bb   : > { %v3716_v52 = vpop.f32.mrf.mxu0  ;;  %v7842_v39 = vadd.f32 %v3713_v18, %v3649_v61  ;;  %5479 = vmatpush.msrb.mxu3 %v7766_v0  ;;  %v7895_v61 = vld [vmem:[#allocation6] sm:$0xff] }
 0x4bd   : > { %5480 = vmatpush.msrb.mxu3 %v7773_v9 }
 0x4bf   : > { %3913 = vmatmul.f32.gmra.mxu3 %v7610_v7 }
 0x4c0   : > { %3845 = vmatmul.f32.gmra.mxu2 %v7578_v17  ;;  %4037 = vmatmul.f32.gmra.mxu1 %v7578_v17  ;;  %v3586_v4 = vpop.f32.mrf.mxu2  ;;  %v3555_v17 = vld [vmem:[#allocation21 + $0x440] sm:$0xff] }
 0x4c1   : > { %3975 = vmatmul.f32.gmra.mxu0 %v7608_v19  ;;  %v3652_v3 = vadd.f32 %v3651_v43, %v3586_v4  ;;  %v3654_v27 = vpop.f32.mrf.mxu3  ;;  %5481 = vmatpush.msrb.mxu3 %v7779_v30 }
 0x4c2   : > { %v7855_v54 = vpop.f32.mrf.mxu1  ;;  %4090 = vmatpush.msrb.mxu2 %v3555_v17 }
 0x4c3   : > { %v3719_v41 = vpop.f32.mrf.mxu0  ;;  %v7853_v8 = vadd.f32 %v3716_v52, %v3652_v3  ;;  %5482 = vmatpush.msrb.mxu3 %v7790_v40 }
 0x4c5   : > { %5483 = vmatpush.msrb.mxu3 %v7797_v62 }
 0x4c7   : > { %3916 = vmatmul.f32.gmra.mxu3 %v7624_v53 }
 0x4c8   : > { %3848 = vmatmul.f32.gmra.mxu2 %v7592_v48  ;;  %4040 = vmatmul.f32.gmra.mxu1 %v7592_v48  ;;  %v3589_v19 = vpop.f32.mrf.mxu2  ;;  %v3554_v48 = vld [vmem:[#allocation21 + $0x438] sm:$0xff] }
 0x4c9   : > { %3978 = vmatmul.f32.gmra.mxu0 %v7622_v45  ;;  %v3655_v7 = vadd.f32 %v3654_v27, %v3589_v19  ;;  %v3657_v0 = vpop.f32.mrf.mxu3  ;;  %4091 = vmatpush.msrb.mxu2 %v3554_v48  ;;  %v3218_v27 = vld [vmem:[#allocation6 + $0x91] sm:$0xff] }
 0x4ca   : > { %v7866_v30 = vpop.f32.mrf.mxu1 }
 0x4cb   : > { %v3722_v9 = vpop.f32.mrf.mxu0  ;;  %v7864_v38 = vadd.f32 %v3719_v41, %v3655_v7 }
 0x4cf   : > { %3919 = vmatmul.f32.gmra.mxu3 %v7638_v59 }
 0x4d0   : > { %3851 = vmatmul.f32.gmra.mxu2 %v7606_v58  ;;  %4043 = vmatmul.f32.gmra.mxu1 %v7606_v58  ;;  %v3592_v45 = vpop.f32.mrf.mxu2  ;;  %v3553_v58 = vld [vmem:[#allocation21 + $0x430] sm:$0xff] }
 0x4d1   : > { %3981 = vmatmul.f32.gmra.mxu0 %v7636_v47  ;;  %v3658_v53 = vadd.f32 %v3657_v0, %v3592_v45  ;;  %v3660_v40 = vpop.f32.mrf.mxu3  ;;  %4092 = vmatpush.msrb.mxu2 %v3553_v58 }
 0x4d2   : > { %v7874_v37 = vpop.f32.mrf.mxu1 }
 0x4d3   : > { %v3725_v63 = vpop.f32.mrf.mxu0  ;;  %v7872_v62 = vadd.f32 %v3722_v9, %v3658_v53 }
 0x4d7   : > { %3922 = vmatmul.f32.gmra.mxu3 %v7652_v15 }
 0x4d8   : > { %3854 = vmatmul.f32.gmra.mxu2 %v7620_v33  ;;  %4046 = vmatmul.f32.gmra.mxu1 %v7620_v33  ;;  %v3595_v47 = vpop.f32.mrf.mxu2  ;;  %v3552_v33 = vld [vmem:[#allocation21 + $0x428] sm:$0xff] }
 0x4d9   : > { %3984 = vmatmul.f32.gmra.mxu0 %v7650_v23  ;;  %v3661_v59 = vadd.f32 %v3660_v40, %v3595_v47  ;;  %v3663_v5 = vpop.f32.mrf.mxu3  ;;  %4093 = vmatpush.msrb.mxu2 %v3552_v33 }
 0x4da   : > { %v7882_v42 = vpop.f32.mrf.mxu1 }
 0x4db   : > { %v3728_v22 = vpop.f32.mrf.mxu0  ;;  %v7880_v25 = vadd.f32 %v3725_v63, %v3661_v59 }
 0x4df   : > { %3925 = vmatmul.f32.gmra.mxu3 %v7886_v21 }
 0x4e0   : > { %3857 = vmatmul.f32.gmra.mxu2 %v7634_v60  ;;  %4049 = vmatmul.f32.gmra.mxu1 %v7634_v60  ;;  %v3598_v23 = vpop.f32.mrf.mxu2  ;;  %v3551_v60 = vld [vmem:[#allocation21 + $0x420] sm:$0xff] }
 0x4e1   : > { %3987 = vmatmul.f32.gmra.mxu0 %v7663_v51  ;;  %v3664_v15 = vadd.f32 %v3663_v5, %v3598_v23  ;;  %v3666_v24 = vpop.f32.mrf.mxu3  ;;  %4094 = vmatpush.msrb.mxu2 %v3551_v60  ;;  %v8427_v23 = vld [vmem:[#allocation42_spill] sm:$0xff] }
 0x4e2   : > { %v7892_v55 = vpop.f32.mrf.mxu1 }
 0x4e3   : > { %v3731_v18 = vpop.f32.mrf.mxu0  ;;  %v7890_v28 = vadd.f32 %v3728_v22, %v3664_v15  ;;  %v8428_v15 = vld [vmem:[#allocation46_spill] sm:$0xff] }
 0x4e7   : > { %3928 = vmatmul.f32.gmra.mxu3 %v7674_v57 }
 0x4e8   : > { %3860 = vmatmul.f32.gmra.mxu2 %v7648_v12  ;;  %4052 = vmatmul.f32.gmra.mxu1 %v7648_v12  ;;  %v3601_v51 = vpop.f32.mrf.mxu2  ;;  %v3550_v12 = vld [vmem:[#allocation21 + $0x418] sm:$0xff] }
 0x4e9   : > { %3990 = vmatmul.f32.gmra.mxu0 %v7895_v61  ;;  %v3667_v43 = vadd.f32 %v3666_v24, %v3601_v51  ;;  %v3669_v52 = vpop.f32.mrf.mxu3  ;;  %4095 = vmatpush.msrb.mxu2 %v3550_v12 }
 0x4ea   : > { %v7902_v3 = vpop.f32.mrf.mxu1 }
 0x4eb   : > { %v3734_v20 = vpop.f32.mrf.mxu0  ;;  %v7900_v4 = vadd.f32 %v3731_v18, %v3667_v43 }
 0x4ef   : > { %3931 = vmatmul.f32.gmra.mxu3 %v7692_v14 }
 0x4f0   : > { %3863 = vmatmul.f32.gmra.mxu2 %v7661_v32  ;;  %4055 = vmatmul.f32.gmra.mxu1 %v3218_v27  ;;  %v3604_v57 = vpop.f32.mrf.mxu2  ;;  %v3549_v32 = vld [vmem:[#allocation21 + $0x410] sm:$0xff] }
 0x4f1   : > { %3993 = vmatmul.f32.gmra.mxu0 %v7690_v16  ;;  %v3670_v41 = vadd.f32 %v3669_v52, %v3604_v57  ;;  %v3672_v17 = vpop.f32.mrf.mxu3  ;;  %4096 = vmatpush.msrb.mxu2 %v3549_v32  ;;  %v8430_v27 = vld [vmem:[#allocation43_spill] sm:$0xff] }
 0x4f2   : > { %v3799_v0 = vpop.f32.mrf.mxu1 }
 0x4f3   : > { %v3737_v19 = vpop.f32.mrf.mxu0  ;;  %v3735_v7 = vadd.f32 %v3734_v20, %v3670_v41 }
 0x4f5   : > { %v7907_v9 = vadd.f32 %v3799_v0, %v3735_v7  ;;  %v8431_v0 = vld [vmem:[#allocation45_spill] sm:$0xff] }
 0x4f7   : > { %3934 = vmatmul.f32.gmra.mxu3 %v7716_v35 }
 0x4f8   : > { %3866 = vmatmul.f32.gmra.mxu2 %v7672_v11  ;;  %4058 = vmatmul.f32.gmra.mxu1 %v7672_v11  ;;  %v3607_v16 = vpop.f32.mrf.mxu2  ;;  %v3548_v11 = vld [vmem:[#allocation21 + $0x408] sm:$0xff] }
 0x4f9   : > { %3996 = vmatmul.f32.gmra.mxu0 %v7714_v34  ;;  %v3673_v14 = vadd.f32 %v3672_v17, %v3607_v16  ;;  %v3675_v48 = vpop.f32.mrf.mxu3  ;;  %v8426_v34 = vld [vmem:[#allocation44_spill] sm:$0xff]  ;;  %4097 = vmatpush.msrb.mxu2 %v3548_v11 }
 0x4fa   : > { %v3802_v40 = vpop.f32.mrf.mxu1 }
 0x4fb   : > { %v3740_v45 = vpop.f32.mrf.mxu0  ;;  %v3738_v53 = vadd.f32 %v3737_v19, %v3673_v14 }
 0x4fd   : > { %v7913_v63 = vadd.f32 %v3802_v40, %v3738_v53  ;;  %v7940_v53 = vld [vmem:[#allocation6 + $0x122] sm:$0xff] }
 0x4ff   : > { %3937 = vmatmul.f32.gmra.mxu3 %v8426_v34 }
 0x500   : > { %3869 = vmatmul.f32.gmra.mxu2 %v7688_v31  ;;  %4061 = vmatmul.f32.gmra.mxu1 %v7688_v31  ;;  %v3610_v35 = vpop.f32.mrf.mxu2  ;;  %v3547_v31 = vld [vmem:[#allocation21 + $0x400] sm:$0xff] }
 0x501   : > { %3999 = vmatmul.f32.gmra.mxu0 %v7738_v50  ;;  %v3676_v58 = vadd.f32 %v3675_v48, %v3610_v35  ;;  %v3678_v47 = vpop.f32.mrf.mxu3  ;;  %v8429_v50 = vld [vmem:[#allocation47_spill] sm:$0xff]  ;;  %4098 = vmatpush.msrb.mxu2 %v3547_v31 }
 0x502   : > { %v3805_v22 = vpop.f32.mrf.mxu1  ;;  %v3243_v31 = vld [vmem:[#allocation6 + $0x22] sm:$0xff] }
 0x503   : > { %v3743_v59 = vpop.f32.mrf.mxu0  ;;  %v3741_v5 = vadd.f32 %v3740_v45, %v3676_v58 }
 0x505   : > { %v7919_v33 = vadd.f32 %v3805_v22, %v3741_v5 }
 0x507   : > { %3940 = vmatmul.f32.gmra.mxu3 %v8429_v50 }
 0x508   : > { %3872 = vmatmul.f32.gmra.mxu2 %v8427_v23  ;;  %4064 = vmatmul.f32.gmra.mxu1 %v8427_v23  ;;  %v3613_v24 = vpop.f32.mrf.mxu2 }
 0x509   : > { %4002 = vmatmul.f32.gmra.mxu0 %v8428_v15  ;;  %v3679_v18 = vadd.f32 %v3678_v47, %v3613_v24  ;;  %v3681_v60 = vpop.f32.mrf.mxu3  ;;  %v3226_v15 = vld [vmem:[#allocation6 + $0x131] sm:$0xff] }
 0x50b   : > { %v3744_v51 = vadd.f32 %v3743_v59, %v3679_v18  ;;  %v3808_v43 = vpop.f32.mrf.mxu1 }
 0x50c   : > { %v3746_v52 = vpop.f32.mrf.mxu0 }
 0x50d   : > { %v7925_v20 = vadd.f32 %v3808_v43, %v3744_v51  ;;  %v3245_v43 = vld [vmem:[#allocation6 + $0x42] sm:$0xff] }
 0x50f   : > { %3943 = vmatmul.f32.gmra.mxu3 %v7788_v13 }
 0x510   : > { %3875 = vmatmul.f32.gmra.mxu2 %v8430_v27  ;;  %4067 = vmatmul.f32.gmra.mxu1 %v8430_v27 }
 0x511   : > { %4005 = vmatmul.f32.gmra.mxu0 %v7786_v1  ;;  %v3616_v12 = vpop.f32.mrf.mxu2 }
 0x512   : > { %v3682_v57 = vadd.f32 %v3681_v60, %v3616_v12  ;;  %v3684_v19 = vpop.f32.mrf.mxu3  ;;  %v3244_v60 = vld [vmem:[#allocation6 + $0x32] sm:$0xff] }
 0x513   : > { %v3811_v17 = vpop.f32.mrf.mxu1 }
 0x514   : > { %v3747_v41 = vadd.f32 %v3746_v52, %v3682_v57  ;;  %v3749_v32 = vpop.f32.mrf.mxu0  ;;  %v3782_v52 = vadd.f32 %v7855_v54, %v7853_v8  ;;  %v3785_v57 = vadd.f32 %v7866_v30, %v7864_v38  ;;  %v3248_v8 = vld [vmem:[#allocation6 + $0x72] sm:$0xff]  ;;  %v3791_v54 = vadd.f32 %v7882_v42, %v7880_v25  ;;  %v3251_v25 = vld [vmem:[#allocation6 + $0xc2] sm:$0xff] }
 0x515   : > { %v3794_v38 = vadd.f32 %v7892_v55, %v7890_v28 }
 0x516   : > { %v7931_v7 = vadd.f32 %v3811_v17, %v3747_v41 }
 0x517   : > { %3946 = vmatmul.f32.gmra.mxu3 %v7808_v44 }
 0x518   : > { %3878 = vmatmul.f32.gmra.mxu2 %v8431_v0  ;;  %4070 = vmatmul.f32.gmra.mxu1 %v8431_v0 }
 0x519   : > { %4008 = vmatmul.f32.gmra.mxu0 %v7806_v26  ;;  %v3619_v1 = vpop.f32.mrf.mxu2 }
 0x51a   : > { %v3685_v16 = vadd.f32 %v3684_v19, %v3619_v1  ;;  %v3687_v40 = vpop.f32.mrf.mxu3 }
 0x51c   : > { %v3750_v14 = vadd.f32 %v3749_v32, %v3685_v16 }
 0x51d   : > { %v3814_v48 = vpop.f32.mrf.mxu1 }
 0x51e   : > { %v7937_v45 = vadd.f32 %v3814_v48, %v3750_v14  ;;  %v3752_v26 = vpop.f32.mrf.mxu0 }
 0x51f   : > { %3949 = vmatmul.f32.gmra.mxu3 %v7940_v53 }
 0x520   : > { %3881 = vmatmul.f32.gmra.mxu2 %v7783_v46  ;;  %4073 = vmatmul.f32.gmra.mxu1 %v7783_v46 }
 0x522   : > { %v3690_v5 = vpop.f32.mrf.mxu3 }
 0x523   : > { %v3622_v34 = vpop.f32.mrf.mxu2 }
 0x524   : > { %v3688_v11 = vadd.f32 %v3687_v40, %v3622_v34  ;;  %v3253_v34 = vld [vmem:[#allocation6 + $0xe2] sm:$0xff] }
 0x525   : > { %v3817_v58 = vpop.f32.mrf.mxu1 }
 0x526   : > { %v3753_v35 = vadd.f32 %v3752_v26, %v3688_v11  ;;  %v3755_v46 = vpop.f32.mrf.mxu0 }
 0x527   : > { %4011 = vmatmul.f32.vlgmr.msrb.gmra.mxu3 %v7822_v29 }
 0x528   : > { %v7944_v47 = vadd.f32 %v3817_v58, %v3753_v35  ;;  %3884 = vmatmul.f32.gmra.mxu2 %v7804_v6  ;;  %4076 = vmatmul.f32.gmra.mxu1 %v7804_v6  ;;  %v3779_v6 = vadd.f32 %v7844_v49, %v7842_v39  ;;  %v3247_v39 = vld [vmem:[#allocation6 + $0x62] sm:$0xff]  ;;  %v3788_v49 = vadd.f32 %v7874_v37, %v7872_v62  ;;  %v3250_v62 = vld [vmem:[#allocation6 + $0x92] sm:$0xff] }
 0x529   : > { %v3797_v37 = vadd.f32 %v7902_v3, %v7900_v4  ;;  %v3254_v35 = vld [vmem:[#allocation6 + $0xf2] sm:$0xff] }
 0x52a   : > { %v3905_v28 = vpop.f32.mrf.mxu3 }
 0x52b   : > { %v3625_v59 = vpop.f32.mrf.mxu2 }
 0x52c   : > { %v3691_v22 = vadd.f32 %v3690_v5, %v3625_v59 }
 0x52d   : > { %v3820_v50 = vpop.f32.mrf.mxu1 }
 0x52e   : > { %v3756_v23 = vadd.f32 %v3755_v46, %v3691_v22  ;;  %v3970_v5 = vpop.f32.mrf.mxu0 }
 0x52f   : > { %4014 = vmatmul.f32.gmra.mxu3 %v7895_v61  ;;  %v3246_v61 = vld [vmem:[#allocation6 + $0x52] sm:$0xff] }
 0x530   : > { %v7949_v24 = vadd.f32 %v3820_v50, %v3756_v23  ;;  %4099 = vmatmul.f32.vlgmr.msrb.gmra.mxu2 %v3243_v31  ;;  %4079 = vmatmul.f32.gmra.mxu1 %v3226_v15  ;;  %v3646_v15 = vadd.f32 %v7816_v56, %v7830_v10 }
 0x532   : > { %v3908_v11 = vpop.f32.mrf.mxu3 }
 0x533   : > { %v7952_v18 = vpop.f32.mrf.mxu2 }
 0x535   : > { %v4035_v22 = vpop.f32.mrf.mxu1 }
 0x536   : > { %v3973_v50 = vpop.f32.mrf.mxu0 }
 0x538   : > { %4102 = vmatmul.f32.gmra.mxu2 %v3244_v60 }
 0x53a   : > { %v3911_v59 = vpop.f32.mrf.mxu3 }
 0x53b   : > { %v3843_v29 = vpop.f32.mrf.mxu2 }
 0x53c   : > { %v7956_v51 = vadd.f32 %v3843_v29, %v3779_v6 }
 0x53d   : > { %v4038_v31 = vpop.f32.mrf.mxu1 }
 0x53e   : > { %v3976_v56 = vpop.f32.mrf.mxu0 }
 0x540   : > { %4105 = vmatmul.f32.gmra.mxu2 %v3245_v43 }
 0x542   : > { %v3914_v23 = vpop.f32.mrf.mxu3 }
 0x543   : > { %v3846_v27 = vpop.f32.mrf.mxu2 }
 0x544   : > { %v7960_v12 = vadd.f32 %v3846_v27, %v3782_v52 }
 0x545   : > { %v4041_v10 = vpop.f32.mrf.mxu1 }
 0x548   : > { %4108 = vmatmul.f32.gmra.mxu2 %v3246_v61  ;;  %v3979_v61 = vpop.f32.mrf.mxu0 }
 0x54a   : > { %v3917_v60 = vpop.f32.mrf.mxu3 }
 0x54b   : > { %v3849_v41 = vpop.f32.mrf.mxu2 }
 0x54c   : > { %v7964_v17 = vadd.f32 %v3849_v41, %v3785_v57 }
 0x54d   : > { %v4044_v57 = vpop.f32.mrf.mxu1 }
 0x550   : > { %4111 = vmatmul.f32.gmra.mxu2 %v3247_v39 }
 0x552   : > { %v3920_v52 = vpop.f32.mrf.mxu3 }
 0x553   : > { %v3852_v19 = vpop.f32.mrf.mxu2 }
 0x554   : > { %v7968_v0 = vadd.f32 %v3852_v19, %v3788_v49 }
 0x558   : > { %4114 = vmatmul.f32.gmra.mxu2 %v3248_v8 }
 0x55a   : > { %v3923_v19 = vpop.f32.mrf.mxu3 }
 0x55b   : > { %v3855_v32 = vpop.f32.mrf.mxu2 }
 0x55c   : > { %v7972_v1 = vadd.f32 %v3855_v32, %v3791_v54 }
 0x560   : > { %4117 = vmatmul.f32.gmra.mxu2 %v7886_v21  ;;  %v3252_v21 = vld [vmem:[#allocation6 + $0xd2] sm:$0xff] }
 0x563   : > { %v3858_v30 = vpop.f32.mrf.mxu2 }
 0x564   : > { %v7977_v16 = vadd.f32 %v3858_v30, %v3794_v38  ;;  %v3912_v38 = vadd.f32 %v3911_v59, %v7960_v12  ;;  %v3982_v30 = vpop.f32.mrf.mxu0 }
 0x568   : > { %4120 = vmatmul.f32.gmra.mxu2 %v3250_v62 }
 0x56b   : > { %v3861_v14 = vpop.f32.mrf.mxu2 }
 0x56c   : > { %v7981_v48 = vadd.f32 %v3861_v14, %v3797_v37  ;;  %v4047_v37 = vpop.f32.mrf.mxu1 }
 0x570   : > { %4123 = vmatmul.f32.gmra.mxu2 %v3251_v25  ;;  %v3977_v25 = vadd.f32 %v3976_v56, %v3912_v38  ;;  %v3921_v56 = vadd.f32 %v3920_v52, %v7972_v1 }
 0x573   : > { %v3864_v42 = vpop.f32.mrf.mxu2 }
 0x574   : > { %v7984_v40 = vadd.f32 %v3864_v42, %v7907_v9 }
 0x578   : > { %4126 = vmatmul.f32.gmra.mxu2 %v3252_v21  ;;  %v3926_v21 = vpop.f32.mrf.mxu3 }
 0x57b   : > { %v3867_v55 = vpop.f32.mrf.mxu2 }
 0x57c   : > { %v7987_v26 = vadd.f32 %v3867_v55, %v7913_v63  ;;  %v4042_v55 = vadd.f32 %v4041_v10, %v3977_v25 }
 0x580   : > { %4129 = vmatmul.f32.gmra.mxu2 %v3253_v34  ;;  %v3915_v34 = vadd.f32 %v3914_v23, %v7964_v17 }
 0x582   : > { %v3980_v59 = vadd.f32 %v3979_v61, %v3915_v34 }
 0x583   : > { %v3870_v4 = vpop.f32.mrf.mxu2 }
 0x584   : > { %v7990_v3 = vadd.f32 %v3870_v4, %v7919_v33 }
 0x588   : > { %4132 = vmatmul.f32.gmra.mxu2 %v3254_v35  ;;  %v3985_v35 = vpop.f32.mrf.mxu0 }
 0x58b   : > { %v3873_v58 = vpop.f32.mrf.mxu2 }
 0x58c   : > { %v7993_v9 = vadd.f32 %v3873_v58, %v7925_v20  ;;  %v4050_v58 = vpop.f32.mrf.mxu1 }
 0x590   : > { %4135 = vmatmul.f32.gmra.mxu2 %v7788_v13  ;;  %v3711_v13 = vadd.f32 %v7818_v2, %v3646_v15  ;;  %v3918_v15 = vadd.f32 %v3917_v60, %v7968_v0  ;;  %v3988_v23 = vpop.f32.mrf.mxu0  ;;  %v3986_v0 = vadd.f32 %v3985_v35, %v3921_v56 }
 0x592   : > { %v3983_v17 = vadd.f32 %v3982_v30, %v3918_v15  ;;  %v3927_v30 = vadd.f32 %v3926_v21, %v7981_v48 }
 0x593   : > { %v3876_v63 = vpop.f32.mrf.mxu2 }
 0x594   : > { %v7997_v46 = vadd.f32 %v3876_v63, %v7931_v7  ;;  %v3776_v7 = vadd.f32 %v7833_v36, %v3711_v13  ;;  %v3909_v36 = vadd.f32 %v3908_v11, %v7956_v51  ;;  %v3929_v63 = vpop.f32.mrf.mxu3 }
 0x595   : > { %v3930_v34 = vadd.f32 %v3929_v63, %v7984_v40 }
 0x596   : > { %v3841_v43 = vadd.f32 %v7952_v18, %v3776_v7  ;;  %v8018_v18 = vld [vmem:[#allocation24] ss:$0 sm:$0xff]  ;;  %v3974_v8 = vadd.f32 %v3973_v50, %v3909_v36  ;;  %v4053_v7 = vpop.f32.mrf.mxu1  ;;  %v4051_v36 = vadd.f32 %v4050_v58, %v3986_v0 }
 0x598   : > { %4138 = vmatmul.f32.gmra.mxu2 %v7808_v44  ;;  %v3258_v44 = vld [vmem:[#allocation6 + $0x132] sm:$0xff]  ;;  %v3991_v61 = vpop.f32.mrf.mxu0 }
 0x59b   : > { %v3879_v33 = vpop.f32.mrf.mxu2 }
 0x59c   : > { %v8003_v20 = vadd.f32 %v3879_v33, %v7937_v45  ;;  %v3906_v45 = vadd.f32 %v3905_v28, %v3841_v43  ;;  %v4045_v33 = vadd.f32 %v4044_v57, %v3980_v59  ;;  %v4048_v43 = vadd.f32 %v4047_v37, %v3983_v17 }
 0x5a0   : > { %4141 = vmatmul.f32.gmra.mxu2 %v7940_v53  ;;  %v3971_v53 = vadd.f32 %v3970_v5, %v3906_v45  ;;  %v3932_v45 = vpop.f32.mrf.mxu3 }
 0x5a2   : > { %v4036_v41 = vadd.f32 %v4035_v22, %v3971_v53 }
 0x5a3   : > { %v3882_v6 = vpop.f32.mrf.mxu2 }
 0x5a4   : > { %v8009_v29 = vadd.f32 %v3882_v6, %v7944_v47  ;;  %v8016_v47 = vld [vmem:[#allocation22] ss:$0 sm:$0xff] }
 0x5a8   : > { %4144 = vmatmul.f32.gmra.mxu2 %v3258_v44  ;;  %v3935_v1 = vpop.f32.mrf.mxu3 }
 0x5ab   : > { %v3885_v27 = vpop.f32.mrf.mxu2 }
 0x5ac   : > { %v8013_v2 = vadd.f32 %v3885_v27, %v7949_v24  ;;  %v4039_v24 = vadd.f32 %v4038_v31, %v3974_v8 }
 0x5b3   : > { %v4100_v39 = vpop.f32.mrf.mxu2 }
 0x5b4   : > { %v4101_v49 = vadd.f32 %v4100_v39, %v4036_v41  ;;  %v4056_v41 = vpop.f32.mrf.mxu1  ;;  %v3924_v39 = vadd.f32 %v3923_v19, %v7977_v16  ;;  %v3992_v16 = vadd.f32 %v3991_v61, %v3927_v30 }
 0x5b6   : > { %v4152_v54 = vmul.f32 %v8016_v47, %v4101_v49  ;;  %v3989_v52 = vadd.f32 %v3988_v23, %v3924_v39 }
 0x5b8   : > { %v4172_v32 = vadd.f32 %v8018_v18, %v4152_v54  ;;  %v4054_v38 = vadd.f32 %v4053_v7, %v3989_v52  ;;  %v3936_v7 = vadd.f32 %v3935_v1, %v7990_v3 }
 0x5ba   : > { %v4188_v62 = vmax.f32 %v4172_v32, 0.0 }
 0x5bb   : > { %v4103_v14 = vpop.f32.mrf.mxu2 }
 0x5bc   : > { %4204 = vst [vmem:[#allocation8] sm:$0xff] %v4188_v62  ;;  %v4104_v51 = vadd.f32 %v4103_v14, %v4039_v24  ;;  %v3994_v62 = vpop.f32.mrf.mxu0  ;;  %v4059_v14 = vpop.f32.mrf.mxu1 }
 0x5be   : > { %v4153_v42 = vmul.f32 %v8016_v47, %v4104_v51 }
 0x5c0   : > { %v4173_v28 = vadd.f32 %v8018_v18, %v4153_v42  ;;  %v3938_v42 = vpop.f32.mrf.mxu3 }
 0x5c1   : > { %v3939_v61 = vadd.f32 %v3938_v42, %v7993_v9 }
 0x5c2   : > { %v4189_v11 = vmax.f32 %v4173_v28, 0.0 }
 0x5c3   : > { %v4106_v4 = vpop.f32.mrf.mxu2 }
 0x5c4   : > { %4205 = vst [vmem:[#allocation8 + $0x8] sm:$0xff] %v4189_v11  ;;  %v4107_v12 = vadd.f32 %v4106_v4, %v4042_v55  ;;  %v4057_v55 = vadd.f32 %v4056_v41, %v3992_v16  ;;  %v3997_v35 = vpop.f32.mrf.mxu0  ;;  %v4062_v21 = vpop.f32.mrf.mxu1 }
 0x5c6   : > { %v4154_v5 = vmul.f32 %v8016_v47, %v4107_v12  ;;  %v3995_v12 = vadd.f32 %v3994_v62, %v3930_v34 }
 0x5c8   : > { %v4174_v22 = vadd.f32 %v8018_v18, %v4154_v5  ;;  %v3941_v5 = vpop.f32.mrf.mxu3 }
 0x5c9   : > { %v3942_v52 = vadd.f32 %v3941_v5, %v7997_v46 }
 0x5ca   : > { %v4190_v50 = vmax.f32 %v4174_v22, 0.0  ;;  %v4060_v22 = vadd.f32 %v4059_v14, %v3995_v12 }
 0x5cb   : > { %v4109_v31 = vpop.f32.mrf.mxu2 }
 0x5cc   : > { %4206 = vst [vmem:[#allocation8 + $0x10] sm:$0xff] %v4190_v50  ;;  %v4110_v13 = vadd.f32 %v4109_v31, %v4045_v33  ;;  %v3933_v33 = vadd.f32 %v3932_v45, %v7987_v26  ;;  %v4000_v40 = vpop.f32.mrf.mxu0  ;;  %v4065_v17 = vpop.f32.mrf.mxu1 }
 0x5cd   : > { %v4001_v26 = vadd.f32 %v4000_v40, %v3936_v7 }
 0x5ce   : > { %v4155_v6 = vmul.f32 %v8016_v47, %v4110_v13  ;;  %v3998_v63 = vadd.f32 %v3997_v35, %v3933_v33 }
 0x5d0   : > { %v4175_v44 = vadd.f32 %v8018_v18, %v4155_v6  ;;  %v4063_v6 = vadd.f32 %v4062_v21, %v3998_v63 }
 0x5d2   : > { %v4191_v10 = vmax.f32 %v4175_v44, 0.0 }
 0x5d3   : > { %v4112_v27 = vpop.f32.mrf.mxu2 }
 0x5d4   : > { %4207 = vst [vmem:[#allocation8 + $0x18] sm:$0xff] %v4191_v10  ;;  %v4113_v53 = vadd.f32 %v4112_v27, %v4048_v43  ;;  %v3944_v43 = vpop.f32.mrf.mxu3  ;;  %v4003_v27 = vpop.f32.mrf.mxu0 }
 0x5d5   : > { %v4068_v0 = vpop.f32.mrf.mxu1  ;;  %v4004_v39 = vadd.f32 %v4003_v27, %v3939_v61 }
 0x5d6   : > { %v4156_v60 = vmul.f32 %v8016_v47, %v4113_v53 }
 0x5d7   : > { %v4069_v1 = vadd.f32 %v4068_v0, %v4004_v39 }
 0x5d8   : > { %v4176_v57 = vadd.f32 %v8018_v18, %v4156_v60  ;;  %v4066_v60 = vadd.f32 %v4065_v17, %v4001_v26 }
 0x5da   : > { %v4192_v49 = vmax.f32 %v4176_v57, 0.0 }
 0x5db   : > { %v4115_v8 = vpop.f32.mrf.mxu2 }
 0x5dc   : > { %4208 = vst [vmem:[#allocation8 + $0x20] sm:$0xff] %v4192_v49  ;;  %v4116_v54 = vadd.f32 %v4115_v8, %v4051_v36  ;;  %v3947_v3 = vpop.f32.mrf.mxu3 }
 0x5dd   : > { %v3948_v12 = vadd.f32 %v3947_v3, %v8009_v29 }
 0x5de   : > { %v4157_v32 = vmul.f32 %v8016_v47, %v4116_v54  ;;  %v4006_v54 = vpop.f32.mrf.mxu0 }
 0x5df   : > { %v4007_v9 = vadd.f32 %v4006_v54, %v3942_v52 }
 0x5e0   : > { %v4177_v24 = vadd.f32 %v8018_v18, %v4157_v32 }
 0x5e2   : > { %v4193_v37 = vmax.f32 %v4177_v24, 0.0  ;;  %v4071_v24 = vpop.f32.mrf.mxu1 }
 0x5e3   : > { %v4118_v51 = vpop.f32.mrf.mxu2 }
 0x5e4   : > { %4209 = vst [vmem:[#allocation8 + $0x28] sm:$0xff] %v4193_v37  ;;  %v4119_v25 = vadd.f32 %v4118_v51, %v4054_v38  ;;  %v3950_v37 = vpop.f32.mrf.mxu3  ;;  %v4072_v51 = vadd.f32 %v4071_v24, %v4007_v9 }
 0x5e5   : > { %v3951_v40 = vadd.f32 %v3950_v37, %v8013_v2 }
 0x5e6   : > { %v4158_v19 = vmul.f32 %v8016_v47, %v4119_v25  ;;  %v3945_v25 = vadd.f32 %v3944_v43, %v8003_v20 }
 0x5e8   : > { %v4178_v28 = vadd.f32 %v8018_v18, %v4158_v19 }
 0x5ea   : > { %v4194_v11 = vmax.f32 %v4178_v28, 0.0  ;;  %v4009_v28 = vpop.f32.mrf.mxu0  ;;  %v4074_v46 = vpop.f32.mrf.mxu1 }
 0x5eb   : > { %v4121_v4 = vpop.f32.mrf.mxu2 }
 0x5ec   : > { %4210 = vst [vmem:[#allocation8 + $0x30] sm:$0xff] %v4194_v11  ;;  %v4122_v48 = vadd.f32 %v4121_v4, %v4057_v55  ;;  %v4010_v55 = vadd.f32 %v4009_v28, %v3945_v25  ;;  %v4012_v4 = vpop.f32.mrf.mxu3 }
 0x5ed   : > { %v4013_v20 = vadd.f32 %v4012_v4, %v3948_v12 }
 0x5ee   : > { %v4159_v58 = vmul.f32 %v8016_v47, %v4122_v48  ;;  %v4075_v35 = vadd.f32 %v4074_v46, %v4010_v55 }
 0x5f0   : > { %v4179_v59 = vadd.f32 %v8018_v18, %v4159_v58 }
 0x5f2   : > { %v4195_v15 = vmax.f32 %v4179_v59, 0.0  ;;  %v4077_v5 = vpop.f32.mrf.mxu1 }
 0x5f3   : > { %v4124_v50 = vpop.f32.mrf.mxu2 }
 0x5f4   : > { %4211 = vst [vmem:[#allocation8 + $0x38] sm:$0xff] %v4195_v15  ;;  %v4125_v31 = vadd.f32 %v4124_v50, %v4060_v22  ;;  %v4078_v15 = vadd.f32 %v4077_v5, %v4013_v20  ;;  %v4015_v50 = vpop.f32.mrf.mxu3 }
 0x5f6   : > { %v4160_v13 = vmul.f32 %v8016_v47, %v4125_v31 }
 0x5f8   : > { %v4180_v23 = vadd.f32 %v8018_v18, %v4160_v13  ;;  %v4016_v13 = vadd.f32 %v4015_v50, %v3951_v40 }
 0x5fa   : > { %v4196_v44 = vmax.f32 %v4180_v23, 0.0  ;;  %v4080_v29 = vpop.f32.mrf.mxu1 }
 0x5fb   : > { %v4127_v56 = vpop.f32.mrf.mxu2 }
 0x5fc   : > { %4212 = vst [vmem:[#allocation8 + $0x40] sm:$0xff] %v4196_v44  ;;  %v4128_v10 = vadd.f32 %v4127_v56, %v4063_v6  ;;  %v4081_v6 = vadd.f32 %v4080_v29, %v4016_v13 }
 0x5fe   : > { %v4161_v45 = vmul.f32 %v8016_v47, %v4128_v10 }
 0x600   : > { %v4181_v53 = vadd.f32 %v8018_v18, %v4161_v45 }
 0x602   : > { %v4197_v57 = vmax.f32 %v4181_v53, 0.0 }
 0x603   : > { %v4130_v41 = vpop.f32.mrf.mxu2 }
 0x604   : > { %4213 = vst [vmem:[#allocation8 + $0x48] sm:$0xff] %v4197_v57  ;;  %v4131_v36 = vadd.f32 %v4130_v41, %v4066_v60 }
 0x606   : > { %v4162_v49 = vmul.f32 %v8016_v47, %v4131_v36 }
 0x608   : > { %v4182_v8 = vadd.f32 %v8018_v18, %v4162_v49 }
 0x60a   : > { %v4198_v32 = vmax.f32 %v4182_v8, 0.0 }
 0x60b   : > { %v4133_v38 = vpop.f32.mrf.mxu2 }
 0x60c   : > { %4214 = vst [vmem:[#allocation8 + $0x50] sm:$0xff] %v4198_v32  ;;  %v4134_v30 = vadd.f32 %v4133_v38, %v4069_v1 }
 0x60e   : > { %v4163_v62 = vmul.f32 %v8016_v47, %v4134_v30 }
 0x610   : > { %v4183_v14 = vadd.f32 %v8018_v18, %v4163_v62 }
 0x612   : > { %v4199_v16 = vmax.f32 %v4183_v14, 0.0 }
 0x613   : > { %v4136_v19 = vpop.f32.mrf.mxu2 }
 0x614   : > { %4215 = vst [vmem:[#allocation8 + $0x58] sm:$0xff] %v4199_v16  ;;  %v4137_v42 = vadd.f32 %v4136_v19, %v4072_v51 }
 0x616   : > { %v4164_v34 = vmul.f32 %v8016_v47, %v4137_v42 }
 0x618   : > { %v4184_v11 = vadd.f32 %v8018_v18, %v4164_v34 }
 0x61a   : > { %v4200_v48 = vmax.f32 %v4184_v11, 0.0 }
 0x61b   : > { %v4139_v21 = vpop.f32.mrf.mxu2 }
 0x61c   : > { %4216 = vst [vmem:[#allocation8 + $0x60] sm:$0xff] %v4200_v48  ;;  %v4140_v58 = vadd.f32 %v4139_v21, %v4075_v35 }
 0x61e   : > { %v4165_v59 = vmul.f32 %v8016_v47, %v4140_v58 }
 0x620   : > { %v4185_v22 = vadd.f32 %v8018_v18, %v4165_v59 }
 0x622   : > { %v4201_v33 = vmax.f32 %v4185_v22, 0.0 }
 0x623   : > { %v4142_v31 = vpop.f32.mrf.mxu2 }
 0x624   : > { %4217 = vst [vmem:[#allocation8 + $0x68] sm:$0xff] %v4201_v33  ;;  %v4143_v63 = vadd.f32 %v4142_v31, %v4078_v15 }
 0x626   : > { %v4166_v17 = vmul.f32 %v8016_v47, %v4143_v63 }
 0x628   : > { %v4186_v23 = vadd.f32 %v8018_v18, %v4166_v17 }
 0x62a   : > { %v4202_v7 = vmax.f32 %v4186_v23, 0.0 }
 0x62b   : > { %v4145_v44 = vpop.f32.mrf.mxu2 }
 0x62c   : > { %4218 = vst [vmem:[#allocation8 + $0x70] sm:$0xff] %v4202_v7  ;;  %v4146_v43 = vadd.f32 %v4145_v44, %v4081_v6 }
 0x62e   : > { %v4167_v56 = vmul.f32 %v8016_v47, %v4146_v43 }
 0x630   : > { %v4187_v10 = vadd.f32 %v8018_v18, %v4167_v56 }
 0x632   : > { %v4203_v26 = vmax.f32 %v4187_v10, 0.0 }
 0x634   : > { %4219 = vst [vmem:[#allocation8 + $0x78] sm:$0xff] %v4203_v26 }
 0x635 PF: > { %v5235_v2 = vld [vmem:[%s6442_s24 + $0x1f0] sm:$0xff]  ;;  %v5236_v45 = vld [vmem:[%s6442_s24 + $0x1f8] sm:$0xff]  ;;  %v5233_v27 = vld [vmem:[%s6442_s24 + $0x1e0] sm:$0xff]  ;;  %s5204_s0 = sshll.u32 %s6288_s20, 3  ;;  %vm4293_vm15 = vcmask 1041409   ;;  %vm4857_vm0 = vcmask 1041408  }
 0x636   : > { %v4255_v47 = vld [vmem:[%s6442_s24 + $0xf0] sm:$0xff]  ;;  %4296 = vmatpush.msra.mxu0 %v5235_v2  ;;  %4316 = vmatpush.msra.mxu1 %v5236_v45  ;;  %v4256_v18 = vld [vmem:[%s6442_s24 + $0xf8] sm:$0xff]  ;;  %v5234_v53 = vld [vmem:[%s6442_s24 + $0x1e8] sm:$0xff]  ;;  %s4222_s6 = scalar_lea.vmem [#allocation8], %s5204_s0  ;;  %p5429_p1 = scmp.ne.s32.totalorder %s6288_s20, 7 }
 0x637   : > { %4339 = vmatpush.msra.mxu2 %v4255_v47  ;;  %4359 = vmatpush.msra.mxu3 %v4256_v18  ;;  %v4253_v0 = vld [vmem:[%s6442_s24 + $0xe0] sm:$0xff]  ;;  %v4254_v60 = vld [vmem:[%s6442_s24 + $0xe8] sm:$0xff]  ;;  %v5231_v61 = vld [vmem:[%s6442_s24 + $0x1d0] sm:$0xff] }
 0x638   : > { %4297 = vmatpush.msra.mxu0 %v5233_v27  ;;  %4317 = vmatpush.msra.mxu1 %v5234_v53  ;;  %v5232_v57 = vld [vmem:[%s6442_s24 + $0x1d8] sm:$0xff]  ;;  %v4251_v41 = vld [vmem:[%s6442_s24 + $0xd0] sm:$0xff]  ;;  %v5229_v3 = vld [vmem:[%s6442_s24 + $0x1c0] sm:$0xff] }
 0x639   : > { %v4252_v36 = vld [vmem:[%s6442_s24 + $0xd8] sm:$0xff]  ;;  %4340 = vmatpush.msra.mxu2 %v4253_v0  ;;  %4360 = vmatpush.msra.mxu3 %v4254_v60  ;;  %v5230_v39 = vld [vmem:[%s6442_s24 + $0x1c8] sm:$0xff]  ;;  %v4249_v49 = vld [vmem:[%s6442_s24 + $0xc0] sm:$0xff] }
 0x63a   : > { %4298 = vmatpush.msra.mxu0 %v5231_v61  ;;  %4318 = vmatpush.msra.mxu1 %v5232_v57  ;;  %v4250_v8 = vld [vmem:[%s6442_s24 + $0xc8] sm:$0xff]  ;;  %v5227_v54 = vld [vmem:[%s6442_s24 + $0x1b0] sm:$0xff]  ;;  %v5228_v1 = vld [vmem:[%s6442_s24 + $0x1b8] sm:$0xff] }
 0x63b   : > { %4341 = vmatpush.msra.mxu2 %v4251_v41  ;;  %4361 = vmatpush.msra.mxu3 %v4252_v36  ;;  %v4247_v52 = vld [vmem:[%s6442_s24 + $0xb0] sm:$0xff]  ;;  %v4248_v32 = vld [vmem:[%s6442_s24 + $0xb8] sm:$0xff]  ;;  %v5225_v24 = vld [vmem:[%s6442_s24 + $0x1a0] sm:$0xff] }
 0x63c   : > { %4299 = vmatpush.msra.mxu0 %v5229_v3  ;;  %4319 = vmatpush.msra.mxu1 %v5230_v39  ;;  %v5226_v38 = vld [vmem:[%s6442_s24 + $0x1a8] sm:$0xff]  ;;  %v4245_v30 = vld [vmem:[%s6442_s24 + $0xa0] sm:$0xff]  ;;  %v5223_v62 = vld [vmem:[%s6442_s24 + $0x190] sm:$0xff] }
 0x63d   : > { %4342 = vmatpush.msra.mxu2 %v4249_v49  ;;  %4362 = vmatpush.msra.mxu3 %v4250_v8  ;;  %v4246_v9 = vld [vmem:[%s6442_s24 + $0xa8] sm:$0xff]  ;;  %v5224_v37 = vld [vmem:[%s6442_s24 + $0x198] sm:$0xff]  ;;  %v4243_v14 = vld [vmem:[%s6442_s24 + $0x90] sm:$0xff] }
 0x63e   : > { %4300 = vmatpush.msra.mxu0 %v5227_v54  ;;  %4320 = vmatpush.msra.mxu1 %v5228_v1  ;;  %v4244_v51 = vld [vmem:[%s6442_s24 + $0x98] sm:$0xff]  ;;  %v5221_v25 = vld [vmem:[%s6442_s24 + $0x180] sm:$0xff]  ;;  %v5222_v16 = vld [vmem:[%s6442_s24 + $0x188] sm:$0xff] }
 0x63f   : > { %4343 = vmatpush.msra.mxu2 %v4247_v52  ;;  %4363 = vmatpush.msra.mxu3 %v4248_v32  ;;  %v4241_v19 = vld [vmem:[%s6442_s24 + $0x80] sm:$0xff]  ;;  %v4242_v42 = vld [vmem:[%s6442_s24 + $0x88] sm:$0xff]  ;;  %v5219_v28 = vld [vmem:[%s6442_s24 + $0x170] sm:$0xff] }
 0x640   : > { %4301 = vmatpush.msra.mxu0 %v5225_v24  ;;  %4321 = vmatpush.msra.mxu1 %v5226_v38  ;;  %v5220_v46 = vld [vmem:[%s6442_s24 + $0x178] sm:$0xff]  ;;  %v4239_v55 = vld [vmem:[%s6442_s24 + $0x70] sm:$0xff]  ;;  %v5217_v11 = vld [vmem:[%s6442_s24 + $0x160] sm:$0xff] }
 0x641   : > { %4344 = vmatpush.msra.mxu2 %v4245_v30  ;;  %4364 = vmatpush.msra.mxu3 %v4246_v9  ;;  %v4240_v34 = vld [vmem:[%s6442_s24 + $0x78] sm:$0xff]  ;;  %v5218_v4 = vld [vmem:[%s6442_s24 + $0x168] sm:$0xff]  ;;  %v4237_v35 = vld [vmem:[%s6442_s24 + $0x60] sm:$0xff] }
 0x642   : > { %4302 = vmatpush.msra.mxu0 %v5223_v62  ;;  %4322 = vmatpush.msra.mxu1 %v5224_v37  ;;  %v4238_v48 = vld [vmem:[%s6442_s24 + $0x68] sm:$0xff]  ;;  %v5215_v21 = vld [vmem:[%s6442_s24 + $0x150] sm:$0xff]  ;;  %v5216_v12 = vld [vmem:[%s6442_s24 + $0x158] sm:$0xff] }
 0x643   : > { %4345 = vmatpush.msra.mxu2 %v4243_v14  ;;  %4365 = vmatpush.msra.mxu3 %v4244_v51  ;;  %v4235_v58 = vld [vmem:[%s6442_s24 + $0x50] sm:$0xff]  ;;  %v4236_v20 = vld [vmem:[%s6442_s24 + $0x58] sm:$0xff]  ;;  %v5213_v59 = vld [vmem:[%s6442_s24 + $0x140] sm:$0xff] }
 0x644   : > { %4303 = vmatpush.msra.mxu0 %v5221_v25  ;;  %4323 = vmatpush.msra.mxu1 %v5222_v16  ;;  %v5214_v5 = vld [vmem:[%s6442_s24 + $0x148] sm:$0xff]  ;;  %v4233_v22 = vld [vmem:[%s6442_s24 + $0x40] sm:$0xff]  ;;  %v5211_v15 = vld [vmem:[%s6442_s24 + $0x130] sm:$0xff] }
 0x645   : > { %4346 = vmatpush.msra.mxu2 %v4241_v19  ;;  %4366 = vmatpush.msra.mxu3 %v4242_v42  ;;  %v4234_v33 = vld [vmem:[%s6442_s24 + $0x48] sm:$0xff]  ;;  %v5212_v50 = vld [vmem:[%s6442_s24 + $0x138] sm:$0xff]  ;;  %v4231_v31 = vld [vmem:[%s6442_s24 + $0x30] sm:$0xff] }
 0x646   : > { %4304 = vmatpush.msra.mxu0 %v5219_v28  ;;  %4324 = vmatpush.msra.mxu1 %v5220_v46  ;;  %v4232_v40 = vld [vmem:[%s6442_s24 + $0x38] sm:$0xff]  ;;  %v5209_v63 = vld [vmem:[%s6442_s24 + $0x120] sm:$0xff]  ;;  %v5210_v13 = vld [vmem:[%s6442_s24 + $0x128] sm:$0xff] }
 0x647   : > { %4347 = vmatpush.msra.mxu2 %v4239_v55  ;;  %4367 = vmatpush.msra.mxu3 %v4240_v34  ;;  %v4229_v17 = vld [vmem:[%s6442_s24 + $0x20] sm:$0xff]  ;;  %v4230_v29 = vld [vmem:[%s6442_s24 + $0x28] sm:$0xff]  ;;  %v5207_v23 = vld [vmem:[%s6442_s24 + $0x110] sm:$0xff] }
 0x648   : > { %4305 = vmatpush.msra.mxu0 %v5217_v11  ;;  %4325 = vmatpush.msra.mxu1 %v5218_v4  ;;  %v5208_v6 = vld [vmem:[%s6442_s24 + $0x118] sm:$0xff]  ;;  %v4227_v7 = vld [vmem:[%s6442_s24 + $0x10] sm:$0xff]  ;;  %v5205_v43 = vld [vmem:[%s6442_s24 + $0x100] sm:$0xff] }
 0x649   : > { %4348 = vmatpush.msra.mxu2 %v4237_v35  ;;  %4368 = vmatpush.msra.mxu3 %v4238_v48  ;;  %v4228_v44 = vld [vmem:[%s6442_s24 + $0x18] sm:$0xff]  ;;  %v5206_v56 = vld [vmem:[%s6442_s24 + $0x108] sm:$0xff]  ;;  %v4225_v10 = vld [vmem:[%s6442_s24] sm:$0xff] }
 0x64a   : > { %4306 = vmatpush.msra.mxu0 %v5215_v21  ;;  %4326 = vmatpush.msra.mxu1 %v5216_v12  ;;  %v4226_v26 = vld [vmem:[%s6442_s24 + $0x8] sm:$0xff]  ;;  %v5267_v2 = vld [vmem:[%s6442_s24 + $0x2f0] sm:$0xff]  ;;  %v5268_v45 = vld [vmem:[%s6442_s24 + $0x2f8] sm:$0xff] }
 0x64b   : > { %4349 = vmatpush.msra.mxu2 %v4235_v58  ;;  %4369 = vmatpush.msra.mxu3 %v4236_v20  ;;  %v5299_v47 = vld [vmem:[%s6442_s24 + $0x3f0] sm:$0xff]  ;;  %v5300_v18 = vld [vmem:[%s6442_s24 + $0x3f8] sm:$0xff]  ;;  %v5265_v27 = vld [vmem:[%s6442_s24 + $0x2e0] sm:$0xff] }
 0x64c   : > { %4307 = vmatpush.msra.mxu0 %v5213_v59  ;;  %4327 = vmatpush.msra.mxu1 %v5214_v5  ;;  %v5266_v53 = vld [vmem:[%s6442_s24 + $0x2e8] sm:$0xff]  ;;  %v5297_v0 = vld [vmem:[%s6442_s24 + $0x3e0] sm:$0xff]  ;;  %v5263_v61 = vld [vmem:[%s6442_s24 + $0x2d0] sm:$0xff] }
 0x64d   : > { %4350 = vmatpush.msra.mxu2 %v4233_v22  ;;  %4370 = vmatpush.msra.mxu3 %v4234_v33  ;;  %v5298_v60 = vld [vmem:[%s6442_s24 + $0x3e8] sm:$0xff]  ;;  %v5264_v57 = vld [vmem:[%s6442_s24 + $0x2d8] sm:$0xff]  ;;  %v5295_v41 = vld [vmem:[%s6442_s24 + $0x3d0] sm:$0xff] }
 0x64e   : > { %4308 = vmatpush.msra.mxu0 %v5211_v15  ;;  %4328 = vmatpush.msra.mxu1 %v5212_v50  ;;  %v5296_v36 = vld [vmem:[%s6442_s24 + $0x3d8] sm:$0xff]  ;;  %v5261_v3 = vld [vmem:[%s6442_s24 + $0x2c0] sm:$0xff]  ;;  %v5262_v39 = vld [vmem:[%s6442_s24 + $0x2c8] sm:$0xff] }
 0x64f   : > { %4351 = vmatpush.msra.mxu2 %v4231_v31  ;;  %4371 = vmatpush.msra.mxu3 %v4232_v40  ;;  %v5293_v49 = vld [vmem:[%s6442_s24 + $0x3c0] sm:$0xff]  ;;  %v5294_v8 = vld [vmem:[%s6442_s24 + $0x3c8] sm:$0xff]  ;;  %v5259_v54 = vld [vmem:[%s6442_s24 + $0x2b0] sm:$0xff] }
 0x650   : > { %4309 = vmatpush.msra.mxu0 %v5209_v63  ;;  %4329 = vmatpush.msra.mxu1 %v5210_v13  ;;  %v5260_v1 = vld [vmem:[%s6442_s24 + $0x2b8] sm:$0xff]  ;;  %v5291_v52 = vld [vmem:[%s6442_s24 + $0x3b0] sm:$0xff]  ;;  %v5257_v24 = vld [vmem:[%s6442_s24 + $0x2a0] sm:$0xff] }
 0x651   : > { %4352 = vmatpush.msra.mxu2 %v4229_v17  ;;  %4372 = vmatpush.msra.mxu3 %v4230_v29  ;;  %v5292_v32 = vld [vmem:[%s6442_s24 + $0x3b8] sm:$0xff]  ;;  %v5258_v38 = vld [vmem:[%s6442_s24 + $0x2a8] sm:$0xff]  ;;  %v5289_v30 = vld [vmem:[%s6442_s24 + $0x3a0] sm:$0xff] }
 0x652   : > { %4310 = vmatpush.msra.mxu0 %v5207_v23  ;;  %4330 = vmatpush.msra.mxu1 %v5208_v6  ;;  %v5290_v9 = vld [vmem:[%s6442_s24 + $0x3a8] sm:$0xff]  ;;  %v5255_v62 = vld [vmem:[%s6442_s24 + $0x290] sm:$0xff]  ;;  %v5256_v37 = vld [vmem:[%s6442_s24 + $0x298] sm:$0xff] }
 0x653   : > { %4353 = vmatpush.msra.mxu2 %v4227_v7  ;;  %4373 = vmatpush.msra.mxu3 %v4228_v44  ;;  %v5287_v14 = vld [vmem:[%s6442_s24 + $0x390] sm:$0xff]  ;;  %v5288_v51 = vld [vmem:[%s6442_s24 + $0x398] sm:$0xff]  ;;  %v5253_v25 = vld [vmem:[%s6442_s24 + $0x280] sm:$0xff] }
 0x654   : > { %4311 = vmatpush.msra.mxu0 %v5205_v43  ;;  %4331 = vmatpush.msra.mxu1 %v5206_v56  ;;  %v5254_v16 = vld [vmem:[%s6442_s24 + $0x288] sm:$0xff]  ;;  %v5285_v19 = vld [vmem:[%s6442_s24 + $0x380] sm:$0xff]  ;;  %v5251_v28 = vld [vmem:[%s6442_s24 + $0x270] sm:$0xff] }
 0x655   : > { %4354 = vmatpush.msra.mxu2 %v4225_v10  ;;  %4374 = vmatpush.msra.mxu3 %v4226_v26  ;;  %v5286_v42 = vld [vmem:[%s6442_s24 + $0x388] sm:$0xff]  ;;  %v5252_v46 = vld [vmem:[%s6442_s24 + $0x278] sm:$0xff]  ;;  %v5283_v55 = vld [vmem:[%s6442_s24 + $0x370] sm:$0xff] }
 0x656   : > { %4416 = vmatpush.msrb.mxu0 %v5267_v2  ;;  %4436 = vmatpush.msrb.mxu1 %v5268_v45  ;;  %v5284_v34 = vld [vmem:[%s6442_s24 + $0x378] sm:$0xff]  ;;  %v5249_v11 = vld [vmem:[%s6442_s24 + $0x260] sm:$0xff]  ;;  %v5250_v4 = vld [vmem:[%s6442_s24 + $0x268] sm:$0xff] }
 0x657   : > { %4495 = vmatpush.msrb.mxu2 %v5299_v47  ;;  %4515 = vmatpush.msrb.mxu3 %v5300_v18  ;;  %v5281_v35 = vld [vmem:[%s6442_s24 + $0x360] sm:$0xff]  ;;  %v5282_v48 = vld [vmem:[%s6442_s24 + $0x368] sm:$0xff]  ;;  %v5247_v12 = vld [vmem:[%s6442_s24 + $0x250] sm:$0xff] }
 0x658   : > { %4417 = vmatpush.msrb.mxu0 %v5265_v27  ;;  %4437 = vmatpush.msrb.mxu1 %v5266_v53  ;;  %v8171_v21 = vld [vmem:[%s4222_s6 + $0x40] sm:$0xff]  ;;  %v5248_v58 = vld [vmem:[%s6442_s24 + $0x258] sm:$0xff]  ;;  %v5279_v20 = vld [vmem:[%s6442_s24 + $0x350] sm:$0xff] }
 0x659   : > { %4496 = vmatpush.msrb.mxu2 %v5297_v0  ;;  %4516 = vmatpush.msrb.mxu3 %v5298_v60  ;;  %v5280_v59 = vld [vmem:[%s6442_s24 + $0x358] sm:$0xff]  ;;  %v5245_v5 = vld [vmem:[%s6442_s24 + $0x240] sm:$0xff]  ;;  %v5246_v22 = vld [vmem:[%s6442_s24 + $0x248] sm:$0xff]  ;;  %v4336_v33 = vrot.slane %v8171_v21, 7  ;;  %v4492_v0 = vrot.slane %v8171_v21, 2 }
 0x65a   : > { %4418 = vmatpush.msrb.mxu0 %v5263_v61  ;;  %4438 = vmatpush.msrb.mxu1 %v5264_v57  ;;  %v5277_v15 = vld [vmem:[%s6442_s24 + $0x340] sm:$0xff]  ;;  %v5278_v50 = vld [vmem:[%s6442_s24 + $0x348] sm:$0xff]  ;;  %v5243_v40 = vld [vmem:[%s6442_s24 + $0x230] sm:$0xff] }
 0x65b   : > { %4497 = vmatpush.msrb.mxu2 %v5295_v41  ;;  %4517 = vmatpush.msrb.mxu3 %v5296_v36  ;;  %v8182_v31 = vld [vmem:[%s4222_s6] sm:$0xff]  ;;  %v5244_v63 = vld [vmem:[%s6442_s24 + $0x238] sm:$0xff]  ;;  %v5275_v13 = vld [vmem:[%s6442_s24 + $0x330] sm:$0xff] }
 0x65c   : > { %4419 = vmatpush.msrb.mxu0 %v5261_v3  ;;  %4439 = vmatpush.msrb.mxu1 %v5262_v39  ;;  %v5276_v17 = vld [vmem:[%s6442_s24 + $0x338] sm:$0xff]  ;;  %v4337_v29 = vsel %vm4293_vm15, %v4336_v33, %v8182_v31  ;;  %v5241_v23 = vld [vmem:[%s6442_s24 + $0x220] sm:$0xff]  ;;  %v5242_v6 = vld [vmem:[%s6442_s24 + $0x228] sm:$0xff]  ;;  %v4292_v44 = vrot.slane %v8182_v31, 1  ;;  %v4491_v53 = vrot.slane %v8182_v31, 3 }
 0x65d   : > { %4498 = vmatpush.msrb.mxu2 %v5293_v49  ;;  %4518 = vmatpush.msrb.mxu3 %v5294_v8  ;;  %v5273_v7 = vld [vmem:[%s6442_s24 + $0x320] sm:$0xff]  ;;  %v5274_v43 = vld [vmem:[%s6442_s24 + $0x328] sm:$0xff]  ;;  %v5239_v56 = vld [vmem:[%s6442_s24 + $0x210] sm:$0xff] }
 0x65e   : > { %4420 = vmatpush.msrb.mxu0 %v5259_v54  ;;  %4440 = vmatpush.msrb.mxu1 %v5260_v1  ;;  %v5240_v10 = vld [vmem:[%s6442_s24 + $0x218] sm:$0xff]  ;;  %v5271_v26 = vld [vmem:[%s6442_s24 + $0x310] sm:$0xff]  ;;  %v4294_v45 = vsel %vm4293_vm15, %v8171_v21, %v4292_v44  ;;  %v5237_v47 = vld [vmem:[%s6442_s24 + $0x200] sm:$0xff]  ;;  %v4493_v3 = vsel %vm4293_vm15, %v4492_v0, %v4491_v53  ;;  %v4412_v54 = vrot.slane %v8182_v31, 2  ;;  %v4413_v1 = vrot.slane %v8171_v21, 1 }
 0x65f   : > { %4499 = vmatpush.msrb.mxu2 %v5291_v52  ;;  %4519 = vmatpush.msrb.mxu3 %v5292_v32  ;;  %v5272_v2 = vld [vmem:[%s6442_s24 + $0x318] sm:$0xff]  ;;  %v5238_v18 = vld [vmem:[%s6442_s24 + $0x208] sm:$0xff]  ;;  %v5269_v27 = vld [vmem:[%s6442_s24 + $0x300] sm:$0xff] }
 0x660   : > { %4421 = vmatpush.msrb.mxu0 %v5257_v24  ;;  %4441 = vmatpush.msrb.mxu1 %v5258_v38  ;;  %v5270_v60 = vld [vmem:[%s6442_s24 + $0x308] sm:$0xff]  ;;  %v5331_v61 = vld [vmem:[%s6442_s24 + $0x4f0] sm:$0xff]  ;;  %v5332_v57 = vld [vmem:[%s6442_s24 + $0x4f8] sm:$0xff] }
 0x661   : > { %4500 = vmatpush.msrb.mxu2 %v5289_v30  ;;  %4520 = vmatpush.msrb.mxu3 %v5290_v9  ;;  %v5363_v41 = vld [vmem:[%s6442_s24 + $0x5f0] sm:$0xff]  ;;  %v5364_v36 = vld [vmem:[%s6442_s24 + $0x5f8] sm:$0xff]  ;;  %v5329_v39 = vld [vmem:[%s6442_s24 + $0x4e0] sm:$0xff]  ;;  %v4414_v9 = vsel %vm4293_vm15, %v4413_v1, %v4412_v54 }
 0x662   : > { %4422 = vmatpush.msrb.mxu0 %v5255_v62  ;;  %4442 = vmatpush.msrb.mxu1 %v5256_v37  ;;  %v5330_v49 = vld [vmem:[%s6442_s24 + $0x4e8] sm:$0xff]  ;;  %v5361_v8 = vld [vmem:[%s6442_s24 + $0x5e0] sm:$0xff]  ;;  %v5327_v32 = vld [vmem:[%s6442_s24 + $0x4d0] sm:$0xff] }
 0x663   : > { %4501 = vmatpush.msrb.mxu2 %v5287_v14  ;;  %4521 = vmatpush.msrb.mxu3 %v5288_v51  ;;  %v5362_v52 = vld [vmem:[%s6442_s24 + $0x5e8] sm:$0xff]  ;;  %v5328_v24 = vld [vmem:[%s6442_s24 + $0x4d8] sm:$0xff]  ;;  %v5359_v38 = vld [vmem:[%s6442_s24 + $0x5d0] sm:$0xff] }
 0x664   : > { %4423 = vmatpush.msrb.mxu0 %v5253_v25  ;;  %4443 = vmatpush.msrb.mxu1 %v5254_v16  ;;  %v5360_v30 = vld [vmem:[%s6442_s24 + $0x5d8] sm:$0xff]  ;;  %v5325_v62 = vld [vmem:[%s6442_s24 + $0x4c0] sm:$0xff]  ;;  %v5326_v37 = vld [vmem:[%s6442_s24 + $0x4c8] sm:$0xff] }
 0x665   : > { %4502 = vmatpush.msrb.mxu2 %v5285_v19  ;;  %4522 = vmatpush.msrb.mxu3 %v5286_v42  ;;  %v5357_v14 = vld [vmem:[%s6442_s24 + $0x5c0] sm:$0xff]  ;;  %v5358_v51 = vld [vmem:[%s6442_s24 + $0x5c8] sm:$0xff]  ;;  %v5323_v25 = vld [vmem:[%s6442_s24 + $0x4b0] sm:$0xff] }
 0x666   : > { %4424 = vmatpush.msrb.mxu0 %v5251_v28  ;;  %4444 = vmatpush.msrb.mxu1 %v5252_v46  ;;  %v5324_v16 = vld [vmem:[%s6442_s24 + $0x4b8] sm:$0xff]  ;;  %v5355_v19 = vld [vmem:[%s6442_s24 + $0x5b0] sm:$0xff]  ;;  %v5321_v28 = vld [vmem:[%s6442_s24 + $0x4a0] sm:$0xff] }
 0x667   : > { %4503 = vmatpush.msrb.mxu2 %v5283_v55  ;;  %4523 = vmatpush.msrb.mxu3 %v5284_v34  ;;  %v5356_v42 = vld [vmem:[%s6442_s24 + $0x5b8] sm:$0xff]  ;;  %v5322_v46 = vld [vmem:[%s6442_s24 + $0x4a8] sm:$0xff]  ;;  %v5353_v55 = vld [vmem:[%s6442_s24 + $0x5a0] sm:$0xff] }
 0x668   : > { %4425 = vmatpush.msrb.mxu0 %v5249_v11  ;;  %4445 = vmatpush.msrb.mxu1 %v5250_v4  ;;  %v5354_v34 = vld [vmem:[%s6442_s24 + $0x5a8] sm:$0xff]  ;;  %v5319_v11 = vld [vmem:[%s6442_s24 + $0x490] sm:$0xff]  ;;  %v5320_v4 = vld [vmem:[%s6442_s24 + $0x498] sm:$0xff] }
 0x669   : > { %4504 = vmatpush.msrb.mxu2 %v5281_v35  ;;  %4524 = vmatpush.msrb.mxu3 %v5282_v48  ;;  %v5351_v35 = vld [vmem:[%s6442_s24 + $0x590] sm:$0xff]  ;;  %v5352_v48 = vld [vmem:[%s6442_s24 + $0x598] sm:$0xff]  ;;  %v5310_v44 = vld [vmem:[%s6442_s24 + $0x448] sm:$0xff] }
 0x66a   : > { %4426 = vmatpush.msrb.mxu0 %v5247_v12  ;;  %4446 = vmatpush.msrb.mxu1 %v5248_v58  ;;  %v5317_v12 = vld [vmem:[%s6442_s24 + $0x480] sm:$0xff]  ;;  %v5318_v58 = vld [vmem:[%s6442_s24 + $0x488] sm:$0xff]  ;;  %v5347_v33 = vld [vmem:[%s6442_s24 + $0x570] sm:$0xff] }
 0x66b   : > { %4505 = vmatpush.msrb.mxu2 %v5279_v20  ;;  %4525 = vmatpush.msrb.mxu3 %v5280_v59  ;;  %v5349_v20 = vld [vmem:[%s6442_s24 + $0x580] sm:$0xff]  ;;  %v5350_v59 = vld [vmem:[%s6442_s24 + $0x588] sm:$0xff]  ;;  %v5303_v0 = vld [vmem:[%s6442_s24 + $0x410] sm:$0xff] }
 0x66c   : > { %4427 = vmatpush.msrb.mxu0 %v5245_v5  ;;  %4447 = vmatpush.msrb.mxu1 %v5246_v22  ;;  %v5315_v5 = vld [vmem:[%s6442_s24 + $0x470] sm:$0xff]  ;;  %v5316_v22 = vld [vmem:[%s6442_s24 + $0x478] sm:$0xff]  ;;  %v5338_v53 = vld [vmem:[%s6442_s24 + $0x528] sm:$0xff] }
 0x66d   : > { %4506 = vmatpush.msrb.mxu2 %v5277_v15  ;;  %4526 = vmatpush.msrb.mxu3 %v5278_v50  ;;  %v5348_v15 = vld [vmem:[%s6442_s24 + $0x578] sm:$0xff]  ;;  %v5313_v50 = vld [vmem:[%s6442_s24 + $0x460] sm:$0xff]  ;;  %v5334_v1 = vld [vmem:[%s6442_s24 + $0x508] sm:$0xff] }
 0x66e   : > { %4428 = vmatpush.msrb.mxu0 %v5243_v40  ;;  %4448 = vmatpush.msrb.mxu1 %v5244_v63  ;;  %v5314_v40 = vld [vmem:[%s6442_s24 + $0x468] sm:$0xff]  ;;  %v5345_v63 = vld [vmem:[%s6442_s24 + $0x560] sm:$0xff] }
 0x66f   : > { %4507 = vmatpush.msrb.mxu2 %v5275_v13  ;;  %4527 = vmatpush.msrb.mxu3 %v5276_v17  ;;  %v5346_v13 = vld [vmem:[%s6442_s24 + $0x568] sm:$0xff]  ;;  %v5311_v17 = vld [vmem:[%s6442_s24 + $0x450] sm:$0xff]  ;;  %v5333_v54 = vld [vmem:[%s6442_s24 + $0x500] sm:$0xff] }
 0x670   : > { %4375 = vmatmul.f32.vlgmr.msra.gmra.mxu3 %v4337_v29  ;;  %4429 = vmatpush.msrb.mxu0 %v5241_v23  ;;  %v5343_v23 = vld [vmem:[%s6442_s24 + $0x550] sm:$0xff] }
 0x671   : > { %4449 = vmatpush.msrb.mxu1 %v5242_v6  ;;  %4508 = vmatpush.msrb.mxu2 %v5273_v7  ;;  %v5344_v6 = vld [vmem:[%s6442_s24 + $0x558] sm:$0xff]  ;;  %v5309_v7 = vld [vmem:[%s6442_s24 + $0x440] sm:$0xff] }
 0x672   : > { %4528 = vmatpush.msrb.mxu3 %v5274_v43  ;;  %4355 = vmatmul.f32.vlgmr.msra.gmra.mxu2 %v4337_v29  ;;  %v5312_v29 = vld [vmem:[%s6442_s24 + $0x458] sm:$0xff]  ;;  %v5341_v43 = vld [vmem:[%s6442_s24 + $0x540] sm:$0xff] }
 0x673   : > { %4430 = vmatpush.msrb.mxu0 %v5239_v56  ;;  %4450 = vmatpush.msrb.mxu1 %v5240_v10  ;;  %v5342_v56 = vld [vmem:[%s6442_s24 + $0x548] sm:$0xff]  ;;  %v5307_v10 = vld [vmem:[%s6442_s24 + $0x430] sm:$0xff] }
 0x674   : > { %4509 = vmatpush.msrb.mxu2 %v5271_v26  ;;  %4529 = vmatpush.msrb.mxu3 %v5272_v2  ;;  %v5308_v26 = vld [vmem:[%s6442_s24 + $0x438] sm:$0xff]  ;;  %v5339_v2 = vld [vmem:[%s6442_s24 + $0x530] sm:$0xff] }
 0x675   : > { %4332 = vmatmul.f32.vlgmr.msra.gmra.mxu1 %v4294_v45  ;;  %4431 = vmatpush.msrb.mxu0 %v5237_v47  ;;  %v5305_v47 = vld [vmem:[%s6442_s24 + $0x420] sm:$0xff] }
 0x676   : > { %4451 = vmatpush.msrb.mxu1 %v5238_v18  ;;  %4510 = vmatpush.msrb.mxu2 %v5269_v27  ;;  %v5306_v18 = vld [vmem:[%s6442_s24 + $0x428] sm:$0xff]  ;;  %v5337_v27 = vld [vmem:[%s6442_s24 + $0x520] sm:$0xff] }
 0x677   : > { %4530 = vmatpush.msrb.mxu3 %v5270_v60  ;;  %4312 = vmatmul.f32.vlgmr.msra.gmra.mxu0 %v4294_v45  ;;  %v5340_v45 = vld [vmem:[%s6442_s24 + $0x538] sm:$0xff] }
 0x678   : > { %4574 = vmatpush.msra.mxu0 %v5331_v61  ;;  %4594 = vmatpush.msra.mxu1 %v5332_v57  ;;  %v5304_v60 = vld [vmem:[%s6442_s24 + $0x418] sm:$0xff]  ;;  %v4570_v61 = vrot.slane %v8182_v31, 4  ;;  %v4571_v57 = vrot.slane %v8171_v21, 3 }
 0x679   : > { %4653 = vmatpush.msra.mxu2 %v5363_v41  ;;  %4673 = vmatpush.msra.mxu3 %v5364_v36  ;;  %v5335_v41 = vld [vmem:[%s6442_s24 + $0x510] sm:$0xff]  ;;  %v5336_v36 = vld [vmem:[%s6442_s24 + $0x518] sm:$0xff] }
 0x67a   : > { %4531 = vmatmul.f32.vlgmr.msrb.gmra.mxu3 %v4493_v3  ;;  %4575 = vmatpush.msra.mxu0 %v5329_v39  ;;  %v4650_v39 = vrot.slane %v8171_v21, 4 }
 0x67b   : > { %4595 = vmatpush.msra.mxu1 %v5330_v49  ;;  %4654 = vmatpush.msra.mxu2 %v5361_v8  ;;  %v5301_v49 = vld [vmem:[%s6442_s24 + $0x400] sm:$0xff]  ;;  %v5302_v8 = vld [vmem:[%s6442_s24 + $0x408] sm:$0xff] }
 0x67c   : > { %4674 = vmatpush.msra.mxu3 %v5362_v52  ;;  %4511 = vmatmul.f32.vlgmr.msrb.gmra.mxu2 %v4493_v3  ;;  %v4649_v3 = vrot.slane %v8182_v31, 5  ;;  %v4572_v52 = vsel %vm4293_vm15, %v4571_v57, %v4570_v61  ;;  %v5405_v61 = vld [vmem:[%s6442_s24 + $0x740] sm:$0xff]  ;;  %v5406_v57 = vld [vmem:[%s6442_s24 + $0x748] sm:$0xff] }
 0x67d   : > { %4576 = vmatpush.msra.mxu0 %v5327_v32  ;;  %4596 = vmatpush.msra.mxu1 %v5328_v24  ;;  %v5395_v24 = vld [vmem:[%s6442_s24 + $0x6f0] sm:$0xff] }
 0x67e   : > { %4655 = vmatpush.msra.mxu2 %v5359_v38  ;;  %4675 = vmatpush.msra.mxu3 %v5360_v30  ;;  %v4651_v32 = vsel %vm4293_vm15, %v4650_v39, %v4649_v3  ;;  %v5396_v38 = vld [vmem:[%s6442_s24 + $0x6f8] sm:$0xff]  ;;  %v4728_v30 = vrot.slane %v8182_v31, 6  ;;  %v5403_v3 = vld [vmem:[%s6442_s24 + $0x730] sm:$0xff] }
 0x67f   : > { %4452 = vmatmul.f32.vlgmr.msrb.gmra.mxu1 %v4414_v9  ;;  %4577 = vmatpush.msra.mxu0 %v5325_v62  ;;  %v4807_v62 = vrot.slane %v8182_v31, 7  ;;  %v5404_v39 = vld [vmem:[%s6442_s24 + $0x738] sm:$0xff] }
 0x680   : > { %4597 = vmatpush.msra.mxu1 %v5326_v37  ;;  %4656 = vmatpush.msra.mxu2 %v5357_v14  ;;  %v4808_v37 = vrot.slane %v8171_v21, 6  ;;  %v5427_v14 = vld [vmem:[%s6442_s24 + $0x7f0] sm:$0xff] }
 0x681   : > { %4676 = vmatpush.msra.mxu3 %v5358_v51  ;;  %4432 = vmatmul.f32.vlgmr.msrb.gmra.mxu0 %v4414_v9  ;;  %v4729_v9 = vrot.slane %v8171_v21, 5  ;;  %v5428_v51 = vld [vmem:[%s6442_s24 + $0x7f8] sm:$0xff]  ;;  %v5425_v21 = vld [vmem:[%s6442_s24 + $0x7e0] sm:$0xff] }
 0x682   : > { %4578 = vmatpush.msra.mxu0 %v5323_v25  ;;  %4598 = vmatpush.msra.mxu1 %v5324_v16  ;;  %v5393_v25 = vld [vmem:[%s6442_s24 + $0x6e0] sm:$0xff]  ;;  %v5394_v16 = vld [vmem:[%s6442_s24 + $0x6e8] sm:$0xff]  ;;  %v8295_v31 = vsel %vm4293_vm15, %v4808_v37, %v4807_v62 }
 0x683   : > { %4657 = vmatpush.msra.mxu2 %v5355_v19  ;;  %4677 = vmatpush.msra.mxu3 %v5356_v42  ;;  %v8292_v19 = vsel %vm4293_vm15, %v4729_v9, %v4728_v30  ;;  %v5426_v42 = vld [vmem:[%s6442_s24 + $0x7e8] sm:$0xff]  ;;  %v5365_v30 = vld [vmem:[%s6442_s24 + $0x600] sm:$0xff] }
 0x684   : > { %4579 = vmatpush.msra.mxu0 %v5321_v28  ;;  %4599 = vmatpush.msra.mxu1 %v5322_v46  ;;  %v5391_v28 = vld [vmem:[%s6442_s24 + $0x6d0] sm:$0xff]  ;;  %v5392_v46 = vld [vmem:[%s6442_s24 + $0x6d8] sm:$0xff]  ;;  %v5366_v9 = vld [vmem:[%s6442_s24 + $0x608] sm:$0xff] }
 0x685   : > { %4658 = vmatpush.msra.mxu2 %v5353_v55  ;;  %4678 = vmatpush.msra.mxu3 %v5354_v34  ;;  %v5423_v55 = vld [vmem:[%s6442_s24 + $0x7d0] sm:$0xff]  ;;  %v5424_v34 = vld [vmem:[%s6442_s24 + $0x7d8] sm:$0xff]  ;;  %v5397_v62 = vld [vmem:[%s6442_s24 + $0x700] sm:$0xff] }
 0x686   : > { %4580 = vmatpush.msra.mxu0 %v5319_v11  ;;  %4600 = vmatpush.msra.mxu1 %v5320_v4  ;;  %v5389_v11 = vld [vmem:[%s6442_s24 + $0x6c0] sm:$0xff]  ;;  %v5390_v4 = vld [vmem:[%s6442_s24 + $0x6c8] sm:$0xff] }
 0x687   : > { %4659 = vmatpush.msra.mxu2 %v5351_v35  ;;  %4679 = vmatpush.msra.mxu3 %v5352_v48  ;;  %v5421_v35 = vld [vmem:[%s6442_s24 + $0x7c0] sm:$0xff]  ;;  %v5422_v48 = vld [vmem:[%s6442_s24 + $0x7c8] sm:$0xff] }
 0x688   : > { %4581 = vmatpush.msra.mxu0 %v5317_v12  ;;  %4601 = vmatpush.msra.mxu1 %v5318_v58  ;;  %v5387_v12 = vld [vmem:[%s6442_s24 + $0x6b0] sm:$0xff]  ;;  %v5388_v58 = vld [vmem:[%s6442_s24 + $0x6b8] sm:$0xff]  ;;  %v5398_v37 = vld [vmem:[%s6442_s24 + $0x708] sm:$0xff] }
 0x689   : > { %4660 = vmatpush.msra.mxu2 %v5349_v20  ;;  %4680 = vmatpush.msra.mxu3 %v5350_v59  ;;  %v5419_v20 = vld [vmem:[%s6442_s24 + $0x7b0] sm:$0xff]  ;;  %v5420_v59 = vld [vmem:[%s6442_s24 + $0x7b8] sm:$0xff] }
 0x68a   : > { %4582 = vmatpush.msra.mxu0 %v5315_v5  ;;  %4602 = vmatpush.msra.mxu1 %v5316_v22  ;;  %v5385_v5 = vld [vmem:[%s6442_s24 + $0x6a0] sm:$0xff]  ;;  %v5386_v22 = vld [vmem:[%s6442_s24 + $0x6a8] sm:$0xff] }
 0x68b   : > { %4661 = vmatpush.msra.mxu2 %v5347_v33  ;;  %4681 = vmatpush.msra.mxu3 %v5348_v15  ;;  %v5417_v33 = vld [vmem:[%s6442_s24 + $0x7a0] sm:$0xff]  ;;  %v5418_v15 = vld [vmem:[%s6442_s24 + $0x7a8] sm:$0xff] }
 0x68c   : > { %4583 = vmatpush.msra.mxu0 %v5313_v50  ;;  %4603 = vmatpush.msra.mxu1 %v5314_v40  ;;  %v5383_v50 = vld [vmem:[%s6442_s24 + $0x690] sm:$0xff]  ;;  %v5384_v40 = vld [vmem:[%s6442_s24 + $0x698] sm:$0xff] }
 0x68d   : > { %4662 = vmatpush.msra.mxu2 %v5345_v63  ;;  %4682 = vmatpush.msra.mxu3 %v5346_v13  ;;  %v5415_v63 = vld [vmem:[%s6442_s24 + $0x790] sm:$0xff]  ;;  %v5416_v13 = vld [vmem:[%s6442_s24 + $0x798] sm:$0xff] }
 0x68e   : > { %4584 = vmatpush.msra.mxu0 %v5311_v17  ;;  %4604 = vmatpush.msra.mxu1 %v5312_v29  ;;  %v5381_v17 = vld [vmem:[%s6442_s24 + $0x680] sm:$0xff]  ;;  %v5382_v29 = vld [vmem:[%s6442_s24 + $0x688] sm:$0xff] }
 0x68f   : > { %4663 = vmatpush.msra.mxu2 %v5343_v23  ;;  %4683 = vmatpush.msra.mxu3 %v5344_v6  ;;  %v5413_v23 = vld [vmem:[%s6442_s24 + $0x780] sm:$0xff]  ;;  %v5414_v6 = vld [vmem:[%s6442_s24 + $0x788] sm:$0xff] }
 0x690   : > { %4585 = vmatpush.msra.mxu0 %v5309_v7  ;;  %4605 = vmatpush.msra.mxu1 %v5310_v44  ;;  %v5379_v7 = vld [vmem:[%s6442_s24 + $0x670] sm:$0xff]  ;;  %v5380_v44 = vld [vmem:[%s6442_s24 + $0x678] sm:$0xff] }
 0x691   : > { %4664 = vmatpush.msra.mxu2 %v5341_v43  ;;  %4684 = vmatpush.msra.mxu3 %v5342_v56  ;;  %v5411_v43 = vld [vmem:[%s6442_s24 + $0x770] sm:$0xff]  ;;  %v5412_v56 = vld [vmem:[%s6442_s24 + $0x778] sm:$0xff] }
 0x692   : > { %4586 = vmatpush.msra.mxu0 %v5307_v10  ;;  %4606 = vmatpush.msra.mxu1 %v5308_v26  ;;  %v5377_v10 = vld [vmem:[%s6442_s24 + $0x660] sm:$0xff]  ;;  %v5378_v26 = vld [vmem:[%s6442_s24 + $0x668] sm:$0xff] }
 0x693   : > { %4665 = vmatpush.msra.mxu2 %v5339_v2  ;;  %4685 = vmatpush.msra.mxu3 %v5340_v45  ;;  %v5409_v2 = vld [vmem:[%s6442_s24 + $0x760] sm:$0xff]  ;;  %v5410_v45 = vld [vmem:[%s6442_s24 + $0x768] sm:$0xff] }
 0x694   : > { %4587 = vmatpush.msra.mxu0 %v5305_v47  ;;  %4607 = vmatpush.msra.mxu1 %v5306_v18  ;;  %v5375_v47 = vld [vmem:[%s6442_s24 + $0x650] sm:$0xff]  ;;  %v5376_v18 = vld [vmem:[%s6442_s24 + $0x658] sm:$0xff] }
 0x695   : > { %4666 = vmatpush.msra.mxu2 %v5337_v27  ;;  %4686 = vmatpush.msra.mxu3 %v5338_v53  ;;  %v5407_v27 = vld [vmem:[%s6442_s24 + $0x750] sm:$0xff]  ;;  %v5408_v53 = vld [vmem:[%s6442_s24 + $0x758] sm:$0xff] }
 0x696   : > { %4588 = vmatpush.msra.mxu0 %v5303_v0  ;;  %4608 = vmatpush.msra.mxu1 %v5304_v60  ;;  %v5373_v0 = vld [vmem:[%s6442_s24 + $0x640] sm:$0xff]  ;;  %v5374_v60 = vld [vmem:[%s6442_s24 + $0x648] sm:$0xff] }
 0x697   : > { %4667 = vmatpush.msra.mxu2 %v5335_v41  ;;  %4687 = vmatpush.msra.mxu3 %v5336_v36  ;;  %v5371_v41 = vld [vmem:[%s6442_s24 + $0x630] sm:$0xff]  ;;  %v5372_v36 = vld [vmem:[%s6442_s24 + $0x638] sm:$0xff] }
 0x698   : > { %4589 = vmatpush.msra.mxu0 %v5301_v49  ;;  %4609 = vmatpush.msra.mxu1 %v5302_v8  ;;  %v5369_v49 = vld [vmem:[%s6442_s24 + $0x620] sm:$0xff]  ;;  %v5370_v8 = vld [vmem:[%s6442_s24 + $0x628] sm:$0xff] }
 0x699   : > { %4668 = vmatpush.msra.mxu2 %v5333_v54  ;;  %4688 = vmatpush.msra.mxu3 %v5334_v1  ;;  %v5401_v54 = vld [vmem:[%s6442_s24 + $0x720] sm:$0xff]  ;;  %v5402_v1 = vld [vmem:[%s6442_s24 + $0x728] sm:$0xff] }
 0x69a   : > { %4590 = vmatmul.f32.vlgmr.msra.gmra.mxu0 %v4572_v52  ;;  %4610 = vmatmul.f32.vlgmr.msra.gmra.mxu1 %v4572_v52  ;;  %v5367_v52 = vld [vmem:[%s6442_s24 + $0x610] sm:$0xff] }
 0x69b   : > { %4669 = vmatmul.f32.vlgmr.msra.gmra.mxu2 %v4651_v32  ;;  %4689 = vmatmul.f32.vlgmr.msra.gmra.mxu3 %v4651_v32  ;;  %v5368_v32 = vld [vmem:[%s6442_s24 + $0x618] sm:$0xff] }
 0x69c   : > { %4732 = vmatpush.msrb.mxu0 %v5395_v24  ;;  %4752 = vmatpush.msrb.mxu1 %v5396_v38  ;;  %v5399_v24 = vld [vmem:[%s6442_s24 + $0x710] sm:$0xff]  ;;  %v5400_v38 = vld [vmem:[%s6442_s24 + $0x718] sm:$0xff] }
 0x69d   : > { %4811 = vmatpush.msrb.mxu2 %v5427_v14  ;;  %4831 = vmatpush.msrb.mxu3 %v5428_v51 }
 0x69e   : > { %4733 = vmatpush.msrb.mxu0 %v5393_v25  ;;  %4753 = vmatpush.msrb.mxu1 %v5394_v16 }
 0x69f   : > { %4812 = vmatpush.msrb.mxu2 %v5425_v21  ;;  %4832 = vmatpush.msrb.mxu3 %v5426_v42 }
 0x6a0   : > { %4734 = vmatpush.msrb.mxu0 %v5391_v28  ;;  %4754 = vmatpush.msrb.mxu1 %v5392_v46 }
 0x6a1   : > { %4813 = vmatpush.msrb.mxu2 %v5423_v55  ;;  %4833 = vmatpush.msrb.mxu3 %v5424_v34 }
 0x6a2   : > { %4735 = vmatpush.msrb.mxu0 %v5389_v11  ;;  %4755 = vmatpush.msrb.mxu1 %v5390_v4 }
 0x6a3   : > { %4814 = vmatpush.msrb.mxu2 %v5421_v35  ;;  %4834 = vmatpush.msrb.mxu3 %v5422_v48 }
 0x6a4   : > { %4736 = vmatpush.msrb.mxu0 %v5387_v12  ;;  %4756 = vmatpush.msrb.mxu1 %v5388_v58 }
 0x6a5   : > { %4815 = vmatpush.msrb.mxu2 %v5419_v20  ;;  %4835 = vmatpush.msrb.mxu3 %v5420_v59 }
 0x6a6   : > { %4737 = vmatpush.msrb.mxu0 %v5385_v5  ;;  %4757 = vmatpush.msrb.mxu1 %v5386_v22 }
 0x6a7   : > { %4816 = vmatpush.msrb.mxu2 %v5417_v33  ;;  %4836 = vmatpush.msrb.mxu3 %v5418_v15 }
 0x6a8   : > { %4738 = vmatpush.msrb.mxu0 %v5383_v50  ;;  %4758 = vmatpush.msrb.mxu1 %v5384_v40 }
 0x6a9   : > { %4817 = vmatpush.msrb.mxu2 %v5415_v63  ;;  %4837 = vmatpush.msrb.mxu3 %v5416_v13 }
 0x6aa   : > { %4739 = vmatpush.msrb.mxu0 %v5381_v17  ;;  %4759 = vmatpush.msrb.mxu1 %v5382_v29 }
 0x6ab   : > { %4818 = vmatpush.msrb.mxu2 %v5413_v23  ;;  %4838 = vmatpush.msrb.mxu3 %v5414_v6  ;;  %v4853_v23 = vld [vmem:[#allocation9] sm:$0xf] }
 0x6ac   : > { %4740 = vmatpush.msrb.mxu0 %v5379_v7  ;;  %4760 = vmatpush.msrb.mxu1 %v5380_v44 }
 0x6ad   : > { %4819 = vmatpush.msrb.mxu2 %v5411_v43  ;;  %4839 = vmatpush.msrb.mxu3 %v5412_v56 }
 0x6ae   : > { %4741 = vmatpush.msrb.mxu0 %v5377_v10  ;;  %4761 = vmatpush.msrb.mxu1 %v5378_v26 }
 0x6af   : > { %4820 = vmatpush.msrb.mxu2 %v5409_v2  ;;  %4840 = vmatpush.msrb.mxu3 %v5410_v45 }
 0x6b0   : > { %4742 = vmatpush.msrb.mxu0 %v5375_v47  ;;  %4762 = vmatpush.msrb.mxu1 %v5376_v18 }
 0x6b1   : > { %4821 = vmatpush.msrb.mxu2 %v5407_v27  ;;  %4841 = vmatpush.msrb.mxu3 %v5408_v53 }
 0x6b2   : > { %4743 = vmatpush.msrb.mxu0 %v5373_v0  ;;  %4763 = vmatpush.msrb.mxu1 %v5374_v60 }
 0x6b3   : > { %4822 = vmatpush.msrb.mxu2 %v5405_v61  ;;  %4842 = vmatpush.msrb.mxu3 %v5406_v57 }
 0x6b4   : > { %4744 = vmatpush.msrb.mxu0 %v5371_v41  ;;  %4764 = vmatpush.msrb.mxu1 %v5372_v36 }
 0x6b5   : > { %4823 = vmatpush.msrb.mxu2 %v5403_v3  ;;  %4843 = vmatpush.msrb.mxu3 %v5404_v39 }
 0x6b6   : > { %4745 = vmatpush.msrb.mxu0 %v5369_v49  ;;  %4765 = vmatpush.msrb.mxu1 %v5370_v8 }
 0x6b7   : > { %4824 = vmatpush.msrb.mxu2 %v5401_v54  ;;  %4844 = vmatpush.msrb.mxu3 %v5402_v1 }
 0x6b8   : > { %4746 = vmatpush.msrb.mxu0 %v5367_v52  ;;  %4766 = vmatpush.msrb.mxu1 %v5368_v32 }
 0x6b9   : > { %4825 = vmatpush.msrb.mxu2 %v5399_v24  ;;  %4845 = vmatpush.msrb.mxu3 %v5400_v38 }
 0x6ba   : > { %4747 = vmatpush.msrb.mxu0 %v5365_v30  ;;  %4767 = vmatpush.msrb.mxu1 %v5366_v9 }
 0x6bb   : > { %4826 = vmatpush.msrb.mxu2 %v5397_v62  ;;  %4846 = vmatpush.msrb.mxu3 %v5398_v37 }
 0x6bc   : > { %4748 = vmatmul.f32.vlgmr.msrb.gmra.mxu0 %v8292_v19  ;;  %4768 = vmatmul.f32.vlgmr.msrb.gmra.mxu1 %v8292_v19 }
 0x6bd   : > { %4827 = vmatmul.f32.vlgmr.msrb.gmra.mxu2 %v8295_v31  ;;  %4847 = vmatmul.f32.vlgmr.msrb.gmra.mxu3 %v8295_v31 }
 0x6f2   : > { %v4333_v14 = vpop.f32.mrf.mxu1 }
 0x6f3   : > { %v4376_v25 = vpop.f32.mrf.mxu3 }
 0x6f4   : > { %v4313_v51 = vpop.f32.mrf.mxu0  ;;  %v4377_v55 = vadd.f32 %v4376_v25, %v4333_v14 }
 0x6f5   : > { %v4356_v16 = vpop.f32.mrf.mxu2 }
 0x6f6   : > { %v4357_v34 = vadd.f32 %v4356_v16, %v4313_v51 }
 0x6fc   : > { %v4453_v21 = vpop.f32.mrf.mxu1 }
 0x6fd   : > { %v4532_v28 = vpop.f32.mrf.mxu3  ;;  %v4457_v4 = vadd.f32 %v4453_v21, %v4377_v55 }
 0x6fe   : > { %v4433_v42 = vpop.f32.mrf.mxu0 }
 0x6ff   : > { %v4512_v46 = vpop.f32.mrf.mxu2  ;;  %v4456_v48 = vadd.f32 %v4433_v42, %v4357_v34  ;;  %v4536_v58 = vadd.f32 %v4532_v28, %v4457_v4 }
 0x701   : > { %v4535_v20 = vadd.f32 %v4512_v46, %v4456_v48 }
 0x717   : > { %v4611_v11 = vpop.f32.mrf.mxu1  ;;  %v4591_v35 = vpop.f32.mrf.mxu0 }
 0x718   : > { %v4615_v59 = vadd.f32 %v4611_v11, %v4536_v58  ;;  %v4614_v5 = vadd.f32 %v4591_v35, %v4535_v20 }
 0x71e   : > { %v4670_v12 = vpop.f32.mrf.mxu2  ;;  %v4690_v19 = vpop.f32.mrf.mxu3 }
 0x71f   : > { %v4694_v22 = vadd.f32 %v4690_v19, %v4615_v59  ;;  %v4693_v15 = vadd.f32 %v4670_v12, %v4614_v5 }
 0x739   : > { %v4769_v31 = vpop.f32.mrf.mxu1  ;;  %v4749_v33 = vpop.f32.mrf.mxu0 }
 0x73a   : > { %v4773_v50 = vadd.f32 %v4769_v31, %v4694_v22  ;;  %v4772_v13 = vadd.f32 %v4749_v33, %v4693_v15 }
 0x740   : > { %v4828_v40 = vpop.f32.mrf.mxu2  ;;  %v4848_v63 = vpop.f32.mrf.mxu3 }
 0x741   : > { %v4852_v17 = vadd.f32 %v4848_v63, %v4773_v50  ;;  %v4851_v29 = vadd.f32 %v4828_v40, %v4772_v13 }
 0x743   : > { %v4856_v6 = vrot.slane %v4852_v17, 6 }
 0x744   : > { %4865 = sbr.rel (%p5429_p1) target bundleno = 2028 (0x7ec), region = 136 }
 0x745   : > { %v4858_v7 = vsel %vm4857_vm0, %v4851_v29, %v4856_v6 }
 0x746   : > { %v4860_v44 = vadd.f32 %v4858_v7, %v4853_v23 }
 0x748   : > { %4861 = vst [vmem:[#allocation9] sm:$0xf] %v4860_v44 }
 0x749   : > { %v4891_v43 = vld [vmem:[#allocation28 + $0x78] sm:$0xff]  ;;  %v4890_v56 = vld [vmem:[#allocation28 + $0x70] sm:$0xff]  ;;  %v4889_v2 = vld [vmem:[#allocation28 + $0x68] sm:$0xff]  ;;  %vm4958_vm1 = vcmask 25600  }
 0x74a   : > { %v4907_v10 = vld [vmem:[#allocation28 + $0xf8] sm:$0xff]  ;;  %4918 = vmatpush.msra.mxu0 %v4891_v43  ;;  %v4906_v26 = vld [vmem:[#allocation28 + $0xf0] sm:$0xff]  ;;  %v4905_v45 = vld [vmem:[#allocation28 + $0xe8] sm:$0xff] }
 0x74b   : > { %4938 = vmatpush.msra.mxu1 %v4907_v10  ;;  %v4888_v47 = vld [vmem:[#allocation28 + $0x60] sm:$0xff]  ;;  %v4887_v27 = vld [vmem:[#allocation28 + $0x58] sm:$0xff]  ;;  %v4886_v0 = vld [vmem:[#allocation28 + $0x50] sm:$0xff] }
 0x74c   : > { %4919 = vmatpush.msra.mxu0 %v4890_v56  ;;  %v4904_v18 = vld [vmem:[#allocation28 + $0xe0] sm:$0xff]  ;;  %v4903_v53 = vld [vmem:[#allocation28 + $0xd8] sm:$0xff]  ;;  %v4902_v60 = vld [vmem:[#allocation28 + $0xd0] sm:$0xff] }
 0x74d   : > { %4939 = vmatpush.msra.mxu1 %v4906_v26  ;;  %v4885_v61 = vld [vmem:[#allocation28 + $0x48] sm:$0xff]  ;;  %v4867_v41 = vld [vmem:[#allocation27] sm:$0x3]  ;;  %v4884_v39 = vld [vmem:[#allocation28 + $0x40] sm:$0xff] }
 0x74e   : > { %4920 = vmatpush.msra.mxu0 %v4889_v2  ;;  %v4901_v57 = vld [vmem:[#allocation28 + $0xc8] sm:$0xff]  ;;  %v4869_v36 = vperm.slane %v4867_v41, 0  ;;  %v4870_v3 = vperm.slane %v4867_v41, 1  ;;  %v4900_v49 = vld [vmem:[#allocation28 + $0xc0] sm:$0xff]  ;;  %v4883_v1 = vld [vmem:[#allocation28 + $0x38] sm:$0xff] }
 0x74f   : > { %4940 = vmatpush.msra.mxu1 %v4905_v45  ;;  %v4866_v8 = vld [vmem:[#allocation9] sm:$0xf]  ;;  %v4899_v52 = vld [vmem:[#allocation28 + $0xb8] sm:$0xff]  ;;  %v4882_v24 = vld [vmem:[#allocation28 + $0x30] sm:$0xff] }
 0x750   : > { %4921 = vmatpush.msra.mxu0 %v4888_v47  ;;  %v4871_v54 = vrot.slane %v4870_v3, 6  ;;  %v4898_v38 = vld [vmem:[#allocation28 + $0xb0] sm:$0xff]  ;;  %v4881_v9 = vld [vmem:[#allocation28 + $0x28] sm:$0xff]  ;;  %v4880_v14 = vld [vmem:[#allocation28 + $0x20] sm:$0xff] }
 0x751   : > { %4941 = vmatpush.msra.mxu1 %v4904_v18  ;;  %v4897_v62 = vld [vmem:[#allocation28 + $0xa8] sm:$0xff]  ;;  %v4896_v51 = vld [vmem:[#allocation28 + $0xa0] sm:$0xff]  ;;  %v4879_v25 = vld [vmem:[#allocation28 + $0x18] sm:$0xff] }
 0x752   : > { %4922 = vmatpush.msra.mxu0 %v4887_v27  ;;  %v4872_v32 = vsel %vm4857_vm0, %v4869_v36, %v4871_v54  ;;  %v4895_v16 = vld [vmem:[#allocation28 + $0x98] sm:$0xff]  ;;  %v4878_v21 = vld [vmem:[#allocation28 + $0x10] sm:$0xff]  ;;  %v4877_v28 = vld [vmem:[#allocation28 + $0x8] sm:$0xff] }
 0x753   : > { %4942 = vmatpush.msra.mxu1 %v4903_v53  ;;  %v4874_v30 = vadd.f32 %v4872_v32, %v4866_v8  ;;  %v4894_v42 = vld [vmem:[#allocation28 + $0x90] sm:$0xff]  ;;  %v4893_v46 = vld [vmem:[#allocation28 + $0x88] sm:$0xff]  ;;  %v4876_v55 = vld [vmem:[#allocation28] sm:$0xff] }
 0x754   : > { %4923 = vmatpush.msra.mxu0 %v4886_v0  ;;  %v4892_v34 = vld [vmem:[#allocation28 + $0x80] sm:$0xff] }
 0x755   : > { %4943 = vmatpush.msra.mxu1 %v4902_v60  ;;  %v4875_v37 = vmax.f32 %v4874_v30, 0.0  ;;  %v5675_v35 = vld [vmem:[#allocation30] ss:$0 sm:$0xff] }
 0x756   : > { %4924 = vmatpush.msra.mxu0 %v4885_v61 }
 0x757   : > { %4944 = vmatpush.msra.mxu1 %v4901_v57  ;;  %4913 = vst [vmem:[#allocation1] ss:$4 sm:$0xff] %v4875_v37 }
 0x758   : > { %4925 = vmatpush.msra.mxu0 %v4884_v39 }
 0x759   : > { %4945 = vmatpush.msra.mxu1 %v4900_v49 }
 0x75a   : > { %4926 = vmatpush.msra.mxu0 %v4883_v1 }
 0x75b   : > { %4946 = vmatpush.msra.mxu1 %v4899_v52 }
 0x75c   : > { %4927 = vmatpush.msra.mxu0 %v4882_v24 }
 0x75d   : > { %4947 = vmatpush.msra.mxu1 %v4898_v38 }
 0x75e   : > { %4928 = vmatpush.msra.mxu0 %v4881_v9  ;;  %v4914_v11 = vld.sshfl [vmem:[#allocation1] sm:$0xff pattern:$0x73625140]  ;;  %v4915_v4 = vld.sshfl [vmem:[#allocation1 + $0x8] sm:$0xff pattern:$0x73625140] }
 0x75f   : > { %4948 = vmatpush.msra.mxu1 %v4897_v62 }
 0x760   : > { %4929 = vmatpush.msra.mxu0 %v4880_v14 }
 0x761   : > { %4949 = vmatpush.msra.mxu1 %v4896_v51 }
 0x762   : > { %4930 = vmatpush.msra.mxu0 %v4879_v25 }
 0x763   : > { %4950 = vmatpush.msra.mxu1 %v4895_v16 }
 0x764   : > { %4931 = vmatpush.msra.mxu0 %v4878_v21 }
 0x765   : > { %4951 = vmatpush.msra.mxu1 %v4894_v42 }
 0x766   : > { %4932 = vmatpush.msra.mxu0 %v4877_v28 }
 0x767   : > { %4952 = vmatpush.msra.mxu1 %v4893_v46 }
 0x768   : > { %4933 = vmatpush.msra.mxu0 %v4876_v55 }
 0x769   : > { %4953 = vmatpush.msra.mxu1 %v4892_v34  ;;  %4934 = vmatmul.f32.vlgmr.msra.gmra.mxu0 %v4914_v11 }
 0x76a   : > { %4954 = vmatmul.f32.vlgmr.msra.gmra.mxu1 %v4915_v4 }
 0x7e6   : > { %v4935_v48 = vpop.f32.mrf.mxu0 }
 0x7e7   : > { %v4955_v12 = vpop.f32.mrf.mxu1  ;;  %v4936_v19 = vadd.f32 %v5675_v35, %v4935_v48 }
 0x7e9   : > { %v4956_v58 = vadd.f32 %v4955_v12, %v4936_v19 }
 0x7eb   : > { %4959 = vst.msk [vmem:[#allocation31] sm:$0x3] %vm4958_vm1, %v4956_v58 }
 0x7ec PF: > { %p5604_p3 = scmp.eq.s32.totalorder %s6288_s20, 7  ;;  %s6188_s24 = smov [#allocation31]  }
 0x7ed   : > { %s4966_s14 = sshll.u32 %s6188_s24, 4  ;;  %s8432_s29 = sld [smem:[#allocation52_spill]]  ;;  %s4967_s14 = int_to_ptr.vmem [resolvable:$true] %s4966_s14 }
 0x7f3   : > { %s4968_s26 = sshll.u32 %s8432_s29, 4  ;;  %s4969_s26 = int_to_ptr.hbm [resolvable:$true] %s4968_s26 }
 0x7f4   : > { %5535 = dma.vmem_to_hbm [thread:$0]  (%p5604_p3), %s4967_s14, 32, %s4969_s26, [#allocation12]  }
 0x7f5   : > { %6143 = dma.done.wait (%p5604_p3), [#allocation12], 32  }
 0x7f6   : > { %6145 = vsyncadd (%p5604_p3), [#allocation12], 4294967264 }
 0x7f7 PF: > { %p31_p4 = scmp.ge.s32.totalorder %s6376_s25, 10   ;;  %s8433_s29 = smov %s6152_s30 }
 0x7f8   : > { %s8434_s30 = smov %s6156_s15  ;;  %s8435_s15 = smov %s6388_s22 }
 0x7f9   : > { %s8436_s16 = smov %s6376_s25  ;;  %33 = sbr.rel (!%p31_p4) target bundleno = 16 (0x10), region = 184 }
 0x7fe   :  { %4982 = vsyncpa [#allocation11], 1 }
 0x7ff   :  { %4984 = vsyncpa [#allocation11 + $0x1], 1 }
 0x800   :  { %4985 = vsyncpa [#allocation14], 1 }
 0x801   :  { %4986 = vsyncpa [#allocation17], 1 }
 0x802   :  { %4987 = vsyncpa [#allocation20], 1 }
 0x803   :  { %4988 = vsyncpa [#allocation23], 1 }
 0x804   :  { %4989 = vsyncpa [#allocation26], 1 }
 0x805   :  { %4991 = vsyncpa [#allocation26 + $0x1], 1 }
 0x806   :  { %4992 = vsyncpa [#allocation29], 1 }
 0x807   :  { %4993 = vsyncpa [#allocation12], 1 }
 0x808   :  { %4995 = vsyncpa [#allocation12 + $0x1], 1 }

</bundles_post_ra>
